<compile_context>
chip_gen: v6e
topology: v6e:2x2x1
jax: 0.10.0
libtpu: 0.0.40
codegen_flags: <defaults>
</compile_context>

<pallas_src>
import numpy as np
import jax
import jax.numpy as jnp
from jax.experimental import pallas as pl
from jax.experimental.pallas import tpu as pltpu


# -----------------------------------------------------------------------------
# Fused Pallas kernel (both GarNet layers + prediction MLP)
# -----------------------------------------------------------------------------
def _make_fused_kernel(layer_dims, T, Bt):
    """layer_dims: static list of (Din, Fd, A) per GarNet layer."""
    inv_t = 1.0 / float(T)

    def kernel(*refs):
        # refs = [x_ref,
        #         (Wfdx, bfdx, Wpmax, Wpmean) * n_layers,
        #         W1_mean, W1_max, b1, W2, b2,
        #         o_ref]
        x_ref = refs[0]
        o_ref = refs[-1]
        w = refs[1:-1]

        h3 = x_ref[...].astype(jnp.float32)              # [Bt, T, Din0]

        idx = 0
        for (Din, Fd, A) in layer_dims:
            Wfdx = w[idx][...]                           # [Din, Fd + A + Fd]
            bfdx = w[idx + 1][...]                       # [1,  Fd + A + Fd]
            Wpmax = w[idx + 2][...]                      # [A*Fd, Fd]
            Wpmean = w[idx + 3][...]                     # [A*Fd, Fd]
            idx += 4

            # One MXU pass with M = Bt*T produces [feat | dist | X-part of out].
            x2 = h3.reshape(Bt * T, Din)
            y = jnp.dot(x2, Wfdx, preferred_element_type=jnp.float32) + bfdx
            feat = y[:, :Fd]                             # [Bt*T, Fd]
            pot = jnp.exp(-jnp.abs(y[:, Fd:Fd + A]))     # [Bt*T, A]
            accx = y[:, Fd + A:]                         # [Bt*T, Fd]

            # Per-aggregator weighted features; max/mean over the T tracks
            # (T == 8 -> single sublane-group reduction per vreg).
            mx_parts, mn_parts = [], []
            for a in range(A):                           # A is tiny & static
                e = pot[:, a:a + 1] * feat               # [Bt*T, Fd]
                e3 = e.reshape(Bt, T, Fd)
                mx_parts.append(jnp.max(e3, axis=1))     # [Bt, Fd]
                mn_parts.append(jnp.sum(e3, axis=1) * inv_t)
            max_flat = jnp.concatenate(mx_parts, axis=1)   # [Bt, A*Fd]
            mean_flat = jnp.concatenate(mn_parts, axis=1)  # [Bt, A*Fd]

            contrib = (jnp.dot(max_flat, Wpmax, preferred_element_type=jnp.float32)
                       + jnp.dot(mean_flat, Wpmean, preferred_element_type=jnp.float32))  # [Bt, Fd]

            # pooled contribution is identical for every track of a sample.
            h3 = jnp.tanh(accx.reshape(Bt, T, Fd) + contrib.reshape(Bt, 1, Fd))

        # ---- prediction MLP: mean/max over tracks, Linear -> ReLU -> Linear ----
        W1m = w[idx][...]
        W1x = w[idx + 1][...]
        b1 = w[idx + 2][...]
        W2 = w[idx + 3][...]
        b2 = w[idx + 4][...]

        mean_p = jnp.sum(h3, axis=1) * inv_t             # [Bt, Fd]
        max_p = jnp.max(h3, axis=1)                      # [Bt, Fd]
        h = (jnp.dot(mean_p, W1m, preferred_element_type=jnp.float32)
             + jnp.dot(max_p, W1x, preferred_element_type=jnp.float32) + b1)
        h = jnp.maximum(h, 0.0)
        out = jnp.dot(h, W2, preferred_element_type=jnp.float32) + b2   # [Bt, C]
        o_ref[...] = out.astype(o_ref.dtype)

    return kernel


# -----------------------------------------------------------------------------
# Wrapper
# -----------------------------------------------------------------------------
def _pick_batch_tile(B, target):
    """Largest Bt <= target that divides B and satisfies the sublane rule
    (Bt % 8 == 0 or Bt == B)."""
    bt = min(B, target)
    while bt > 1:
        if B % bt == 0 and (bt % 8 == 0 or bt == B):
            return bt
        bt -= 1
    return B


def garnet_forward_pallas(x, params, batch_tile_target=32):
    B, T, Din0 = x.shape
    layers = params["layers"]
    layer_dims = [(lp["Din"], lp["Fd"], lp["A"]) for lp in layers]
    pp = params["pred"]
    C = pp["W2"].shape[1]

    Bt = _pick_batch_tile(B, batch_tile_target)
    grid = (B // Bt,)

    def full(arr):
        return pl.BlockSpec(arr.shape, lambda i, _nd=arr.ndim: (0,) * _nd)

    in_specs = [pl.BlockSpec((Bt, T, Din0), lambda i: (i, 0, 0))]
    inputs = [x]
    for lp in layers:
        for name in ("Wfdx", "bfdx", "Wpmax", "Wpmean"):
            in_specs.append(full(lp[name]))
            inputs.append(lp[name])
    for name in ("W1_mean", "W1_max", "b1", "W2", "b2"):
        in_specs.append(full(pp[name]))
        inputs.append(pp[name])

    kernel = _make_fused_kernel(layer_dims, T, Bt)
    return pl.pallas_call(
        kernel,
        out_shape=jax.ShapeDtypeStruct((B, C), x.dtype),
        grid=grid,
        in_specs=in_specs,
        out_specs=pl.BlockSpec((Bt, C), lambda i: (i, 0)),
        compiler_params=pltpu.CompilerParams(
            dimension_semantics=("parallel",),
        ),
    )(*inputs)


# -----------------------------------------------------------------------------
# Deterministic parameter construction (mirrors nn.Linear shapes in __init__)
# -----------------------------------------------------------------------------
def _init_linear(key, fan_in, fan_out):
    k1, k2 = jax.random.split(key)
    bound = 1.0 / np.sqrt(fan_in)
    W = jax.random.uniform(k1, (fan_in, fan_out), jnp.float32, -bound, bound)
    b = jax.random.uniform(k2, (1, fan_out), jnp.float32, -bound, bound)
    return W, b


def make_params(key, num_features, layers_spec, num_classes):
    params = {"layers": [], "ref_layers": []}
    prev = num_features
    for (Fd, A) in layers_spec:
        key, k_in, k_out = jax.random.split(key, 3)
        # transform_in: Linear(prev, Fd + A)
        Win, bin_ = _init_linear(k_in, prev, Fd + A)
        # transform_out: Linear(2*Fd*A + prev, Fd)
        Wout, bout = _init_linear(k_out, 2 * Fd * A + prev, Fd)

        # Kernel-format weights:
        #   Wfdx  = [Wf | Wd | Wx]  (column concat)  -> one matmul per layer
        #   bfdx  = [bf | bd | bo]
        #   Wpmax / Wpmean: pooled rows of Wout, flattened to [A*Fd, Fd] so that
        #   column a*Fd+f of the flattened pool vector matches pooled[b, a, f].
        Wfdx = jnp.concatenate([Win, Wout[:prev]], axis=1)           # [prev, Fd+A+Fd]
        bfdx = jnp.concatenate([bin_, bout], axis=1)                 # [1, Fd+A+Fd]
        Wpool = Wout[prev:].reshape(A, 2 * Fd, Fd)
        Wpmax = Wpool[:, :Fd, :].reshape(A * Fd, Fd)
        Wpmean = Wpool[:, Fd:, :].reshape(A * Fd, Fd)

        params["layers"].append(dict(Din=prev, Fd=Fd, A=A,
                                     Wfdx=Wfdx, bfdx=bfdx,
                                     Wpmax=Wpmax, Wpmean=Wpmean))
        params["ref_layers"].append(dict(Win=Win, bin=bin_, Wout=Wout, bout=bout,
                                         Fd=Fd, A=A))
        prev = Fd

    key, k1, k2 = jax.random.split(key, 3)
    # _pred_layers: Linear(2*prev, prev) -> ReLU -> Linear(prev, num_classes)
    W1, b1 = _init_linear(k1, 2 * prev, prev)
    W2, b2 = _init_linear(k2, prev, num_classes)
    params["pred"] = dict(W1_mean=W1[:prev], W1_max=W1[prev:], b1=b1, W2=W2, b2=b2)
    params["ref_pred"] = dict(W1=W1, b1=b1, W2=W2, b2=b2)
    return params


# -----------------------------------------------------------------------------
# Pure-JAX reference following the PyTorch code literally
# -----------------------------------------------------------------------------
def garnet_layer_ref(x, rp):
    Fd, A = rp["Fd"], rp["A"]
    Xp = x @ rp["Win"] + rp["bin"]
    F = Xp[..., :Fd]
    dist = Xp[..., Fd:]
    pot = jnp.exp(-jnp.abs(dist))
    edges = jnp.einsum("btf,bta->baft", F, pot)
    max_p = jnp.max(edges, axis=-1)
    mean_p = jnp.mean(edges, axis=-1)
    pooled = jnp.concatenate([max_p, mean_p], axis=-1)              # [B, A, 2Fd]
    B, T, _ = x.shape
    pooled = pooled.reshape(B, 1, -1)
    pooled = jnp.broadcast_to(pooled, (B, T, pooled.shape[-1]))
    H = jnp.concatenate([x, pooled], axis=-1)
    return jnp.tanh(H @ rp["Wout"] + rp["bout"])


def garnet_forward_ref(x, params):
    h = x
    for rp in params["ref_layers"]:
        h = garnet_layer_ref(h, rp)
    mean_p = jnp.mean(h, axis=-2)
    max_p = jnp.max(h, axis=-2)
    H = jnp.concatenate([mean_p, max_p], axis=-1)
    rp = params["ref_pred"]
    h1 = jnp.maximum(H @ rp["W1"] + rp["b1"], 0.0)
    return h1 @ rp["W2"] + rp["b2"]


# -----------------------------------------------------------------------------
if __name__ == "__main__":
    B, T = 64, 8                      # n_minibatches, n_tracks  (Bt=32 -> 2 parallel tiles, M=256)
    num_features = 4                  # n_track_features
    layers_spec = [(8, 4), (8, 4)]    # (feature_dim, n_aggregators) per GarNet layer
    num_classes = 3

    root = jax.random.PRNGKey(0)
    k_x, k_p = jax.random.split(root)
    X = jax.random.normal(k_x, (B, T, num_features), jnp.float32)
    params = make_params(k_p, num_features, layers_spec, num_classes)

    out = garnet_forward_pallas(X, params, batch_tile_target=32)
    out = jax.block_until_ready(out)

    ref = garnet_forward_ref(X, params)
    np.testing.assert_allclose(np.asarray(out), np.asarray(ref), rtol=1e-4, atol=1e-4)

    print("KERNEL_OK")
</pallas_src>

<mosaic_0001>
module attributes {stable_mosaic.version = 11 : i64} {
  func.func @kernel(%arg0: i32, %arg1: memref<32x8x4xf32, #tpu.memory_space<vmem>>, %arg2: memref<4x20xf32, #tpu.memory_space<vmem>>, %arg3: memref<1x20xf32, #tpu.memory_space<vmem>>, %arg4: memref<32x8xf32, #tpu.memory_space<vmem>>, %arg5: memref<32x8xf32, #tpu.memory_space<vmem>>, %arg6: memref<8x20xf32, #tpu.memory_space<vmem>>, %arg7: memref<1x20xf32, #tpu.memory_space<vmem>>, %arg8: memref<32x8xf32, #tpu.memory_space<vmem>>, %arg9: memref<32x8xf32, #tpu.memory_space<vmem>>, %arg10: memref<8x8xf32, #tpu.memory_space<vmem>>, %arg11: memref<8x8xf32, #tpu.memory_space<vmem>>, %arg12: memref<1x8xf32, #tpu.memory_space<vmem>>, %arg13: memref<8x3xf32, #tpu.memory_space<vmem>>, %arg14: memref<1x3xf32, #tpu.memory_space<vmem>>, %arg15: memref<32x3xf32, #tpu.memory_space<vmem>>) attributes {dimension_semantics = [#tpu.dimension_semantics<parallel>], iteration_bounds = array<i64: 2>, scalar_prefetch = 0 : i64, scratch_operands = 0 : i64, tpu.core_type = #tpu.core_type<tc>, window_params = [{transform_indices = @transform_0, window_bounds = array<i64: 32, 8, 4>}, {pipeline_mode = #tpu.pipeline_mode<synchronous>, transform_indices = @transform_1, window_bounds = array<i64: 4, 20>}, {pipeline_mode = #tpu.pipeline_mode<synchronous>, transform_indices = @transform_2, window_bounds = array<i64: 1, 20>}, {pipeline_mode = #tpu.pipeline_mode<synchronous>, transform_indices = @transform_3, window_bounds = array<i64: 32, 8>}, {pipeline_mode = #tpu.pipeline_mode<synchronous>, transform_indices = @transform_4, window_bounds = array<i64: 32, 8>}, {pipeline_mode = #tpu.pipeline_mode<synchronous>, transform_indices = @transform_5, window_bounds = array<i64: 8, 20>}, {pipeline_mode = #tpu.pipeline_mode<synchronous>, transform_indices = @transform_6, window_bounds = array<i64: 1, 20>}, {pipeline_mode = #tpu.pipeline_mode<synchronous>, transform_indices = @transform_7, window_bounds = array<i64: 32, 8>}, {pipeline_mode = #tpu.pipeline_mode<synchronous>, transform_indices = @transform_8, window_bounds = array<i64: 32, 8>}, {pipeline_mode = #tpu.pipeline_mode<synchronous>, transform_indices = @transform_9, window_bounds = array<i64: 8, 8>}, {pipeline_mode = #tpu.pipeline_mode<synchronous>, transform_indices = @transform_10, window_bounds = array<i64: 8, 8>}, {pipeline_mode = #tpu.pipeline_mode<synchronous>, transform_indices = @transform_11, window_bounds = array<i64: 1, 8>}, {pipeline_mode = #tpu.pipeline_mode<synchronous>, transform_indices = @transform_12, window_bounds = array<i64: 8, 3>}, {pipeline_mode = #tpu.pipeline_mode<synchronous>, transform_indices = @transform_13, window_bounds = array<i64: 1, 3>}, {transform_indices = @transform_14, window_bounds = array<i64: 32, 3>}]} {
    %c0 = arith.constant 0 : index
    %c0_0 = arith.constant 0 : index
    %c0_1 = arith.constant 0 : index
    %0 = vector.load %arg1[%c0, %c0_0, %c0_1] : memref<32x8x4xf32, #tpu.memory_space<vmem>>, vector<32x8x4xf32>
    %c0_2 = arith.constant 0 : index
    %c0_3 = arith.constant 0 : index
    %1 = vector.load %arg2[%c0_2, %c0_3] : memref<4x20xf32, #tpu.memory_space<vmem>>, vector<4x20xf32>
    %c0_4 = arith.constant 0 : index
    %c0_5 = arith.constant 0 : index
    %2 = vector.load %arg3[%c0_4, %c0_5] : memref<1x20xf32, #tpu.memory_space<vmem>>, vector<1x20xf32>
    %c0_6 = arith.constant 0 : index
    %c0_7 = arith.constant 0 : index
    %3 = vector.load %arg4[%c0_6, %c0_7] : memref<32x8xf32, #tpu.memory_space<vmem>>, vector<32x8xf32>
    %c0_8 = arith.constant 0 : index
    %c0_9 = arith.constant 0 : index
    %4 = vector.load %arg5[%c0_8, %c0_9] : memref<32x8xf32, #tpu.memory_space<vmem>>, vector<32x8xf32>
    %5 = vector.shape_cast %0 : vector<32x8x4xf32> to vector<256x4xf32>
    %cst = arith.constant dense<0.000000e+00> : vector<256x20xf32>
    %6 = tpu.matmul %5, %1, %cst {dimension_numbers = #tpu.dot_dimension_numbers<[1], [0], [0], [1], [0, 0, 1, 1], [], []>} : vector<256x4xf32>, vector<4x20xf32>, vector<256x20xf32> -> vector<256x20xf32>
    %7 = vector.broadcast %2 : vector<1x20xf32> to vector<256x20xf32>
    %8 = arith.addf %6, %7 : vector<256x20xf32>
    %9 = vector.extract_strided_slice %8 {offsets = [0, 0], sizes = [256, 8], strides = [1, 1]} : vector<256x20xf32> to vector<256x8xf32>
    %10 = vector.extract_strided_slice %8 {offsets = [0, 8], sizes = [256, 4], strides = [1, 1]} : vector<256x20xf32> to vector<256x4xf32>
    %11 = math.absf %10 : vector<256x4xf32>
    %cst_10 = arith.constant 0.000000e+00 : f32
    %12 = vector.broadcast %cst_10 : f32 to vector<256x4xf32>
    %13 = arith.subf %12, %11 : vector<256x4xf32>
    %14 = math.exp %13 : vector<256x4xf32>
    %15 = vector.extract_strided_slice %8 {offsets = [0, 12], sizes = [256, 8], strides = [1, 1]} : vector<256x20xf32> to vector<256x8xf32>
    %16 = vector.extract_strided_slice %14 {offsets = [0, 0], sizes = [256, 1], strides = [1, 1]} : vector<256x4xf32> to vector<256x1xf32>
    %17 = vector.broadcast %16 : vector<256x1xf32> to vector<256x8xf32>
    %18 = arith.mulf %17, %9 : vector<256x8xf32>
    %19 = vector.shape_cast %18 : vector<256x8xf32> to vector<32x8x8xf32>
    %cst_11 = arith.constant dense<0xFF800000> : vector<32x8xf32>
    %20 = vector.multi_reduction <maximumf>, %19, %cst_11 [1] : vector<32x8x8xf32> to vector<32x8xf32>
    %cst_12 = arith.constant dense<0.000000e+00> : vector<32x8xf32>
    %21 = vector.multi_reduction <add>, %19, %cst_12 [1] : vector<32x8x8xf32> to vector<32x8xf32>
    %cst_13 = arith.constant 1.250000e-01 : f32
    %22 = vector.broadcast %cst_13 : f32 to vector<32x8xf32>
    %23 = arith.mulf %21, %22 : vector<32x8xf32>
    %24 = vector.extract_strided_slice %14 {offsets = [0, 1], sizes = [256, 1], strides = [1, 1]} : vector<256x4xf32> to vector<256x1xf32>
    %25 = vector.broadcast %24 : vector<256x1xf32> to vector<256x8xf32>
    %26 = arith.mulf %25, %9 : vector<256x8xf32>
    %27 = vector.shape_cast %26 : vector<256x8xf32> to vector<32x8x8xf32>
    %cst_14 = arith.constant dense<0xFF800000> : vector<32x8xf32>
    %28 = vector.multi_reduction <maximumf>, %27, %cst_14 [1] : vector<32x8x8xf32> to vector<32x8xf32>
    %cst_15 = arith.constant dense<0.000000e+00> : vector<32x8xf32>
    %29 = vector.multi_reduction <add>, %27, %cst_15 [1] : vector<32x8x8xf32> to vector<32x8xf32>
    %cst_16 = arith.constant 1.250000e-01 : f32
    %30 = vector.broadcast %cst_16 : f32 to vector<32x8xf32>
    %31 = arith.mulf %29, %30 : vector<32x8xf32>
    %32 = vector.extract_strided_slice %14 {offsets = [0, 2], sizes = [256, 1], strides = [1, 1]} : vector<256x4xf32> to vector<256x1xf32>
    %33 = vector.broadcast %32 : vector<256x1xf32> to vector<256x8xf32>
    %34 = arith.mulf %33, %9 : vector<256x8xf32>
    %35 = vector.shape_cast %34 : vector<256x8xf32> to vector<32x8x8xf32>
    %cst_17 = arith.constant dense<0xFF800000> : vector<32x8xf32>
    %36 = vector.multi_reduction <maximumf>, %35, %cst_17 [1] : vector<32x8x8xf32> to vector<32x8xf32>
    %cst_18 = arith.constant dense<0.000000e+00> : vector<32x8xf32>
    %37 = vector.multi_reduction <add>, %35, %cst_18 [1] : vector<32x8x8xf32> to vector<32x8xf32>
    %cst_19 = arith.constant 1.250000e-01 : f32
    %38 = vector.broadcast %cst_19 : f32 to vector<32x8xf32>
    %39 = arith.mulf %37, %38 : vector<32x8xf32>
    %40 = vector.extract_strided_slice %14 {offsets = [0, 3], sizes = [256, 1], strides = [1, 1]} : vector<256x4xf32> to vector<256x1xf32>
    %41 = vector.broadcast %40 : vector<256x1xf32> to vector<256x8xf32>
    %42 = arith.mulf %41, %9 : vector<256x8xf32>
    %43 = vector.shape_cast %42 : vector<256x8xf32> to vector<32x8x8xf32>
    %cst_20 = arith.constant dense<0xFF800000> : vector<32x8xf32>
    %44 = vector.multi_reduction <maximumf>, %43, %cst_20 [1] : vector<32x8x8xf32> to vector<32x8xf32>
    %cst_21 = arith.constant dense<0.000000e+00> : vector<32x8xf32>
    %45 = vector.multi_reduction <add>, %43, %cst_21 [1] : vector<32x8x8xf32> to vector<32x8xf32>
    %cst_22 = arith.constant 1.250000e-01 : f32
    %46 = vector.broadcast %cst_22 : f32 to vector<32x8xf32>
    %47 = arith.mulf %45, %46 : vector<32x8xf32>
    %48 = tpu.concatenate %20, %28, %36, %44 in 1 : vector<32x8xf32>, vector<32x8xf32>, vector<32x8xf32>, vector<32x8xf32> -> vector<32x32xf32>
    %49 = tpu.concatenate %23, %31, %39, %47 in 1 : vector<32x8xf32>, vector<32x8xf32>, vector<32x8xf32>, vector<32x8xf32> -> vector<32x32xf32>
    %cst_23 = arith.constant dense<0.000000e+00> : vector<32x8xf32>
    %50 = tpu.matmul %48, %3, %cst_23 {dimension_numbers = #tpu.dot_dimension_numbers<[1], [0], [0], [1], [0, 0, 1, 1], [], []>} : vector<32x32xf32>, vector<32x8xf32>, vector<32x8xf32> -> vector<32x8xf32>
    %cst_24 = arith.constant dense<0.000000e+00> : vector<32x8xf32>
    %51 = tpu.matmul %49, %4, %cst_24 {dimension_numbers = #tpu.dot_dimension_numbers<[1], [0], [0], [1], [0, 0, 1, 1], [], []>} : vector<32x32xf32>, vector<32x8xf32>, vector<32x8xf32> -> vector<32x8xf32>
    %52 = arith.addf %50, %51 : vector<32x8xf32>
    %53 = vector.shape_cast %15 : vector<256x8xf32> to vector<32x8x8xf32>
    %54 = vector.shape_cast %52 : vector<32x8xf32> to vector<32x1x8xf32>
    %55 = vector.broadcast %54 : vector<32x1x8xf32> to vector<32x8x8xf32>
    %56 = arith.addf %53, %55 : vector<32x8x8xf32>
    %57 = math.tanh %56 : vector<32x8x8xf32>
    %c0_25 = arith.constant 0 : index
    %c0_26 = arith.constant 0 : index
    %58 = vector.load %arg6[%c0_25, %c0_26] : memref<8x20xf32, #tpu.memory_space<vmem>>, vector<8x20xf32>
    %c0_27 = arith.constant 0 : index
    %c0_28 = arith.constant 0 : index
    %59 = vector.load %arg7[%c0_27, %c0_28] : memref<1x20xf32, #tpu.memory_space<vmem>>, vector<1x20xf32>
    %c0_29 = arith.constant 0 : index
    %c0_30 = arith.constant 0 : index
    %60 = vector.load %arg8[%c0_29, %c0_30] : memref<32x8xf32, #tpu.memory_space<vmem>>, vector<32x8xf32>
    %c0_31 = arith.constant 0 : index
    %c0_32 = arith.constant 0 : index
    %61 = vector.load %arg9[%c0_31, %c0_32] : memref<32x8xf32, #tpu.memory_space<vmem>>, vector<32x8xf32>
    %62 = vector.shape_cast %57 : vector<32x8x8xf32> to vector<256x8xf32>
    %cst_33 = arith.constant dense<0.000000e+00> : vector<256x20xf32>
    %63 = tpu.matmul %62, %58, %cst_33 {dimension_numbers = #tpu.dot_dimension_numbers<[1], [0], [0], [1], [0, 0, 1, 1], [], []>} : vector<256x8xf32>, vector<8x20xf32>, vector<256x20xf32> -> vector<256x20xf32>
    %64 = vector.broadcast %59 : vector<1x20xf32> to vector<256x20xf32>
    %65 = arith.addf %63, %64 : vector<256x20xf32>
    %66 = vector.extract_strided_slice %65 {offsets = [0, 0], sizes = [256, 8], strides = [1, 1]} : vector<256x20xf32> to vector<256x8xf32>
    %67 = vector.extract_strided_slice %65 {offsets = [0, 8], sizes = [256, 4], strides = [1, 1]} : vector<256x20xf32> to vector<256x4xf32>
    %68 = math.absf %67 : vector<256x4xf32>
    %cst_34 = arith.constant 0.000000e+00 : f32
    %69 = vector.broadcast %cst_34 : f32 to vector<256x4xf32>
    %70 = arith.subf %69, %68 : vector<256x4xf32>
    %71 = math.exp %70 : vector<256x4xf32>
    %72 = vector.extract_strided_slice %65 {offsets = [0, 12], sizes = [256, 8], strides = [1, 1]} : vector<256x20xf32> to vector<256x8xf32>
    %73 = vector.extract_strided_slice %71 {offsets = [0, 0], sizes = [256, 1], strides = [1, 1]} : vector<256x4xf32> to vector<256x1xf32>
    %74 = vector.broadcast %73 : vector<256x1xf32> to vector<256x8xf32>
    %75 = arith.mulf %74, %66 : vector<256x8xf32>
    %76 = vector.shape_cast %75 : vector<256x8xf32> to vector<32x8x8xf32>
    %cst_35 = arith.constant dense<0xFF800000> : vector<32x8xf32>
    %77 = vector.multi_reduction <maximumf>, %76, %cst_35 [1] : vector<32x8x8xf32> to vector<32x8xf32>
    %cst_36 = arith.constant dense<0.000000e+00> : vector<32x8xf32>
    %78 = vector.multi_reduction <add>, %76, %cst_36 [1] : vector<32x8x8xf32> to vector<32x8xf32>
    %cst_37 = arith.constant 1.250000e-01 : f32
    %79 = vector.broadcast %cst_37 : f32 to vector<32x8xf32>
    %80 = arith.mulf %78, %79 : vector<32x8xf32>
    %81 = vector.extract_strided_slice %71 {offsets = [0, 1], sizes = [256, 1], strides = [1, 1]} : vector<256x4xf32> to vector<256x1xf32>
    %82 = vector.broadcast %81 : vector<256x1xf32> to vector<256x8xf32>
    %83 = arith.mulf %82, %66 : vector<256x8xf32>
    %84 = vector.shape_cast %83 : vector<256x8xf32> to vector<32x8x8xf32>
    %cst_38 = arith.constant dense<0xFF800000> : vector<32x8xf32>
    %85 = vector.multi_reduction <maximumf>, %84, %cst_38 [1] : vector<32x8x8xf32> to vector<32x8xf32>
    %cst_39 = arith.constant dense<0.000000e+00> : vector<32x8xf32>
    %86 = vector.multi_reduction <add>, %84, %cst_39 [1] : vector<32x8x8xf32> to vector<32x8xf32>
    %cst_40 = arith.constant 1.250000e-01 : f32
    %87 = vector.broadcast %cst_40 : f32 to vector<32x8xf32>
    %88 = arith.mulf %86, %87 : vector<32x8xf32>
    %89 = vector.extract_strided_slice %71 {offsets = [0, 2], sizes = [256, 1], strides = [1, 1]} : vector<256x4xf32> to vector<256x1xf32>
    %90 = vector.broadcast %89 : vector<256x1xf32> to vector<256x8xf32>
    %91 = arith.mulf %90, %66 : vector<256x8xf32>
    %92 = vector.shape_cast %91 : vector<256x8xf32> to vector<32x8x8xf32>
    %cst_41 = arith.constant dense<0xFF800000> : vector<32x8xf32>
    %93 = vector.multi_reduction <maximumf>, %92, %cst_41 [1] : vector<32x8x8xf32> to vector<32x8xf32>
    %cst_42 = arith.constant dense<0.000000e+00> : vector<32x8xf32>
    %94 = vector.multi_reduction <add>, %92, %cst_42 [1] : vector<32x8x8xf32> to vector<32x8xf32>
    %cst_43 = arith.constant 1.250000e-01 : f32
    %95 = vector.broadcast %cst_43 : f32 to vector<32x8xf32>
    %96 = arith.mulf %94, %95 : vector<32x8xf32>
    %97 = vector.extract_strided_slice %71 {offsets = [0, 3], sizes = [256, 1], strides = [1, 1]} : vector<256x4xf32> to vector<256x1xf32>
    %98 = vector.broadcast %97 : vector<256x1xf32> to vector<256x8xf32>
    %99 = arith.mulf %98, %66 : vector<256x8xf32>
    %100 = vector.shape_cast %99 : vector<256x8xf32> to vector<32x8x8xf32>
    %cst_44 = arith.constant dense<0xFF800000> : vector<32x8xf32>
    %101 = vector.multi_reduction <maximumf>, %100, %cst_44 [1] : vector<32x8x8xf32> to vector<32x8xf32>
    %cst_45 = arith.constant dense<0.000000e+00> : vector<32x8xf32>
    %102 = vector.multi_reduction <add>, %100, %cst_45 [1] : vector<32x8x8xf32> to vector<32x8xf32>
    %cst_46 = arith.constant 1.250000e-01 : f32
    %103 = vector.broadcast %cst_46 : f32 to vector<32x8xf32>
    %104 = arith.mulf %102, %103 : vector<32x8xf32>
    %105 = tpu.concatenate %77, %85, %93, %101 in 1 : vector<32x8xf32>, vector<32x8xf32>, vector<32x8xf32>, vector<32x8xf32> -> vector<32x32xf32>
    %106 = tpu.concatenate %80, %88, %96, %104 in 1 : vector<32x8xf32>, vector<32x8xf32>, vector<32x8xf32>, vector<32x8xf32> -> vector<32x32xf32>
    %cst_47 = arith.constant dense<0.000000e+00> : vector<32x8xf32>
    %107 = tpu.matmul %105, %60, %cst_47 {dimension_numbers = #tpu.dot_dimension_numbers<[1], [0], [0], [1], [0, 0, 1, 1], [], []>} : vector<32x32xf32>, vector<32x8xf32>, vector<32x8xf32> -> vector<32x8xf32>
    %cst_48 = arith.constant dense<0.000000e+00> : vector<32x8xf32>
    %108 = tpu.matmul %106, %61, %cst_48 {dimension_numbers = #tpu.dot_dimension_numbers<[1], [0], [0], [1], [0, 0, 1, 1], [], []>} : vector<32x32xf32>, vector<32x8xf32>, vector<32x8xf32> -> vector<32x8xf32>
    %109 = arith.addf %107, %108 : vector<32x8xf32>
    %110 = vector.shape_cast %72 : vector<256x8xf32> to vector<32x8x8xf32>
    %111 = vector.shape_cast %109 : vector<32x8xf32> to vector<32x1x8xf32>
    %112 = vector.broadcast %111 : vector<32x1x8xf32> to vector<32x8x8xf32>
    %113 = arith.addf %110, %112 : vector<32x8x8xf32>
    %114 = math.tanh %113 : vector<32x8x8xf32>
    %c0_49 = arith.constant 0 : index
    %c0_50 = arith.constant 0 : index
    %115 = vector.load %arg10[%c0_49, %c0_50] : memref<8x8xf32, #tpu.memory_space<vmem>>, vector<8x8xf32>
    %c0_51 = arith.constant 0 : index
    %c0_52 = arith.constant 0 : index
    %116 = vector.load %arg11[%c0_51, %c0_52] : memref<8x8xf32, #tpu.memory_space<vmem>>, vector<8x8xf32>
    %c0_53 = arith.constant 0 : index
    %c0_54 = arith.constant 0 : index
    %117 = vector.load %arg12[%c0_53, %c0_54] : memref<1x8xf32, #tpu.memory_space<vmem>>, vector<1x8xf32>
    %c0_55 = arith.constant 0 : index
    %c0_56 = arith.constant 0 : index
    %118 = vector.load %arg13[%c0_55, %c0_56] : memref<8x3xf32, #tpu.memory_space<vmem>>, vector<8x3xf32>
    %c0_57 = arith.constant 0 : index
    %c0_58 = arith.constant 0 : index
    %119 = vector.load %arg14[%c0_57, %c0_58] : memref<1x3xf32, #tpu.memory_space<vmem>>, vector<1x3xf32>
    %cst_59 = arith.constant dense<0.000000e+00> : vector<32x8xf32>
    %120 = vector.multi_reduction <add>, %114, %cst_59 [1] : vector<32x8x8xf32> to vector<32x8xf32>
    %cst_60 = arith.constant 1.250000e-01 : f32
    %121 = vector.broadcast %cst_60 : f32 to vector<32x8xf32>
    %122 = arith.mulf %120, %121 : vector<32x8xf32>
    %cst_61 = arith.constant dense<0xFF800000> : vector<32x8xf32>
    %123 = vector.multi_reduction <maximumf>, %114, %cst_61 [1] : vector<32x8x8xf32> to vector<32x8xf32>
    %cst_62 = arith.constant dense<0.000000e+00> : vector<32x8xf32>
    %124 = tpu.matmul %122, %115, %cst_62 {dimension_numbers = #tpu.dot_dimension_numbers<[1], [0], [0], [1], [0, 0, 1, 1], [], []>} : vector<32x8xf32>, vector<8x8xf32>, vector<32x8xf32> -> vector<32x8xf32>
    %cst_63 = arith.constant dense<0.000000e+00> : vector<32x8xf32>
    %125 = tpu.matmul %123, %116, %cst_63 {dimension_numbers = #tpu.dot_dimension_numbers<[1], [0], [0], [1], [0, 0, 1, 1], [], []>} : vector<32x8xf32>, vector<8x8xf32>, vector<32x8xf32> -> vector<32x8xf32>
    %126 = arith.addf %124, %125 : vector<32x8xf32>
    %127 = vector.broadcast %117 : vector<1x8xf32> to vector<32x8xf32>
    %128 = arith.addf %126, %127 : vector<32x8xf32>
    %cst_64 = arith.constant 0.000000e+00 : f32
    %129 = vector.broadcast %cst_64 : f32 to vector<32x8xf32>
    %130 = arith.maximumf %128, %129 : vector<32x8xf32>
    %cst_65 = arith.constant dense<0.000000e+00> : vector<32x3xf32>
    %131 = tpu.matmul %130, %118, %cst_65 {dimension_numbers = #tpu.dot_dimension_numbers<[1], [0], [0], [1], [0, 0, 1, 1], [], []>} : vector<32x8xf32>, vector<8x3xf32>, vector<32x3xf32> -> vector<32x3xf32>
    %132 = vector.broadcast %119 : vector<1x3xf32> to vector<32x3xf32>
    %133 = arith.addf %131, %132 : vector<32x3xf32>
    %c0_66 = arith.constant 0 : index
    %c0_67 = arith.constant 0 : index
    %134 = vector.load %arg15[%c0_66, %c0_67] : memref<32x3xf32, #tpu.memory_space<vmem>>, vector<32x3xf32>
    tpu.vector_store %arg15[%c0_66, %c0_67], %133 {strides = array<i32>} : memref<32x3xf32, #tpu.memory_space<vmem>>, vector<32x3xf32>,
    return
  }
  func.func @transform_0(%arg0: i32) -> (i32, i32, i32) {
    %c0_i32 = arith.constant 0 : i32
    %c0_i32_0 = arith.constant 0 : i32
    %c0_i32_1 = arith.constant 0 : i32
    return %arg0, %c0_i32, %c0_i32_0 : i32, i32, i32
  }
  func.func @transform_1(%arg0: i32) -> (i32, i32) {
    %c0_i32 = arith.constant 0 : i32
    %c0_i32_0 = arith.constant 0 : i32
    %c0_i32_1 = arith.constant 0 : i32
    return %c0_i32, %c0_i32_0 : i32, i32
  }
  func.func @transform_2(%arg0: i32) -> (i32, i32) {
    %c0_i32 = arith.constant 0 : i32
    %c0_i32_0 = arith.constant 0 : i32
    %c0_i32_1 = arith.constant 0 : i32
    return %c0_i32, %c0_i32_0 : i32, i32
  }
  func.func @transform_3(%arg0: i32) -> (i32, i32) {
    %c0_i32 = arith.constant 0 : i32
    %c0_i32_0 = arith.constant 0 : i32
    %c0_i32_1 = arith.constant 0 : i32
    return %c0_i32, %c0_i32_0 : i32, i32
  }
  func.func @transform_4(%arg0: i32) -> (i32, i32) {
    %c0_i32 = arith.constant 0 : i32
    %c0_i32_0 = arith.constant 0 : i32
    %c0_i32_1 = arith.constant 0 : i32
    return %c0_i32, %c0_i32_0 : i32, i32
  }
  func.func @transform_5(%arg0: i32) -> (i32, i32) {
    %c0_i32 = arith.constant 0 : i32
    %c0_i32_0 = arith.constant 0 : i32
    %c0_i32_1 = arith.constant 0 : i32
    return %c0_i32, %c0_i32_0 : i32, i32
  }
  func.func @transform_6(%arg0: i32) -> (i32, i32) {
    %c0_i32 = arith.constant 0 : i32
    %c0_i32_0 = arith.constant 0 : i32
    %c0_i32_1 = arith.constant 0 : i32
    return %c0_i32, %c0_i32_0 : i32, i32
  }
  func.func @transform_7(%arg0: i32) -> (i32, i32) {
    %c0_i32 = arith.constant 0 : i32
    %c0_i32_0 = arith.constant 0 : i32
    %c0_i32_1 = arith.constant 0 : i32
    return %c0_i32, %c0_i32_0 : i32, i32
  }
  func.func @transform_8(%arg0: i32) -> (i32, i32) {
    %c0_i32 = arith.constant 0 : i32
    %c0_i32_0 = arith.constant 0 : i32
    %c0_i32_1 = arith.constant 0 : i32
    return %c0_i32, %c0_i32_0 : i32, i32
  }
  func.func @transform_9(%arg0: i32) -> (i32, i32) {
    %c0_i32 = arith.constant 0 : i32
    %c0_i32_0 = arith.constant 0 : i32
    %c0_i32_1 = arith.constant 0 : i32
    return %c0_i32, %c0_i32_0 : i32, i32
  }
  func.func @transform_10(%arg0: i32) -> (i32, i32) {
    %c0_i32 = arith.constant 0 : i32
    %c0_i32_0 = arith.constant 0 : i32
    %c0_i32_1 = arith.constant 0 : i32
    return %c0_i32, %c0_i32_0 : i32, i32
  }
  func.func @transform_11(%arg0: i32) -> (i32, i32) {
    %c0_i32 = arith.constant 0 : i32
    %c0_i32_0 = arith.constant 0 : i32
    %c0_i32_1 = arith.constant 0 : i32
    return %c0_i32, %c0_i32_0 : i32, i32
  }
  func.func @transform_12(%arg0: i32) -> (i32, i32) {
    %c0_i32 = arith.constant 0 : i32
    %c0_i32_0 = arith.constant 0 : i32
    %c0_i32_1 = arith.constant 0 : i32
    return %c0_i32, %c0_i32_0 : i32, i32
  }
  func.func @transform_13(%arg0: i32) -> (i32, i32) {
    %c0_i32 = arith.constant 0 : i32
    %c0_i32_0 = arith.constant 0 : i32
    %c0_i32_1 = arith.constant 0 : i32
    return %c0_i32, %c0_i32_0 : i32, i32
  }
  func.func @transform_14(%arg0: i32) -> (i32, i32) {
    %c0_i32 = arith.constant 0 : i32
    %c0_i32_0 = arith.constant 0 : i32
    return %arg0, %c0_i32 : i32, i32
  }
}

</mosaic_0001>

<bundles_post_ra>
// kernel: tpu_custom_call.1
= control target key start
LH: loop header
LB: loop body
LE: loop exit
PB: predicated region body
PF: predicated region fallthrough
CT: control target
= control target key end

     0   :  { %s11173_s29 = smov 0   ;;  %s16251_s0 = inlined_call_operand.vmem [shape: f32[64,8,4], index: 0, kind: input, shape index: {}]   ;;  %s16252_s1 = inlined_call_operand.vmem [shape: f32[4,20], index: 1, kind: input, shape index: {}]   ;;  %s16253_s2 = inlined_call_operand.vmem [shape: f32[1,20], index: 2, kind: input, shape index: {}]   ;;  %s16254_s3 = inlined_call_operand.vmem [shape: f32[32,8], index: 3, kind: input, shape index: {}]   ;;  %s16255_s4 = inlined_call_operand.vmem [shape: f32[32,8], index: 4, kind: input, shape index: {}]   ;;  %s16256_s5 = inlined_call_operand.vmem [shape: f32[8,20], index: 5, kind: input, shape index: {}]   ;;  %s16257_s6 = inlined_call_operand.vmem [shape: f32[1,20], index: 6, kind: input, shape index: {}]   ;;  %s16258_s7 = inlined_call_operand.vmem [shape: f32[32,8], index: 7, kind: input, shape index: {}]   ;;  %s16259_s8 = inlined_call_operand.vmem [shape: f32[32,8], index: 8, kind: input, shape index: {}]   ;;  %s16260_s9 = inlined_call_operand.vmem [shape: f32[8,8], index: 9, kind: input, shape index: {}]   ;;  %s16261_s10 = inlined_call_operand.vmem [shape: f32[8,8], index: 10, kind: input, shape index: {}]   ;;  %s16262_s11 = inlined_call_operand.vmem [shape: f32[1,8], index: 11, kind: input, shape index: {}]   ;;  %s16263_s12 = inlined_call_operand.vmem [shape: f32[8,3], index: 12, kind: input, shape index: {}]   ;;  %s16264_s13 = inlined_call_operand.vmem [shape: f32[1,3], index: 13, kind: input, shape index: {}]   ;;  %s16265_s14 = inlined_call_operand.vmem [shape: f32[64,3], index: 14, kind: output, shape index: {}]  }
   0x1 LB: > { %s10215_s30 = sadd.s32 4294967295, %s11086_s29   ;;  %p10219_p0 = scmp.ge.s32.totalorder %s11086_s29, 1  ;;  %s11086_s29 = sphi %s11173_s29, %s24_s29  }
   0x2   : > { %p413_p1 = scmp.lt.s32.totalorder %s11086_s29, 3 }
   0x4   : > { %p414_p2 = pnand %p10219_p0, %p413_p1 }
   0x6   : > { %417 = sbr.rel (%p414_p2) target bundleno = 3429 (0xd65), region = 76 }
   0xb   : > { %v503_v0 = vld [vmem:[%s16252_s1] sm:$0xf]  ;;  %vm616_vm0 = vcmask 1043456   ;;  %s10220_s17 = sshll.u32 %s10215_s30, 5  ;;  %vm519_vm1 = vcmask 31744   ;;  %v16270_v33 = vmov 9  }
   0xc   : > { %10436 = vmatprep.subr.msk.mxu0 %vm616_vm0, %v503_v0  ;;  %p460_p3 = scmp.lt.s32.totalorder %s10220_s17, 63  ;;  %10634 = vset.pattern.permute.xlu0 %v16270_v33  ;;  %v16276_v34 = vmov 10   ;;  %v11260_v35 = vld [vmem:[%s16253_s2] ss:$0 sm:$0xff]  ;;  %v16268_v62 = vmov 11   ;;  %vm1165_vm2 = vcmask 64512  }
   0xd   : > { %10437 = vmatpush3.msk.msra.mxu0 %vm616_vm0, %v503_v0  ;;  %10639 = vset.pattern.permute.xlu1 %v16276_v34  ;;  %vm3598_vm3 = vcmask 1041409   ;;  %vm3600_vm4 = vcmask 1042434   ;;  %vm3602_vm5 = vcmask 1043459   ;;  %vm3604_vm6 = vcmask 1044484   ;;  %s11092_s26 = smov 8   ;;  %s11093_s27 = smov 16  }
   0xe   : > { %s17333_s17 = smov (!%p460_p3, %s10220_s17), 63  ;;  %vm3608_vm7 = vcmask 1046534   ;;  %vm3606_vm8 = vcmask 1045509   ;;  %vm3610_vm9 = vcmask 1047559   ;;  %s11094_s28 = smov 24   ;;  %vm3862_vm10 = vcmask 195584  }
   0xf   : > { %s10221_s18 = sshll.u32 %s17333_s17, 3  ;;  %vm3857_vm11 = vcmask 130048   ;;  %vm4159_vm12 = vcmask 261120   ;;  %s11096_s20 = smov 12   ;;  %vm9234_vm13 = vcmask 162912   ;;  %vm10154_vm14 = vcmask 23552  }
  0x10   : > { %s11189_s21 = scalar_lea.vmem %s16251_s0, %s10221_s18  ;;  %s11097_s23 = smov 116  }
  0x11   : > { %v471_v1 = vld [vmem:[%s11189_s21] sm:$0xff]  ;;  %v472_v2 = vld [vmem:[%s11189_s21 + $0x8] sm:$0xff]  ;;  %v473_v3 = vld [vmem:[%s11189_s21 + $0x10] sm:$0xff] }
  0x12   : > { %10438 = vmatprep.mubr.msk.f32.mxu0 %vm519_vm1, %v471_v1  ;;  %v474_v4 = vld [vmem:[%s11189_s21 + $0x18] sm:$0xff]  ;;  %v475_v5 = vld [vmem:[%s11189_s21 + $0x20] sm:$0xff]  ;;  %v476_v6 = vld [vmem:[%s11189_s21 + $0x28] sm:$0xff] }
  0x13   : > { %10439 = vmatmul.mubr.msk.f32.vlgmr.msra.gmra.mxu0 %vm519_vm1, %v472_v2  ;;  %v477_v7 = vld [vmem:[%s11189_s21 + $0x30] sm:$0xff]  ;;  %v478_v8 = vld [vmem:[%s11189_s21 + $0x38] sm:$0xff]  ;;  %v479_v9 = vld [vmem:[%s11189_s21 + $0x40] sm:$0xff] }
  0x14   : > { %10441 = vmatprep.mubr.msk.f32.mxu0 %vm519_vm1, %v473_v3  ;;  %v480_v10 = vld [vmem:[%s11189_s21 + $0x48] sm:$0xff]  ;;  %v481_v11 = vld [vmem:[%s11189_s21 + $0x50] sm:$0xff]  ;;  %v482_v12 = vld [vmem:[%s11189_s21 + $0x58] sm:$0xff] }
  0x15   : > { %v483_v13 = vld [vmem:[%s11189_s21 + $0x60] sm:$0xff]  ;;  %v484_v14 = vld [vmem:[%s11189_s21 + $0x68] sm:$0xff]  ;;  %v485_v15 = vld [vmem:[%s11189_s21 + $0x70] sm:$0xff] }
  0x16   : > { %v486_v16 = vld [vmem:[%s11189_s21 + $0x78] sm:$0xff]  ;;  %v487_v17 = vld [vmem:[%s11189_s21 + $0x80] sm:$0xff]  ;;  %v488_v18 = vld [vmem:[%s11189_s21 + $0x88] sm:$0xff] }
  0x17   : > { %10442 = vmatmul.mubr.msk.f32.gmra.mxu0 %vm519_vm1, %v474_v4  ;;  %v489_v19 = vld [vmem:[%s11189_s21 + $0x90] sm:$0xff]  ;;  %v490_v20 = vld [vmem:[%s11189_s21 + $0x98] sm:$0xff]  ;;  %v491_v21 = vld [vmem:[%s11189_s21 + $0xa0] sm:$0xff] }
  0x18   : > { %10444 = vmatprep.mubr.msk.f32.mxu0 %vm519_vm1, %v475_v5  ;;  %v492_v22 = vld [vmem:[%s11189_s21 + $0xa8] sm:$0xff]  ;;  %v493_v23 = vld [vmem:[%s11189_s21 + $0xb0] sm:$0xff]  ;;  %v494_v24 = vld [vmem:[%s11189_s21 + $0xb8] sm:$0xff]  ;;  %v16266_v5 = vmov 8  }
  0x19   : > { %v495_v25 = vld [vmem:[%s11189_s21 + $0xc0] sm:$0xff]  ;;  %v496_v26 = vld [vmem:[%s11189_s21 + $0xc8] sm:$0xff]  ;;  %v497_v27 = vld [vmem:[%s11189_s21 + $0xd0] sm:$0xff] }
  0x1a   : > { %v498_v28 = vld [vmem:[%s11189_s21 + $0xd8] sm:$0xff]  ;;  %v499_v29 = vld [vmem:[%s11189_s21 + $0xe0] sm:$0xff]  ;;  %v500_v30 = vld [vmem:[%s11189_s21 + $0xe8] sm:$0xff] }
  0x1b   : > { %10445 = vmatmul.mubr.msk.f32.gmra.mxu0 %vm519_vm1, %v476_v6  ;;  %v501_v31 = vld [vmem:[%s11189_s21 + $0xf0] sm:$0xff]  ;;  %v502_v32 = vld [vmem:[%s11189_s21 + $0xf8] sm:$0xff] }
  0x1c   : > { %10447 = vmatprep.mubr.msk.f32.mxu0 %vm519_vm1, %v477_v7 }
  0x1f   : > { %10448 = vmatmul.mubr.msk.f32.gmra.mxu0 %vm519_vm1, %v478_v8 }
  0x20   : > { %10450 = vmatprep.mubr.msk.f32.mxu0 %vm519_vm1, %v479_v9 }
  0x23   : > { %10451 = vmatmul.mubr.msk.f32.gmra.mxu0 %vm519_vm1, %v480_v10 }
  0x24   : > { %10453 = vmatprep.mubr.msk.f32.mxu0 %vm519_vm1, %v481_v11 }
  0x27   : > { %10454 = vmatmul.mubr.msk.f32.gmra.mxu0 %vm519_vm1, %v482_v12 }
  0x28   : > { %10456 = vmatprep.mubr.msk.f32.mxu0 %vm519_vm1, %v483_v13 }
  0x2b   : > { %10457 = vmatmul.mubr.msk.f32.gmra.mxu0 %vm519_vm1, %v484_v14 }
  0x2c   : > { %10459 = vmatprep.mubr.msk.f32.mxu0 %vm519_vm1, %v485_v15 }
  0x2f   : > { %10460 = vmatmul.mubr.msk.f32.gmra.mxu0 %vm519_vm1, %v486_v16 }
  0x30   : > { %10462 = vmatprep.mubr.msk.f32.mxu0 %vm519_vm1, %v487_v17 }
  0x33   : > { %10463 = vmatmul.mubr.msk.f32.gmra.mxu0 %vm519_vm1, %v488_v18 }
  0x34   : > { %10465 = vmatprep.mubr.msk.f32.mxu0 %vm519_vm1, %v489_v19 }
  0x37   : > { %10466 = vmatmul.mubr.msk.f32.gmra.mxu0 %vm519_vm1, %v490_v20 }
  0x38   : > { %10468 = vmatprep.mubr.msk.f32.mxu0 %vm519_vm1, %v491_v21 }
  0x3b   : > { %10469 = vmatmul.mubr.msk.f32.gmra.mxu0 %vm519_vm1, %v492_v22 }
  0x3c   : > { %10471 = vmatprep.mubr.msk.f32.mxu0 %vm519_vm1, %v493_v23 }
  0x3f   : > { %10472 = vmatmul.mubr.msk.f32.gmra.mxu0 %vm519_vm1, %v494_v24 }
  0x40   : > { %10474 = vmatprep.mubr.msk.f32.mxu0 %vm519_vm1, %v495_v25 }
  0x43   : > { %10475 = vmatmul.mubr.msk.f32.gmra.mxu0 %vm519_vm1, %v496_v26 }
  0x44   : > { %10477 = vmatprep.mubr.msk.f32.mxu0 %vm519_vm1, %v497_v27 }
  0x47   : > { %10478 = vmatmul.mubr.msk.f32.gmra.mxu0 %vm519_vm1, %v498_v28 }
  0x48   : > { %10480 = vmatprep.mubr.msk.f32.mxu0 %vm519_vm1, %v499_v29 }
  0x4b   : > { %10481 = vmatmul.mubr.msk.f32.gmra.mxu0 %vm519_vm1, %v500_v30 }
  0x4c   : > { %10483 = vmatprep.mubr.msk.f32.mxu0 %vm519_vm1, %v501_v31 }
  0x4f   : > { %10484 = vmatmul.mubr.msk.f32.gmra.mxu0 %vm519_vm1, %v502_v32 }
  0xd3   : > { %v10440_v36 = vpop.f32.mrf.mxu0 }
  0xd4   : > { %v11263_v37 = vadd.f32 %v10440_v36, %v11260_v35 }
  0xd5   : > { %v686_v38 = vpop.f32.mrf.mxu0 }
  0xd6   : > { %16548 = vst [vmem:[#allocation2_spill] sm:$0xff] %v11263_v37  ;;  %v846_v39 = vand.u32 2147483647, %v11263_v37  ;;  %v11267_v40 = vadd.f32 %v11260_v35, %v686_v38 }
  0xd7   : > { %v10443_v45 = vpop.f32.mrf.mxu0 }
  0xd8   : > { %16549 = vst [vmem:[#allocation3_spill] sm:$0xff] %v11267_v40  ;;  %v878_v41 = vsub.f32 0.0, %v846_v39  ;;  %v845_v42 = vand.u32 2147483647, %v11267_v40  ;;  %v11271_v46 = vadd.f32 %v10443_v45, %v11260_v35 }
  0xd9   : > { %v696_v50 = vpop.f32.mrf.mxu0 }
  0xda   : > { %v911_v43 = vmul.f32 1.442695, %v878_v41  ;;  %v877_v44 = vsub.f32 0.0, %v845_v42  ;;  %16550 = vst [vmem:[#allocation4_spill] sm:$0xff] %v11271_v46  ;;  %v848_v48 = vand.u32 2147483647, %v11271_v46  ;;  %v11275_v54 = vadd.f32 %v11260_v35, %v696_v50 }
  0xdb   : > { %v10446_v52 = vpop.f32.mrf.mxu0 }
  0xdc   : > { %10823 = vpow2.f32 %v911_v43  ;;  %v909_v47 = vmul.f32 1.442695, %v877_v44  ;;  %v880_v49 = vsub.f32 0.0, %v848_v48  ;;  %16551 = vst [vmem:[#allocation5_spill] sm:$0xff] %v11275_v54  ;;  %v11278_v56 = vadd.f32 %v10446_v52, %v11260_v35 }
  0xdd   : > { %v706_v57 = vpop.f32.mrf.mxu0  ;;  %v847_v58 = vand.u32 2147483647, %v11275_v54 }
  0xde   : > { %10825 = vpow2.f32 %v909_v47  ;;  %v915_v51 = vmul.f32 1.442695, %v880_v49  ;;  %16552 = vst [vmem:[#allocation6_spill] sm:$0xff] %v11278_v56  ;;  %v850_v60 = vand.u32 2147483647, %v11278_v56  ;;  %v11284_v61 = vadd.f32 %v11260_v35, %v706_v57 }
  0xdf   : > { %v10449_v59 = vpop.f32.mrf.mxu0  ;;  %v879_v63 = vsub.f32 0.0, %v847_v58 }
  0xe0   : > { %10827 = vpow2.f32 %v915_v51  ;;  %16553 = vst [vmem:[#allocation7_spill] sm:$0xff] %v11284_v61  ;;  %v882_v1 = vsub.f32 0.0, %v850_v60  ;;  %v849_v2 = vand.u32 2147483647, %v11284_v61  ;;  %v11292_v3 = vadd.f32 %v10449_v59, %v11260_v35 }
  0xe1   : > { %v11287_v0 = vpop.f32.mrf.mxu0  ;;  %v913_v4 = vmul.f32 1.442695, %v879_v63 }
  0xe2   : > { %16554 = vst [vmem:[#allocation8_spill] sm:$0xff] %v11292_v3  ;;  %v919_v7 = vmul.f32 1.442695, %v882_v1  ;;  %v881_v8 = vsub.f32 0.0, %v849_v2  ;;  %v852_v9 = vand.u32 2147483647, %v11292_v3  ;;  %v11335_v43 = vadd.f32 %v11260_v35, %v11287_v0 }
  0xe3   : > { %v10452_v6 = vpop.f32.mrf.mxu0  ;;  %10829 = vpow2.f32 %v913_v4 }
  0xe4   : > { %v11298_v11 = vadd.f32 %v10452_v6, %v11260_v35  ;;  %10831 = vpow2.f32 %v919_v7  ;;  %v917_v12 = vmul.f32 1.442695, %v881_v8  ;;  %v884_v13 = vsub.f32 0.0, %v852_v9  ;;  %16561 = vst [vmem:[#allocation15_spill] sm:$0xff] %v11335_v43 }
  0xe5   : > { %v726_v18 = vpop.f32.mrf.mxu0  ;;  %v851_v47 = vand.u32 2147483647, %v11335_v43 }
  0xe6   : > { %16555 = vst [vmem:[#allocation9_spill] sm:$0xff] %v11298_v11  ;;  %v854_v14 = vand.u32 2147483647, %v11298_v11  ;;  %10833 = vpow2.f32 %v917_v12  ;;  %v923_v15 = vmul.f32 1.442695, %v884_v13  ;;  %v11307_v20 = vadd.f32 %v11260_v35, %v726_v18 }
  0xe7   : > { %v10455_v22 = vpop.f32.mrf.mxu0  ;;  %v883_v49 = vsub.f32 0.0, %v851_v47 }
  0xe8   : > { %v886_v16 = vsub.f32 0.0, %v854_v14  ;;  %10835 = vpow2.f32 %v923_v15  ;;  %16556 = vst [vmem:[#allocation10_spill] sm:$0xff] %v11307_v20  ;;  %v853_v23 = vand.u32 2147483647, %v11307_v20  ;;  %v11315_v24 = vadd.f32 %v10455_v22, %v11260_v35 }
  0xe9   : > { %v10824_v53 = vpop.eup %10823  ;;  %v736_v26 = vpop.f32.mrf.mxu0 }
  0xea   : > { %1651 = vperm.xlu0 %10634, %v10824_v53   ;;  %v927_v17 = vmul.f32 1.442695, %v886_v16  ;;  %16558 = vst [vmem:[#allocation12_spill] sm:$0xff] %v11315_v24  ;;  %v885_v27 = vsub.f32 0.0, %v853_v23  ;;  %v856_v28 = vand.u32 2147483647, %v11315_v24  ;;  %v11323_v29 = vadd.f32 %v11260_v35, %v736_v26 }
  0xeb   : > { %v10826_v55 = vpop.eup %10825  ;;  %v10458_v39 = vpop.f32.mrf.mxu0 }
  0xec   : > { %2287 = vperm.xlu1 %10639, %v10826_v55   ;;  %10837 = vpow2.f32 %v927_v17  ;;  %16560 = vst [vmem:[#allocation14_spill] sm:$0xff] %v11323_v29  ;;  %v925_v31 = vmul.f32 1.442695, %v885_v27  ;;  %v888_v32 = vsub.f32 0.0, %v856_v28  ;;  %v855_v36 = vand.u32 2147483647, %v11323_v29 }
  0xed   : > { %v10828_v10 = vpop.eup %10827  ;;  %v11341_v44 = vadd.f32 %v10458_v39, %v11260_v35  ;;  %v746_v50 = vpop.f32.mrf.mxu0 }
  0xee   : > { %10635 = vset.pattern.permute.xlu0 %v16276_v34  ;;  %10839 = vpow2.f32 %v925_v31  ;;  %v931_v41 = vmul.f32 1.442695, %v888_v32  ;;  %v887_v42 = vsub.f32 0.0, %v855_v36  ;;  %v11354_v52 = vadd.f32 %v11260_v35, %v746_v50 }
  0xef   : > { %2291 = vperm.xlu0 %10635, %v10824_v53   ;;  %16562 = vst [vmem:[#allocation16_spill] sm:$0xff] %v11341_v44  ;;  %v858_v48 = vand.u32 2147483647, %v11341_v44  ;;  %v10461_v60 = vpop.f32.mrf.mxu0 }
  0xf0   : > { %10640 = vset.pattern.permute.xlu1 %v16268_v62  ;;  %v10830_v19 = vpop.eup %10829  ;;  %10841 = vpow2.f32 %v931_v41  ;;  %v929_v45 = vmul.f32 1.442695, %v887_v42  ;;  %16563 = vst [vmem:[#allocation17_spill] sm:$0xff] %v11354_v52  ;;  %v857_v58 = vand.u32 2147483647, %v11354_v52  ;;  %v11371_v1 = vadd.f32 %v10461_v60, %v11260_v35 }
  0xf1   : > { %2927 = vperm.xlu1 %10640, %v10826_v55   ;;  %v11309_v21 = vpop.eup %10831  ;;  %v890_v51 = vsub.f32 0.0, %v858_v48  ;;  %v11373_v2 = vpop.f32.mrf.mxu0 }
  0xf2   : > { %16557 = vst [vmem:[#allocation11_spill] sm:$0xff] %v11309_v21  ;;  %10843 = vpow2.f32 %v929_v45  ;;  %v889_v63 = vsub.f32 0.0, %v857_v58  ;;  %16564 = vst [vmem:[#allocation18_spill] sm:$0xff] %v11371_v1  ;;  %v860_v6 = vand.u32 2147483647, %v11371_v1 }
  0xf3   : > { %10636 = vset.pattern.permute.xlu0 %v16268_v62  ;;  %v11317_v25 = vpop.eup %10833  ;;  %v935_v57 = vmul.f32 1.442695, %v890_v51  ;;  %v10464_v7 = vpop.f32.mrf.mxu0 }
  0xf4   : > { %2931 = vperm.xlu0 %10636, %v10824_v53   ;;  %16559 = vst [vmem:[#allocation13_spill] sm:$0xff] %v11317_v25  ;;  %v933_v4 = vmul.f32 1.442695, %v889_v63  ;;  %v892_v9 = vsub.f32 0.0, %v860_v6  ;;  %v11390_v13 = vadd.f32 %v10464_v7, %v11260_v35 }
  0xf5   : > { %10641 = vset.pattern.permute.xlu1 %v16266_v5  ;;  %v11325_v30 = vpop.eup %10835 }
  0xf6   : > { %975 = vperm.xlu1 %10641, %v10826_v55   ;;  %16566 = vst [vmem:[#allocation20_spill] sm:$0xff] %v11390_v13  ;;  %v939_v14 = vmul.f32 1.442695, %v892_v9  ;;  %v862_v16 = vand.u32 2147483647, %v11390_v13  ;;  %v11458_v9 = vadd.f32 %v11260_v35, %v11373_v2 }
  0xf8   : > { %10637 = vset.pattern.permute.xlu0 %v16266_v5  ;;  %16572 = vst [vmem:[#allocation26_spill] sm:$0xff] %v11458_v9 }
  0xf9   : > { %980 = vperm.xlu0 %10637, %v10824_v53   ;;  %v11330_v38 = vpop.eup %10837 }
  0xfa   : > { %10642 = vset.pattern.permute.xlu1 %v16270_v33 }
  0xfb   : > { %1659 = vperm.xlu1 %10642, %v10828_v10   ;;  %v11356_v53 = vpop.eup %10839 }
  0xfd   : > { %10638 = vset.pattern.permute.xlu0 %v16270_v33  ;;  %v11362_v59 = vpop.eup %10841 }
  0xfe   : > { %1647 = vperm.xlu0 %10638, %v10826_v55   ;;  %v921_v55 = vmul.f32 1.442695, %v883_v49 }
  0xff   : > { %10644 = vset.pattern.permute.xlu1 %v16268_v62  ;;  %v11366_v0 = vpop.eup %10843 }
 0x100   : > { %2939 = vperm.xlu1 %10644, %v10828_v10   ;;  %10845 = vpow2.f32 %v921_v55 }
 0x101   : > { %10847 = vpow2.f32 %v935_v57 }
 0x102   : > { %10643 = vset.pattern.permute.xlu0 %v16276_v34  ;;  %10849 = vpow2.f32 %v933_v4 }
 0x103   : > { %2299 = vperm.xlu0 %10643, %v10828_v10   ;;  %10851 = vpow2.f32 %v939_v14 }
 0x104   : > { %10645 = vset.pattern.permute.xlu1 %v16266_v5 }
 0x105   : > { %990 = vperm.xlu1 %10645, %v10828_v10   ;;  %v11383_v10 = vpop.f32.mrf.mxu0 }
 0x107   : > { %2295 = vperm.xlu0 %10643, %v10830_v19   ;;  %v10467_v15 = vpop.f32.mrf.mxu0 }
 0x108   : > { %v11398_v18 = vadd.f32 %v10467_v15, %v11260_v35 }
 0x109   : > { %10646 = vset.pattern.permute.xlu1 %v16270_v33  ;;  %v776_v17 = vpop.f32.mrf.mxu0 }
 0x10a   : > { %1655 = vperm.xlu1 %10646, %v10830_v19   ;;  %16567 = vst [vmem:[#allocation21_spill] sm:$0xff] %v11398_v18  ;;  %v864_v26 = vand.u32 2147483647, %v11398_v18  ;;  %v11415_v32 = vadd.f32 %v11260_v35, %v776_v17  ;;  %v859_v17 = vand.u32 2147483647, %v11458_v9  ;;  %v16585_v9 = vmov 11  }
 0x10b   : > { %2307 = vperm.xlu0 %10643, %v11309_v21   ;;  %v11402_v22 = vpop.f32.mrf.mxu0 }
 0x10c   : > { %v896_v31 = vsub.f32 0.0, %v864_v26  ;;  %16568 = vst [vmem:[#allocation22_spill] sm:$0xff] %v11415_v32  ;;  %v863_v42 = vand.u32 2147483647, %v11415_v32 }
 0x10d   : > { %v11381_v8 = vpop.eup %10845  ;;  %v11411_v28 = vpop.f32.mrf.mxu0 }
 0x10e   : > { %10647 = vset.pattern.permute.xlu1 %v16268_v62  ;;  %16565 = vst [vmem:[#allocation19_spill] sm:$0xff] %v11381_v8  ;;  %v11385_v12 = vpop.eup %10847  ;;  %v947_v39 = vmul.f32 1.442695, %v896_v31  ;;  %v895_v45 = vsub.f32 0.0, %v863_v42  ;;  %v891_v31 = vsub.f32 0.0, %v859_v17 }
 0x10f   : > { %2935 = vperm.xlu1 %10647, %v10830_v19   ;;  %2303 = vperm.xlu0 %10643, %v11317_v25   ;;  %v11404_v23 = vpop.eup %10849  ;;  %v10473_v36 = vpop.f32.mrf.mxu0 }
 0x110   : > { %v11420_v41 = vpop.eup %10851  ;;  %v945_v49 = vmul.f32 1.442695, %v895_v45 }
 0x111   : > { %v796_v48 = vpop.f32.mrf.mxu0 }
 0x112   : > { %v11436_v51 = vadd.f32 %v11260_v35, %v796_v48 }
 0x113   : > { %10648 = vset.pattern.permute.xlu1 %v16266_v5  ;;  %2315 = vperm.xlu0 %10643, %v11325_v30   ;;  %v10476_v57 = vpop.f32.mrf.mxu0 }
 0x114   : > { %985 = vperm.xlu1 %10648, %v10830_v19   ;;  %v894_v19 = vsub.f32 0.0, %v862_v16  ;;  %16570 = vst [vmem:[#allocation24_spill] sm:$0xff] %v11436_v51  ;;  %v867_v60 = vand.u32 2147483647, %v11436_v51  ;;  %v11446_v63 = vadd.f32 %v10476_v57, %v11260_v35 }
 0x115   : > { %v11452_v6 = vpop.f32.mrf.mxu0 }
 0x116   : > { %v943_v27 = vmul.f32 1.442695, %v894_v19  ;;  %16571 = vst [vmem:[#allocation25_spill] sm:$0xff] %v11446_v63  ;;  %v870_v7 = vand.u32 2147483647, %v11446_v63 }
 0x117   : > { %10658 = vset.pattern.permute.xlu0 %v16270_v33  ;;  %v10479_v15 = vpop.f32.mrf.mxu0 }
 0x118   : > { %10649 = vset.pattern.permute.xlu1 %v16270_v33  ;;  %1683 = vperm.xlu0 %10658, %v11330_v38   ;;  %10853 = vpow2.f32 %v943_v27  ;;  %v902_v16 = vsub.f32 0.0, %v870_v7  ;;  %v11467_v19 = vadd.f32 %v10479_v15, %v11260_v35 }
 0x119   : > { %1667 = vperm.xlu1 %10649, %v11309_v21   ;;  %10855 = vpow2.f32 %v947_v39  ;;  %v816_v26 = vpop.f32.mrf.mxu0 }
 0x11a   : > { %10857 = vpow2.f32 %v945_v49  ;;  %16573 = vst [vmem:[#allocation27_spill] sm:$0xff] %v11467_v19  ;;  %v959_v27 = vmul.f32 1.442695, %v902_v16  ;;  %v872_v39 = vand.u32 2147483647, %v11467_v19  ;;  %v11478_v42 = vadd.f32 %v11260_v35, %v816_v26 }
 0x11b   : > { %v10482_v48 = vpop.f32.mrf.mxu0  ;;  %v937_v49 = vmul.f32 1.442695, %v891_v31 }
 0x11c   : > { %10659 = vset.pattern.permute.xlu0 %v16276_v34  ;;  %16575 = vst [vmem:[#allocation29_spill] sm:$0xff] %v11478_v42  ;;  %v871_v57 = vand.u32 2147483647, %v11478_v42 }
 0x11d   : > { %10650 = vset.pattern.permute.xlu1 %v16268_v62  ;;  %2323 = vperm.xlu0 %10659, %v11330_v38  }
 0x11e   : > { %2947 = vperm.xlu1 %10650, %v11309_v21  }
 0x121   : > { %10660 = vset.pattern.permute.xlu0 %v16266_v5 }
 0x122   : > { %10651 = vset.pattern.permute.xlu1 %v16270_v33  ;;  %1020 = vperm.xlu0 %10660, %v11330_v38  }
 0x123   : > { %1663 = vperm.xlu1 %10651, %v11317_v25  }
 0x125   : > { %v11438_v55 = vpop.eup %10853 }
 0x126   : > { %10663 = vset.pattern.permute.xlu0 %v16268_v62  ;;  %v11448_v4 = vpop.eup %10855 }
 0x127   : > { %10652 = vset.pattern.permute.xlu1 %v16268_v62  ;;  %2959 = vperm.xlu0 %10663, %v11356_v53   ;;  %v11469_v2 = vpop.eup %10857 }
 0x128   : > { %2943 = vperm.xlu1 %10652, %v11317_v25   ;;  %16574 = vst [vmem:[#allocation28_spill] sm:$0xff] %v11469_v2 }
 0x12b   : > { %2971 = vperm.xlu0 %10663, %v11362_v59  }
 0x12c   : > { %10653 = vset.pattern.permute.xlu1 %v16270_v33 }
 0x12d   : > { %1675 = vperm.xlu1 %10653, %v11325_v30  }
 0x12f   : > { %2967 = vperm.xlu0 %10663, %v11366_v0  }
 0x131   : > { %10654 = vset.pattern.permute.xlu1 %v16268_v62 }
 0x132   : > { %2955 = vperm.xlu1 %10654, %v11325_v30  }
 0x133   : > { %10669 = vset.pattern.permute.xlu0 %v16266_v5 }
 0x134   : > { %1025 = vperm.xlu0 %10669, %v11366_v0  }
 0x136   : > { %10655 = vset.pattern.permute.xlu1 %v16270_v33 }
 0x137   : > { %1671 = vperm.xlu1 %10655, %v11381_v8  }
 0x138   : > { %10671 = vset.pattern.permute.xlu0 %v16276_v34 }
 0x139   : > { %2339 = vperm.xlu0 %10671, %v11385_v12  }
 0x13b   : > { %10656 = vset.pattern.permute.xlu1 %v16276_v34 }
 0x13c   : > { %2311 = vperm.xlu1 %10656, %v11381_v8  }
 0x13d   : > { %10672 = vset.pattern.permute.xlu0 %v16268_v62 }
 0x13e   : > { %2979 = vperm.xlu0 %10672, %v11385_v12  }
 0x140   : > { %10657 = vset.pattern.permute.xlu1 %v16268_v62 }
 0x141   : > { %2951 = vperm.xlu1 %10657, %v11381_v8  }
 0x142   : > { %10673 = vset.pattern.permute.xlu0 %v16270_v33 }
 0x143   : > { %1695 = vperm.xlu0 %10673, %v11404_v23  }
 0x145   : > { %2963 = vperm.xlu1 %10657, %v11330_v38   ;;  %v11425_v38 = vadd.f32 %v10473_v36, %v11260_v35 }
 0x147   : > { %10675 = vset.pattern.permute.xlu0 %v16268_v62  ;;  %16569 = vst [vmem:[#allocation23_spill] sm:$0xff] %v11425_v38  ;;  %v868_v47 = vand.u32 2147483647, %v11425_v38 }
 0x148   : > { %2975 = vperm.xlu0 %10675, %v11404_v23  }
 0x149   : > { %10661 = vset.pattern.permute.xlu1 %v16270_v33  ;;  %v900_v50 = vsub.f32 0.0, %v868_v47 }
 0x14a   : > { %1679 = vperm.xlu1 %10661, %v11356_v53  }
 0x14b   : > { %v955_v58 = vmul.f32 1.442695, %v900_v50  ;;  %v904_v50 = vsub.f32 0.0, %v872_v39  ;;  %v826_v39 = vpop.f32.mrf.mxu0 }
 0x14c   : > { %10676 = vset.pattern.permute.xlu0 %v16270_v33 }
 0x14d   : > { %1707 = vperm.xlu0 %10676, %v11420_v41   ;;  %10859 = vpow2.f32 %v955_v58  ;;  %v11489_v58 = vadd.f32 %v10482_v48, %v11260_v35  ;;  %v963_v7 = vmul.f32 1.442695, %v904_v50 }
 0x14e   : > { %10662 = vset.pattern.permute.xlu1 %v16276_v34 }
 0x14f   : > { %2319 = vperm.xlu1 %10662, %v11356_v53   ;;  %16577 = vst [vmem:[#allocation31_spill] sm:$0xff] %v11489_v58  ;;  %v874_v15 = vand.u32 2147483647, %v11489_v58 }
 0x151   : > { %10677 = vset.pattern.permute.xlu0 %v16268_v62  ;;  %v906_v48 = vsub.f32 0.0, %v874_v15 }
 0x152   : > { %2987 = vperm.xlu0 %10677, %v11420_v41  }
 0x153   : > { %10664 = vset.pattern.permute.xlu1 %v16266_v5  ;;  %v11514_v5 = vadd.f32 %v11260_v35, %v826_v39 }
 0x154   : > { %1015 = vperm.xlu1 %10664, %v11356_v53   ;;  %v899_v53 = vsub.f32 0.0, %v867_v60 }
 0x155   : > { %16580 = vst [vmem:[#allocation34_spill] sm:$0xff] %v11514_v5 }
 0x156   : > { %10682 = vset.pattern.permute.xlu0 %v16276_v34  ;;  %v953_v14 = vmul.f32 1.442695, %v899_v53 }
 0x157   : > { %2355 = vperm.xlu0 %10682, %v11438_v55  }
 0x158   : > { %10665 = vset.pattern.permute.xlu1 %v16270_v33  ;;  %10861 = vpow2.f32 %v953_v14  ;;  %v903_v14 = vsub.f32 0.0, %v871_v57 }
 0x159   : > { %1691 = vperm.xlu1 %10665, %v11362_v59   ;;  %10863 = vpow2.f32 %v959_v27 }
 0x15a   : > { %v11480_v45 = vpop.eup %10859  ;;  %10865 = vpow2.f32 %v937_v49  ;;  %v961_v31 = vmul.f32 1.442695, %v903_v14  ;;  %v10485_v14 = vpop.f32.mrf.mxu0 }
 0x15b   : > { %10687 = vset.pattern.permute.xlu0 %v16270_v33  ;;  %16576 = vst [vmem:[#allocation30_spill] sm:$0xff] %v11480_v45  ;;  %10867 = vpow2.f32 %v963_v7  ;;  %v11518_v7 = vadd.f32 %v11260_v35, %v11383_v10  ;;  %v11532_v39 = vadd.f32 %v10485_v14, %v11260_v35 }
 0x15c   : > { %1723 = vperm.xlu0 %10687, %v11448_v4   ;;  %10869 = vpow2.f32 %v961_v31  ;;  %v873_v31 = vand.u32 2147483647, %v11514_v5 }
 0x15d   : > { %10666 = vset.pattern.permute.xlu1 %v16276_v34  ;;  %16581 = vst [vmem:[#allocation35_spill] sm:$0xff] %v11518_v7  ;;  %16582 = vst [vmem:[#allocation36_spill] sm:$0xff] %v11532_v39  ;;  %v861_v58 = vand.u32 2147483647, %v11518_v7  ;;  %v876_v51 = vand.u32 2147483647, %v11532_v39 }
 0x15e   : > { %2331 = vperm.xlu1 %10666, %v11362_v59   ;;  %v905_v14 = vsub.f32 0.0, %v873_v31 }
 0x15f   : > { %v893_v38 = vsub.f32 0.0, %v861_v58  ;;  %v908_v58 = vsub.f32 0.0, %v876_v51 }
 0x160   : > { %10689 = vset.pattern.permute.xlu0 %v16268_v62 }
 0x161   : > { %3003 = vperm.xlu0 %10689, %v11448_v4   ;;  %v941_v31 = vmul.f32 1.442695, %v893_v38  ;;  %v971_v51 = vmul.f32 1.442695, %v908_v58 }
 0x162   : > { %10667 = vset.pattern.permute.xlu1 %v16270_v33 }
 0x163   : > { %1687 = vperm.xlu1 %10667, %v11366_v0  }
 0x165   : > { %10690 = vset.pattern.permute.xlu0 %v16270_v33  ;;  %v11473_v36 = vpop.permute.xlu0 %1651  ;;  %v11501_v16 = vpop.eup %10861 }
 0x166   : > { %1719 = vperm.xlu0 %10690, %v11469_v2   ;;  %16578 = vst [vmem:[#allocation32_spill] sm:$0xff] %v11501_v16  ;;  %v11508_v57 = vpop.eup %10863 }
 0x167   : > { %10668 = vset.pattern.permute.xlu1 %v16276_v34  ;;  %v11483_v47 = vpop.permute.xlu1 %2287  ;;  %16579 = vst [vmem:[#allocation33_spill] sm:$0xff] %v11508_v57 }
 0x168   : > { %2327 = vperm.xlu1 %10668, %v11366_v0  }
 0x16a   : > { %1739 = vperm.xlu0 %10690, %v11480_v45   ;;  %v11491_v60 = vpop.permute.xlu0 %2291 }
 0x16c   : > { %10670 = vset.pattern.permute.xlu1 %v16270_v33  ;;  %v2928_v53 = vpop.permute.xlu1 %2927  ;;  %v11534_v33 = vpop.eup %10865 }
 0x16d   : > { %1699 = vperm.xlu1 %10670, %v11385_v12   ;;  %v11496_v0 = vmul.f32 %v2928_v53, %v11267_v40  ;;  %16583 = vst [vmem:[#allocation37_spill] sm:$0xff] %v11534_v33 }
 0x16e   : > { %10699 = vset.pattern.permute.xlu0 %v16268_v62 }
 0x16f   : > { %3019 = vperm.xlu0 %10699, %v11480_v45   ;;  %v3086_v17 = vsel %vm1165_vm2, %v11496_v0, -inf  ;;  %v2932_v27 = vpop.permute.xlu0 %2931 }
 0x170   : > { %v3087_v26 = vrot.slane %v3086_v17, 4  ;;  %v11511_v53 = vmul.f32 %v2932_v27, %v11263_v37 }
 0x171   : > { %10674 = vset.pattern.permute.xlu1 %v16276_v34  ;;  %v976_v50 = vpop.permute.xlu1 %975 }
 0x172   : > { %2335 = vperm.xlu1 %10674, %v11404_v23   ;;  %v3088_v49 = vmax.f32 %v3086_v17, %v3087_v26  ;;  %v3093_v15 = vsel %vm1165_vm2, %v11511_v53, -inf  ;;  %v11524_v17 = vmul.f32 %v976_v50, %v11267_v40  ;;  %v967_v26 = vmul.f32 1.442695, %v906_v48 }
 0x173   : > { %3015 = vperm.xlu0 %10699, %v11501_v16   ;;  %v3094_v27 = vrot.slane %v3093_v15, 4  ;;  %v16584_v50 = vmov 9  }
 0x174   : > { %v3089_v62 = vrot.slane %v3088_v49, 2  ;;  %v1166_v10 = vsel %vm1165_vm2, %v11524_v17, -inf  ;;  %v981_v19 = vpop.permute.xlu0 %980  ;;  %10871 = vpow2.f32 %v967_v26  ;;  %v16586_v26 = vmov 10  }
 0x175   : > { %v3095_v42 = vmax.f32 %v3093_v15, %v3094_v27  ;;  %v11543_v7 = vmul.f32 %v981_v19, %v11263_v37 }
 0x176   : > { %2347 = vperm.xlu1 %10674, %v11420_v41   ;;  %v3090_v48 = vmax.f32 %v3088_v49, %v3089_v62  ;;  %v11545_v62 = vpop.eup %10867 }
 0x177   : > { %10703 = vset.pattern.permute.xlu0 %v16276_v34  ;;  %v1167_v34 = vrot.slane %v1166_v10, 4  ;;  %v3096_v63 = vrot.slane %v3095_v42, 2  ;;  %v1173_v32 = vsel %vm1165_vm2, %v11543_v7, -inf  ;;  %v11553_v39 = vpop.eup %10869 }
 0x178   : > { %2387 = vperm.xlu0 %10703, %v11508_v57   ;;  %v3091_v49 = vrot.slane %v3090_v48, 1  ;;  %v1174_v19 = vrot.slane %v1173_v32, 4  ;;  %16587 = vst [vmem:[#allocation38_spill] sm:$0xff] %v11553_v39 }
 0x179   : > { %v1168_v5 = vmax.f32 %v1166_v10, %v1167_v34  ;;  %v3097_v15 = vmax.f32 %v3095_v42, %v3096_v63  ;;  %v965_v10 = vmul.f32 1.442695, %v905_v14  ;;  %v11559_v14 = vpop.permute.xlu1 %1659 }
 0x17a   : > { %10678 = vset.pattern.permute.xlu1 %v16584_v50  ;;  %v3092_v63 = vmax.f32 %v3090_v48, %v3091_v49  ;;  %v1175_v13 = vmax.f32 %v1173_v32, %v1174_v19  ;;  %v2415_v32 = vmul.f32 %v11491_v60, %v11263_v37 }
 0x17b   : > { %1703 = vperm.xlu1 %10678, %v11534_v33   ;;  %v1169_v27 = vrot.slane %v1168_v5, 2  ;;  %v3098_v34 = vrot.slane %v3097_v15, 1  ;;  %10873 = vpow2.f32 %v965_v10  ;;  %v11576_v10 = vadd.f32 %v11402_v22, %v11260_v35 }
 0x17c   : > { %10704 = vset.pattern.permute.xlu0 %v16585_v9  ;;  %10875 = vpow2.f32 %v941_v31  ;;  %v1176_v38 = vrot.slane %v1175_v13, 2 }
 0x17d   : > { %3027 = vperm.xlu0 %10704, %v11508_v57   ;;  %v3099_v42 = vmax.f32 %v3097_v15, %v3098_v34  ;;  %v1170_v18 = vmax.f32 %v1168_v5, %v1169_v27  ;;  %v2414_v5 = vmul.f32 %v11483_v47, %v11267_v40  ;;  %v1775_v27 = vmul.f32 %v11473_v36, %v11263_v37  ;;  %v11578_v47 = vpop.permute.xlu1 %2939 }
 0x17e   : > { %v1177_v15 = vmax.f32 %v1175_v13, %v1176_v38  ;;  %10877 = vpow2.f32 %v971_v51  ;;  %16588 = vst [vmem:[#allocation39_spill] sm:$0xff] %v11576_v10  ;;  %v2677_v36 = vsel %vm1165_vm2, %v2415_v32, 0.0  ;;  %v3310_v37 = vsel %vm1165_vm2, %v11496_v0, 0.0 }
 0x17f   : > { %10679 = vset.pattern.permute.xlu1 %v16586_v26  ;;  %v11557_v8 = vsel %vm3598_vm3, %v3099_v42, %v3092_v63  ;;  %v1171_v49 = vrot.slane %v1170_v18, 1  ;;  %v2670_v13 = vsel %vm1165_vm2, %v2414_v5, 0.0  ;;  %v1813_v31 = vsel %vm1165_vm2, %v1775_v27, -inf }
 0x180   : > { %2343 = vperm.xlu1 %10679, %v11534_v33   ;;  %v1178_v34 = vrot.slane %v1177_v15, 1  ;;  %v2037_v19 = vsel %vm1165_vm2, %v1775_v27, 0.0  ;;  %v11587_v63 = vadd.f32 %v11260_v35, %v11411_v28  ;;  %v866_v42 = vand.u32 2147483647, %v11576_v10 }
 0x181   : > { %10708 = vset.pattern.permute.xlu0 %v16586_v26  ;;  %v11563_v48 = vpop.eup %10871  ;;  %v1172_v60 = vmax.f32 %v1170_v18, %v1171_v49  ;;  %v2446_v51 = vsel %vm1165_vm2, %v2414_v5, -inf  ;;  %v2671_v38 = vrot.slane %v2670_v13, 4  ;;  %v2678_v18 = vrot.slane %v2677_v36, 4 }
 0x182   : > { %2395 = vperm.xlu0 %10708, %v11545_v62   ;;  %v1179_v58 = vmax.f32 %v1177_v15, %v1178_v34  ;;  %16589 = vst [vmem:[#allocation40_spill] sm:$0xff] %v11587_v63  ;;  %v1814_v49 = vrot.slane %v1813_v31, 4  ;;  %v2038_v15 = vrot.slane %v2037_v19, 4  ;;  %v11599_v28 = vadd.f32 %v11260_v35, %v11452_v6  ;;  %v11603_v34 = vpop.permute.xlu1 %990 }
 0x183   : > { %v2453_v27 = vsel %vm1165_vm2, %v2415_v32, -inf  ;;  %v865_v5 = vand.u32 2147483647, %v11587_v63  ;;  %v3317_v10 = vsel %vm1165_vm2, %v11511_v53, 0.0  ;;  %v2672_v35 = vadd.f32 %v2671_v38, %v2670_v13 }
 0x184   : > { %10680 = vset.pattern.permute.xlu1 %v16585_v9  ;;  %v11590_v22 = vsel %vm3598_vm3, %v1179_v58, %v1172_v60  ;;  %16590 = vst [vmem:[#allocation41_spill] sm:$0xff] %v11599_v28  ;;  %v2447_v58 = vrot.slane %v2446_v51, 4  ;;  %v2454_v6 = vrot.slane %v2453_v27, 4  ;;  %v2679_v32 = vadd.f32 %v2678_v18, %v2677_v36 }
 0x185   : > { %2983 = vperm.xlu1 %10680, %v11534_v33   ;;  %v898_v21 = vsub.f32 0.0, %v866_v42  ;;  %v1815_v1 = vmax.f32 %v1813_v31, %v1814_v49  ;;  %v2039_v25 = vadd.f32 %v2038_v15, %v2037_v19  ;;  %v869_v52 = vand.u32 2147483647, %v11599_v28 }
 0x186   : > { %2391 = vperm.xlu0 %10708, %v11553_v39   ;;  %v3311_v0 = vrot.slane %v3310_v37, 4  ;;  %v3318_v63 = vrot.slane %v3317_v10, 4  ;;  %v897_v13 = vsub.f32 0.0, %v865_v5  ;;  %v2448_v38 = vmax.f32 %v2446_v51, %v2447_v58  ;;  %v11623_v18 = vpop.permute.xlu1 %1655 }
 0x187   : > { %v1390_v36 = vsel %vm1165_vm2, %v11524_v17, 0.0  ;;  %v2673_v42 = vrot.slane %v2672_v35, 2  ;;  %v2455_v31 = vmax.f32 %v2453_v27, %v2454_v6  ;;  %v2680_v19 = vrot.slane %v2679_v32, 2 }
 0x188   : > { %v11605_v60 = vpop.eup %10873  ;;  %v951_v49 = vmul.f32 1.442695, %v898_v21  ;;  %v1816_v15 = vrot.slane %v1815_v1, 2  ;;  %v2040_v28 = vrot.slane %v2039_v25, 2  ;;  %v901_v44 = vsub.f32 0.0, %v869_v52 }
 0x189   : > { %10681 = vset.pattern.permute.xlu1 %v16584_v50  ;;  %v11612_v33 = vpop.eup %10875  ;;  %v3312_v43 = vadd.f32 %v3311_v0, %v3310_v37  ;;  %v3319_v39 = vadd.f32 %v3318_v63, %v3317_v10  ;;  %v1391_v29 = vrot.slane %v1390_v36, 4  ;;  %v1777_v51 = vmul.f32 %v11559_v14, %v11271_v46 }
 0x18a   : > { %1715 = vperm.xlu1 %10681, %v11438_v55   ;;  %10712 = vset.pattern.permute.xlu0 %v16584_v50  ;;  %16591 = vst [vmem:[#allocation42_spill] sm:$0xff] %v11612_v33  ;;  %v949_v17 = vmul.f32 1.442695, %v897_v13  ;;  %v2449_v27 = vrot.slane %v2448_v38, 2  ;;  %v2674_v5 = vadd.f32 %v2673_v42, %v2672_v35  ;;  %v2456_v58 = vrot.slane %v2455_v31, 2  ;;  %v2936_v20 = vpop.permute.xlu1 %2935 }
 0x18b   : > { %1763 = vperm.xlu0 %10712, %v11563_v48   ;;  %v11619_v53 = vpop.eup %10877  ;;  %v2681_v21 = vadd.f32 %v2680_v19, %v2679_v32  ;;  %v1397_v52 = vsel %vm1165_vm2, %v11543_v7, 0.0  ;;  %10879 = vpow2.f32 %v951_v49  ;;  %v1817_v6 = vmax.f32 %v1815_v1, %v1816_v15 }
 0x18c   : > { %16592 = vst [vmem:[#allocation43_spill] sm:$0xff] %v11619_v53  ;;  %v2041_v37 = vadd.f32 %v2040_v28, %v2039_v25  ;;  %v957_v10 = vmul.f32 1.442695, %v901_v44  ;;  %v3313_v63 = vrot.slane %v3312_v43, 2  ;;  %v3320_v0 = vrot.slane %v3319_v39, 2 }
 0x18d   : > { %v1392_v24 = vadd.f32 %v1391_v29, %v1390_v36  ;;  %v1827_v14 = vsel %vm1165_vm2, %v1777_v51, -inf  ;;  %10881 = vpow2.f32 %v949_v17  ;;  %v2450_v35 = vmax.f32 %v2448_v38, %v2449_v27  ;;  %v1648_v29 = vpop.permute.xlu0 %1647 }
 0x18e   : > { %10683 = vset.pattern.permute.xlu1 %v16585_v9  ;;  %v1398_v32 = vrot.slane %v1397_v52, 4  ;;  %v2675_v1 = vrot.slane %v2674_v5, 1  ;;  %v2457_v25 = vmax.f32 %v2455_v31, %v2456_v58  ;;  %v2682_v44 = vrot.slane %v2681_v21, 1 }
 0x18f   : > { %2995 = vperm.xlu1 %10683, %v11438_v55   ;;  %10713 = vset.pattern.permute.xlu0 %v16586_v26  ;;  %v2051_v7 = vsel %vm1165_vm2, %v1777_v51, 0.0  ;;  %v1818_v28 = vrot.slane %v1817_v6, 1  ;;  %10883 = vpow2.f32 %v957_v10  ;;  %v1828_v13 = vrot.slane %v1827_v14, 4 }
 0x190   : > { %2403 = vperm.xlu0 %10713, %v11563_v48   ;;  %v11639_v36 = vmul.f32 %v2936_v20, %v11275_v54  ;;  %v2042_v42 = vrot.slane %v2041_v37, 1  ;;  %v3314_v19 = vadd.f32 %v3313_v63, %v3312_v43  ;;  %v3321_v38 = vadd.f32 %v3320_v0, %v3319_v39 }
 0x191   : > { %v1393_v49 = vrot.slane %v1392_v24, 2  ;;  %v1399_v15 = vadd.f32 %v1398_v32, %v1397_v52  ;;  %v2052_v17 = vrot.slane %v2051_v7, 4  ;;  %v1774_v27 = vmul.f32 %v1648_v29, %v11267_v40 }
 0x192   : > { %v3100_v31 = vsel %vm1165_vm2, %v11639_v36, -inf  ;;  %v16593_v51 = vmov 8   ;;  %v2451_v58 = vrot.slane %v2450_v35, 1  ;;  %v2676_v10 = vadd.f32 %v2675_v1, %v2674_v5 }
 0x193   : > { %10684 = vset.pattern.permute.xlu1 %v16584_v50  ;;  %v2683_v20 = vadd.f32 %v2682_v44, %v2681_v21  ;;  %v11648_v43 = vmax.f32 %v1817_v6, %v1818_v28  ;;  %v1829_v39 = vmax.f32 %v1827_v14, %v1828_v13  ;;  %v3057_v52 = vmul.f32 %v11578_v47, %v11271_v46  ;;  %v2300_v6 = vpop.permute.xlu0 %2299 }
 0x194   : > { %1711 = vperm.xlu1 %10684, %v11612_v33   ;;  %10714 = vset.pattern.permute.xlu0 %v16584_v50  ;;  %v3101_v63 = vrot.slane %v3100_v31, 4  ;;  %v2043_v0 = vadd.f32 %v2042_v42, %v2041_v37  ;;  %v3315_v32 = vrot.slane %v3314_v19, 1  ;;  %v3322_v29 = vrot.slane %v3321_v38, 1 }
 0x195   : > { %1759 = vperm.xlu0 %10714, %v11605_v60   ;;  %v1394_v40 = vadd.f32 %v1393_v49, %v1392_v24  ;;  %v2030_v5 = vsel %vm1165_vm2, %v1774_v27, 0.0  ;;  %v2452_v1 = vmax.f32 %v2450_v35, %v2451_v58  ;;  %v2894_v44 = vmul.f32 0.125, %v2676_v10 }
 0x196   : > { %v3102_v21 = vmax.f32 %v3100_v31, %v3101_v63  ;;  %v1830_v47 = vrot.slane %v1829_v39, 2  ;;  %v1806_v37 = vsel %vm1165_vm2, %v1774_v27, -inf  ;;  %v3107_v24 = vsel %vm1165_vm2, %v3057_v52, -inf }
 0x197   : > { %v3316_v28 = vadd.f32 %v3315_v32, %v3314_v19  ;;  %v3323_v13 = vadd.f32 %v3322_v29, %v3321_v38  ;;  %v1395_v35 = vrot.slane %v1394_v40, 1  ;;  %v2031_v42 = vrot.slane %v2030_v5, 4 }
 0x198   : > { %10685 = vset.pattern.permute.xlu1 %v16586_v26  ;;  %v3103_v14 = vrot.slane %v3102_v21, 2  ;;  %v3331_v49 = vsel %vm1165_vm2, %v3057_v52, 0.0  ;;  %v1807_v58 = vrot.slane %v1806_v37, 4  ;;  %v3108_v27 = vrot.slane %v3107_v24, 4 }
 0x199   : > { %2351 = vperm.xlu1 %10685, %v11612_v33   ;;  %1771 = vperm.xlu0 %10714, %v11619_v53   ;;  %v2417_v10 = vmul.f32 %v2300_v6, %v11271_v46  ;;  %v3534_v63 = vmul.f32 0.125, %v3316_v28  ;;  %v2032_v32 = vadd.f32 %v2031_v42, %v2030_v5  ;;  %v3332_v29 = vrot.slane %v3331_v49, 4 }
 0x19a   : > { %v1396_v6 = vadd.f32 %v1395_v35, %v1394_v40  ;;  %v3109_v16 = vmax.f32 %v3107_v24, %v3108_v27 }
 0x19b   : > { %v2467_v24 = vsel %vm1165_vm2, %v2417_v10, -inf }
 0x19c   : > { %v1614_v42 = vmul.f32 0.125, %v1396_v6 }
 0x19d   : > { %10686 = vset.pattern.permute.xlu1 %v16585_v9  ;;  %10718 = vset.pattern.permute.xlu0 %v16585_v9 }
 0x19e   : > { %2991 = vperm.xlu1 %10686, %v11612_v33   ;;  %3051 = vperm.xlu0 %10718, %v11619_v53   ;;  %v2458_v33 = vrot.slane %v2457_v25, 1  ;;  %v2053_v53 = vadd.f32 %v2052_v17, %v2051_v7  ;;  %v11657_v7 = vpop.eup %10879  ;;  %v3104_v17 = vmax.f32 %v3102_v21, %v3103_v14  ;;  %v2296_v21 = vpop.permute.xlu0 %2295 }
 0x19f   : > { %16594 = vst [vmem:[#allocation44_spill] sm:$0xff] %v11657_v7  ;;  %v11660_v31 = vpop.eup %10881  ;;  %v2416_v5 = vmul.f32 %v2296_v21, %v11275_v54 }
 0x1a0   : > { %v2459_v57 = vmax.f32 %v2457_v25, %v2458_v33  ;;  %v2054_v25 = vrot.slane %v2053_v53, 2  ;;  %16595 = vst [vmem:[#allocation45_spill] sm:$0xff] %v11660_v31  ;;  %v11674_v52 = vpop.eup %10883 }
 0x1a1   : > { %v2684_v27 = vsel %vm1165_vm2, %v2416_v5, 0.0 }
 0x1a2   : > { %10688 = vset.pattern.permute.xlu1 %v16586_v26  ;;  %10723 = vset.pattern.permute.xlu0 %v16593_v51  ;;  %v1400_v51 = vrot.slane %v1399_v15, 2  ;;  %v11668_v19 = vsel %vm3598_vm3, %v2459_v57, %v2452_v1  ;;  %v2055_v14 = vadd.f32 %v2054_v25, %v2053_v53  ;;  %v1808_v1 = vmax.f32 %v1806_v37, %v1807_v58  ;;  %v2308_v6 = vpop.permute.xlu0 %2307 }
 0x1a3   : > { %2363 = vperm.xlu1 %10688, %v11448_v4   ;;  %1030 = vperm.xlu0 %10723, %v11362_v59   ;;  %v2895_v59 = vmul.f32 0.125, %v2683_v20  ;;  %v986_v20 = vpop.permute.xlu1 %985  ;;  %v2033_v53 = vrot.slane %v2032_v32, 2  ;;  %v3333_v37 = vadd.f32 %v3332_v29, %v3331_v49  ;;  %v2468_v49 = vrot.slane %v2467_v24, 4 }
 0x1a4   : > { %v1401_v33 = vadd.f32 %v1400_v51, %v1399_v15  ;;  %v1831_v15 = vmax.f32 %v1829_v39, %v1830_v47  ;;  %v3105_v51 = vrot.slane %v3104_v17, 1  ;;  %v11678_v39 = vmul.f32 %v986_v20, %v11275_v54 }
 0x1a5   : > { %v11671_v38 = vsel %vm3598_vm3, %v2895_v59, %v2894_v44  ;;  %v2691_v44 = vsel %vm1165_vm2, %v2417_v10, 0.0  ;;  %v1136_v47 = vmul.f32 %v11603_v34, %v11271_v46  ;;  %v2056_v34 = vrot.slane %v2055_v14, 1 }
 0x1a6   : > { %v3106_v57 = vmax.f32 %v3104_v17, %v3105_v51  ;;  %v1832_v59 = vrot.slane %v1831_v15, 1  ;;  %v1180_v28 = vsel %vm1165_vm2, %v11678_v39, -inf  ;;  %v1809_v25 = vrot.slane %v1808_v1, 2 }
 0x1a7   : > { %2359 = vperm.xlu1 %10688, %v11469_v2   ;;  %1035 = vperm.xlu0 %10723, %v11404_v23   ;;  %v11662_v23 = vmul.f32 0.125, %v2043_v0  ;;  %v3535_v0 = vmul.f32 0.125, %v3323_v13  ;;  %v2692_v13 = vrot.slane %v2691_v44, 4  ;;  %v1181_v35 = vrot.slane %v1180_v28, 4 }
 0x1a8   : > { %v11686_v40 = vsel %vm3600_vm4, %v3106_v57, %v11557_v8  ;;  %v3110_v17 = vrot.slane %v3109_v16, 2  ;;  %v1411_v58 = vsel %vm1165_vm2, %v1136_v47, 0.0  ;;  %v11699_v51 = vmax.f32 %v1831_v15, %v1832_v59 }
 0x1a9   : > { %16596 = vst [vmem:[#allocation46_spill] sm:$0xff] %v11686_v40  ;;  %v1182_v10 = vmax.f32 %v1180_v28, %v1181_v35  ;;  %v2034_v20 = vadd.f32 %v2033_v53, %v2032_v32  ;;  %v2693_v29 = vadd.f32 %v2692_v13, %v2691_v44  ;;  %v1187_v21 = vsel %vm1165_vm2, %v1136_v47, -inf }
 0x1aa   : > { %v1412_v46 = vrot.slane %v1411_v58, 4  ;;  %v2460_v15 = vsel %vm1165_vm2, %v2416_v5, -inf  ;;  %v2685_v59 = vrot.slane %v2684_v27, 4  ;;  %v1810_v32 = vmax.f32 %v1808_v1, %v1809_v25  ;;  %v2304_v25 = vpop.permute.xlu0 %2303 }
 0x1ab   : > { %10691 = vset.pattern.permute.xlu1 %v16585_v9  ;;  %1060 = vperm.xlu0 %10723, %v11438_v55   ;;  %v1402_v55 = vrot.slane %v1401_v33, 1  ;;  %v3111_v53 = vmax.f32 %v3109_v16, %v3110_v17  ;;  %v2035_v35 = vrot.slane %v2034_v20, 1  ;;  %v1188_v44 = vrot.slane %v1187_v21, 4 }
 0x1ac   : > { %2999 = vperm.xlu1 %10691, %v11469_v2   ;;  %v2461_v13 = vrot.slane %v2460_v15, 4  ;;  %v1413_v40 = vadd.f32 %v1412_v46, %v1411_v58  ;;  %v2419_v16 = vmul.f32 %v2308_v6, %v11278_v56  ;;  %v1811_v1 = vrot.slane %v1810_v32, 1 }
 0x1ad   : > { %v1403_v8 = vadd.f32 %v1402_v55, %v1401_v33  ;;  %v2057_v33 = vadd.f32 %v2056_v34, %v2055_v14  ;;  %v1183_v55 = vrot.slane %v1182_v10, 2  ;;  %v2694_v34 = vrot.slane %v2693_v29, 2 }
 0x1ae   : > { %v2462_v58 = vmax.f32 %v2460_v15, %v2461_v13  ;;  %v1414_v6 = vrot.slane %v1413_v40, 2  ;;  %v2316_v13 = vpop.permute.xlu0 %2315 }
 0x1af   : > { %1040 = vperm.xlu0 %10723, %v11385_v12   ;;  %v11694_v12 = vsel %vm3598_vm3, %v3535_v0, %v3534_v63  ;;  %v3334_v63 = vrot.slane %v3333_v37, 2  ;;  %v1776_v0 = vmul.f32 %v11623_v18, %v11275_v54  ;;  %v1615_v57 = vmul.f32 0.125, %v1403_v8 }
 0x1b0   : > { %10692 = vset.pattern.permute.xlu1 %v16584_v50  ;;  %v2469_v18 = vmax.f32 %v2467_v24, %v2468_v49  ;;  %v1184_v28 = vmax.f32 %v1182_v10, %v1183_v55  ;;  %v11711_v5 = vmul.f32 0.125, %v2057_v33  ;;  %v2036_v33 = vadd.f32 %v2035_v35, %v2034_v20 }
 0x1b1   : > { %1731 = vperm.xlu1 %10692, %v11657_v7   ;;  %v3335_v14 = vadd.f32 %v3334_v63, %v3333_v37  ;;  %v1820_v47 = vsel %vm1165_vm2, %v1776_v0, -inf  ;;  %v2044_v54 = vsel %vm1165_vm2, %v1776_v0, 0.0  ;;  %v11717_v49 = vsel %vm3598_vm3, %v1615_v57, %v1614_v42 }
 0x1b2   : > { %v1185_v8 = vrot.slane %v1184_v28, 1  ;;  %16597 = vst [vmem:[#allocation47_spill] sm:$0xff] %v11711_v5  ;;  %v2470_v37 = vrot.slane %v2469_v18, 2  ;;  %v1821_v24 = vrot.slane %v1820_v47, 4  ;;  %v1189_v63 = vmax.f32 %v1187_v21, %v1188_v44 }
 0x1b3   : > { %1095 = vperm.xlu0 %10723, %v11674_v52   ;;  %v3336_v10 = vrot.slane %v3335_v14, 1  ;;  %v2045_v0 = vrot.slane %v2044_v54, 4  ;;  %v2695_v46 = vadd.f32 %v2694_v34, %v2693_v29  ;;  %v2705_v55 = vsel %vm1165_vm2, %v2419_v16, 0.0 }
 0x1b4   : > { %v1186_v17 = vmax.f32 %v1184_v28, %v1185_v8  ;;  %v1812_v42 = vmax.f32 %v1810_v32, %v1811_v1  ;;  %v3112_v21 = vrot.slane %v3111_v53, 1  ;;  %v2471_v20 = vmax.f32 %v2469_v18, %v2470_v37  ;;  %v11731_v1 = vpop.permute.xlu1 %1667 }
 0x1b5   : > { %10693 = vset.pattern.permute.xlu1 %v16586_v26  ;;  %v1822_v29 = vmax.f32 %v1820_v47, %v1821_v24  ;;  %v3337_v57 = vadd.f32 %v3336_v10, %v3335_v14  ;;  %v2046_v15 = vadd.f32 %v2045_v0, %v2044_v54  ;;  %v2418_v28 = vmul.f32 %v2304_v25, %v11284_v61 }
 0x1b6   : > { %2371 = vperm.xlu1 %10693, %v11657_v7   ;;  %v2463_v35 = vrot.slane %v2462_v58, 2  ;;  %v2481_v44 = vsel %vm1165_vm2, %v2419_v16, -inf  ;;  %v2706_v34 = vrot.slane %v2705_v55, 4  ;;  %v2254_v8 = vmul.f32 0.125, %v2036_v33 }
 0x1b7   : > { %1010 = vperm.xlu0 %10723, %v11325_v30   ;;  %v2686_v30 = vadd.f32 %v2685_v59, %v2684_v27  ;;  %v11721_v27 = vsel %vm3600_vm4, %v1186_v17, %v11590_v22  ;;  %v3324_v59 = vsel %vm1165_vm2, %v11639_v36, 0.0  ;;  %v1190_v22 = vrot.slane %v1189_v63, 2 }
 0x1b8   : > { %16598 = vst [vmem:[#allocation48_spill] sm:$0xff] %v11721_v27  ;;  %v3325_v36 = vrot.slane %v3324_v59, 4  ;;  %v2696_v17 = vrot.slane %v2695_v46, 1  ;;  %v11736_v18 = vsel %vm3598_vm3, %v11648_v43, %v1812_v42  ;;  %v11738_v54 = vmax.f32 %v3111_v53, %v3112_v21 }
 0x1b9   : > { %v2472_v14 = vrot.slane %v2471_v20, 1  ;;  %v1823_v47 = vrot.slane %v1822_v29, 2  ;;  %v1191_v16 = vmax.f32 %v1189_v63, %v1190_v22  ;;  %v2047_v37 = vrot.slane %v2046_v15, 2 }
 0x1ba   : > { %10694 = vset.pattern.permute.xlu1 %v16585_v9  ;;  %16599 = vst [vmem:[#allocation49_spill] sm:$0xff] %v11738_v54  ;;  %v2482_v24 = vrot.slane %v2481_v44, 4  ;;  %v2464_v25 = vmax.f32 %v2462_v58, %v2463_v35  ;;  %v2707_v10 = vadd.f32 %v2706_v34, %v2705_v55  ;;  %v3326_v0 = vadd.f32 %v3325_v36, %v3324_v59  ;;  %v11754_v35 = vpop.permute.xlu1 %2947 }
 0x1bb   : > { %3011 = vperm.xlu1 %10694, %v11657_v7   ;;  %1070 = vperm.xlu0 %10723, %v11448_v4   ;;  %v2687_v4 = vrot.slane %v2686_v30, 2  ;;  %v11747_v43 = vsel %vm3598_vm3, %v11662_v23, %v2254_v8  ;;  %v2697_v53 = vadd.f32 %v2696_v17, %v2695_v46  ;;  %v1824_v63 = vmax.f32 %v1822_v29, %v1823_v47 }
 0x1bc   : > { %v2421_v21 = vmul.f32 %v2316_v13, %v11292_v3  ;;  %v11752_v22 = vmax.f32 %v2471_v20, %v2472_v14  ;;  %v1192_v58 = vrot.slane %v1191_v16, 1  ;;  %v2048_v55 = vadd.f32 %v2047_v37, %v2046_v15 }
 0x1bd   : > { %v2688_v32 = vadd.f32 %v2687_v4, %v2686_v30  ;;  %v11743_v30 = vmul.f32 0.125, %v3337_v57  ;;  %v2474_v4 = vsel %vm1165_vm2, %v2418_v28, -inf  ;;  %v1684_v57 = vpop.permute.xlu0 %1683  ;;  %v2483_v59 = vmax.f32 %v2481_v44, %v2482_v24 }
 0x1be   : > { %v2465_v23 = vrot.slane %v2464_v25, 1  ;;  %v2708_v46 = vrot.slane %v2707_v10, 2  ;;  %v3327_v34 = vrot.slane %v3326_v0, 2  ;;  %v1404_v29 = vsel %vm1165_vm2, %v11678_v39, 0.0 }
 0x1bf   : > { %10695 = vset.pattern.permute.xlu1 %v16584_v50  ;;  %1050 = vperm.xlu0 %10723, %v11420_v41   ;;  %v1415_v41 = vadd.f32 %v1414_v6, %v1413_v40  ;;  %v2698_v40 = vsel %vm1165_vm2, %v2418_v28, 0.0  ;;  %16600 = vst [vmem:[#allocation50_spill] sm:$0xff] %v11743_v30  ;;  %v2689_v6 = vrot.slane %v2688_v32, 1  ;;  %v11760_v28 = vmul.f32 0.125, %v2697_v53 }
 0x1c0   : > { %1727 = vperm.xlu1 %10695, %v11660_v31   ;;  %v2699_v42 = vrot.slane %v2698_v40, 4  ;;  %v2475_v20 = vrot.slane %v2474_v4, 4  ;;  %v1783_v13 = vmul.f32 %v1684_v57, %v11298_v11  ;;  %v1825_v44 = vrot.slane %v1824_v63, 1 }
 0x1c1   : > { %v1416_v33 = vrot.slane %v1415_v41, 1  ;;  %16601 = vst [vmem:[#allocation51_spill] sm:$0xff] %v11760_v28  ;;  %v2690_v36 = vadd.f32 %v2689_v6, %v2688_v32  ;;  %v2495_v17 = vsel %vm1165_vm2, %v2421_v21, -inf  ;;  %v2049_v14 = vrot.slane %v2048_v55, 1 }
 0x1c2   : > { %v2700_v8 = vadd.f32 %v2699_v42, %v2698_v40  ;;  %v2484_v47 = vrot.slane %v2483_v59, 2  ;;  %v2719_v37 = vsel %vm1165_vm2, %v2421_v21, 0.0  ;;  %v1405_v39 = vrot.slane %v1404_v29, 4  ;;  %v11770_v40 = vpop.permute.xlu1 %1663 }
 0x1c3   : > { %1110 = vperm.xlu0 %10723, %v11545_v62   ;;  %v1417_v15 = vadd.f32 %v1416_v33, %v1415_v41  ;;  %v11766_v24 = vmax.f32 %v1191_v16, %v1192_v58  ;;  %v2466_v53 = vmax.f32 %v2464_v25, %v2465_v23  ;;  %v2709_v27 = vadd.f32 %v2708_v46, %v2707_v10  ;;  %v2324_v23 = vpop.permute.xlu0 %2323 }
 0x1c4   : > { %10696 = vset.pattern.permute.xlu1 %v16586_v26  ;;  %v3328_v32 = vadd.f32 %v3327_v34, %v3326_v0  ;;  %v2896_v6 = vmul.f32 0.125, %v2690_v36  ;;  %v2476_v57 = vmax.f32 %v2474_v4, %v2475_v20  ;;  %v2496_v54 = vrot.slane %v2495_v17, 4 }
 0x1c5   : > { %2367 = vperm.xlu1 %10696, %v11660_v31   ;;  %16602 = vst [vmem:[#allocation52_spill] sm:$0xff] %v11766_v24  ;;  %v1869_v41 = vsel %vm1165_vm2, %v1783_v13, -inf  ;;  %v11773_v33 = vmul.f32 0.125, %v1417_v15  ;;  %v2701_v42 = vrot.slane %v2700_v8, 2  ;;  %v2720_v21 = vrot.slane %v2719_v37, 4 }
 0x1c6   : > { %v1779_v16 = vmul.f32 %v11731_v1, %v11278_v56  ;;  %v1826_v25 = vmax.f32 %v1824_v63, %v1825_v44  ;;  %v2050_v10 = vadd.f32 %v2049_v14, %v2048_v55  ;;  %v2485_v0 = vmax.f32 %v2483_v59, %v2484_v47  ;;  %v16605_v44 = vld [vmem:[#allocation32_spill] sm:$0xff]  ;;  %v11794_v47 = vpop.permute.xlu1 %2943 }
 0x1c7   : > { %1115 = vperm.xlu0 %10723, %v11605_v60   ;;  %16603 = vst [vmem:[#allocation53_spill] sm:$0xff] %v11773_v33  ;;  %v1406_v58 = vadd.f32 %v1405_v39, %v1404_v29  ;;  %v2710_v4 = vrot.slane %v2709_v27, 1  ;;  %v3329_v46 = vrot.slane %v3328_v32, 1  ;;  %v1870_v34 = vrot.slane %v1869_v41, 4 }
 0x1c8   : > { %v2093_v36 = vsel %vm1165_vm2, %v1783_v13, 0.0  ;;  %v11780_v20 = vsel %vm3600_vm4, %v2466_v53, %v11668_v19  ;;  %v11784_v15 = vsel %vm3600_vm4, %v2896_v6, %v11671_v38  ;;  %v2477_v33 = vrot.slane %v2476_v57, 2 }
 0x1c9   : > { %10697 = vset.pattern.permute.xlu1 %v16585_v9  ;;  %16604 = vst [vmem:[#allocation54_spill] sm:$0xff] %v11784_v15  ;;  %v2497_v1 = vmax.f32 %v2495_v17, %v2496_v54  ;;  %v2702_v63 = vadd.f32 %v2701_v42, %v2700_v8  ;;  %v2721_v55 = vadd.f32 %v2720_v21, %v2719_v37  ;;  %v2065_v59 = vsel %vm1165_vm2, %v1779_v16, 0.0 }
 0x1ca   : > { %3007 = vperm.xlu1 %10697, %v11660_v31   ;;  %v2423_v29 = vmul.f32 %v2324_v23, %v11298_v11  ;;  %v2256_v13 = vmul.f32 0.125, %v2050_v10  ;;  %v11792_v19 = vsel %vm3600_vm4, %v1826_v25, %v11736_v18  ;;  %v1407_v14 = vrot.slane %v1406_v58, 2 }
 0x1cb   : > { %1120 = vperm.xlu0 %10723, %v11563_v48   ;;  %v2094_v38 = vrot.slane %v2093_v36, 4  ;;  %v2486_v54 = vrot.slane %v2485_v0, 1  ;;  %v2711_v17 = vadd.f32 %v2710_v4, %v2709_v27  ;;  %v3330_v39 = vadd.f32 %v3329_v46, %v3328_v32 }
 0x1cc   : > { %v1871_v8 = vmax.f32 %v1869_v41, %v1870_v34  ;;  %v2478_v37 = vmax.f32 %v2476_v57, %v2477_v33  ;;  %v2498_v53 = vrot.slane %v2497_v1, 2  ;;  %v1841_v6 = vsel %vm1165_vm2, %v1779_v16, -inf  ;;  %v1021_v41 = vpop.permute.xlu0 %1020 }
 0x1cd   : > { %v2066_v42 = vrot.slane %v2065_v59, 4  ;;  %v2703_v21 = vrot.slane %v2702_v63, 1  ;;  %v2722_v23 = vrot.slane %v2721_v55, 2  ;;  %v2509_v10 = vsel %vm1165_vm2, %v2423_v29, -inf }
 0x1ce   : > { %10698 = vset.pattern.permute.xlu1 %v16586_v26  ;;  %v2733_v18 = vsel %vm1165_vm2, %v2423_v29, 0.0  ;;  %v11802_v25 = vsel %vm3600_vm4, %v2256_v13, %v11747_v43  ;;  %v1408_v27 = vadd.f32 %v1407_v14, %v1406_v58  ;;  %v2095_v32 = vadd.f32 %v2094_v38, %v2093_v36  ;;  %v11811_v43 = vpop.permute.xlu1 %1675 }
 0x1cf   : > { %2379 = vperm.xlu1 %10698, %v11480_v45   ;;  %16606 = vst [vmem:[#allocation55_spill] sm:$0xff] %v11802_v25  ;;  %v3059_v57 = vmul.f32 %v11754_v35, %v11278_v56  ;;  %v11807_v33 = vmax.f32 %v2485_v0, %v2486_v54  ;;  %v3536_v16 = vmul.f32 0.125, %v3330_v39  ;;  %v1872_v4 = vrot.slane %v1871_v8, 2 }
 0x1d0   : > { %v1842_v46 = vrot.slane %v1841_v6, 4  ;;  %v11809_v34 = vmax.f32 %v2497_v1, %v2498_v53  ;;  %v2067_v29 = vadd.f32 %v2066_v42, %v2065_v59  ;;  %v2510_v24 = vrot.slane %v2509_v10, 4  ;;  %v16611_v53 = vld [vmem:[#allocation33_spill] sm:$0xff] }
 0x1d1   : > { %16607 = vst [vmem:[#allocation56_spill] sm:$0xff] %v11807_v33  ;;  %v2734_v45 = vrot.slane %v2733_v18, 4  ;;  %v11813_v58 = vmul.f32 0.125, %v2711_v17  ;;  %v2479_v36 = vrot.slane %v2478_v37, 1  ;;  %v2704_v13 = vadd.f32 %v2703_v21, %v2702_v63 }
 0x1d2   : > { %v11815_v35 = vadd.f32 %v2722_v23, %v2721_v55  ;;  %v1409_v14 = vrot.slane %v1408_v27, 1  ;;  %v2096_v38 = vrot.slane %v2095_v32, 2  ;;  %v3121_v0 = vsel %vm1165_vm2, %v3059_v57, -inf  ;;  %v2960_v23 = vpop.permute.xlu0 %2959 }
 0x1d3   : > { %10700 = vset.pattern.permute.xlu1 %v16584_v50  ;;  %16608 = vst [vmem:[#allocation57_spill] sm:$0xff] %v11813_v58  ;;  %v3345_v54 = vsel %vm1165_vm2, %v3059_v57, 0.0  ;;  %v11822_v1 = vsel %vm3600_vm4, %v3536_v16, %v11694_v12  ;;  %v1873_v59 = vmax.f32 %v1871_v8, %v1872_v4  ;;  %v1843_v39 = vmax.f32 %v1841_v6, %v1842_v46  ;;  %v11834_v4 = vpop.permute.xlu1 %2955 }
 0x1d4   : > { %1735 = vperm.xlu1 %10700, %v16605_v44   ;;  %16609 = vst [vmem:[#allocation58_spill] sm:$0xff] %v11815_v35  ;;  %16610 = vst [vmem:[#allocation59_spill] sm:$0xff] %v11822_v1  ;;  %v1142_v17 = vmul.f32 %v1021_v41, %v11298_v11  ;;  %v2068_v55 = vrot.slane %v2067_v29, 2  ;;  %v2511_v42 = vmax.f32 %v2509_v10, %v2510_v24  ;;  %v3122_v57 = vrot.slane %v3121_v0, 4  ;;  %v16613_v24 = vld [vmem:[#allocation10_spill] sm:$0xff] }
 0x1d5   : > { %v2735_v21 = vadd.f32 %v2734_v45, %v2733_v18  ;;  %v11827_v56 = vmax.f32 %v2478_v37, %v2479_v36  ;;  %v1778_v12 = vmul.f32 %v11770_v40, %v11284_v61  ;;  %v11831_v16 = vmul.f32 0.125, %v2704_v13 }
 0x1d6   : > { %v1410_v6 = vadd.f32 %v1409_v14, %v1408_v27  ;;  %v2097_v41 = vadd.f32 %v2096_v38, %v2095_v32  ;;  %v1874_v46 = vrot.slane %v1873_v59, 1  ;;  %v1844_v63 = vrot.slane %v1843_v39, 2 }
 0x1d7   : > { %16612 = vst [vmem:[#allocation60_spill] sm:$0xff] %v11831_v16  ;;  %v1453_v45 = vsel %vm1165_vm2, %v1142_v17, 0.0  ;;  %v3062_v37 = vmul.f32 %v2960_v23, %v16613_v24  ;;  %v2069_v10 = vadd.f32 %v2068_v55, %v2067_v29  ;;  %v2512_v18 = vrot.slane %v2511_v42, 2 }
 0x1d8   : > { %10701 = vset.pattern.permute.xlu1 %v16586_v26  ;;  %v2736_v36 = vrot.slane %v2735_v21, 2  ;;  %v1229_v40 = vsel %vm1165_vm2, %v1142_v17, -inf  ;;  %v3123_v13 = vmax.f32 %v3121_v0, %v3122_v57  ;;  %v1834_v27 = vsel %vm1165_vm2, %v1778_v12, -inf  ;;  %v11848_v57 = vpop.permute.xlu1 %1671 }
 0x1d9   : > { %2375 = vperm.xlu1 %10701, %v16605_v44   ;;  %v3346_v44 = vrot.slane %v3345_v54, 4  ;;  %v2058_v32 = vsel %vm1165_vm2, %v1778_v12, 0.0  ;;  %v1616_v14 = vmul.f32 0.125, %v1410_v6  ;;  %v2098_v38 = vrot.slane %v2097_v41, 1 }
 0x1da   : > { %v1454_v8 = vrot.slane %v1453_v45, 4  ;;  %v3058_v31 = vmul.f32 %v11794_v47, %v11284_v61  ;;  %v11844_v23 = vmax.f32 %v1873_v59, %v1874_v46  ;;  %v1845_v30 = vmax.f32 %v1843_v39, %v1844_v63 }
 0x1db   : > { %v3347_v7 = vadd.f32 %v3346_v44, %v3345_v54  ;;  %v1230_v29 = vrot.slane %v1229_v40, 4  ;;  %v3366_v55 = vsel %vm1165_vm2, %v3062_v37, 0.0  ;;  %v2070_v0 = vrot.slane %v2069_v10, 1 }
 0x1dc   : > { %16614 = vst [vmem:[#allocation61_spill] sm:$0xff] %v11844_v23  ;;  %v2513_v44 = vmax.f32 %v2511_v42, %v2512_v18  ;;  %v1835_v54 = vrot.slane %v1834_v27, 4  ;;  %v2059_v17 = vrot.slane %v2058_v32, 4  ;;  %v2737_v12 = vadd.f32 %v2736_v36, %v2735_v21 }
 0x1dd   : > { %10702 = vset.pattern.permute.xlu1 %v16584_v50  ;;  %v3124_v6 = vrot.slane %v3123_v13, 2  ;;  %v3348_v1 = vrot.slane %v3347_v7, 2  ;;  %v3142_v47 = vsel %vm1165_vm2, %v3062_v37, -inf  ;;  %v1455_v59 = vadd.f32 %v1454_v8, %v1453_v45 }
 0x1de   : > { %1747 = vperm.xlu1 %10702, %v16611_v53   ;;  %v3367_v39 = vrot.slane %v3366_v55, 4  ;;  %v3114_v63 = vsel %vm1165_vm2, %v3058_v31, -inf  ;;  %v3338_v46 = vsel %vm1165_vm2, %v3058_v31, 0.0  ;;  %v11856_v42 = vsel %vm3600_vm4, %v1616_v14, %v11717_v49  ;;  %v2972_v53 = vpop.permute.xlu0 %2971 }
 0x1df   : > { %16615 = vst [vmem:[#allocation62_spill] sm:$0xff] %v11856_v42  ;;  %v2099_v18 = vadd.f32 %v2098_v38, %v2097_v41  ;;  %v1846_v61 = vrot.slane %v1845_v30, 1  ;;  %v1231_v23 = vmax.f32 %v1229_v40, %v1230_v29  ;;  %v2514_v58 = vrot.slane %v2513_v44, 1  ;;  %v11860_v41 = vpop.permute.xlu1 %2311  ;;  %v16617_v38 = vld [vmem:[#allocation12_spill] sm:$0xff]  ;;  %v836_v42 = vpop.f32.mrf.mxu0 }
 0x1e0   : > { %v1836_v16 = vmax.f32 %v1834_v27, %v1835_v54  ;;  %v2060_v21 = vadd.f32 %v2059_v17, %v2058_v32  ;;  %v3143_v36 = vrot.slane %v3142_v47, 4  ;;  %v2071_v8 = vadd.f32 %v2070_v0, %v2069_v10 }
 0x1e1   : > { %v2738_v45 = vrot.slane %v2737_v12, 1  ;;  %v3115_v37 = vrot.slane %v3114_v63, 4  ;;  %v3339_v28 = vrot.slane %v3338_v46, 4  ;;  %v3125_v31 = vmax.f32 %v3123_v13, %v3124_v6 }
 0x1e2   : > { %1743 = vperm.xlu1 %10702, %v11674_v52   ;;  %v3349_v15 = vadd.f32 %v3348_v1, %v3347_v7  ;;  %v1456_v49 = vrot.slane %v1455_v59, 2  ;;  %v3368_v14 = vadd.f32 %v3367_v39, %v3366_v55  ;;  %v11862_v40 = vmul.f32 0.125, %v2099_v18 }
 0x1e3   : > { %v11864_v27 = vmax.f32 %v1845_v30, %v1846_v61  ;;  %v1232_v32 = vrot.slane %v1231_v23, 2  ;;  %v3065_v29 = vmul.f32 %v2972_v53, %v16617_v38  ;;  %v11867_v54 = vmax.f32 %v2513_v44, %v2514_v58 }
 0x1e4   : > { %16616 = vst [vmem:[#allocation63_spill] sm:$0xff] %v11862_v40  ;;  %v1837_v10 = vrot.slane %v1836_v16, 2  ;;  %v2061_v0 = vrot.slane %v2060_v21, 2  ;;  %v3144_v17 = vmax.f32 %v3142_v47, %v3143_v36  ;;  %v2739_v7 = vadd.f32 %v2738_v45, %v2737_v12  ;;  %v11079_v12 = vld [vmem:[%s16253_s2] ss:$0 sm:$0xff] }
 0x1e5   : > { %16618 = vst [vmem:[#allocation64_spill] sm:$0xff] %v11867_v54  ;;  %v3116_v1 = vmax.f32 %v3114_v63, %v3115_v37  ;;  %v3340_v13 = vadd.f32 %v3339_v28, %v3338_v46  ;;  %v3126_v55 = vrot.slane %v3125_v31, 1  ;;  %v3350_v6 = vrot.slane %v3349_v15, 1  ;;  %v11882_v46 = vpop.permute.xlu1 %2951 }
 0x1e6   : > { %10705 = vset.pattern.permute.xlu1 %v16586_v26  ;;  %v1457_v61 = vadd.f32 %v1456_v49, %v1455_v59  ;;  %v3369_v30 = vrot.slane %v3368_v14, 2  ;;  %v1233_v53 = vmax.f32 %v1231_v23, %v1232_v32  ;;  %v3163_v58 = vsel %vm1165_vm2, %v3065_v29, -inf }
 0x1e7   : > { %2383 = vperm.xlu1 %10705, %v11674_v52   ;;  %v1781_v44 = vmul.f32 %v11811_v43, %v11292_v3  ;;  %v11879_v47 = vadd.f32 %v11079_v12, %v836_v42  ;;  %v1838_v28 = vmax.f32 %v1836_v16, %v1837_v10  ;;  %v2062_v39 = vadd.f32 %v2061_v0, %v2060_v21 }
 0x1e8   : > { %v3145_v63 = vrot.slane %v3144_v17, 2  ;;  %v3387_v59 = vsel %vm1165_vm2, %v3065_v29, 0.0  ;;  %v11884_v18 = vmul.f32 0.125, %v2739_v7  ;;  %v3117_v23 = vrot.slane %v3116_v1, 2 }
 0x1e9   : > { %16620 = vst [vmem:[#allocation66_spill] sm:$0xff] %v11879_v47  ;;  %v3341_v36 = vrot.slane %v3340_v13, 2  ;;  %v875_v43 = vand.u32 2147483647, %v11879_v47  ;;  %v3351_v45 = vadd.f32 %v3350_v6, %v3349_v15  ;;  %v1458_v37 = vrot.slane %v1457_v61, 1  ;;  %v16623_v15 = vld [vmem:[#allocation14_spill] sm:$0xff]  ;;  %v2964_v35 = vpop.permute.xlu1 %2963 }
 0x1ea   : > { %16621 = vst [vmem:[#allocation67_spill] sm:$0xff] %v11884_v18  ;;  %v3370_v49 = vadd.f32 %v3369_v30, %v3368_v14  ;;  %v3164_v32 = vrot.slane %v3163_v58, 4  ;;  %v1234_v16 = vrot.slane %v1233_v53, 1  ;;  %v3388_v42 = vrot.slane %v3387_v59, 4 }
 0x1eb   : > { %10706 = vset.pattern.permute.xlu1 %v16585_v9  ;;  %v1855_v21 = vsel %vm1165_vm2, %v1781_v44, -inf  ;;  %v907_v29 = vsub.f32 0.0, %v875_v43  ;;  %v11890_v10 = vmax.f32 %v3125_v31, %v3126_v55  ;;  %v1839_v0 = vrot.slane %v1838_v28, 1 }
 0x1ec   : > { %3023 = vperm.xlu1 %10706, %v11674_v52   ;;  %v11869_v52 = vmul.f32 0.125, %v2071_v8  ;;  %v2968_v8 = vpop.permute.xlu0 %2967  ;;  %v2063_v7 = vrot.slane %v2062_v39, 1  ;;  %v3146_v12 = vmax.f32 %v3144_v17, %v3145_v63  ;;  %v3118_v18 = vmax.f32 %v3116_v1, %v3117_v23 }
 0x1ed   : > { %16622 = vst [vmem:[#allocation68_spill] sm:$0xff] %v11890_v10  ;;  %v3342_v47 = vadd.f32 %v3341_v36, %v3340_v13  ;;  %v3064_v6 = vmul.f32 %v2968_v8, %v16623_v15  ;;  %v969_v14 = vmul.f32 1.442695, %v907_v29  ;;  %v1459_v30 = vadd.f32 %v1458_v37, %v1457_v61  ;;  %v16625_v61 = vld [vmem:[#allocation38_spill] sm:$0xff]  ;;  %v16627_v29 = vld [vmem:[#allocation15_spill] sm:$0xff] }
 0x1ee   : > { %16619 = vst [vmem:[#allocation65_spill] sm:$0xff] %v11869_v52  ;;  %v3371_v54 = vrot.slane %v3370_v49, 1  ;;  %v3165_v40 = vmax.f32 %v3163_v58, %v3164_v32  ;;  %v1856_v38 = vrot.slane %v1855_v21, 4  ;;  %v11893_v2 = vmul.f32 0.125, %v3351_v45 }
 0x1ef   : > { %v11895_v43 = vmax.f32 %v1233_v53, %v1234_v16  ;;  %10885 = vpow2.f32 %v969_v14  ;;  %v11898_v17 = vmax.f32 %v1838_v28, %v1839_v0  ;;  %v2064_v1 = vadd.f32 %v2063_v7, %v2062_v39 }
 0x1f0   : > { %10707 = vset.pattern.permute.xlu1 %v16584_v50  ;;  %16624 = vst [vmem:[#allocation69_spill] sm:$0xff] %v11893_v2  ;;  %v1026_v31 = vpop.permute.xlu0 %1025  ;;  %v3147_v13 = vrot.slane %v3146_v12, 1  ;;  %v2079_v55 = vsel %vm1165_vm2, %v1781_v44, 0.0  ;;  %v3119_v58 = vrot.slane %v3118_v18, 1  ;;  %v3343_v63 = vrot.slane %v3342_v47, 1 }
 0x1f1   : > { %1755 = vperm.xlu1 %10707, %v11545_v62   ;;  %v3380_v23 = vsel %vm1165_vm2, %v3064_v6, 0.0  ;;  %v11904_v53 = vmul.f32 %v2964_v35, %v11298_v11  ;;  %v3372_v36 = vadd.f32 %v3371_v54, %v3370_v49  ;;  %v3166_v8 = vrot.slane %v3165_v40, 2 }
 0x1f2   : > { %v1857_v45 = vmax.f32 %v1855_v21, %v1856_v38  ;;  %v2080_v37 = vrot.slane %v2079_v55, 4  ;;  %v3156_v39 = vsel %vm1165_vm2, %v3064_v6, -inf  ;;  %v1143_v44 = vmul.f32 %v1026_v31, %v16623_v15 }
 0x1f3   : > { %v11910_v32 = vmax.f32 %v3146_v12, %v3147_v13  ;;  %v3381_v16 = vrot.slane %v3380_v23, 4  ;;  %v1780_v35 = vmul.f32 %v11848_v57, %v16627_v29  ;;  %v11917_v54 = vmul.f32 0.125, %v2064_v1  ;;  %v16631_v13 = vld [vmem:[#allocation16_spill] sm:$0xff] }
 0x1f4   : > { %v11919_v38 = vmax.f32 %v3118_v18, %v3119_v58  ;;  %v3344_v49 = vadd.f32 %v3343_v63, %v3342_v47  ;;  %v2340_v21 = vpop.permute.xlu0 %2339  ;;  %v3149_v0 = vsel %vm1165_vm2, %v11904_v53, -inf  ;;  %v11924_v7 = vmul.f32 0.125, %v3372_v36 }
 0x1f5   : > { %10709 = vset.pattern.permute.xlu1 %v16585_v9  ;;  %16628 = vst [vmem:[#allocation71_spill] sm:$0xff] %v11917_v54  ;;  %v3167_v12 = vmax.f32 %v3165_v40, %v3166_v8  ;;  %v3157_v6 = vrot.slane %v3156_v39, 4  ;;  %v11926_v57 = vadd.f32 %v2080_v37, %v2079_v55  ;;  %v3150_v31 = vrot.slane %v3149_v0, 4 }
 0x1f6   : > { %3035 = vperm.xlu1 %10709, %v11545_v62   ;;  %v3389_v62 = vadd.f32 %v3388_v42, %v3387_v59  ;;  %v11906_v59 = vmul.f32 0.125, %v1459_v30  ;;  %v3061_v42 = vmul.f32 %v11834_v4, %v11292_v3  ;;  %16629 = vst [vmem:[#allocation72_spill] sm:$0xff] %v11919_v38  ;;  %16630 = vst [vmem:[#allocation73_spill] sm:$0xff] %v11924_v7  ;;  %v1858_v4 = vrot.slane %v1857_v45, 2 }
 0x1f7   : > { %v1460_v30 = vsel %vm1165_vm2, %v1143_v44, 0.0  ;;  %v3382_v18 = vadd.f32 %v3381_v16, %v3380_v23  ;;  %v2072_v1 = vsel %vm1165_vm2, %v1780_v35, 0.0  ;;  %v2427_v58 = vmul.f32 %v2340_v21, %v16631_v13 }
 0x1f8   : > { %16626 = vst [vmem:[#allocation70_spill] sm:$0xff] %v11906_v59  ;;  %v3390_v28 = vrot.slane %v3389_v62, 2  ;;  %v3135_v47 = vsel %vm1165_vm2, %v3061_v42, -inf  ;;  %v11932_v63 = vmul.f32 0.125, %v3344_v49  ;;  %v3359_v36 = vsel %vm1165_vm2, %v3061_v42, 0.0  ;;  %v11948_v59 = vpop.permute.xlu1 %1679  ;;  %v2980_v25 = vpop.permute.xlu0 %2979 }
 0x1f9   : > { %v2420_v40 = vmul.f32 %v11860_v41, %v16627_v29  ;;  %v3168_v55 = vrot.slane %v3167_v12, 1  ;;  %v3158_v8 = vmax.f32 %v3156_v39, %v3157_v6  ;;  %v1236_v23 = vsel %vm1165_vm2, %v1143_v44, -inf }
 0x1fa   : > { %10710 = vset.pattern.permute.xlu1 %v16584_v50  ;;  %v3391_v14 = vadd.f32 %v3390_v28, %v3389_v62  ;;  %16632 = vst [vmem:[#allocation74_spill] sm:$0xff] %v11932_v63  ;;  %v3151_v62 = vmax.f32 %v3149_v0, %v3150_v31  ;;  %v1461_v28 = vrot.slane %v1460_v30, 4  ;;  %v3136_v37 = vrot.slane %v3135_v47, 4 }
 0x1fb   : > { %1751 = vperm.xlu1 %10710, %v16625_v61   ;;  %v1848_v16 = vsel %vm1165_vm2, %v1780_v35, -inf  ;;  %v2073_v11 = vrot.slane %v2072_v1, 4  ;;  %v11942_v10 = vmax.f32 %v1857_v45, %v1858_v4  ;;  %v3383_v42 = vrot.slane %v3382_v18, 2 }
 0x1fc   : > { %v3152_v21 = vrot.slane %v3151_v62, 2  ;;  %v11940_v49 = vpop.eup %10885  ;;  %v3360_v38 = vrot.slane %v3359_v36, 4  ;;  %v2537_v41 = vsel %vm1165_vm2, %v2427_v58, -inf  ;;  %v1237_v0 = vrot.slane %v1236_v23, 4 }
 0x1fd   : > { %v2488_v39 = vsel %vm1165_vm2, %v2420_v40, -inf  ;;  %1125 = vperm.xlu0 %10723, %v11940_v49   ;;  %v3392_v6 = vrot.slane %v3391_v14, 1  ;;  %v3159_v35 = vrot.slane %v3158_v8, 2  ;;  %v1462_v31 = vadd.f32 %v1461_v28, %v1460_v30 }
 0x1fe   : > { %v3153_v44 = vmax.f32 %v3151_v62, %v3152_v21  ;;  %v1849_v3 = vrot.slane %v1848_v16, 4  ;;  %v3137_v45 = vmax.f32 %v3135_v47, %v3136_v37  ;;  %v2074_v4 = vadd.f32 %v2073_v11, %v2072_v1 }
 0x1ff   : > { %10711 = vset.pattern.permute.xlu1 %v16585_v9  ;;  %v2538_v15 = vrot.slane %v2537_v41, 4  ;;  %v3361_v63 = vadd.f32 %v3360_v38, %v3359_v36  ;;  %v2489_v21 = vrot.slane %v2488_v39, 4  ;;  %v3384_v7 = vadd.f32 %v3383_v42, %v3382_v18 }
 0x200   : > { %3031 = vperm.xlu1 %10711, %v16625_v61   ;;  %v3154_v2 = vrot.slane %v3153_v44, 1  ;;  %v11953_v61 = vmax.f32 %v3167_v12, %v3168_v55  ;;  %v1238_v30 = vmax.f32 %v1236_v23, %v1237_v0  ;;  %v3160_v52 = vmax.f32 %v3158_v8, %v3159_v35 }
 0x201   : > { %v1463_v54 = vrot.slane %v1462_v31, 2  ;;  %v1850_v5 = vmax.f32 %v1848_v16, %v1849_v3  ;;  %v2712_v47 = vsel %vm1165_vm2, %v2420_v40, 0.0  ;;  %v3138_v11 = vrot.slane %v3137_v45, 2 }
 0x202   : > { %16633 = vst [vmem:[#allocation75_spill] sm:$0xff] %v11953_v61  ;;  %v3155_v28 = vmax.f32 %v3153_v44, %v3154_v2  ;;  %v2075_v1 = vrot.slane %v2074_v4, 2  ;;  %v2539_v37 = vmax.f32 %v2537_v41, %v2538_v15  ;;  %v3393_v38 = vadd.f32 %v3392_v6, %v3391_v14  ;;  %v11961_v2 = vpop.permute.xlu1 %2319 }
 0x203   : > { %v3362_v12 = vrot.slane %v3361_v63, 2  ;;  %v2490_v36 = vmax.f32 %v2488_v39, %v2489_v21  ;;  %v3385_v40 = vrot.slane %v3384_v7, 1  ;;  %v1239_v15 = vrot.slane %v1238_v30, 2 }
 0x204   : > { %3043 = vperm.xlu1 %10711, %v11563_v48   ;;  %v2761_v48 = vsel %vm1165_vm2, %v2427_v58, 0.0  ;;  %v2082_v58 = vrot.slane %v11926_v57, 2  ;;  %v11958_v33 = vsel %vm3598_vm3, %v3155_v28, %v11910_v32  ;;  %v2713_v55 = vrot.slane %v2712_v47, 4 }
 0x205   : > { %v2762_v62 = vrot.slane %v2761_v48, 4  ;;  %16634 = vst [vmem:[#allocation76_spill] sm:$0xff] %v11958_v33  ;;  %v1464_v32 = vadd.f32 %v1463_v54, %v1462_v31  ;;  %v1851_v23 = vrot.slane %v1850_v5, 2  ;;  %v3067_v16 = vmul.f32 %v2980_v25, %v16631_v13  ;;  %v16637_v31 = vld [vmem:[#allocation43_spill] sm:$0xff] }
 0x206   : > { %v11965_v3 = vadd.f32 %v2082_v58, %v11926_v57  ;;  %v3161_v14 = vrot.slane %v3160_v52, 1  ;;  %v11969_v42 = vmax.f32 %v3137_v45, %v3138_v11  ;;  %v2076_v41 = vadd.f32 %v2075_v1, %v2074_v4 }
 0x207   : > { %v2763_v18 = vadd.f32 %v2762_v62, %v2761_v48  ;;  %v2540_v0 = vrot.slane %v2539_v37, 2  ;;  %v11971_v48 = vmul.f32 0.125, %v3393_v38  ;;  %v2491_v39 = vrot.slane %v2490_v36, 2  ;;  %v1016_v62 = vpop.permute.xlu1 %1015  ;;  %v1696_v38 = vpop.permute.xlu0 %1695 }
 0x208   : > { %10715 = vset.pattern.permute.xlu1 %v16586_v26  ;;  %16635 = vst [vmem:[#allocation77_spill] sm:$0xff] %v11969_v42  ;;  %v3386_v6 = vadd.f32 %v3385_v40, %v3384_v7  ;;  %v1240_v54 = vmax.f32 %v1238_v30, %v1239_v15  ;;  %v2714_v35 = vadd.f32 %v2713_v55, %v2712_v47  ;;  %v1465_v25 = vrot.slane %v1464_v32, 1 }
 0x209   : > { %2399 = vperm.xlu1 %10715, %v11605_v60   ;;  %16636 = vst [vmem:[#allocation78_spill] sm:$0xff] %v11971_v48  ;;  %v2764_v57 = vrot.slane %v2763_v18, 2  ;;  %v1852_v45 = vmax.f32 %v1850_v5, %v1851_v23  ;;  %v3177_v4 = vsel %vm1165_vm2, %v3067_v16, -inf  ;;  %v3401_v58 = vsel %vm1165_vm2, %v3067_v16, 0.0  ;;  %v16640_v16 = vld [vmem:[#allocation17_spill] sm:$0xff] }
 0x20a   : > { %v2077_v28 = vrot.slane %v2076_v41, 1  ;;  %v2541_v11 = vmax.f32 %v2539_v37, %v2540_v0  ;;  %v2492_v30 = vmax.f32 %v2490_v36, %v2491_v39  ;;  %v3060_v47 = vmul.f32 %v11882_v46, %v16627_v29 }
 0x20b   : > { %v2765_v7 = vadd.f32 %v2764_v57, %v2763_v18  ;;  %v2715_v5 = vrot.slane %v2714_v35, 2  ;;  %v3402_v40 = vrot.slane %v3401_v58, 4  ;;  %v11987_v15 = vmul.f32 %v1016_v62, %v16613_v24 }
 0x20c   : > { %v1241_v55 = vrot.slane %v1240_v54, 1  ;;  %v1466_v37 = vadd.f32 %v1465_v25, %v1464_v32  ;;  %v1853_v23 = vrot.slane %v1852_v45, 1  ;;  %v2078_v18 = vadd.f32 %v2077_v28, %v2076_v41 }
 0x20d   : > { %10716 = vset.pattern.permute.xlu1 %v16585_v9  ;;  %v2542_v36 = vrot.slane %v2541_v11, 1  ;;  %v1786_v46 = vmul.f32 %v1696_v38, %v16640_v16  ;;  %v2766_v0 = vrot.slane %v2765_v7, 1  ;;  %v3128_v57 = vsel %vm1165_vm2, %v3060_v47, -inf }
 0x20e   : > { %3039 = vperm.xlu1 %10716, %v11605_v60   ;;  %v11973_v60 = vadd.f32 %v3362_v12, %v3361_v63  ;;  %v11980_v63 = vmax.f32 %v3160_v52, %v3161_v14  ;;  %v3178_v12 = vrot.slane %v3177_v4, 4  ;;  %v11990_v52 = vmul.f32 0.125, %v3386_v6 }
 0x20f   : > { %v1222_v14 = vsel %vm1165_vm2, %v11987_v15, -inf  ;;  %v3352_v39 = vsel %vm1165_vm2, %v3060_v47, 0.0  ;;  %v2493_v6 = vrot.slane %v2492_v30, 1  ;;  %v2716_v21 = vadd.f32 %v2715_v5, %v2714_v35  ;;  %v2976_v47 = vpop.permute.xlu0 %2975 }
 0x210   : > { %16638 = vst [vmem:[#allocation43_spill] sm:$0xff] %v11980_v63  ;;  %16639 = vst [vmem:[#allocation79_spill] sm:$0xff] %v11990_v52  ;;  %v1223_v62 = vrot.slane %v1222_v14, 4  ;;  %v3179_v1 = vmax.f32 %v3177_v4, %v3178_v12  ;;  %v3403_v32 = vadd.f32 %v3402_v40, %v3401_v58  ;;  %v11998_v25 = vmax.f32 %v1240_v54, %v1241_v55 }
 0x211   : > { %v12000_v44 = vmul.f32 0.125, %v1466_v37  ;;  %v1854_v41 = vmax.f32 %v1852_v45, %v1853_v23  ;;  %v12003_v38 = vmul.f32 0.125, %v2078_v18  ;;  %v3129_v8 = vrot.slane %v3128_v57, 4 }
 0x212   : > { %10717 = vset.pattern.permute.xlu1 %v16586_v26  ;;  %16641 = vst [vmem:[#allocation80_spill] sm:$0xff] %v11998_v25  ;;  %v1224_v28 = vmax.f32 %v1222_v14, %v1223_v62  ;;  %v3353_v61 = vrot.slane %v3352_v39, 4  ;;  %v2114_v63 = vsel %vm1165_vm2, %v1786_v46, 0.0  ;;  %v12007_v35 = vmax.f32 %v2541_v11, %v2542_v36 }
 0x213   : > { %2411 = vperm.xlu1 %10717, %v16637_v31   ;;  %16642 = vst [vmem:[#allocation81_spill] sm:$0xff] %v12000_v44  ;;  %v2767_v4 = vadd.f32 %v2766_v0, %v2765_v7  ;;  %v3373_v54 = vsel %vm1165_vm2, %v11904_v53, 0.0  ;;  %v2494_v45 = vmax.f32 %v2492_v30, %v2493_v6  ;;  %v2717_v5 = vrot.slane %v2716_v21, 1 }
 0x214   : > { %16643 = vst [vmem:[#allocation82_spill] sm:$0xff] %v12007_v35  ;;  %v1225_v58 = vrot.slane %v1224_v28, 2  ;;  %v3180_v12 = vrot.slane %v3179_v1, 2  ;;  %v3404_v40 = vrot.slane %v3403_v32, 2  ;;  %v1890_v55 = vsel %vm1165_vm2, %v1786_v46, -inf }
 0x215   : > { %v2115_v37 = vrot.slane %v2114_v63, 4  ;;  %v3066_v23 = vmul.f32 %v2976_v47, %v16640_v16  ;;  %v12013_v14 = vmax.f32 %v3128_v57, %v3129_v8  ;;  %v3354_v62 = vadd.f32 %v3353_v61, %v3352_v39 }
 0x216   : > { %v1226_v18 = vmax.f32 %v1224_v28, %v1225_v58  ;;  %v3374_v11 = vrot.slane %v3373_v54, 4  ;;  %v3671_v53 = vsel %vm3602_vm5, %v11699_v51, %v11792_v19  ;;  %v1891_v30 = vrot.slane %v1890_v55, 4 }
 0x217   : > { %10719 = vset.pattern.permute.xlu1 %v16584_v50  ;;  %v3672_v8 = vsel %vm3604_vm6, %v11898_v17, %v3671_v53  ;;  %v2116_v61 = vadd.f32 %v2115_v37, %v2114_v63  ;;  %v16644_v46 = vrot.slane %v11942_v10, 1  ;;  %v3355_v39 = vrot.slane %v3354_v62, 2 }
 0x218   : > { %1767 = vperm.xlu1 %10719, %v11940_v49   ;;  %v1227_v7 = vrot.slane %v1226_v18, 1  ;;  %v3673_v57 = vsel %vm3606_vm8, %v11864_v27, %v3672_v8  ;;  %v3375_v6 = vadd.f32 %v3374_v11, %v3373_v54  ;;  %v3170_v51 = vsel %vm1165_vm2, %v3066_v23, -inf }
 0x219   : > { %v1861_v0 = vmax.f32 %v11942_v10, %v16644_v46  ;;  %v3674_v19 = vsel %vm3608_vm7, %v1854_v41, %v3673_v57  ;;  %v1782_v17 = vmul.f32 %v11948_v59, %v16613_v24  ;;  %v16646_v28 = vmov 8   ;;  %v16648_v41 = vld [vmem:[#allocation13_spill] sm:$0xff] }
 0x21a   : > { %v1228_v36 = vmax.f32 %v1226_v18, %v1227_v7  ;;  %v12038_v27 = vmul.f32 0.125, %v2767_v4  ;;  %v2718_v47 = vadd.f32 %v2717_v5, %v2716_v21  ;;  %v12040_v54 = vmax.f32 %v3179_v1, %v3180_v12 }
 0x21b   : > { %v3675_v10 = vsel %vm3610_vm9, %v1861_v0, %v3674_v19  ;;  %v1892_v58 = vmax.f32 %v1890_v55, %v1891_v30  ;;  %v3405_v59 = vadd.f32 %v3404_v40, %v3403_v32  ;;  %v2117_v37 = vrot.slane %v2116_v61, 2  ;;  %v16650_v40 = vld [vmem:[#allocation56_spill] sm:$0xff] }
 0x21c   : > { %10720 = vset.pattern.permute.xlu1 %v16586_v26  ;;  %v12034_v63 = vsel %vm3598_vm3, %v11895_v43, %v1228_v36  ;;  %16647 = vst [vmem:[#allocation84_spill] sm:$0xff] %v12038_v27  ;;  %3697 = vrot.lane.b32.xlu0 %v3675_v10, %s11092_s26  ;;  %v1708_v43 = vpop.permute.xlu0 %1707  ;;  %v3743_v18 = vsel %vm3602_vm5, %v11752_v22, %v11780_v20  ;;  %v3131_v4 = vrot.slane %v12013_v14, 2  ;;  %v3376_v11 = vrot.slane %v3375_v6, 2  ;;  %v16651_v20 = vld [vmem:[#allocation18_spill] sm:$0xff]  ;;  %v16652_v36 = vld [vmem:[#allocation11_spill] sm:$0xff] }
 0x21d   : > { %2407 = vperm.xlu1 %10720, %v11940_v49   ;;  %16645 = vst [vmem:[#allocation83_spill] sm:$0xff] %v12034_v63  ;;  %v3744_v1 = vsel %vm3604_vm6, %v11827_v56, %v3743_v18  ;;  %v3356_v5 = vadd.f32 %v3355_v39, %v3354_v62  ;;  %v1862_v12 = vsel %vm1165_vm2, %v1782_v17, -inf  ;;  %v16649_v55 = vrot.slane %v11809_v34, 1  ;;  %v16695_v63 = vld [vmem:[#allocation64_spill] sm:$0xff] }
 0x21e   : > { %v3745_v7 = vsel %vm3606_vm8, %v16650_v40, %v3744_v1  ;;  %v12056_v53 = vmul.f32 0.125, %v2718_v47  ;;  %v1893_v22 = vrot.slane %v1892_v58, 2  ;;  %v1789_v30 = vmul.f32 %v1708_v43, %v16651_v20  ;;  %v16656_v43 = vld [vmem:[#allocation42_spill] sm:$0xff] }
 0x21f   : > { %v2501_v32 = vmax.f32 %v11809_v34, %v16649_v55  ;;  %v3746_v8 = vsel %vm3608_vm7, %v2494_v45, %v3745_v7  ;;  %v2118_v56 = vadd.f32 %v2117_v37, %v2116_v61  ;;  %v2086_v46 = vsel %vm1165_vm2, %v1782_v17, 0.0  ;;  %v16655_v37 = vld [vmem:[#allocation47_spill] sm:$0xff] }
 0x220   : > { %v3406_v57 = vrot.slane %v3405_v59, 1  ;;  %v3377_v34 = vadd.f32 %v3376_v11, %v3375_v6  ;;  %v1863_v19 = vrot.slane %v1862_v12, 4  ;;  %v3182_v10 = vrot.slane %v12040_v54, 1 }
 0x221   : > { %10721 = vset.pattern.permute.xlu1 %v16585_v9  ;;  %v3747_v0 = vsel %vm3610_vm9, %v2501_v32, %v3746_v8  ;;  %v3132_v47 = vmax.f32 %v12013_v14, %v3131_v4  ;;  %v3357_v45 = vrot.slane %v3356_v5, 1  ;;  %v16653_v61 = vrot.slane %v11965_v3, 1  ;;  %v16657_v4 = vld [vmem:[#allocation71_spill] sm:$0xff] }
 0x222   : > { %3047 = vperm.xlu1 %10721, %v11940_v49   ;;  %v3394_v49 = vsel %vm1165_vm2, %v3066_v23, 0.0  ;;  %v3171_v23 = vrot.slane %v3170_v51, 4  ;;  %3769 = vrot.lane.b32.xlu0 %v3747_v0, %s11093_s27  ;;  %v1911_v17 = vsel %vm1165_vm2, %v1789_v30, -inf  ;;  %v2422_v6 = vmul.f32 %v11961_v2, %v16613_v24  ;;  %v16658_v2 = vld [vmem:[#allocation65_spill] sm:$0xff] }
 0x223   : > { %v3395_v21 = vrot.slane %v3394_v49, 4  ;;  %v1894_v18 = vmax.f32 %v1892_v58, %v1893_v22  ;;  %v2119_v11 = vrot.slane %v2118_v56, 1  ;;  %v3407_v1 = vadd.f32 %v3406_v57, %v3405_v59  ;;  %v2988_v58 = vpop.permute.xlu0 %2987  ;;  %v16679_v24 = vld [vmem:[#allocation21_spill] sm:$0xff] }
 0x224   : > { %v3172_v62 = vmax.f32 %v3170_v51, %v3171_v23  ;;  %v2085_v51 = vadd.f32 %v16653_v61, %v11965_v3  ;;  %v3378_v3 = vrot.slane %v3377_v34, 1  ;;  %v1864_v32 = vmax.f32 %v1862_v12, %v1863_v19 }
 0x225   : > { %v3396_v39 = vadd.f32 %v3395_v21, %v3394_v49  ;;  %v16654_v49 = vld [vmem:[#allocation55_spill] sm:$0xff]  ;;  %v3133_v40 = vrot.slane %v3132_v47, 1  ;;  %v1912_v7 = vrot.slane %v1911_v17, 4  ;;  %v3358_v0 = vadd.f32 %v3357_v45, %v3356_v5 }
 0x226   : > { %10722 = vset.pattern.permute.xlu1 %v16646_v28  ;;  %v3965_v23 = vsel %vm3602_vm5, %v16655_v37, %v16654_v49  ;;  %v3173_v14 = vrot.slane %v3172_v62, 2  ;;  %v2261_v8 = vmul.f32 0.125, %v2085_v51  ;;  %v2502_v49 = vsel %vm1165_vm2, %v2422_v6, -inf  ;;  %v16659_v37 = vld [vmem:[#allocation19_spill] sm:$0xff] }
 0x227   : > { %995 = vperm.xlu1 %10722, %v16648_v41   ;;  %v2087_v41 = vrot.slane %v2086_v46, 4  ;;  %v3966_v21 = vsel %vm3604_vm6, %v16657_v4, %v3965_v23  ;;  %v3397_v55 = vrot.slane %v3396_v39, 2  ;;  %v1895_v59 = vrot.slane %v1894_v18, 1 }
 0x228   : > { %v2120_v57 = vadd.f32 %v2119_v11, %v2118_v56  ;;  %v3174_v23 = vmax.f32 %v3172_v62, %v3173_v14  ;;  %v3379_v19 = vadd.f32 %v3378_v3, %v3377_v34  ;;  %v2135_v4 = vsel %vm1165_vm2, %v1789_v30, 0.0 }
 0x229   : > { %v2088_v61 = vadd.f32 %v2087_v41, %v2086_v46  ;;  %v3398_v51 = vadd.f32 %v3397_v55, %v3396_v39  ;;  %v1913_v5 = vmax.f32 %v1911_v17, %v1912_v7  ;;  %v2503_v46 = vrot.slane %v2502_v49, 4  ;;  %v16663_v39 = vld [vmem:[#allocation28_spill] sm:$0xff] }
 0x22a   : > { %v2726_v45 = vsel %vm1165_vm2, %v2422_v6, 0.0  ;;  %v12090_v41 = vmax.f32 %v12040_v54, %v3182_v10  ;;  %v12092_v56 = vmul.f32 0.125, %v3407_v1  ;;  %v12094_v62 = vmax.f32 %v3132_v47, %v3133_v40  ;;  %v2356_v54 = vpop.permute.xlu0 %2355  ;;  %v1692_v10 = vpop.permute.xlu1 %1691 }
 0x22b   : > { %1000 = vperm.xlu1 %10722, %v16652_v36   ;;  %v3967_v36 = vsel %vm3606_vm8, %v16658_v2, %v3966_v21  ;;  %v2089_v34 = vrot.slane %v2088_v61, 2  ;;  %v12097_v11 = vmul.f32 0.125, %v3358_v0  ;;  %v12099_v30 = vmax.f32 %v1894_v18, %v1895_v59 }
 0x22c   : > { %v3968_v22 = vsel %vm3608_vm7, %v12003_v38, %v3967_v36  ;;  %v3069_v38 = vmul.f32 %v2988_v58, %v16651_v20  ;;  %16660 = vst [vmem:[#allocation13_spill] sm:$0xff] %v12090_v41  ;;  %16661 = vst [vmem:[#allocation56_spill] sm:$0xff] %v12092_v56  ;;  %v12101_v17 = vmul.f32 0.125, %v2120_v57  ;;  %v2136_v14 = vrot.slane %v2135_v4, 4  ;;  %v16665_v36 = vld [vmem:[#allocation58_spill] sm:$0xff] }
 0x22d   : > { %v3969_v12 = vsel %vm3610_vm9, %v2261_v8, %v3968_v22  ;;  %16662 = vst [vmem:[#allocation11_spill] sm:$0xff] %v12094_v62  ;;  %v3543_v6 = vmul.f32 0.125, %v3379_v19  ;;  %v3175_v21 = vrot.slane %v3174_v23, 1  ;;  %v2727_v55 = vrot.slane %v2726_v45, 4  ;;  %v16667_v58 = vld [vmem:[#allocation54_spill] sm:$0xff]  ;;  %v16668_v22 = vld [vmem:[#allocation51_spill] sm:$0xff] }
 0x22e   : > { %3991 = vrot.lane.b32.xlu0 %v3969_v12, %s11092_s26  ;;  %16664 = vst [vmem:[#allocation55_spill] sm:$0xff] %v12101_v17  ;;  %v3399_v1 = vrot.slane %v3398_v51, 1  ;;  %v1914_v7 = vrot.slane %v1913_v5, 2  ;;  %v2504_v47 = vmax.f32 %v2502_v49, %v2503_v46  ;;  %v3191_v40 = vsel %vm1165_vm2, %v3069_v38, -inf  ;;  %v16670_v49 = vld [vmem:[#allocation20_spill] sm:$0xff] }
 0x22f   : > { %1055 = vperm.xlu1 %10722, %v16656_v43   ;;  %v1865_v43 = vrot.slane %v1864_v32, 2  ;;  %v2090_v8 = vadd.f32 %v2089_v34, %v2088_v61  ;;  %v3415_v2 = vsel %vm1165_vm2, %v3069_v38, 0.0  ;;  %v16666_v18 = vrot.slane %v16665_v36, 1  ;;  %v16671_v19 = vld [vmem:[#allocation60_spill] sm:$0xff] }
 0x230   : > { %v2137_v59 = vadd.f32 %v2136_v14, %v2135_v4  ;;  %v1446_v57 = vsel %vm1165_vm2, %v11987_v15, 0.0  ;;  %v2431_v12 = vmul.f32 %v2356_v54, %v16670_v49  ;;  %v2728_v38 = vadd.f32 %v2727_v55, %v2726_v45 }
 0x231   : > { %v1866_v3 = vmax.f32 %v1864_v32, %v1865_v43  ;;  %v2725_v0 = vadd.f32 %v16666_v18, %v16665_v36  ;;  %v16669_v32 = vld [vmem:[#allocation33_spill] sm:$0xff]  ;;  %v12117_v43 = vmax.f32 %v3174_v23, %v3175_v21  ;;  %v3192_v34 = vrot.slane %v3191_v40, 4 }
 0x232   : > { %v3400_v18 = vadd.f32 %v3399_v1, %v3398_v51  ;;  %v3416_v4 = vrot.slane %v3415_v2, 4  ;;  %v12123_v14 = vmax.f32 %v1913_v5, %v1914_v7  ;;  %v1447_v15 = vrot.slane %v1446_v57, 4  ;;  %v16676_v23 = vld [vmem:[#allocation37_spill] sm:$0xff] }
 0x233   : > { %1005 = vperm.xlu1 %10722, %v16659_v37   ;;  %v4037_v37 = vsel %vm3602_vm5, %v16668_v22, %v16667_v58  ;;  %16672 = vst [vmem:[#allocation47_spill] sm:$0xff] %v12117_v43  ;;  %v1867_v46 = vrot.slane %v1866_v3, 1  ;;  %v2505_v58 = vrot.slane %v2504_v47, 2  ;;  %v2332_v22 = vpop.permute.xlu1 %2331  ;;  %v2901_v54 = vmul.f32 0.125, %v2725_v0 }
 0x234   : > { %v4038_v61 = vsel %vm3604_vm6, %v16671_v19, %v4037_v37  ;;  %v2091_v21 = vrot.slane %v2090_v8, 1  ;;  %v2138_v45 = vrot.slane %v2137_v59, 2  ;;  %v2565_v55 = vsel %vm1165_vm2, %v2431_v12, -inf  ;;  %v1724_v19 = vpop.permute.xlu0 %1723 }
 0x235   : > { %v2729_v1 = vrot.slane %v2728_v38, 2  ;;  %v3193_v5 = vmax.f32 %v3191_v40, %v3192_v34  ;;  %v3417_v0 = vadd.f32 %v3416_v4, %v3415_v2  ;;  %v2789_v28 = vsel %vm1165_vm2, %v2431_v12, 0.0 }
 0x236   : > { %v1448_v9 = vadd.f32 %v1447_v15, %v1446_v57  ;;  %v2566_v26 = vrot.slane %v2565_v55, 4  ;;  %v1793_v44 = vmul.f32 %v1724_v19, %v16679_v24  ;;  %v16686_v19 = vld [vmem:[#allocation74_spill] sm:$0xff] }
 0x237   : > { %1065 = vperm.xlu1 %10722, %v16663_v39   ;;  %v16673_v39 = vld [vmem:[#allocation73_spill] sm:$0xff]  ;;  %v2730_v34 = vadd.f32 %v2729_v1, %v2728_v38  ;;  %v3194_v57 = vrot.slane %v3193_v5, 2  ;;  %v3418_v15 = vrot.slane %v3417_v0, 2 }
 0x238   : > { %v12121_v36 = vsel %vm3598_vm3, %v3543_v6, %v16673_v39  ;;  %v1868_v6 = vmax.f32 %v1866_v3, %v1867_v46  ;;  %v2506_v39 = vmax.f32 %v2504_v47, %v2505_v58  ;;  %v2092_v3 = vadd.f32 %v2091_v21, %v2090_v8  ;;  %v1688_v58 = vpop.permute.xlu1 %1687 }
 0x239   : > { %16674 = vst [vmem:[#allocation42_spill] sm:$0xff] %v12121_v36  ;;  %v12140_v46 = vadd.f32 %v2138_v45, %v2137_v59  ;;  %v16682_v47 = vrot.slane %v11973_v60, 1  ;;  %v1449_v21 = vrot.slane %v1448_v9, 2  ;;  %v2567_v45 = vmax.f32 %v2565_v55, %v2566_v26 }
 0x23a   : > { %v2507_v4 = vrot.slane %v2506_v39, 1  ;;  %v1939_v25 = vsel %vm1165_vm2, %v1793_v44, -inf }
 0x23b   : > { %1100 = vperm.xlu1 %10722, %v16669_v32   ;;  %v16675_v32 = vld [vmem:[#allocation57_spill] sm:$0xff]  ;;  %16681 = vst [vmem:[#allocation65_spill] sm:$0xff] %v12140_v46  ;;  %v3365_v2 = vadd.f32 %v16682_v47, %v11973_v60  ;;  %v2163_v60 = vsel %vm1165_vm2, %v1793_v44, 0.0 }
 0x23c   : > { %v4039_v37 = vsel %vm3606_vm8, %v16675_v32, %v4038_v61  ;;  %v16677_v61 = vld [vmem:[#allocation12_spill] sm:$0xff] }
 0x23d   : > { %v4040_v51 = vsel %vm3608_vm7, %v12056_v53, %v4039_v37  ;;  %v1785_v32 = vmul.f32 %v1692_v10, %v16677_v61  ;;  %v16680_v53 = vld [vmem:[#allocation38_spill] sm:$0xff]  ;;  %v16683_v10 = vld [vmem:[#allocation61_spill] sm:$0xff]  ;;  %v2425_v1 = vmul.f32 %v2332_v22, %v16677_v61  ;;  %v1450_v22 = vadd.f32 %v1449_v21, %v1448_v9  ;;  %v16693_v21 = vld [vmem:[#allocation63_spill] sm:$0xff] }
 0x23e   : > { %v4041_v7 = vsel %vm3610_vm9, %v2901_v54, %v4040_v51  ;;  %v12147_v12 = vsel %vm3598_vm3, %v16683_v10, %v1868_v6  ;;  %v16684_v54 = vld [vmem:[#allocation59_spill] sm:$0xff]  ;;  %v16685_v37 = vld [vmem:[#allocation50_spill] sm:$0xff]  ;;  %v16687_v6 = vld [vmem:[#allocation45_spill] sm:$0xff]  ;;  %v2262_v10 = vmul.f32 0.125, %v2092_v3  ;;  %v12170_v3 = vadd.f32 %v3418_v15, %v3417_v0 }
 0x23f   : > { %1045 = vperm.xlu1 %10722, %v16676_v23   ;;  %4063 = vrot.lane.b32.xlu0 %v4041_v7, %s11093_s27  ;;  %v12135_v23 = vmul.f32 0.125, %v3400_v18  ;;  %v2790_v18 = vrot.slane %v2789_v28, 4  ;;  %v2107_v8 = vsel %vm1165_vm2, %v1785_v32, 0.0  ;;  %v4109_v59 = vsel %vm3602_vm5, %v16685_v37, %v16684_v54  ;;  %v16692_v9 = vld [vmem:[#allocation14_spill] sm:$0xff]  ;;  %v16694_v15 = vld [vmem:[#allocation32_spill] sm:$0xff] }
 0x240   : > { %v4110_v51 = vsel %vm3604_vm6, %v16686_v19, %v4109_v59  ;;  %v1883_v38 = vsel %vm1165_vm2, %v1785_v32, -inf  ;;  %v3541_v7 = vmul.f32 0.125, %v3365_v2  ;;  %v2108_v54 = vrot.slane %v2107_v8, 4  ;;  %v3004_v19 = vpop.permute.xlu0 %3003  ;;  %16691 = vst [vmem:[#allocation28_spill] sm:$0xff] %v12170_v3 }
 0x241   : > { %16678 = vst [vmem:[#allocation71_spill] sm:$0xff] %v12135_v23  ;;  %v2791_v40 = vadd.f32 %v2790_v18, %v2789_v28  ;;  %v2731_v37 = vrot.slane %v2730_v34, 1  ;;  %v2164_v59 = vrot.slane %v2163_v60, 4  ;;  %v12165_v32 = vmax.f32 %v3193_v5, %v3194_v57  ;;  %v16690_v28 = vld [vmem:[#allocation44_spill] sm:$0xff] }
 0x242   : > { %v1884_v2 = vrot.slane %v1883_v38, 4  ;;  %v2568_v18 = vrot.slane %v2567_v45, 2  ;;  %v3073_v5 = vmul.f32 %v3004_v19, %v16679_v24  ;;  %v1784_v57 = vmul.f32 %v1688_v58, %v16692_v9 }
 0x243   : > { %1105 = vperm.xlu1 %10722, %v16680_v53   ;;  %v16688_v53 = vld [vmem:[#allocation69_spill] sm:$0xff]  ;;  %16689 = vst [vmem:[#allocation19_spill] sm:$0xff] %v12165_v32  ;;  %v12177_v44 = vsel %vm3598_vm3, %v16693_v21, %v2262_v10  ;;  %v2165_v55 = vadd.f32 %v2164_v59, %v2163_v60  ;;  %v2523_v0 = vsel %vm1165_vm2, %v2425_v1, -inf }
 0x244   : > { %v4111_v47 = vsel %vm3606_vm8, %v16688_v53, %v4110_v51  ;;  %v2328_v51 = vpop.permute.xlu1 %2327  ;;  %v2747_v53 = vsel %vm1165_vm2, %v2425_v1, 0.0  ;;  %v2569_v10 = vmax.f32 %v2567_v45, %v2568_v18  ;;  %v3219_v60 = vsel %vm1165_vm2, %v3073_v5, -inf  ;;  %v1720_v41 = vpop.permute.xlu0 %1719 }
 0x245   : > { %v4112_v26 = vsel %vm3608_vm7, %v12097_v11, %v4111_v47  ;;  %v2508_v11 = vmax.f32 %v2506_v39, %v2507_v4  ;;  %v2792_v47 = vrot.slane %v2791_v40, 2  ;;  %v1885_v39 = vmax.f32 %v1883_v38, %v1884_v2 }
 0x246   : > { %v2748_v4 = vrot.slane %v2747_v53, 4  ;;  %v2100_v38 = vsel %vm1165_vm2, %v1784_v57, 0.0  ;;  %v2166_v59 = vrot.slane %v2165_v55, 2  ;;  %v2524_v2 = vrot.slane %v2523_v0, 4 }
 0x247   : > { %1075 = vperm.xlu1 %10722, %v16687_v6   ;;  %v4113_v6 = vsel %vm3610_vm9, %v3541_v7, %v4112_v26  ;;  %v2109_v7 = vadd.f32 %v2108_v54, %v2107_v8  ;;  %v2732_v26 = vadd.f32 %v2731_v37, %v2730_v34  ;;  %v12183_v8 = vsel %vm3598_vm3, %v16695_v63, %v2508_v11  ;;  %v16696_v54 = vld [vmem:[#allocation30_spill] sm:$0xff] }
 0x248   : > { %4135 = vrot.lane.b32.xlu0 %v4113_v6, %s11094_s28  ;;  %v1940_v6 = vrot.slane %v1939_v25, 4  ;;  %v2793_v19 = vadd.f32 %v2792_v47, %v2791_v40  ;;  %v12189_v37 = vpop.permute.xlu1 %1699  ;;  %v3443_v21 = vsel %vm1165_vm2, %v3073_v5, 0.0  ;;  %v2749_v58 = vadd.f32 %v2748_v4, %v2747_v53 }
 0x249   : > { %v2110_v34 = vrot.slane %v2109_v7, 2  ;;  %v2902_v63 = vmul.f32 0.125, %v2732_v26  ;;  %v3220_v40 = vrot.slane %v3219_v60, 4  ;;  %v1876_v45 = vsel %vm1165_vm2, %v1784_v57, -inf  ;;  %v16697_v26 = vld [vmem:[#allocation22_spill] sm:$0xff] }
 0x24a   : > { %v1941_v1 = vmax.f32 %v1939_v25, %v1940_v6  ;;  %v2101_v18 = vrot.slane %v2100_v38, 4  ;;  %v2424_v47 = vmul.f32 %v2328_v51, %v16692_v9  ;;  %v2570_v32 = vrot.slane %v2569_v10, 1 }
 0x24b   : > { %1080 = vperm.xlu1 %10722, %v16690_v28   ;;  %v1451_v28 = vrot.slane %v1450_v22, 1  ;;  %v2794_v43 = vrot.slane %v2793_v19, 1  ;;  %v2111_v25 = vadd.f32 %v2110_v34, %v2109_v7  ;;  %v3444_v6 = vrot.slane %v3443_v21, 4 }
 0x24c   : > { %v1942_v33 = vrot.slane %v1941_v1, 2  ;;  %v2167_v29 = vadd.f32 %v2166_v59, %v2165_v55  ;;  %v2525_v5 = vmax.f32 %v2523_v0, %v2524_v2  ;;  %v1877_v62 = vrot.slane %v1876_v45, 4  ;;  %v12200_v57 = vpop.permute.xlu1 %2335 }
 0x24d   : > { %v1452_v11 = vadd.f32 %v1451_v28, %v1450_v22  ;;  %v1792_v22 = vmul.f32 %v1720_v41, %v16697_v26  ;;  %v16698_v28 = vld [vmem:[#allocation67_spill] sm:$0xff]  ;;  %v2750_v51 = vrot.slane %v2749_v58, 2  ;;  %v3221_v9 = vmax.f32 %v3219_v60, %v3220_v40  ;;  %v1740_v60 = vpop.permute.xlu0 %1739 }
 0x24e   : > { %v12198_v53 = vsel %vm3598_vm3, %v16698_v28, %v2902_v63  ;;  %v2102_v7 = vadd.f32 %v2101_v18, %v2100_v38  ;;  %v2740_v34 = vsel %vm1165_vm2, %v2424_v47, 0.0  ;;  %v12204_v55 = vmax.f32 %v2569_v10, %v2570_v32 }
 0x24f   : > { %1085 = vperm.xlu1 %10722, %v16694_v15   ;;  %v1886_v15 = vrot.slane %v1885_v39, 2  ;;  %v1622_v4 = vmul.f32 0.125, %v1452_v11  ;;  %v2795_v0 = vadd.f32 %v2794_v43, %v2793_v19  ;;  %v2112_v41 = vrot.slane %v2111_v25, 1  ;;  %v16699_v19 = vld [vmem:[#allocation70_spill] sm:$0xff] }
 0x250   : > { %v3445_v59 = vadd.f32 %v3444_v6, %v3443_v21  ;;  %v1943_v2 = vmax.f32 %v1941_v1, %v1942_v33  ;;  %v2168_v63 = vrot.slane %v2167_v29, 1  ;;  %v2526_v28 = vrot.slane %v2525_v5, 2 }
 0x251   : > { %v1878_v11 = vmax.f32 %v1876_v45, %v1877_v62  ;;  %v2741_v42 = vrot.slane %v2740_v34, 4  ;;  %v2751_v32 = vadd.f32 %v2750_v51, %v2749_v58  ;;  %v3222_v10 = vrot.slane %v3221_v9, 2 }
 0x252   : > { %v2103_v43 = vrot.slane %v2102_v7, 2  ;;  %v12212_v33 = vsel %vm3598_vm3, %v16699_v19, %v1622_v4  ;;  %v12214_v1 = vmul.f32 0.125, %v2795_v0  ;;  %v3446_v21 = vrot.slane %v3445_v59, 2  ;;  %v16701_v19 = vld [vmem:[#allocation23_spill] sm:$0xff] }
 0x253   : > { %1090 = vperm.xlu1 %10722, %v16696_v54   ;;  %v1887_v54 = vmax.f32 %v1885_v39, %v1886_v15  ;;  %v1932_v39 = vsel %vm1165_vm2, %v1792_v22, -inf  ;;  %v2156_v15 = vsel %vm1165_vm2, %v1792_v22, 0.0  ;;  %16700 = vst [vmem:[#allocation58_spill] sm:$0xff] %v12212_v33  ;;  %v2113_v40 = vadd.f32 %v2112_v41, %v2111_v25  ;;  %v3020_v25 = vpop.permute.xlu0 %3019 }
 0x254   : > { %v1933_v62 = vrot.slane %v1932_v39, 4  ;;  %v1944_v45 = vrot.slane %v1943_v2, 1  ;;  %v2157_v18 = vrot.slane %v2156_v15, 4  ;;  %v2169_v6 = vadd.f32 %v2168_v63, %v2167_v29 }
 0x255   : > { %v1888_v38 = vrot.slane %v1887_v54, 1  ;;  %v2527_v22 = vmax.f32 %v2525_v5, %v2526_v28  ;;  %v1879_v56 = vrot.slane %v1878_v11, 2  ;;  %v2752_v58 = vrot.slane %v2751_v32, 1 }
 0x256   : > { %v3223_v51 = vmax.f32 %v3221_v9, %v3222_v10  ;;  %v2104_v48 = vadd.f32 %v2103_v43, %v2102_v7  ;;  %v3447_v52 = vadd.f32 %v3446_v21, %v3445_v59  ;;  %v1934_v4 = vmax.f32 %v1932_v39, %v1933_v62 }
 0x257   : > { %1130 = vperm.xlu1 %10722, %v16637_v31   ;;  %v2516_v31 = vsel %vm1165_vm2, %v2424_v47, -inf  ;;  %v12216_v23 = vmax.f32 %v1887_v54, %v1888_v38  ;;  %v1797_v0 = vmul.f32 %v1740_v60, %v16701_v19  ;;  %v1787_v33 = vmul.f32 %v12189_v37, %v16631_v13 }
 0x258   : > { %v2517_v47 = vrot.slane %v2516_v31, 4  ;;  %v12221_v41 = vmul.f32 0.125, %v2113_v40  ;;  %v12223_v36 = vmax.f32 %v1943_v2, %v1944_v45  ;;  %v2158_v29 = vadd.f32 %v2157_v18, %v2156_v15 }
 0x259   : > { %v12227_v54 = vmul.f32 0.125, %v2169_v6  ;;  %v2528_v9 = vrot.slane %v2527_v22, 1  ;;  %v1880_v7 = vmax.f32 %v1878_v11, %v1879_v56  ;;  %v2753_v59 = vadd.f32 %v2752_v58, %v2751_v32 }
 0x25a   : > { %16702 = vst [vmem:[#allocation54_spill] sm:$0xff] %v12221_v41  ;;  %16703 = vst [vmem:[#allocation51_spill] sm:$0xff] %v12223_v36  ;;  %v2518_v5 = vmax.f32 %v2516_v31, %v2517_v47  ;;  %v3224_v63 = vrot.slane %v3223_v51, 1  ;;  %v2105_v28 = vrot.slane %v2104_v48, 1  ;;  %v3077_v39 = vmul.f32 %v3020_v25, %v16701_v19 }
 0x25b   : > { %10724 = vset.pattern.permute.xlu1 %v16584_v50  ;;  %v2742_v50 = vadd.f32 %v2741_v42, %v2740_v34  ;;  %v12225_v42 = vpop.permute.xlu1 %2347  ;;  %16704 = vst [vmem:[#allocation33_spill] sm:$0xff] %v12227_v54  ;;  %v3448_v37 = vrot.slane %v3447_v52, 1  ;;  %v1935_v60 = vrot.slane %v1934_v4, 2  ;;  %v1967_v38 = vsel %vm1165_vm2, %v1797_v0, -inf }
 0x25c   : > { %v2121_v2 = vsel %vm1165_vm2, %v1787_v33, 0.0  ;;  %v2159_v15 = vrot.slane %v2158_v29, 2  ;;  %v2519_v31 = vrot.slane %v2518_v5, 2  ;;  %v2191_v10 = vsel %vm1165_vm2, %v1797_v0, 0.0 }
 0x25d   : > { %v2743_v34 = vrot.slane %v2742_v50, 2  ;;  %v1897_v43 = vsel %vm1165_vm2, %v1787_v33, -inf  ;;  %v12234_v21 = vmax.f32 %v2527_v22, %v2528_v9  ;;  %v1881_v56 = vrot.slane %v1880_v7, 1 }
 0x25e   : > { %v2426_v32 = vmul.f32 %v12200_v57, %v16640_v16  ;;  %v2106_v62 = vadd.f32 %v2105_v28, %v2104_v48  ;;  %v1968_v40 = vrot.slane %v1967_v38, 4  ;;  %v2122_v45 = vrot.slane %v2121_v2, 4  ;;  %v3016_v28 = vpop.permute.xlu0 %3015 }
 0x25f   : > { %16705 = vst [vmem:[#allocation60_spill] sm:$0xff] %v12234_v21  ;;  %v2744_v11 = vadd.f32 %v2743_v34, %v2742_v50  ;;  %v3247_v18 = vsel %vm1165_vm2, %v3077_v39, -inf  ;;  %v1704_v47 = vpop.permute.xlu1 %1703  ;;  %v12239_v6 = vmul.f32 0.125, %v2753_v59  ;;  %v1936_v58 = vmax.f32 %v1934_v4, %v1935_v60 }
 0x260   : > { %v2192_v25 = vrot.slane %v2191_v10, 4  ;;  %v1898_v0 = vrot.slane %v1897_v43, 4  ;;  %v12241_v36 = vmax.f32 %v3223_v51, %v3224_v63  ;;  %v3449_v33 = vadd.f32 %v3448_v37, %v3447_v52 }
 0x261   : > { %16706 = vst [vmem:[#allocation73_spill] sm:$0xff] %v12239_v6  ;;  %v2160_v22 = vadd.f32 %v2159_v15, %v2158_v29  ;;  %v2520_v9 = vmax.f32 %v2518_v5, %v2519_v31  ;;  %v2745_v50 = vrot.slane %v2744_v11, 1  ;;  %v3248_v34 = vrot.slane %v3247_v18, 4  ;;  %v16709_v5 = vld [vmem:[#allocation24_spill] sm:$0xff] }
 0x262   : > { %16707 = vst [vmem:[#allocation57_spill] sm:$0xff] %v12241_v36  ;;  %v3471_v57 = vsel %vm1165_vm2, %v3077_v39, 0.0  ;;  %v2754_v48 = vsel %vm1165_vm2, %v2426_v32, 0.0  ;;  %v1882_v3 = vmax.f32 %v1880_v7, %v1881_v56  ;;  %v2264_v27 = vmul.f32 0.125, %v2106_v62 }
 0x263   : > { %v1969_v54 = vmax.f32 %v1967_v38, %v1968_v40  ;;  %v2123_v59 = vadd.f32 %v2122_v45, %v2121_v2  ;;  %v1937_v6 = vrot.slane %v1936_v58, 1  ;;  %v2193_v4 = vadd.f32 %v2192_v25, %v2191_v10  ;;  %v12249_v15 = vpop.permute.xlu1 %2343  ;;  %v2388_v45 = vpop.permute.xlu0 %2387 }
 0x264   : > { %v1899_v60 = vmax.f32 %v1897_v43, %v1898_v0  ;;  %v2530_v51 = vsel %vm1165_vm2, %v2426_v32, -inf  ;;  %v12246_v63 = vmul.f32 0.125, %v3449_v33  ;;  %v3472_v52 = vrot.slane %v3471_v57, 4 }
 0x265   : > { %v2755_v29 = vrot.slane %v2754_v48, 4  ;;  %v3076_v37 = vmul.f32 %v3016_v28, %v16709_v5  ;;  %v2161_v39 = vrot.slane %v2160_v22, 1  ;;  %v2521_v31 = vrot.slane %v2520_v9, 1 }
 0x266   : > { %16708 = vst [vmem:[#allocation37_spill] sm:$0xff] %v12246_v63  ;;  %v2746_v36 = vadd.f32 %v2745_v50, %v2744_v11  ;;  %v3249_v7 = vmax.f32 %v3247_v18, %v3248_v34  ;;  %v12253_v38 = vsel %vm3600_vm4, %v1882_v3, %v12147_v12  ;;  %v1970_v2 = vrot.slane %v1969_v54, 2 }
 0x267   : > { %v2124_v10 = vrot.slane %v2123_v59, 2  ;;  %v2531_v43 = vrot.slane %v2530_v51, 4  ;;  %v12257_v56 = vsel %vm3600_vm4, %v2264_v27, %v12177_v44  ;;  %v12259_v32 = vmax.f32 %v1936_v58, %v1937_v6  ;;  %v16713_v44 = vld [vmem:[#allocation25_spill] sm:$0xff]  ;;  %v12266_v58 = vpop.permute.xlu1 %2983 }
 0x268   : > { %16710 = vst [vmem:[#allocation38_spill] sm:$0xff] %v12257_v56  ;;  %v2194_v62 = vrot.slane %v2193_v4, 2  ;;  %v1900_v40 = vrot.slane %v1899_v60, 2  ;;  %v3473_v25 = vadd.f32 %v3472_v52, %v3471_v57  ;;  %v2756_v0 = vadd.f32 %v2755_v29, %v2754_v48 }
 0x269   : > { %16711 = vst [vmem:[#allocation61_spill] sm:$0xff] %v12259_v32  ;;  %v3240_v11 = vsel %vm1165_vm2, %v3076_v37, -inf  ;;  %v3464_v18 = vsel %vm1165_vm2, %v3076_v37, 0.0  ;;  %v2162_v12 = vadd.f32 %v2161_v39, %v2160_v22  ;;  %v2522_v3 = vmax.f32 %v2520_v9, %v2521_v31 }
 0x26a   : > { %v2904_v33 = vmul.f32 0.125, %v2746_v36  ;;  %v3250_v50 = vrot.slane %v3249_v7, 2  ;;  %v12263_v34 = vmax.f32 %v1969_v54, %v1970_v2  ;;  %v2125_v28 = vadd.f32 %v2124_v10, %v2123_v59  ;;  %v16715_v36 = vld [vmem:[#allocation26_spill] sm:$0xff]  ;;  %v3028_v2 = vpop.permute.xlu0 %3027 }
 0x26b   : > { %v2532_v27 = vmax.f32 %v2530_v51, %v2531_v43  ;;  %v2439_v6 = vmul.f32 %v2388_v45, %v16713_v44  ;;  %v12268_v32 = vadd.f32 %v2194_v62, %v2193_v4  ;;  %v3241_v57 = vrot.slane %v3240_v11, 4  ;;  %v12292_v45 = vpop.permute.xlu1 %1715 }
 0x26c   : > { %16712 = vst [vmem:[#allocation59_spill] sm:$0xff] %v12263_v34  ;;  %v3465_v48 = vrot.slane %v3464_v18, 4  ;;  %v2429_v52 = vmul.f32 %v12225_v42, %v16651_v20  ;;  %v1901_v29 = vmax.f32 %v1899_v60, %v1900_v40  ;;  %v3474_v22 = vrot.slane %v3473_v25, 2 }
 0x26d   : > { %16714 = vst [vmem:[#allocation50_spill] sm:$0xff] %v12268_v32  ;;  %v2757_v9 = vrot.slane %v2756_v0, 2  ;;  %v1788_v37 = vmul.f32 %v1704_v47, %v16715_v36  ;;  %v12273_v54 = vmul.f32 0.125, %v2162_v12  ;;  %v12277_v59 = vsel %vm3600_vm4, %v2522_v3, %v12183_v8 }
 0x26e   : > { %16717 = vst [vmem:[#allocation45_spill] sm:$0xff] %v12277_v59  ;;  %v12281_v4 = vsel %vm3600_vm4, %v2904_v33, %v12198_v53  ;;  %v12283_v51 = vmax.f32 %v3249_v7, %v3250_v50  ;;  %v2126_v42 = vrot.slane %v2125_v28, 1  ;;  %v2533_v60 = vrot.slane %v2532_v27, 2 }
 0x26f   : > { %16716 = vst [vmem:[#allocation74_spill] sm:$0xff] %v12273_v54  ;;  %16718 = vst [vmem:[#allocation69_spill] sm:$0xff] %v12281_v4  ;;  %v2845_v31 = vsel %vm1165_vm2, %v2439_v6, 0.0  ;;  %v3242_v10 = vmax.f32 %v3240_v11, %v3241_v57  ;;  %v3466_v43 = vadd.f32 %v3465_v48, %v3464_v18  ;;  %v2551_v8 = vsel %vm1165_vm2, %v2429_v52, -inf  ;;  %v12306_v63 = vpop.permute.xlu1 %2995 }
 0x270   : > { %16719 = vst [vmem:[#allocation44_spill] sm:$0xff] %v12283_v51  ;;  %v1902_v62 = vrot.slane %v1901_v29, 1  ;;  %v12289_v40 = vadd.f32 %v3474_v22, %v3473_v25  ;;  %v2758_v53 = vadd.f32 %v2757_v9, %v2756_v0  ;;  %v2128_v7 = vsel %vm1165_vm2, %v1788_v37, 0.0 }
 0x271   : > { %v2775_v3 = vsel %vm1165_vm2, %v2429_v52, 0.0  ;;  %v2846_v33 = vrot.slane %v2845_v31, 4  ;;  %v3079_v50 = vmul.f32 %v3028_v2, %v16713_v44  ;;  %v2127_v39 = vadd.f32 %v2126_v42, %v2125_v28 }
 0x272   : > { %16720 = vst [vmem:[#allocation63_spill] sm:$0xff] %v12289_v40  ;;  %v2534_v11 = vmax.f32 %v2532_v27, %v2533_v60  ;;  %v2552_v18 = vrot.slane %v2551_v8, 4  ;;  %v2621_v57 = vsel %vm1165_vm2, %v2439_v6, -inf  ;;  %v3243_v48 = vrot.slane %v3242_v10, 2  ;;  %v16723_v6 = vld [vmem:[#allocation27_spill] sm:$0xff] }
 0x273   : > { %v3467_v25 = vrot.slane %v3466_v43, 2  ;;  %v1904_v0 = vsel %vm1165_vm2, %v1788_v37, -inf  ;;  %v2129_v22 = vrot.slane %v2128_v7, 4  ;;  %v12299_v9 = vmax.f32 %v1901_v29, %v1902_v62  ;;  %v2396_v37 = vpop.permute.xlu0 %2395 }
 0x274   : > { %v2759_v47 = vrot.slane %v2758_v53, 1  ;;  %v2776_v34 = vrot.slane %v2775_v3, 4  ;;  %v2428_v52 = vmul.f32 %v12249_v15, %v16715_v36  ;;  %v2622_v12 = vrot.slane %v2621_v57, 4 }
 0x275   : > { %16721 = vst [vmem:[#allocation32_spill] sm:$0xff] %v12299_v9  ;;  %v2847_v51 = vadd.f32 %v2846_v33, %v2845_v31  ;;  %v3261_v28 = vsel %vm1165_vm2, %v3079_v50, -inf  ;;  %v3485_v27 = vsel %vm1165_vm2, %v3079_v50, 0.0  ;;  %v2535_v42 = vrot.slane %v2534_v11, 1 }
 0x276   : > { %v2553_v60 = vmax.f32 %v2551_v8, %v2552_v18  ;;  %v1905_v2 = vrot.slane %v1904_v0, 4  ;;  %v12308_v29 = vmul.f32 0.125, %v2127_v39  ;;  %v3244_v62 = vmax.f32 %v3242_v10, %v3243_v48 }
 0x277   : > { %v3468_v4 = vadd.f32 %v3467_v25, %v3466_v43  ;;  %v2130_v54 = vadd.f32 %v2129_v22, %v2128_v7  ;;  %v2777_v15 = vadd.f32 %v2776_v34, %v2775_v3  ;;  %v3262_v32 = vrot.slane %v3261_v28, 4 }
 0x278   : > { %16722 = vst [vmem:[#allocation64_spill] sm:$0xff] %v12308_v29  ;;  %v3486_v31 = vrot.slane %v3485_v27, 4  ;;  %v2768_v33 = vsel %vm1165_vm2, %v2428_v52, 0.0  ;;  %v2760_v17 = vadd.f32 %v2759_v47, %v2758_v53  ;;  %v2623_v50 = vmax.f32 %v2621_v57, %v2622_v12  ;;  %v12317_v53 = vpop.permute.xlu1 %1711 }
 0x279   : > { %v2848_v41 = vrot.slane %v2847_v51, 2  ;;  %v2441_v40 = vmul.f32 %v2396_v37, %v16723_v6  ;;  %v12312_v8 = vmax.f32 %v2534_v11, %v2535_v42  ;;  %v2554_v18 = vrot.slane %v2553_v60, 2 }
 0x27a   : > { %v1906_v56 = vmax.f32 %v1904_v0, %v1905_v2  ;;  %v3068_v39 = vmul.f32 %v12266_v58, %v16715_v36  ;;  %v3245_v10 = vrot.slane %v3244_v62, 1  ;;  %v2131_v43 = vrot.slane %v2130_v54, 2 }
 0x27b   : > { %16724 = vst [vmem:[#allocation30_spill] sm:$0xff] %v12312_v8  ;;  %v2544_v34 = vsel %vm1165_vm2, %v2428_v52, -inf  ;;  %v2769_v7 = vrot.slane %v2768_v33, 4  ;;  %v3469_v3 = vrot.slane %v3468_v4, 1  ;;  %v2778_v48 = vrot.slane %v2777_v15, 2 }
 0x27c   : > { %v3263_v25 = vmax.f32 %v3261_v28, %v3262_v32  ;;  %v3487_v47 = vadd.f32 %v3486_v31, %v3485_v27  ;;  %v12319_v12 = vmul.f32 0.125, %v2760_v17  ;;  %v2624_v11 = vrot.slane %v2623_v50, 2 }
 0x27d   : > { %v2849_v57 = vadd.f32 %v2848_v41, %v2847_v51  ;;  %v2635_v0 = vsel %vm1165_vm2, %v2441_v40, -inf  ;;  %v1907_v22 = vrot.slane %v1906_v56, 2  ;;  %v2545_v42 = vrot.slane %v2544_v34, 4  ;;  %v2392_v41 = vpop.permute.xlu0 %2391 }
 0x27e   : > { %16725 = vst [vmem:[#allocation67_spill] sm:$0xff] %v12319_v12  ;;  %v2859_v58 = vsel %vm1165_vm2, %v2441_v40, 0.0  ;;  %v3184_v2 = vsel %vm1165_vm2, %v3068_v39, -inf  ;;  %v12324_v52 = vmax.f32 %v3244_v62, %v3245_v10  ;;  %v12326_v37 = vmax.f32 %v2553_v60, %v2554_v18  ;;  %v12331_v10 = vpop.permute.xlu1 %2351  ;;  %v16729_v18 = vld [vmem:[#allocation29_spill] sm:$0xff] }
 0x27f   : > { %v2132_v32 = vadd.f32 %v2131_v43, %v2130_v54  ;;  %v2770_v28 = vadd.f32 %v2769_v7, %v2768_v33  ;;  %v3264_v27 = vrot.slane %v3263_v25, 2  ;;  %v3488_v31 = vrot.slane %v3487_v47, 2 }
 0x280   : > { %16726 = vst [vmem:[#allocation70_spill] sm:$0xff] %v12324_v52  ;;  %16727 = vst [vmem:[#allocation24_spill] sm:$0xff] %v12326_v37  ;;  %v2636_v17 = vrot.slane %v2635_v0, 4  ;;  %v3408_v36 = vsel %vm1165_vm2, %v3068_v39, 0.0  ;;  %v3470_v51 = vadd.f32 %v3469_v3, %v3468_v4  ;;  %v12329_v6 = vadd.f32 %v2778_v48, %v2777_v15 }
 0x281   : > { %v2860_v12 = vrot.slane %v2859_v58, 4  ;;  %v3185_v29 = vrot.slane %v3184_v2, 4  ;;  %v2625_v40 = vmax.f32 %v2623_v50, %v2624_v11  ;;  %v2850_v44 = vrot.slane %v2849_v57, 1 }
 0x282   : > { %16728 = vst [vmem:[#allocation85_spill] sm:$0xff] %v12329_v6  ;;  %v1908_v46 = vmax.f32 %v1906_v56, %v1907_v22  ;;  %v2546_v62 = vmax.f32 %v2544_v34, %v2545_v42  ;;  %v2133_v60 = vrot.slane %v2132_v32, 1  ;;  %v2771_v54 = vrot.slane %v2770_v28, 2  ;;  %v1764_v42 = vpop.permute.xlu0 %1763 }
 0x283   : > { %v3409_v33 = vrot.slane %v3408_v36, 4  ;;  %v2440_v43 = vmul.f32 %v2392_v41, %v16729_v18  ;;  %v3265_v39 = vmax.f32 %v3263_v25, %v3264_v27  ;;  %v3489_v52 = vadd.f32 %v3488_v31, %v3487_v47  ;;  %v12340_v27 = vpop.permute.xlu1 %2991 }
 0x284   : > { %v2637_v4 = vmax.f32 %v2635_v0, %v2636_v17  ;;  %v12335_v15 = vmul.f32 0.125, %v3470_v51  ;;  %v2861_v50 = vadd.f32 %v2860_v12, %v2859_v58  ;;  %v3186_v48 = vmax.f32 %v3184_v2, %v3185_v29  ;;  %v16731_v29 = vld [vmem:[#allocation31_spill] sm:$0xff] }
 0x285   : > { %v2626_v56 = vrot.slane %v2625_v40, 1  ;;  %v2851_v34 = vadd.f32 %v2850_v44, %v2849_v57  ;;  %v1909_v11 = vrot.slane %v1908_v46, 1  ;;  %v2547_v22 = vrot.slane %v2546_v62, 2 }
 0x286   : > { %16730 = vst [vmem:[#allocation86_spill] sm:$0xff] %v12335_v15  ;;  %v2134_v35 = vadd.f32 %v2133_v60, %v2132_v32  ;;  %v2772_v8 = vadd.f32 %v2771_v54, %v2770_v28  ;;  %v3410_v21 = vadd.f32 %v3409_v33, %v3408_v36  ;;  %v2852_v41 = vsel %vm1165_vm2, %v2440_v43, 0.0 }
 0x287   : > { %v3266_v7 = vrot.slane %v3265_v39, 1  ;;  %v3490_v25 = vrot.slane %v3489_v52, 1  ;;  %v2638_v47 = vrot.slane %v2637_v4, 2  ;;  %v2628_v0 = vsel %vm1165_vm2, %v2440_v43, -inf }
 0x288   : > { %v2862_v31 = vrot.slane %v2861_v50, 2  ;;  %v3187_v12 = vrot.slane %v3186_v48, 2  ;;  %v1791_v44 = vmul.f32 %v12292_v45, %v16670_v49  ;;  %v1803_v57 = vmul.f32 %v1764_v42, %v16731_v29 }
 0x289   : > { %v12345_v58 = vmax.f32 %v2625_v40, %v2626_v56  ;;  %v12347_v2 = vmul.f32 0.125, %v2851_v34  ;;  %v2548_v36 = vmax.f32 %v2546_v62, %v2547_v22  ;;  %v2853_v32 = vrot.slane %v2852_v41, 4  ;;  %v2404_v34 = vpop.permute.xlu0 %2403 }
 0x28a   : > { %v12349_v28 = vmax.f32 %v1908_v46, %v1909_v11  ;;  %v2773_v17 = vrot.slane %v2772_v8, 1  ;;  %v3411_v51 = vrot.slane %v3410_v21, 2  ;;  %v2629_v60 = vrot.slane %v2628_v0, 4 }
 0x28b   : > { %16732 = vst [vmem:[#allocation87_spill] sm:$0xff] %v12345_v58  ;;  %16733 = vst [vmem:[#allocation88_spill] sm:$0xff] %v12347_v2  ;;  %v12351_v54 = vmul.f32 0.125, %v2134_v35  ;;  %v12353_v33 = vmax.f32 %v3265_v39, %v3266_v7  ;;  %v3491_v43 = vadd.f32 %v3490_v25, %v3489_v52  ;;  %v2639_v3 = vmax.f32 %v2637_v4, %v2638_v47  ;;  %v12360_v35 = vpop.permute.xlu1 %2363 }
 0x28c   : > { %16734 = vst [vmem:[#allocation89_spill] sm:$0xff] %v12349_v28  ;;  %v2863_v45 = vadd.f32 %v2862_v31, %v2861_v50  ;;  %v3188_v18 = vmax.f32 %v3186_v48, %v3187_v12  ;;  %v2149_v40 = vsel %vm1165_vm2, %v1791_v44, 0.0  ;;  %v2233_v56 = vsel %vm1165_vm2, %v1803_v57, 0.0 }
 0x28d   : > { %16735 = vst [vmem:[#allocation90_spill] sm:$0xff] %v12351_v54  ;;  %16736 = vst [vmem:[#allocation91_spill] sm:$0xff] %v12353_v33  ;;  %v2549_v62 = vrot.slane %v2548_v36, 1  ;;  %v2854_v22 = vadd.f32 %v2853_v32, %v2852_v41  ;;  %v1925_v46 = vsel %vm1165_vm2, %v1791_v44, -inf  ;;  %v3071_v11 = vmul.f32 %v12306_v63, %v16670_v49  ;;  %v16738_v33 = vld [vmem:[#allocation35_spill] sm:$0xff] }
 0x28e   : > { %v2774_v7 = vadd.f32 %v2773_v17, %v2772_v8  ;;  %v3412_v39 = vadd.f32 %v3411_v51, %v3410_v21  ;;  %v2630_v52 = vmax.f32 %v2628_v0, %v2629_v60  ;;  %v2009_v4 = vsel %vm1165_vm2, %v1803_v57, -inf }
 0x28f   : > { %v2640_v50 = vrot.slane %v2639_v3, 1  ;;  %v2150_v48 = vrot.slane %v2149_v40, 4  ;;  %v2234_v42 = vrot.slane %v2233_v56, 4  ;;  %v2443_v25 = vmul.f32 %v2404_v34, %v16731_v29 }
 0x290   : > { %v12364_v47 = vmul.f32 0.125, %v3491_v43  ;;  %v2864_v41 = vrot.slane %v2863_v45, 1  ;;  %v3189_v31 = vrot.slane %v3188_v18, 1  ;;  %v1926_v12 = vrot.slane %v1925_v46, 4 }
 0x291   : > { %v2855_v44 = vrot.slane %v2854_v22, 2  ;;  %v2010_v32 = vrot.slane %v2009_v4, 4  ;;  %v3429_v63 = vsel %vm1165_vm2, %v3071_v11, 0.0  ;;  %v1790_v21 = vmul.f32 %v12317_v53, %v16738_v33  ;;  %v1760_v53 = vpop.permute.xlu0 %1759 }
 0x292   : > { %16737 = vst [vmem:[#allocation92_spill] sm:$0xff] %v12364_v47  ;;  %v12369_v8 = vmax.f32 %v2548_v36, %v2549_v62  ;;  %v12371_v0 = vmul.f32 0.125, %v2774_v7  ;;  %v3413_v57 = vrot.slane %v3412_v39, 1  ;;  %v2631_v17 = vrot.slane %v2630_v52, 2  ;;  %v12376_v47 = vpop.permute.xlu1 %2359 }
 0x293   : > { %v12373_v51 = vmax.f32 %v2639_v3, %v2640_v50  ;;  %v2151_v60 = vadd.f32 %v2150_v48, %v2149_v40  ;;  %v2235_v43 = vadd.f32 %v2234_v42, %v2233_v56  ;;  %v2873_v34 = vsel %vm1165_vm2, %v2443_v25, 0.0 }
 0x294   : > { %16739 = vst [vmem:[#allocation93_spill] sm:$0xff] %v12369_v8  ;;  %16740 = vst [vmem:[#allocation94_spill] sm:$0xff] %v12371_v0  ;;  %v2865_v2 = vadd.f32 %v2864_v41, %v2863_v45  ;;  %v12378_v58 = vmax.f32 %v3188_v18, %v3189_v31  ;;  %v1927_v29 = vmax.f32 %v1925_v46, %v1926_v12  ;;  %v3430_v15 = vrot.slane %v3429_v63, 4  ;;  %v16743_v18 = vld [vmem:[#allocation34_spill] sm:$0xff] }
 0x295   : > { %16741 = vst [vmem:[#allocation95_spill] sm:$0xff] %v12373_v51  ;;  %v2856_v36 = vadd.f32 %v2855_v44, %v2854_v22  ;;  %v2011_v62 = vmax.f32 %v2009_v4, %v2010_v32  ;;  %v3205_v7 = vsel %vm1165_vm2, %v3071_v11, -inf  ;;  %v2142_v0 = vsel %vm1165_vm2, %v1790_v21, 0.0 }
 0x296   : > { %16742 = vst [vmem:[#allocation96_spill] sm:$0xff] %v12378_v58  ;;  %v3414_v3 = vadd.f32 %v3413_v57, %v3412_v39  ;;  %v2632_v50 = vmax.f32 %v2630_v52, %v2631_v17  ;;  %v2649_v40 = vsel %vm1165_vm2, %v2443_v25, -inf  ;;  %v2874_v56 = vrot.slane %v2873_v34, 4  ;;  %v12387_v39 = vpop.permute.xlu1 %2999 }
 0x297   : > { %v2152_v48 = vrot.slane %v2151_v60, 2  ;;  %v2236_v42 = vrot.slane %v2235_v43, 2  ;;  %v1918_v45 = vsel %vm1165_vm2, %v1790_v21, -inf  ;;  %v1802_v41 = vmul.f32 %v1760_v53, %v16743_v18 }
 0x298   : > { %v12385_v46 = vmul.f32 0.125, %v2865_v2  ;;  %v3206_v31 = vrot.slane %v3205_v7, 4  ;;  %v3431_v22 = vadd.f32 %v3430_v15, %v3429_v63  ;;  %v2143_v4 = vrot.slane %v2142_v0, 4 }
 0x299   : > { %v2857_v12 = vrot.slane %v2856_v36, 1  ;;  %v1928_v11 = vrot.slane %v1927_v29, 2  ;;  %v2012_v44 = vrot.slane %v2011_v62, 2  ;;  %v2650_v32 = vrot.slane %v2649_v40, 4 }
 0x29a   : > { %16744 = vst [vmem:[#allocation97_spill] sm:$0xff] %v12385_v46  ;;  %v2633_v52 = vrot.slane %v2632_v50, 1  ;;  %v2875_v25 = vadd.f32 %v2874_v56, %v2873_v34  ;;  %v1919_v57 = vrot.slane %v1918_v45, 4  ;;  %v2430_v17 = vmul.f32 %v12331_v10, %v16738_v33 }
 0x29b   : > { %v12391_v21 = vmul.f32 0.125, %v3414_v3  ;;  %v2153_v53 = vadd.f32 %v2152_v48, %v2151_v60  ;;  %v2237_v2 = vadd.f32 %v2236_v42, %v2235_v43  ;;  %v2002_v51 = vsel %vm1165_vm2, %v1802_v41, -inf  ;;  %v12398_v42 = vpop.permute.xlu1 %1731 }
 0x29c   : > { %v3207_v15 = vmax.f32 %v3205_v7, %v3206_v31  ;;  %v3432_v63 = vrot.slane %v3431_v22, 2  ;;  %v2144_v58 = vadd.f32 %v2143_v4, %v2142_v0  ;;  %v2226_v46 = vsel %vm1165_vm2, %v1802_v41, 0.0  ;;  %v1772_v41 = vpop.permute.xlu0 %1771 }
 0x29d   : > { %16745 = vst [vmem:[#allocation98_spill] sm:$0xff] %v12391_v21  ;;  %v2858_v18 = vadd.f32 %v2857_v12, %v2856_v36  ;;  %v1929_v6 = vmax.f32 %v1927_v29, %v1928_v11  ;;  %v2013_v54 = vmax.f32 %v2011_v62, %v2012_v44  ;;  %v2651_v8 = vmax.f32 %v2649_v40, %v2650_v32 }
 0x29e   : > { %v2876_v34 = vrot.slane %v2875_v25, 2  ;;  %v1920_v56 = vmax.f32 %v1918_v45, %v1919_v57  ;;  %v2003_v37 = vrot.slane %v2002_v51, 4  ;;  %v2558_v10 = vsel %vm1165_vm2, %v2430_v17, -inf }
 0x29f   : > { %v12396_v3 = vmax.f32 %v2632_v50, %v2633_v52  ;;  %v2154_v60 = vrot.slane %v2153_v53, 1  ;;  %v2238_v43 = vrot.slane %v2237_v2, 1  ;;  %v2227_v48 = vrot.slane %v2226_v46, 4  ;;  %v12406_v9 = vpop.permute.xlu1 %2371 }
 0x2a0   : > { %v3208_v7 = vrot.slane %v3207_v15, 2  ;;  %v3433_v0 = vadd.f32 %v3432_v63, %v3431_v22  ;;  %v2145_v31 = vrot.slane %v2144_v58, 2  ;;  %v2782_v36 = vsel %vm1165_vm2, %v2430_v17, 0.0  ;;  %v16748_v63 = vld [vmem:[#allocation36_spill] sm:$0xff] }
 0x2a1   : > { %16746 = vst [vmem:[#allocation99_spill] sm:$0xff] %v12396_v3  ;;  %v12401_v29 = vmul.f32 0.125, %v2858_v18  ;;  %v1930_v62 = vrot.slane %v1929_v6, 1  ;;  %v2652_v40 = vrot.slane %v2651_v8, 2  ;;  %v2559_v45 = vrot.slane %v2558_v10, 4 }
 0x2a2   : > { %v2014_v4 = vrot.slane %v2013_v54, 1  ;;  %v2877_v12 = vadd.f32 %v2876_v34, %v2875_v25  ;;  %v1921_v50 = vrot.slane %v1920_v56, 2  ;;  %v2004_v11 = vmax.f32 %v2002_v51, %v2003_v37 }
 0x2a3   : > { %16747 = vst [vmem:[#allocation100_spill] sm:$0xff] %v12401_v29  ;;  %v2155_v44 = vadd.f32 %v2154_v60, %v2153_v53  ;;  %v2239_v32 = vadd.f32 %v2238_v43, %v2237_v2  ;;  %v2228_v52 = vadd.f32 %v2227_v48, %v2226_v46  ;;  %v2783_v57 = vrot.slane %v2782_v36, 4 }
 0x2a4   : > { %v3209_v3 = vmax.f32 %v3207_v15, %v3208_v7  ;;  %v3434_v21 = vrot.slane %v3433_v0, 1  ;;  %v2146_v22 = vadd.f32 %v2145_v31, %v2144_v58  ;;  %v1805_v59 = vmul.f32 %v1772_v41, %v16748_v63 }
 0x2a5   : > { %v1931_v17 = vmax.f32 %v1929_v6, %v1930_v62  ;;  %v2653_v18 = vmax.f32 %v2651_v8, %v2652_v40  ;;  %v2560_v29 = vmax.f32 %v2558_v10, %v2559_v45  ;;  %v3070_v28 = vmul.f32 %v12340_v27, %v16738_v33  ;;  %v3052_v10 = vpop.permute.xlu0 %3051 }
 0x2a6   : > { %v12408_v25 = vmax.f32 %v2013_v54, %v2014_v4  ;;  %v2878_v37 = vrot.slane %v2877_v12, 1  ;;  %v1922_v51 = vmax.f32 %v1920_v56, %v1921_v50  ;;  %v2005_v53 = vrot.slane %v2004_v11, 2 }
 0x2a7   : > { %v2271_v46 = vmul.f32 0.125, %v2155_v44  ;;  %v12410_v2 = vmul.f32 0.125, %v2239_v32  ;;  %v2229_v15 = vrot.slane %v2228_v52, 2  ;;  %v2784_v58 = vadd.f32 %v2783_v57, %v2782_v36 }
 0x2a8   : > { %16749 = vst [vmem:[#allocation101_spill] sm:$0xff] %v12408_v25  ;;  %v3210_v34 = vrot.slane %v3209_v3, 1  ;;  %v3435_v60 = vadd.f32 %v3434_v21, %v3433_v0  ;;  %v2147_v6 = vrot.slane %v2146_v22, 1  ;;  %v2023_v8 = vsel %vm1165_vm2, %v1805_v59, -inf  ;;  %v12417_v0 = vpop.permute.xlu1 %3011 }
 0x2a9   : > { %16750 = vst [vmem:[#allocation102_spill] sm:$0xff] %v12410_v2  ;;  %v2654_v43 = vrot.slane %v2653_v18, 1  ;;  %v2561_v27 = vrot.slane %v2560_v29, 2  ;;  %v2247_v48 = vsel %vm1165_vm2, %v1805_v59, 0.0  ;;  %v3422_v54 = vsel %vm1165_vm2, %v3070_v28, 0.0 }
 0x2aa   : > { %v2879_v7 = vadd.f32 %v2878_v37, %v2877_v12  ;;  %v1923_v56 = vrot.slane %v1922_v51, 1  ;;  %v2006_v31 = vmax.f32 %v2004_v11, %v2005_v53  ;;  %v3198_v62 = vsel %vm1165_vm2, %v3070_v28, -inf  ;;  %v1031_v53 = vpop.permute.xlu0 %1030 }
 0x2ab   : > { %v2230_v40 = vadd.f32 %v2229_v15, %v2228_v52  ;;  %v2785_v45 = vrot.slane %v2784_v58, 2  ;;  %v2024_v36 = vrot.slane %v2023_v8, 4  ;;  %v3085_v21 = vmul.f32 %v3052_v10, %v16748_v63 }
 0x2ac   : > { %v12419_v41 = vmax.f32 %v3209_v3, %v3210_v34  ;;  %v2148_v4 = vadd.f32 %v2147_v6, %v2146_v22  ;;  %v2248_v50 = vrot.slane %v2247_v48, 4  ;;  %v3423_v44 = vrot.slane %v3422_v54, 4 }
 0x2ad   : > { %v12421_v59 = vmul.f32 0.125, %v3435_v60  ;;  %v2562_v32 = vmax.f32 %v2560_v29, %v2561_v27  ;;  %v3199_v12 = vrot.slane %v3198_v62, 4  ;;  %v2433_v11 = vmul.f32 %v12360_v35, %v16679_v24 }
 0x2ae   : > { %v12425_v28 = vmax.f32 %v2653_v18, %v2654_v43  ;;  %v12427_v52 = vmul.f32 0.125, %v2879_v7  ;;  %v1924_v57 = vmax.f32 %v1922_v51, %v1923_v56  ;;  %v2007_v37 = vrot.slane %v2006_v31, 1  ;;  %v12434_v51 = vpop.permute.xlu1 %1727 }
 0x2af   : > { %v2231_v15 = vrot.slane %v2230_v40, 1  ;;  %v2786_v3 = vadd.f32 %v2785_v45, %v2784_v58  ;;  %v2025_v34 = vmax.f32 %v2023_v8, %v2024_v36  ;;  %v3303_v22 = vsel %vm1165_vm2, %v3085_v21, -inf }
 0x2b0   : > { %16751 = vst [vmem:[#allocation103_spill] sm:$0xff] %v12425_v28  ;;  %16752 = vst [vmem:[#allocation104_spill] sm:$0xff] %v12427_v52  ;;  %v2270_v6 = vmul.f32 0.125, %v2148_v4  ;;  %v2249_v60 = vadd.f32 %v2248_v50, %v2247_v48  ;;  %v3424_v10 = vadd.f32 %v3423_v44, %v3422_v54  ;;  %v2432_v29 = vmul.f32 %v12376_v47, %v16697_v26  ;;  %v1036_v50 = vpop.permute.xlu0 %1035 }
 0x2b1   : > { %v2563_v27 = vrot.slane %v2562_v32, 1  ;;  %v3200_v35 = vmax.f32 %v3198_v62, %v3199_v12  ;;  %v3527_v18 = vsel %vm1165_vm2, %v3085_v21, 0.0  ;;  %v2579_v43 = vsel %vm1165_vm2, %v2433_v11, -inf }
 0x2b2   : > { %v12437_v7 = vsel %vm3598_vm3, %v1931_v17, %v1924_v57  ;;  %v12439_v58 = vmax.f32 %v2006_v31, %v2007_v37  ;;  %v3304_v8 = vrot.slane %v3303_v22, 4  ;;  %v1144_v48 = vmul.f32 %v1031_v53, %v16677_v61  ;;  %v12452_v25 = vpop.permute.xlu1 %2367 }
 0x2b3   : > { %v2232_v54 = vadd.f32 %v2231_v15, %v2230_v40  ;;  %v2787_v56 = vrot.slane %v2786_v3, 1  ;;  %v2026_v45 = vrot.slane %v2025_v34, 2  ;;  %v2803_v47 = vsel %vm1165_vm2, %v2433_v11, 0.0 }
 0x2b4   : > { %16753 = vst [vmem:[#allocation105_spill] sm:$0xff] %v12439_v58  ;;  %v3425_v62 = vrot.slane %v3424_v10, 2  ;;  %v3528_v36 = vrot.slane %v3527_v18, 4  ;;  %v2580_v21 = vrot.slane %v2579_v43, 4  ;;  %v2796_v4 = vsel %vm1165_vm2, %v2432_v29, 0.0 }
 0x2b5   : > { %v12445_v44 = vsel %vm3598_vm3, %v2271_v46, %v2270_v6  ;;  %v2564_v17 = vmax.f32 %v2562_v32, %v2563_v27  ;;  %v2250_v31 = vrot.slane %v2249_v60, 2  ;;  %v3201_v12 = vrot.slane %v3200_v35, 2 }
 0x2b6   : > { %v3305_v57 = vmax.f32 %v3303_v22, %v3304_v8  ;;  %v2804_v37 = vrot.slane %v2803_v47, 4  ;;  %v1243_v40 = vsel %vm1165_vm2, %v1144_v48, -inf  ;;  %v1467_v53 = vsel %vm1165_vm2, %v1144_v48, 0.0 }
 0x2b7   : > { %v2788_v15 = vadd.f32 %v2787_v56, %v2786_v3  ;;  %v12449_v11 = vmax.f32 %v2025_v34, %v2026_v45  ;;  %v2572_v61 = vsel %vm1165_vm2, %v2432_v29, -inf  ;;  %v2797_v28 = vrot.slane %v2796_v4, 4  ;;  %v1061_v45 = vpop.permute.xlu0 %1060 }
 0x2b8   : > { %v3426_v58 = vadd.f32 %v3425_v62, %v3424_v10  ;;  %v3529_v46 = vadd.f32 %v3528_v36, %v3527_v18  ;;  %v2581_v6 = vmax.f32 %v2579_v43, %v2580_v21  ;;  %v1145_v32 = vmul.f32 %v1036_v50, %v16640_v16  ;;  %v12467_v50 = vpop.permute.xlu1 %3007 }
 0x2b9   : > { %16754 = vst [vmem:[#allocation106_spill] sm:$0xff] %v12449_v11  ;;  %v12455_v27 = vmul.f32 0.125, %v2232_v54  ;;  %v12457_v22 = vadd.f32 %v2250_v31, %v2249_v60  ;;  %v1244_v8 = vrot.slane %v1243_v40, 4  ;;  %v1468_v52 = vrot.slane %v1467_v53, 4 }
 0x2ba   : > { %v3202_v48 = vmax.f32 %v3200_v35, %v3201_v12  ;;  %v3306_v3 = vrot.slane %v3305_v57, 2  ;;  %v2805_v34 = vadd.f32 %v2804_v37, %v2803_v47  ;;  %v2573_v56 = vrot.slane %v2572_v61, 4 }
 0x2bb   : > { %16755 = vst [vmem:[#allocation107_spill] sm:$0xff] %v12455_v27  ;;  %v2910_v29 = vmul.f32 0.125, %v2788_v15  ;;  %v12461_v2 = vsel %vm3598_vm3, %v12204_v55, %v2564_v17  ;;  %v2798_v18 = vadd.f32 %v2797_v28, %v2796_v4  ;;  %v3427_v43 = vrot.slane %v3426_v58, 1 }
 0x2bc   : > { %v3530_v54 = vrot.slane %v3529_v46, 2  ;;  %v2582_v62 = vrot.slane %v2581_v6, 2  ;;  %v1474_v60 = vsel %vm1165_vm2, %v1145_v32, 0.0  ;;  %v1245_v35 = vmax.f32 %v1243_v40, %v1244_v8 }
 0x2bd   : > { %v1469_v21 = vadd.f32 %v1468_v52, %v1467_v53  ;;  %v1150_v47 = vmul.f32 %v1061_v45, %v16670_v49  ;;  %v3203_v31 = vrot.slane %v3202_v48, 1  ;;  %v12469_v12 = vmax.f32 %v3305_v57, %v3306_v3 }
 0x2be   : > { %v2806_v55 = vrot.slane %v2805_v34, 2  ;;  %v2574_v17 = vmax.f32 %v2572_v61, %v2573_v56  ;;  %v2799_v37 = vrot.slane %v2798_v18, 2  ;;  %v1250_v28 = vsel %vm1165_vm2, %v1145_v32, -inf }
 0x2bf   : > { %16756 = vst [vmem:[#allocation108_spill] sm:$0xff] %v12469_v12  ;;  %v1475_v4 = vrot.slane %v1474_v60, 4  ;;  %v3072_v15 = vmul.f32 %v12387_v39, %v16697_v26  ;;  %v12476_v40 = vsel %vm3598_vm3, %v12214_v1, %v2910_v29  ;;  %v3428_v52 = vadd.f32 %v3427_v43, %v3426_v58  ;;  %v1041_v39 = vpop.permute.xlu0 %1040  ;;  %v16758_v26 = vld [vmem:[#allocation39_spill] sm:$0xff] }
 0x2c0   : > { %v12478_v53 = vadd.f32 %v3530_v54, %v3529_v46  ;;  %v2583_v8 = vmax.f32 %v2581_v6, %v2582_v62  ;;  %v1246_v45 = vrot.slane %v1245_v35, 2  ;;  %v1470_v57 = vrot.slane %v1469_v21, 2  ;;  %v12484_v46 = vpop.permute.xlu1 %2379 }
 0x2c1   : > { %v1285_v3 = vsel %vm1165_vm2, %v1150_v47, -inf  ;;  %v1509_v61 = vsel %vm1165_vm2, %v1150_v47, 0.0  ;;  %v3204_v56 = vmax.f32 %v3202_v48, %v3203_v31  ;;  %v2575_v10 = vrot.slane %v2574_v17, 2 }
 0x2c2   : > { %16757 = vst [vmem:[#allocation109_spill] sm:$0xff] %v12478_v53  ;;  %v1251_v36 = vrot.slane %v1250_v28, 4  ;;  %v2807_v49 = vadd.f32 %v2806_v55, %v2805_v34  ;;  %v2800_v16 = vadd.f32 %v2799_v37, %v2798_v18  ;;  %v1476_v1 = vadd.f32 %v1475_v4, %v1474_v60 }
 0x2c3   : > { %v3436_v58 = vsel %vm1165_vm2, %v3072_v15, 0.0  ;;  %v3550_v6 = vmul.f32 0.125, %v3428_v52  ;;  %v1286_v43 = vrot.slane %v1285_v3, 4  ;;  %v1510_v54 = vrot.slane %v1509_v61, 4 }
 0x2c4   : > { %v2584_v62 = vrot.slane %v2583_v8, 1  ;;  %v1247_v47 = vmax.f32 %v1245_v35, %v1246_v45  ;;  %v1471_v48 = vadd.f32 %v1470_v57, %v1469_v21  ;;  %v3212_v31 = vsel %vm1165_vm2, %v3072_v15, -inf  ;;  %v12495_v21 = vpop.permute.xlu0 %1095 }
 0x2c5   : > { %v2576_v32 = vmax.f32 %v2574_v17, %v2575_v10  ;;  %v1252_v12 = vmax.f32 %v1250_v28, %v1251_v36  ;;  %v3437_v11 = vrot.slane %v3436_v58, 4  ;;  %v1146_v34 = vmul.f32 %v1041_v39, %v16631_v13  ;;  %16759 = vst [vmem:[#allocation110_spill] sm:$0xff] %v12495_v21  ;;  %v12503_v28 = vpop.permute.xlu1 %1735 }
 0x2c6   : > { %v12491_v18 = vsel %vm3598_vm3, %v12419_v41, %v3204_v56  ;;  %v2808_v60 = vrot.slane %v2807_v49, 1  ;;  %v2801_v55 = vrot.slane %v2800_v16, 1  ;;  %v1477_v37 = vrot.slane %v1476_v1, 2 }
 0x2c7   : > { %v1287_v4 = vmax.f32 %v1285_v3, %v1286_v43  ;;  %v1511_v52 = vadd.f32 %v1510_v54, %v1509_v61  ;;  %v3213_v29 = vrot.slane %v3212_v31, 4  ;;  %v1795_v35 = vmul.f32 %v12398_v42, %v16758_v26 }
 0x2c8   : > { %v12499_v10 = vsel %vm3598_vm3, %v12421_v59, %v3550_v6  ;;  %v12501_v36 = vmax.f32 %v2583_v8, %v2584_v62  ;;  %v1248_v17 = vrot.slane %v1247_v47, 1  ;;  %v1472_v41 = vrot.slane %v1471_v48, 1 }
 0x2c9   : > { %v2577_v15 = vrot.slane %v2576_v32, 1  ;;  %v1253_v45 = vrot.slane %v1252_v12, 2  ;;  %v3438_v57 = vadd.f32 %v3437_v11, %v3436_v58  ;;  %v1481_v3 = vsel %vm1165_vm2, %v1146_v34, 0.0 }
 0x2ca   : > { %v2809_v61 = vadd.f32 %v2808_v60, %v2807_v49  ;;  %v2802_v56 = vadd.f32 %v2801_v55, %v2800_v16  ;;  %v1478_v42 = vadd.f32 %v1477_v37, %v1476_v1  ;;  %v1257_v39 = vsel %vm1165_vm2, %v1146_v34, -inf  ;;  %v1011_v16 = vpop.permute.xlu0 %1010 }
 0x2cb   : > { %v1288_v43 = vrot.slane %v1287_v4, 2  ;;  %v1512_v54 = vrot.slane %v1511_v52, 2  ;;  %v3214_v59 = vmax.f32 %v3212_v31, %v3213_v29  ;;  %v2177_v8 = vsel %vm1165_vm2, %v1795_v35, 0.0  ;;  %v12513_v29 = vpop.permute.xlu1 %2375 }
 0x2cc   : > { %v12508_v6 = vmax.f32 %v1247_v47, %v1248_v17  ;;  %v1473_v62 = vadd.f32 %v1472_v41, %v1471_v48  ;;  %v1482_v13 = vrot.slane %v1481_v3, 4  ;;  %v2435_v21 = vmul.f32 %v12406_v9, %v16758_v26 }
 0x2cd   : > { %v2578_v11 = vmax.f32 %v2576_v32, %v2577_v15  ;;  %v1254_v58 = vmax.f32 %v1252_v12, %v1253_v45  ;;  %v3439_v53 = vrot.slane %v3438_v57, 2  ;;  %v1258_v49 = vrot.slane %v1257_v39, 4  ;;  %v16762_v32 = vld [vmem:[#allocation8_spill] sm:$0xff] }
 0x2ce   : > { %16760 = vst [vmem:[#allocation111_spill] sm:$0xff] %v12508_v6  ;;  %v2912_v1 = vmul.f32 0.125, %v2802_v56  ;;  %v1479_v60 = vrot.slane %v1478_v42, 1  ;;  %v1953_v34 = vsel %vm1165_vm2, %v1795_v35, -inf  ;;  %v2178_v55 = vrot.slane %v2177_v8, 4 }
 0x2cf   : > { %v12515_v31 = vmul.f32 0.125, %v2809_v61  ;;  %v1289_v47 = vmax.f32 %v1287_v4, %v1288_v43  ;;  %v1513_v48 = vadd.f32 %v1512_v54, %v1511_v52  ;;  %v3215_v37 = vrot.slane %v3214_v59, 2 }
 0x2d0   : > { %v12517_v17 = vmul.f32 0.125, %v1473_v62  ;;  %v1483_v9 = vadd.f32 %v1482_v13, %v1481_v3  ;;  %v2817_v12 = vsel %vm1165_vm2, %v2435_v21, 0.0  ;;  %v1140_v41 = vmul.f32 %v1011_v16, %v16762_v32 }
 0x2d1   : > { %v12523_v15 = vsel %vm3600_vm4, %v2578_v11, %v12461_v2  ;;  %v3440_v35 = vadd.f32 %v3439_v53, %v3438_v57  ;;  %v1259_v45 = vmax.f32 %v1257_v39, %v1258_v49  ;;  %v1954_v56 = vrot.slane %v1953_v34, 4  ;;  %v12533_v57 = vpop.permute.xlu1 %1747 }
 0x2d2   : > { %16761 = vst [vmem:[#allocation112_spill] sm:$0xff] %v12517_v17  ;;  %v12527_v61 = vsel %vm3600_vm4, %v2912_v1, %v12476_v40  ;;  %v1255_v4 = vrot.slane %v1254_v58, 1  ;;  %v1480_v52 = vadd.f32 %v1479_v60, %v1478_v42  ;;  %v2179_v43 = vadd.f32 %v2178_v55, %v2177_v8  ;;  %v1071_v17 = vpop.permute.xlu0 %1070 }
 0x2d3   : > { %v1290_v54 = vrot.slane %v1289_v47, 1  ;;  %v1514_v13 = vrot.slane %v1513_v48, 1  ;;  %v3216_v3 = vmax.f32 %v3214_v59, %v3215_v37  ;;  %v2818_v62 = vrot.slane %v2817_v12, 4 }
 0x2d4   : > { %v1484_v16 = vrot.slane %v1483_v9, 2  ;;  %v2593_v32 = vsel %vm1165_vm2, %v2435_v21, -inf  ;;  %v1215_v2 = vsel %vm1165_vm2, %v1140_v41, -inf  ;;  %v3075_v53 = vmul.f32 %v12417_v0, %v16758_v26 }
 0x2d5   : > { %v3441_v40 = vrot.slane %v3440_v35, 1  ;;  %v1260_v39 = vrot.slane %v1259_v45, 2  ;;  %v1955_v11 = vmax.f32 %v1953_v34, %v1954_v56  ;;  %v1439_v42 = vsel %vm1165_vm2, %v1140_v41, 0.0 }
 0x2d6   : > { %v12536_v8 = vmax.f32 %v1254_v58, %v1255_v4  ;;  %v12538_v59 = vmul.f32 0.125, %v1480_v52  ;;  %v2180_v49 = vrot.slane %v2179_v43, 2  ;;  %v1152_v1 = vmul.f32 %v1071_v17, %v16679_v24  ;;  %v12547_v17 = vpop.permute.xlu1 %1743 }
 0x2d7   : > { %v1515_v21 = vadd.f32 %v1514_v13, %v1513_v48  ;;  %v2594_v60 = vrot.slane %v2593_v32, 4  ;;  %v2819_v55 = vadd.f32 %v2818_v62, %v2817_v12  ;;  %v1216_v37 = vrot.slane %v1215_v2, 4 }
 0x2d8   : > { %16763 = vst [vmem:[#allocation113_spill] sm:$0xff] %v12536_v8  ;;  %16764 = vst [vmem:[#allocation114_spill] sm:$0xff] %v12538_v59  ;;  %v3217_v6 = vrot.slane %v3216_v3, 1  ;;  %v1485_v0 = vadd.f32 %v1484_v16, %v1483_v9  ;;  %v1440_v26 = vrot.slane %v1439_v42, 4  ;;  %v3457_v33 = vsel %vm1165_vm2, %v3075_v53, 0.0 }
 0x2d9   : > { %v12542_v27 = vmax.f32 %v1289_v47, %v1290_v54  ;;  %v3442_v34 = vadd.f32 %v3441_v40, %v3440_v35  ;;  %v1261_v41 = vmax.f32 %v1259_v45, %v1260_v39  ;;  %v1956_v58 = vrot.slane %v1955_v11, 2  ;;  %v1051_v39 = vpop.permute.xlu0 %1050 }
 0x2da   : > { %v2181_v56 = vadd.f32 %v2180_v49, %v2179_v43  ;;  %v3233_v4 = vsel %vm1165_vm2, %v3075_v53, -inf  ;;  %v1299_v52 = vsel %vm1165_vm2, %v1152_v1, -inf  ;;  %v1523_v48 = vsel %vm1165_vm2, %v1152_v1, 0.0  ;;  %v16767_v53 = vld [vmem:[#allocation40_spill] sm:$0xff] }
 0x2db   : > { %16765 = vst [vmem:[#allocation115_spill] sm:$0xff] %v12542_v27  ;;  %v2595_v12 = vmax.f32 %v2593_v32, %v2594_v60  ;;  %v2820_v13 = vrot.slane %v2819_v55, 2  ;;  %v1217_v9 = vmax.f32 %v1215_v2, %v1216_v37  ;;  %v3458_v62 = vrot.slane %v3457_v33, 4 }
 0x2dc   : > { %v12549_v16 = vmul.f32 0.125, %v1515_v21  ;;  %v3218_v47 = vmax.f32 %v3216_v3, %v3217_v6  ;;  %v1486_v54 = vrot.slane %v1485_v0, 1  ;;  %v1441_v35 = vadd.f32 %v1440_v26, %v1439_v42  ;;  %v12558_v21 = vpop.permute.xlu1 %2383 }
 0x2dd   : > { %v3234_v45 = vrot.slane %v3233_v4, 4  ;;  %v1300_v40 = vrot.slane %v1299_v52, 4  ;;  %v1524_v43 = vrot.slane %v1523_v48, 4  ;;  %v1794_v49 = vmul.f32 %v12434_v51, %v16767_v53 }
 0x2de   : > { %16766 = vst [vmem:[#allocation116_spill] sm:$0xff] %v12549_v16  ;;  %v3552_v24 = vmul.f32 0.125, %v3442_v34  ;;  %v1262_v1 = vrot.slane %v1261_v41, 1  ;;  %v1957_v59 = vmax.f32 %v1955_v11, %v1956_v58  ;;  %v2182_v8 = vrot.slane %v2181_v56, 1 }
 0x2df   : > { %v2596_v32 = vrot.slane %v2595_v12, 2  ;;  %v2821_v60 = vadd.f32 %v2820_v13, %v2819_v55  ;;  %v1218_v2 = vrot.slane %v1217_v9, 2  ;;  %v3459_v37 = vadd.f32 %v3458_v62, %v3457_v33 }
 0x2e0   : > { %v12555_v6 = vsel %vm3600_vm4, %v3218_v47, %v12491_v18  ;;  %v1487_v26 = vadd.f32 %v1486_v54, %v1485_v0  ;;  %v1442_v3 = vrot.slane %v1441_v35, 2  ;;  %v1148_v42 = vmul.f32 %v1051_v39, %v16651_v20 }
 0x2e1   : > { %v3235_v16 = vmax.f32 %v3233_v4, %v3234_v45  ;;  %v1301_v51 = vmax.f32 %v1299_v52, %v1300_v40  ;;  %v1525_v34 = vadd.f32 %v1524_v43, %v1523_v48  ;;  %v2170_v11 = vsel %vm1165_vm2, %v1794_v49, 0.0 }
 0x2e2   : > { %v12563_v55 = vsel %vm3600_vm4, %v3552_v24, %v12499_v10  ;;  %v12565_v33 = vmax.f32 %v1261_v41, %v1262_v1  ;;  %v1958_v58 = vrot.slane %v1957_v59, 1  ;;  %v2183_v18 = vadd.f32 %v2182_v8, %v2181_v56 }
 0x2e3   : > { %v2597_v13 = vmax.f32 %v2595_v12, %v2596_v32  ;;  %v2822_v0 = vrot.slane %v2821_v60, 1  ;;  %v1219_v62 = vmax.f32 %v1217_v9, %v1218_v2  ;;  %v3460_v47 = vrot.slane %v3459_v37, 2  ;;  %v12578_v12 = vpop.permute.xlu1 %3023 }
 0x2e4   : > { %16768 = vst [vmem:[#allocation117_spill] sm:$0xff] %v12565_v33  ;;  %v1443_v54 = vadd.f32 %v1442_v3, %v1441_v35  ;;  %v1271_v39 = vsel %vm1165_vm2, %v1148_v42, -inf  ;;  %v1946_v4 = vsel %vm1165_vm2, %v1794_v49, -inf  ;;  %v2171_v52 = vrot.slane %v2170_v11, 4 }
 0x2e5   : > { %v12569_v48 = vmul.f32 0.125, %v1487_v26  ;;  %v3236_v45 = vrot.slane %v3235_v16, 2  ;;  %v1302_v40 = vrot.slane %v1301_v51, 2  ;;  %v1526_v24 = vrot.slane %v1525_v34, 2 }
 0x2e6   : > { %v12571_v10 = vmax.f32 %v1957_v59, %v1958_v58  ;;  %v12573_v41 = vmul.f32 0.125, %v2183_v18  ;;  %v1495_v8 = vsel %vm1165_vm2, %v1148_v42, 0.0  ;;  %v2434_v56 = vmul.f32 %v12452_v25, %v16767_v53 }
 0x2e7   : > { %16769 = vst [vmem:[#allocation118_spill] sm:$0xff] %v12569_v48  ;;  %v2598_v9 = vrot.slane %v2597_v13, 1  ;;  %v3461_v35 = vadd.f32 %v3460_v47, %v3459_v37  ;;  %v1272_v43 = vrot.slane %v1271_v39, 4  ;;  %v1947_v49 = vrot.slane %v1946_v4, 4 }
 0x2e8   : > { %v2823_v1 = vadd.f32 %v2822_v0, %v2821_v60  ;;  %v1220_v32 = vrot.slane %v1219_v62, 1  ;;  %v1444_v2 = vrot.slane %v1443_v54, 1  ;;  %v2172_v26 = vadd.f32 %v2171_v52, %v2170_v11  ;;  %v12592_v52 = vpop.permute.xlu1 %1755 }
 0x2e9   : > { %v3237_v3 = vmax.f32 %v3235_v16, %v3236_v45  ;;  %v1303_v59 = vmax.f32 %v1301_v51, %v1302_v40  ;;  %v1527_v58 = vadd.f32 %v1526_v24, %v1525_v34  ;;  %v1496_v18 = vrot.slane %v1495_v8, 4 }
 0x2ea   : > { %v2586_v20 = vsel %vm1165_vm2, %v2434_v56, -inf  ;;  %v2810_v42 = vsel %vm1165_vm2, %v2434_v56, 0.0  ;;  %v3074_v25 = vmul.f32 %v12467_v50, %v16767_v53  ;;  %v1796_v37 = vmul.f32 %v12503_v28, %v16709_v5 }
 0x2eb   : > { %v12586_v47 = vmax.f32 %v2597_v13, %v2598_v9  ;;  %v3462_v60 = vrot.slane %v3461_v35, 1  ;;  %v1273_v0 = vmax.f32 %v1271_v39, %v1272_v43  ;;  %v1948_v48 = vmax.f32 %v1946_v4, %v1947_v49 }
 0x2ec   : > { %v12588_v11 = vmul.f32 0.125, %v2823_v1  ;;  %v12590_v16 = vmax.f32 %v1219_v62, %v1220_v32  ;;  %v1445_v51 = vadd.f32 %v1444_v2, %v1443_v54  ;;  %v2173_v34 = vrot.slane %v2172_v26, 2  ;;  %v12605_v27 = vpop.permute.xlu1 %3035 }
 0x2ed   : > { %v3238_v45 = vrot.slane %v3237_v3, 1  ;;  %v1304_v40 = vrot.slane %v1303_v59, 1  ;;  %v2587_v24 = vrot.slane %v2586_v20, 4  ;;  %v2811_v50 = vrot.slane %v2810_v42, 4 }
 0x2ee   : > { %16770 = vst [vmem:[#allocation119_spill] sm:$0xff] %v12590_v16  ;;  %v1528_v56 = vrot.slane %v1527_v58, 1  ;;  %v1497_v33 = vadd.f32 %v1496_v18, %v1495_v8  ;;  %v3450_v28 = vsel %vm1165_vm2, %v3074_v25, 0.0  ;;  %v2184_v13 = vsel %vm1165_vm2, %v1796_v37, 0.0 }
 0x2ef   : > { %v3463_v39 = vadd.f32 %v3462_v60, %v3461_v35  ;;  %v1274_v4 = vrot.slane %v1273_v0, 2  ;;  %v1949_v9 = vrot.slane %v1948_v48, 2  ;;  %v2436_v62 = vmul.f32 %v12513_v29, %v16709_v5 }
 0x2f0   : > { %v2174_v54 = vadd.f32 %v2173_v34, %v2172_v26  ;;  %v3226_v43 = vsel %vm1165_vm2, %v3074_v25, -inf  ;;  %v2437_v49 = vmul.f32 %v12484_v46, %v16701_v19  ;;  %v2185_v1 = vrot.slane %v2184_v13, 4 }
 0x2f1   : > { %v12601_v32 = vmul.f32 0.125, %v1445_v51  ;;  %v2588_v8 = vmax.f32 %v2586_v20, %v2587_v24  ;;  %v2812_v2 = vadd.f32 %v2811_v50, %v2810_v42  ;;  %v3451_v18 = vrot.slane %v3450_v28, 4 }
 0x2f2   : > { %v12603_v16 = vmax.f32 %v3237_v3, %v3238_v45  ;;  %v1529_v35 = vadd.f32 %v1528_v56, %v1527_v58  ;;  %v1498_v60 = vrot.slane %v1497_v33, 2  ;;  %v2186_v53 = vadd.f32 %v2185_v1, %v2184_v13 }
 0x2f3   : > { %v12607_v29 = vmax.f32 %v1303_v59, %v1304_v40  ;;  %v12609_v26 = vmax.f32 %v1273_v0, %v1274_v4  ;;  %v3227_v25 = vrot.slane %v3226_v43, 4  ;;  %v2824_v46 = vsel %vm1165_vm2, %v2436_v62, 0.0 }
 0x2f4   : > { %v12612_v34 = vmul.f32 0.125, %v3463_v39  ;;  %v1950_v51 = vmax.f32 %v1948_v48, %v1949_v9  ;;  %v2175_v20 = vrot.slane %v2174_v54, 1  ;;  %v2831_v42 = vsel %vm1165_vm2, %v2437_v49, 0.0 }
 0x2f5   : > { %16771 = vst [vmem:[#allocation120_spill] sm:$0xff] %v12607_v29  ;;  %16772 = vst [vmem:[#allocation121_spill] sm:$0xff] %v12609_v26  ;;  %v2589_v3 = vrot.slane %v2588_v8, 2  ;;  %v2813_v45 = vrot.slane %v2812_v2, 2  ;;  %v3452_v58 = vadd.f32 %v3451_v18, %v3450_v28  ;;  %v1960_v24 = vsel %vm1165_vm2, %v1796_v37, -inf  ;;  %v12625_v37 = vpop.permute.xlu1 %1751  ;;  %v16776_v26 = vld [vmem:[#allocation89_spill] sm:$0xff] }
 0x2f6   : > { %v12616_v50 = vmul.f32 0.125, %v1529_v35  ;;  %v12618_v59 = vadd.f32 %v1498_v60, %v1497_v33  ;;  %v2187_v0 = vrot.slane %v2186_v53, 2  ;;  %v2825_v40 = vrot.slane %v2824_v46, 4 }
 0x2f7   : > { %v3228_v13 = vmax.f32 %v3226_v43, %v3227_v25  ;;  %v2832_v39 = vrot.slane %v2831_v42, 4  ;;  %v3678_v48 = vsel %vm3602_vm5, %v12216_v23, %v12253_v38  ;;  %v1951_v4 = vrot.slane %v1950_v51, 1  ;;  %v16775_v23 = vld [vmem:[#allocation32_spill] sm:$0xff] }
 0x2f8   : > { %16773 = vst [vmem:[#allocation122_spill] sm:$0xff] %v12616_v50  ;;  %v2176_v9 = vadd.f32 %v2175_v20, %v2174_v54  ;;  %v2607_v28 = vsel %vm1165_vm2, %v2437_v49, -inf  ;;  %v1961_v1 = vrot.slane %v1960_v24, 4  ;;  %v2590_v18 = vmax.f32 %v2588_v8, %v2589_v3 }
 0x2f9   : > { %v2814_v33 = vadd.f32 %v2813_v45, %v2812_v2  ;;  %v3453_v35 = vrot.slane %v3452_v58, 2  ;;  %v3679_v60 = vsel %vm3604_vm6, %v12099_v30, %v3678_v48  ;;  %v2188_v56 = vadd.f32 %v2187_v0, %v2186_v53 }
 0x2fa   : > { %v2826_v43 = vadd.f32 %v2825_v40, %v2824_v46  ;;  %v16774_v25 = vrot.slane %v12123_v14, 1  ;;  %v3680_v38 = vsel %vm3606_vm8, %v16775_v23, %v3679_v60  ;;  %v3229_v54 = vrot.slane %v3228_v13, 2  ;;  %v16778_v60 = vld [vmem:[#allocation60_spill] sm:$0xff] }
 0x2fb   : > { %v2608_v49 = vrot.slane %v2607_v28, 4  ;;  %v2833_v20 = vadd.f32 %v2832_v39, %v2831_v42  ;;  %v3681_v8 = vsel %vm3608_vm7, %v16776_v26, %v3680_v38  ;;  %v12637_v3 = vmax.f32 %v1950_v51, %v1951_v4  ;;  %v16777_v39 = vld [vmem:[#allocation45_spill] sm:$0xff] }
 0x2fc   : > { %v1917_v29 = vmax.f32 %v12123_v14, %v16774_v25  ;;  %v1962_v30 = vmax.f32 %v1960_v24, %v1961_v1  ;;  %v2274_v46 = vmul.f32 0.125, %v2176_v9  ;;  %v2591_v45 = vrot.slane %v2590_v18, 1  ;;  %v12645_v25 = vpop.permute.xlu1 %3031 }
 0x2fd   : > { %v2815_v0 = vrot.slane %v2814_v33, 1  ;;  %v2600_v14 = vsel %vm1165_vm2, %v2436_v62, -inf  ;;  %v3454_v40 = vadd.f32 %v3453_v35, %v3452_v58  ;;  %v2189_v48 = vrot.slane %v2188_v56, 1  ;;  %v16780_v62 = vld [vmem:[#allocation24_spill] sm:$0xff]  ;;  %v16782_v35 = vld [vmem:[#allocation82_spill] sm:$0xff] }
 0x2fe   : > { %v3682_v53 = vsel %vm3610_vm9, %v1917_v29, %v3681_v8  ;;  %v2827_v42 = vrot.slane %v2826_v43, 2  ;;  %v3750_v26 = vsel %vm3602_vm5, %v16778_v60, %v16777_v39  ;;  %v3230_v51 = vmax.f32 %v3228_v13, %v3229_v54  ;;  %v16779_v29 = vld [vmem:[#allocation30_spill] sm:$0xff]  ;;  %v16783_v60 = vld [vmem:[#allocation93_spill] sm:$0xff] }
 0x2ff   : > { %3699 = vrot.lane.b32.xlu1 %v3682_v53, %s11092_s26  ;;  %v2609_v24 = vmax.f32 %v2607_v28, %v2608_v49  ;;  %v2834_v4 = vrot.slane %v2833_v20, 2  ;;  %v3751_v9 = vsel %vm3604_vm6, %v16779_v29, %v3750_v26  ;;  %v1963_v1 = vrot.slane %v1962_v30, 2  ;;  %v16784_v28 = vld [vmem:[#allocation65_spill] sm:$0xff] }
 0x300   : > { %v2601_v23 = vrot.slane %v2600_v14, 4  ;;  %v16781_v38 = vrot.slane %v16780_v62, 1  ;;  %v3752_v8 = vsel %vm3606_vm8, %v16782_v35, %v3751_v9  ;;  %v12654_v53 = vmax.f32 %v2590_v18, %v2591_v45  ;;  %v16787_v18 = vld [vmem:[#allocation38_spill] sm:$0xff] }
 0x301   : > { %v2816_v39 = vadd.f32 %v2815_v0, %v2814_v33  ;;  %v3753_v13 = vsel %vm3608_vm7, %v16783_v60, %v3752_v8  ;;  %v16785_v54 = vrot.slane %v16784_v28, 1  ;;  %v3455_v26 = vrot.slane %v3454_v40, 1  ;;  %v16788_v33 = vld [vmem:[#allocation54_spill] sm:$0xff]  ;;  %v16789_v60 = vld [vmem:[#allocation55_spill] sm:$0xff] }
 0x302   : > { %v2557_v58 = vmax.f32 %v16780_v62, %v16781_v38  ;;  %v2190_v29 = vadd.f32 %v2189_v48, %v2188_v56  ;;  %v2828_v2 = vadd.f32 %v2827_v42, %v2826_v43  ;;  %v3231_v19 = vrot.slane %v3230_v51, 1  ;;  %v16786_v38 = vld [vmem:[#allocation25_spill] sm:$0xff]  ;;  %v12670_v43 = vpop.permute.xlu1 %3043  ;;  %v16790_v42 = vld [vmem:[#allocation64_spill] sm:$0xff] }
 0x303   : > { %v2141_v49 = vadd.f32 %v16785_v54, %v16784_v28  ;;  %v2610_v62 = vrot.slane %v2609_v24, 2  ;;  %v1799_v9 = vmul.f32 %v12533_v57, %v16786_v38  ;;  %v3972_v45 = vsel %vm3602_vm5, %v16788_v33, %v16787_v18  ;;  %v16793_v28 = vld [vmem:[#allocation74_spill] sm:$0xff] }
 0x304   : > { %v3754_v50 = vsel %vm3610_vm9, %v2557_v58, %v3753_v13  ;;  %v2835_v0 = vadd.f32 %v2834_v4, %v2833_v20  ;;  %v1964_v35 = vmax.f32 %v1962_v30, %v1963_v1  ;;  %v2602_v8 = vmax.f32 %v2600_v14, %v2601_v23  ;;  %v16791_v13 = vld [vmem:[#allocation50_spill] sm:$0xff] }
 0x305   : > { %3771 = vrot.lane.b32.xlu1 %v3754_v50, %s11093_s27  ;;  %v3973_v56 = vsel %vm3604_vm6, %v16789_v60, %v3972_v45  ;;  %v2269_v48 = vmul.f32 0.125, %v2141_v49  ;;  %v16792_v57 = vrot.slane %v16791_v13, 1  ;;  %v3978_v54 = vsel %vm3600_vm4, %v16793_v28, %v12445_v44  ;;  %v16794_v4 = vld [vmem:[#allocation90_spill] sm:$0xff]  ;;  %v16795_v49 = vld [vmem:[#allocation41_spill] sm:$0xff] }
 0x306   : > { %v3974_v58 = vsel %vm3606_vm8, %v16790_v42, %v3973_v56  ;;  %v3456_v20 = vadd.f32 %v3455_v26, %v3454_v40  ;;  %v2276_v30 = vmul.f32 0.125, %v2190_v29  ;;  %v2829_v14 = vrot.slane %v2828_v2, 1  ;;  %v16796_v45 = vld [vmem:[#allocation33_spill] sm:$0xff] }
 0x307   : > { %v2197_v50 = vadd.f32 %v16792_v57, %v16791_v13  ;;  %v3975_v1 = vsel %vm3608_vm7, %v16794_v4, %v3974_v58  ;;  %v1981_v23 = vsel %vm1165_vm2, %v1799_v9, -inf  ;;  %v1798_v18 = vmul.f32 %v12547_v17, %v16795_v49  ;;  %v16797_v4 = vld [vmem:[#allocation85_spill] sm:$0xff] }
 0x308   : > { %v3976_v33 = vsel %vm3610_vm9, %v2269_v48, %v3975_v1  ;;  %v3979_v60 = vsel %vm3602_vm5, %v16796_v45, %v3978_v54  ;;  %v12688_v56 = vmax.f32 %v2609_v24, %v2610_v62  ;;  %v1965_v42 = vrot.slane %v1964_v35, 1  ;;  %v12696_v24 = vpop.permute.xlu1 %2399  ;;  %v16800_v45 = vld [vmem:[#allocation73_spill] sm:$0xff] }
 0x309   : > { %v2205_v44 = vsel %vm1165_vm2, %v1799_v9, 0.0  ;;  %3993 = vrot.lane.b32.xlu1 %v3976_v33, %s11092_s26  ;;  %v3980_v40 = vsel %vm3604_vm6, %v2274_v46, %v3979_v60  ;;  %v2836_v26 = vrot.slane %v2835_v0, 1  ;;  %v2603_v29 = vrot.slane %v2602_v8, 2 }
 0x30a   : > { %v2277_v58 = vmul.f32 0.125, %v2197_v50  ;;  %v3981_v17 = vsel %vm3606_vm8, %v12573_v41, %v3980_v40  ;;  %v2914_v13 = vmul.f32 0.125, %v2816_v39  ;;  %v2830_v48 = vadd.f32 %v2829_v14, %v2828_v2  ;;  %v16799_v14 = vld [vmem:[#allocation69_spill] sm:$0xff] }
 0x30b   : > { %v1982_v57 = vrot.slane %v1981_v23, 4  ;;  %v3982_v28 = vsel %vm3608_vm7, %v2276_v30, %v3981_v17  ;;  %v2206_v62 = vrot.slane %v2205_v44, 4  ;;  %v2198_v9 = vsel %vm1165_vm2, %v1798_v18, 0.0 }
 0x30c   : > { %v3983_v54 = vsel %vm3610_vm9, %v2277_v58, %v3982_v28  ;;  %v16798_v46 = vrot.slane %v16797_v4, 1  ;;  %v12703_v50 = vmax.f32 %v3230_v51, %v3231_v19  ;;  %v3554_v33 = vmul.f32 0.125, %v3456_v20  ;;  %v16801_v19 = vld [vmem:[#allocation67_spill] sm:$0xff] }
 0x30d   : > { %v2612_v41 = vrot.slane %v12688_v56, 1  ;;  %v12706_v2 = vmax.f32 %v1964_v35, %v1965_v42  ;;  %3995 = vrot.lane.b32.xlu0 %v3983_v54, %s11092_s26  ;;  %v2604_v39 = vmax.f32 %v2602_v8, %v2603_v29  ;;  %v1974_v30 = vsel %vm1165_vm2, %v1798_v18, -inf  ;;  %v16802_v35 = vld [vmem:[#allocation84_spill] sm:$0xff] }
 0x30e   : > { %v2781_v1 = vadd.f32 %v16798_v46, %v16797_v4  ;;  %v4044_v60 = vsel %vm3602_vm5, %v16800_v45, %v16799_v14  ;;  %v2837_v40 = vadd.f32 %v2836_v26, %v2835_v0  ;;  %v2916_v58 = vmul.f32 0.125, %v2830_v48  ;;  %v16803_v0 = vld [vmem:[#allocation94_spill] sm:$0xff]  ;;  %v12725_v48 = vpop.permute.xlu1 %3039  ;;  %v16804_v54 = vld [vmem:[#allocation28_spill] sm:$0xff]  ;;  %v16807_v14 = vld [vmem:[#allocation79_spill] sm:$0xff] }
 0x30f   : > { %v1983_v17 = vmax.f32 %v1981_v23, %v1982_v57  ;;  %v2199_v28 = vrot.slane %v2198_v9, 4  ;;  %v4045_v51 = vsel %vm3604_vm6, %v16801_v19, %v4044_v60  ;;  %v2207_v20 = vadd.f32 %v2206_v62, %v2205_v44  ;;  %v16808_v19 = vld [vmem:[#allocation78_spill] sm:$0xff] }
 0x310   : > { %v2909_v4 = vmul.f32 0.125, %v2781_v1  ;;  %v4046_v42 = vsel %vm3606_vm8, %v16802_v35, %v4045_v51  ;;  %v4051_v8 = vsel %vm3602_vm5, %v12515_v31, %v12527_v61  ;;  %v1975_v18 = vrot.slane %v1974_v30, 4  ;;  %v16806_v1 = vld [vmem:[#allocation42_spill] sm:$0xff] }
 0x311   : > { %v2438_v29 = vmul.f32 %v12558_v21, %v16795_v49  ;;  %v4047_v23 = vsel %vm3608_vm7, %v16803_v0, %v4046_v42  ;;  %v4052_v26 = vsel %vm3604_vm6, %v2914_v13, %v4051_v8  ;;  %v2917_v57 = vmul.f32 0.125, %v2837_v40 }
 0x312   : > { %v4048_v44 = vsel %vm3610_vm9, %v2909_v4, %v4047_v23  ;;  %v4053_v62 = vsel %vm3606_vm8, %v12588_v11, %v4052_v26  ;;  %v16805_v31 = vrot.slane %v16804_v54, 1  ;;  %v2200_v46 = vadd.f32 %v2199_v28, %v2198_v9  ;;  %v16812_v26 = vld [vmem:[#allocation56_spill] sm:$0xff] }
 0x313   : > { %v3078_v21 = vmul.f32 %v12578_v12, %v16795_v49  ;;  %4065 = vrot.lane.b32.xlu1 %v4048_v44, %s11093_s27  ;;  %v4054_v13 = vsel %vm3608_vm7, %v2916_v58, %v4053_v62  ;;  %v4115_v45 = vsel %vm3600_vm4, %v16807_v14, %v16806_v1  ;;  %v2605_v60 = vrot.slane %v2604_v39, 1  ;;  %v16809_v12 = vld [vmem:[#allocation71_spill] sm:$0xff]  ;;  %v12759_v14 = vpop.permute.xlu1 %2411 }
 0x314   : > { %v3421_v61 = vadd.f32 %v16805_v31, %v16804_v54  ;;  %v1984_v40 = vrot.slane %v1983_v17, 2  ;;  %v4055_v11 = vsel %vm3610_vm9, %v2917_v57, %v4054_v13  ;;  %v4116_v51 = vsel %vm3602_vm5, %v16808_v19, %v4115_v45  ;;  %v16810_v58 = vld [vmem:[#allocation63_spill] sm:$0xff]  ;;  %v16813_v54 = vld [vmem:[#allocation98_spill] sm:$0xff]  ;;  %v16814_v13 = vld [vmem:[#allocation37_spill] sm:$0xff] }
 0x315   : > { %v2208_v4 = vrot.slane %v2207_v20, 2  ;;  %v2614_v9 = vsel %vm1165_vm2, %v2438_v29, -inf  ;;  %4067 = vrot.lane.b32.xlu0 %v4055_v11, %s11093_s27  ;;  %v4117_v28 = vsel %vm3604_vm6, %v16809_v12, %v4116_v51  ;;  %v16811_v35 = vrot.slane %v16810_v58, 1  ;;  %v16816_v12 = vld [vmem:[#allocation46_spill] sm:$0xff] }
 0x316   : > { %v1976_v8 = vmax.f32 %v1974_v30, %v1975_v18  ;;  %v2838_v0 = vsel %vm1165_vm2, %v2438_v29, 0.0  ;;  %v3549_v23 = vmul.f32 0.125, %v3421_v61  ;;  %v4118_v44 = vsel %vm3606_vm8, %v16812_v26, %v4117_v28  ;;  %v16817_v28 = vld [vmem:[#allocation49_spill] sm:$0xff]  ;;  %v510_v26 = vld [vmem:[%s16255_s4 + $0x8] sm:$0xff] }
 0x317   : > { %v3477_v42 = vadd.f32 %v16811_v35, %v16810_v58  ;;  %v2201_v57 = vrot.slane %v2200_v46, 2  ;;  %v3478_v62 = vsel %vm1165_vm2, %v3078_v21, 0.0  ;;  %v4119_v31 = vsel %vm3608_vm7, %v16813_v54, %v4118_v44  ;;  %v16818_v54 = vld [vmem:[#allocation27_spill] sm:$0xff] }
 0x318   : > { %v4123_v1 = vsel %vm3602_vm5, %v16814_v13, %v12563_v55  ;;  %v12761_v45 = vmax.f32 %v1983_v17, %v1984_v40  ;;  %v2615_v30 = vrot.slane %v2614_v9, 4  ;;  %v4120_v18 = vsel %vm3610_vm9, %v3549_v23, %v4119_v31  ;;  %v512_v55 = vld [vmem:[%s16255_s4 + $0x18] sm:$0xff]  ;;  %v511_v17 = vld [vmem:[%s16255_s4 + $0x10] sm:$0xff] }
 0x319   : > { %v4124_v29 = vsel %vm3604_vm6, %v3554_v33, %v4123_v1  ;;  %v12765_v61 = vmax.f32 %v2604_v39, %v2605_v60  ;;  %v2839_v11 = vrot.slane %v2838_v0, 4  ;;  %4137 = vrot.lane.b32.xlu1 %v4120_v18, %s11094_s28  ;;  %v3557_v19 = vmul.f32 0.125, %v3477_v42  ;;  %v16815_v39 = vld [vmem:[#allocation86_spill] sm:$0xff]  ;;  %10486 = vmatprep.subr.mxu1 %v512_v55  ;;  %v16819_v13 = vld [vmem:[#allocation72_spill] sm:$0xff] }
 0x31a   : > { %v4125_v51 = vsel %vm3606_vm8, %v12612_v34, %v4124_v29  ;;  %v3254_v40 = vsel %vm1165_vm2, %v3078_v21, -inf  ;;  %v3479_v33 = vrot.slane %v3478_v62, 4  ;;  %v3815_v58 = vsel %vm3602_vm5, %v16817_v28, %v16816_v12  ;;  %10487 = vmatpush3.msra.mxu1 %v512_v55  ;;  %v16822_v29 = vld [vmem:[#allocation68_spill] sm:$0xff] }
 0x31b   : > { %v4126_v60 = vsel %vm3608_vm7, %v16815_v39, %v4125_v51  ;;  %v2209_v34 = vadd.f32 %v2208_v4, %v2207_v20  ;;  %v1977_v35 = vrot.slane %v1976_v8, 2  ;;  %v2202_v42 = vadd.f32 %v2201_v57, %v2200_v46  ;;  %10488 = vmatprep.subr.mxu1 %v511_v17  ;;  %v16820_v57 = vld [vmem:[#allocation77_spill] sm:$0xff]  ;;  %v12797_v51 = vpop.permute.xlu1 %1767 }
 0x31c   : > { %v4127_v23 = vsel %vm3610_vm9, %v3557_v19, %v4126_v60  ;;  %v1986_v21 = vrot.slane %v12761_v45, 1  ;;  %v2616_v44 = vmax.f32 %v2614_v9, %v2615_v30  ;;  %v1801_v31 = vmul.f32 %v12592_v52, %v16818_v54  ;;  %10489 = vmatpush3.msra.mxu1 %v511_v17  ;;  %v509_v52 = vld [vmem:[%s16255_s4] sm:$0xff]  ;;  %v16823_v30 = vld [vmem:[#allocation11_spill] sm:$0xff] }
 0x31d   : > { %4139 = vrot.lane.b32.xlu0 %v4127_v23, %s11094_s28  ;;  %v3816_v20 = vsel %vm3604_vm6, %v16819_v13, %v3815_v58  ;;  %v2840_v46 = vadd.f32 %v2839_v11, %v2838_v0  ;;  %v3255_v4 = vrot.slane %v3254_v40, 4  ;;  %v16821_v1 = vrot.slane %v16820_v57, 1  ;;  %v16824_v11 = vld [vmem:[#allocation61_spill] sm:$0xff]  ;;  %10490 = vmatprep.subr.mxu1 %v510_v26 }
 0x31e   : > { %v3817_v19 = vsel %vm3606_vm8, %v16822_v29, %v3816_v20  ;;  %v3480_v9 = vadd.f32 %v3479_v33, %v3478_v62  ;;  %v3081_v0 = vmul.f32 %v12605_v27, %v16818_v54  ;;  %v3684_v39 = vsel %vm3600_vm4, %v16824_v11, %v12437_v7  ;;  %10491 = vmatpush3.msra.mxu1 %v510_v26  ;;  %v16825_v27 = vld [vmem:[#allocation51_spill] sm:$0xff] }
 0x31f   : > { %v3141_v18 = vmax.f32 %v16820_v57, %v16821_v1  ;;  %v3818_v55 = vsel %vm3608_vm7, %v16823_v30, %v3817_v19  ;;  %v2210_v60 = vrot.slane %v2209_v34, 1  ;;  %v12809_v12 = vmax.f32 %v1976_v8, %v1977_v35  ;;  %10492 = vmatprep.subr.mxu1 %v509_v52  ;;  %v16826_v35 = vld [vmem:[#allocation29_spill] sm:$0xff]  ;;  %v16827_v1 = vld [vmem:[#allocation59_spill] sm:$0xff] }
 0x320   : > { %v2203_v17 = vrot.slane %v2202_v42, 1  ;;  %v2617_v58 = vrot.slane %v2616_v44, 2  ;;  %v1995_v62 = vsel %vm1165_vm2, %v1801_v31, -inf  ;;  %v2219_v33 = vsel %vm1165_vm2, %v1801_v31, 0.0  ;;  %10493 = vmatpush3.msra.mxu1 %v509_v52 }
 0x321   : > { %v3819_v28 = vsel %vm3610_vm9, %v3141_v18, %v3818_v55  ;;  %v3685_v23 = vsel %vm3602_vm5, %v16825_v27, %v3684_v39  ;;  %v2841_v7 = vrot.slane %v2840_v46, 2  ;;  %v3256_v13 = vmax.f32 %v3254_v40, %v3255_v4  ;;  %v12829_v4 = vpop.permute.xlu1 %2407 }
 0x322   : > { %3841 = vrot.lane.b32.xlu0 %v3819_v28, %s11094_s28  ;;  %v3686_v8 = vsel %vm3604_vm6, %v12637_v3, %v3685_v23  ;;  %v1800_v20 = vmul.f32 %v12625_v37, %v16826_v35  ;;  %v3481_v26 = vrot.slane %v3480_v9, 2  ;;  %v3499_v57 = vsel %vm1165_vm2, %v3081_v0, 0.0 }
 0x323   : > { %v16828_v31 = vrot.slane %v16827_v1, 1  ;;  %v3687_v29 = vsel %vm3606_vm8, %v12571_v10, %v3686_v8  ;;  %v2211_v19 = vadd.f32 %v2210_v60, %v2209_v34  ;;  %v1996_v30 = vrot.slane %v1995_v62, 4 }
 0x324   : > { %v2220_v40 = vrot.slane %v2219_v33, 4  ;;  %v3688_v3 = vsel %vm3608_vm7, %v12706_v2, %v3687_v29  ;;  %v1979_v37 = vrot.slane %v12809_v12, 1  ;;  %v2204_v52 = vadd.f32 %v2203_v17, %v2202_v42 }
 0x325   : > { %v1973_v18 = vmax.f32 %v16827_v1, %v16828_v31  ;;  %v2618_v55 = vmax.f32 %v2616_v44, %v2617_v58  ;;  %v2842_v39 = vadd.f32 %v2841_v7, %v2840_v46  ;;  %v3500_v28 = vrot.slane %v3499_v57, 4 }
 0x326   : > { %v2212_v10 = vsel %vm1165_vm2, %v1800_v20, 0.0  ;;  %v3757_v34 = vsel %vm3602_vm5, %v12501_v36, %v12523_v15  ;;  %v3257_v60 = vrot.slane %v3256_v13, 2  ;;  %v3482_v2 = vadd.f32 %v3481_v26, %v3480_v9  ;;  %v16830_v26 = vld [vmem:[#allocation44_spill] sm:$0xff] }
 0x327   : > { %v3689_v11 = vsel %vm3610_vm9, %v1973_v18, %v3688_v3  ;;  %v3275_v27 = vsel %vm1165_vm2, %v3081_v0, -inf  ;;  %v3758_v42 = vsel %vm3604_vm6, %v12654_v53, %v3757_v34  ;;  %v1997_v44 = vmax.f32 %v1995_v62, %v1996_v30  ;;  %v16829_v62 = vld [vmem:[#allocation57_spill] sm:$0xff] }
 0x328   : > { %3701 = vrot.lane.b32.xlu0 %v3689_v11, %s11092_s26  ;;  %v2221_v17 = vadd.f32 %v2220_v40, %v2219_v33  ;;  %v2613_v46 = vmax.f32 %v12688_v56, %v2612_v41  ;;  %v3759_v58 = vsel %vm3606_vm8, %v12586_v47, %v3758_v42  ;;  %v1988_v23 = vsel %vm1165_vm2, %v1800_v20, -inf  ;;  %v12855_v41 = vpop.permute.xlu1 %3047 }
 0x329   : > { %v2213_v7 = vrot.slane %v2212_v10, 4  ;;  %v3760_v36 = vsel %vm3608_vm7, %v12765_v61, %v3759_v58  ;;  %v3080_v15 = vmul.f32 %v12645_v25, %v16826_v35  ;;  %v3276_v9 = vrot.slane %v3275_v27, 4 }
 0x32a   : > { %v3501_v53 = vadd.f32 %v3500_v28, %v3499_v57  ;;  %v3761_v0 = vsel %vm3610_vm9, %v2613_v46, %v3760_v36  ;;  %v3829_v56 = vsel %vm3602_vm5, %v16829_v62, %v12555_v6  ;;  %v2843_v47 = vrot.slane %v2842_v39, 1 }
 0x32b   : > { %v3258_v33 = vmax.f32 %v3256_v13, %v3257_v60  ;;  %v3483_v8 = vrot.slane %v3482_v2, 1  ;;  %v3830_v61 = vsel %vm3604_vm6, %v12703_v50, %v3829_v56  ;;  %v1998_v20 = vrot.slane %v1997_v44, 2  ;;  %v16832_v13 = vld [vmem:[#allocation70_spill] sm:$0xff] }
 0x32c   : > { %3773 = vrot.lane.b32.xlu0 %v3761_v0, %s11093_s27  ;;  %v1989_v25 = vrot.slane %v1988_v23, 4  ;;  %v16831_v57 = vrot.slane %v16830_v26, 1  ;;  %v3831_v31 = vsel %vm3606_vm8, %v12603_v16, %v3830_v61  ;;  %v2222_v6 = vrot.slane %v2221_v17, 2 }
 0x32d   : > { %v2214_v18 = vadd.f32 %v2213_v7, %v2212_v10  ;;  %v3492_v29 = vsel %vm1165_vm2, %v3080_v15, 0.0  ;;  %v3832_v30 = vsel %vm3608_vm7, %v16832_v13, %v3831_v31  ;;  %v1987_v50 = vmax.f32 %v12761_v45, %v1986_v21  ;;  %v12874_v7 = vpop.permute.xlu1 %995  ;;  %v16837_v31 = vld [vmem:[#allocation88_spill] sm:$0xff] }
 0x32e   : > { %v3253_v1 = vmax.f32 %v16830_v26, %v16831_v57  ;;  %v3277_v40 = vmax.f32 %v3275_v27, %v3276_v9  ;;  %v3502_v3 = vrot.slane %v3501_v53, 2  ;;  %v1980_v28 = vmax.f32 %v12809_v12, %v1979_v37  ;;  %v16835_v26 = vld [vmem:[#allocation34_spill] sm:$0xff] }
 0x32f   : > { %v2278_v34 = vmul.f32 0.125, %v2204_v52  ;;  %v2619_v60 = vrot.slane %v2618_v55, 1  ;;  %v2844_v16 = vadd.f32 %v2843_v47, %v2842_v39  ;;  %v2279_v10 = vmul.f32 0.125, %v2211_v19  ;;  %v16834_v52 = vld [vmem:[#allocation31_spill] sm:$0xff] }
 0x330   : > { %v3833_v11 = vsel %vm3610_vm9, %v3253_v1, %v3832_v30  ;;  %v3259_v42 = vrot.slane %v3258_v33, 1  ;;  %v1990_v46 = vmax.f32 %v1988_v23, %v1989_v25  ;;  %v3493_v58 = vrot.slane %v3492_v29, 4 }
 0x331   : > { %3845 = vrot.lane.b32.xlu0 %v3833_v11, %s11094_s28  ;;  %v3484_v36 = vadd.f32 %v3483_v8, %v3482_v2  ;;  %v1999_v0 = vmax.f32 %v1997_v44, %v1998_v20  ;;  %v2223_v45 = vadd.f32 %v2222_v6, %v2221_v17  ;;  %v2215_v21 = vrot.slane %v2214_v18, 2  ;;  %v12893_v1 = vpop.permute.xlu1 %1000 }
 0x332   : > { %v16833_v27 = vrot.slane %v12618_v59, 1  ;;  %v3278_v12 = vrot.slane %v3277_v40, 2  ;;  %v3503_v37 = vadd.f32 %v3502_v3, %v3501_v53  ;;  %v3083_v39 = vmul.f32 %v12670_v43, %v16834_v52 }
 0x333   : > { %v12884_v19 = vsel %vm3598_vm3, %v1987_v50, %v1980_v28  ;;  %v12887_v23 = vsel %vm3598_vm3, %v2279_v10, %v2278_v34  ;;  %v2620_v2 = vmax.f32 %v2618_v55, %v2619_v60  ;;  %v2918_v44 = vmul.f32 0.125, %v2844_v16  ;;  %v16836_v55 = vld [vmem:[#allocation87_spill] sm:$0xff] }
 0x334   : > { %v12879_v9 = vadd.f32 %v16833_v27, %v12618_v59  ;;  %v3260_v17 = vmax.f32 %v3258_v33, %v3259_v42  ;;  %v1991_v62 = vrot.slane %v1990_v46, 2  ;;  %v3268_v56 = vsel %vm1165_vm2, %v3080_v15, -inf }
 0x335   : > { %v3494_v47 = vadd.f32 %v3493_v58, %v3492_v29  ;;  %v3558_v59 = vmul.f32 0.125, %v3484_v36  ;;  %v2000_v8 = vrot.slane %v1999_v0, 1  ;;  %v2224_v61 = vrot.slane %v2223_v45, 1  ;;  %v16838_v29 = vld [vmem:[#allocation91_spill] sm:$0xff] }
 0x336   : > { %v2216_v53 = vadd.f32 %v2215_v21, %v2214_v18  ;;  %v3279_v20 = vmax.f32 %v3277_v40, %v3278_v12  ;;  %v3504_v25 = vrot.slane %v3503_v37, 1  ;;  %v3513_v43 = vsel %vm1165_vm2, %v3083_v39, 0.0  ;;  %v16839_v40 = vld [vmem:[#allocation92_spill] sm:$0xff] }
 0x337   : > { %v2442_v57 = vmul.f32 %v12696_v24, %v16835_v26  ;;  %v12897_v33 = vsel %vm3598_vm3, %v16836_v55, %v2620_v2  ;;  %v12901_v15 = vsel %vm3598_vm3, %v16837_v31, %v2918_v44  ;;  %v3269_v6 = vrot.slane %v3268_v56, 4 }
 0x338   : > { %v3082_v18 = vmul.f32 %v12725_v48, %v16835_v26  ;;  %v12907_v13 = vsel %vm3598_vm3, %v16838_v29, %v3260_v17  ;;  %v1992_v30 = vmax.f32 %v1990_v46, %v1991_v62  ;;  %v3495_v24 = vrot.slane %v3494_v47, 2 }
 0x339   : > { %v3289_v50 = vsel %vm1165_vm2, %v3083_v39, -inf  ;;  %v12912_v3 = vsel %vm3598_vm3, %v16839_v40, %v3558_v59  ;;  %v12914_v11 = vmax.f32 %v1999_v0, %v2000_v8  ;;  %v2217_v28 = vrot.slane %v2216_v53, 1  ;;  %v16840_v0 = vld [vmem:[#allocation66_spill] sm:$0xff] }
 0x33a   : > { %v3514_v34 = vrot.slane %v3513_v43, 4  ;;  %v2225_v60 = vadd.f32 %v2224_v61, %v2223_v45  ;;  %v3280_v16 = vrot.slane %v3279_v20, 1  ;;  %v3505_v10 = vadd.f32 %v3504_v25, %v3503_v37  ;;  %v12925_v45 = vpop.permute.xlu1 %1055 }
 0x33b   : > { %v2642_v48 = vsel %vm1165_vm2, %v2442_v57, -inf  ;;  %v3270_v42 = vmax.f32 %v3268_v56, %v3269_v6  ;;  %v3290_v58 = vrot.slane %v3289_v50, 4  ;;  %v2866_v46 = vsel %vm1165_vm2, %v2442_v57, 0.0 }
 0x33c   : > { %v3506_v36 = vsel %vm1165_vm2, %v3082_v18, 0.0  ;;  %v1993_v21 = vrot.slane %v1992_v30, 1  ;;  %v3496_v27 = vadd.f32 %v3495_v24, %v3494_v47  ;;  %v2445_v12 = vmul.f32 %v12759_v14, %v16748_v63 }
 0x33d   : > { %v12923_v39 = vmul.f32 %v12797_v51, %v16840_v0  ;;  %v2218_v37 = vadd.f32 %v2217_v28, %v2216_v53  ;;  %v3515_v2 = vadd.f32 %v3514_v34, %v3513_v43  ;;  %v2643_v44 = vrot.slane %v2642_v48, 4 }
 0x33e   : > { %v12929_v17 = vmul.f32 %v12829_v4, %v16840_v0  ;;  %v12931_v62 = vmul.f32 0.125, %v2225_v60  ;;  %v2867_v56 = vrot.slane %v2866_v46, 4  ;;  %v3507_v47 = vrot.slane %v3506_v36, 4  ;;  %v12942_v28 = vpop.permute.xlu1 %1005 }
 0x33f   : > { %v2240_v14 = vsel %vm1165_vm2, %v12923_v39, 0.0  ;;  %v12935_v59 = vmax.f32 %v3279_v20, %v3280_v16  ;;  %v12937_v51 = vmul.f32 0.125, %v3505_v10  ;;  %v3271_v8 = vrot.slane %v3270_v42, 2 }
 0x340   : > { %v3291_v61 = vmax.f32 %v3289_v50, %v3290_v58  ;;  %v3497_v53 = vrot.slane %v3496_v27, 1  ;;  %v2887_v25 = vsel %vm1165_vm2, %v2445_v12, 0.0  ;;  %v2241_v43 = vrot.slane %v2240_v14, 4 }
 0x341   : > { %v2880_v4 = vsel %vm1165_vm2, %v12929_v17, 0.0  ;;  %v1994_v57 = vmax.f32 %v1992_v30, %v1993_v21  ;;  %v2280_v55 = vmul.f32 0.125, %v2218_v37  ;;  %v3516_v31 = vrot.slane %v3515_v2, 2  ;;  %v16841_v30 = vld [vmem:[#allocation48_spill] sm:$0xff] }
 0x342   : > { %v2644_v6 = vmax.f32 %v2642_v48, %v2643_v44  ;;  %v2868_v29 = vadd.f32 %v2867_v56, %v2866_v46  ;;  %v3508_v24 = vadd.f32 %v3507_v47, %v3506_v36  ;;  %v2242_v40 = vadd.f32 %v2241_v43, %v2240_v14  ;;  %v16842_v21 = vld [vmem:[#allocation52_spill] sm:$0xff] }
 0x343   : > { %v2881_v20 = vrot.slane %v2880_v4, 4  ;;  %v3272_v34 = vmax.f32 %v3270_v42, %v3271_v8  ;;  %v3292_v60 = vrot.slane %v3291_v61, 2  ;;  %v2888_v50 = vrot.slane %v2887_v25, 4 }
 0x344   : > { %v12946_v16 = vmul.f32 %v12855_v41, %v16840_v0  ;;  %v3498_v10 = vadd.f32 %v3497_v53, %v3496_v27  ;;  %v2243_v58 = vrot.slane %v2242_v40, 2  ;;  %v12951_v48 = vsel %vm3602_vm5, %v16842_v21, %v16841_v30  ;;  %v16843_v53 = vld [vmem:[#allocation7_spill] sm:$0xff] }
 0x345   : > { %v2882_v63 = vadd.f32 %v2881_v20, %v2880_v4  ;;  %v12955_v46 = vsel %vm3600_vm4, %v1994_v57, %v12884_v19  ;;  %v3517_v36 = vadd.f32 %v3516_v31, %v3515_v2  ;;  %v3282_v42 = vsel %vm1165_vm2, %v3082_v18, -inf  ;;  %v12966_v18 = vpop.permute.xlu1 %1065 }
 0x346   : > { %v3520_v37 = vsel %vm1165_vm2, %v12946_v16, 0.0  ;;  %v2645_v41 = vrot.slane %v2644_v6, 2  ;;  %v2869_v44 = vrot.slane %v2868_v29, 2  ;;  %v3509_v27 = vrot.slane %v3508_v24, 2 }
 0x347   : > { %v2244_v56 = vadd.f32 %v2243_v58, %v2242_v40  ;;  %v2889_v47 = vadd.f32 %v2888_v50, %v2887_v25  ;;  %v2883_v14 = vrot.slane %v2882_v63, 2  ;;  %v3521_v8 = vrot.slane %v3520_v37, 4 }
 0x348   : > { %v12962_v43 = vmul.f32 %v12874_v7, %v16843_v53  ;;  %v3273_v4 = vrot.slane %v3272_v34, 1  ;;  %v3560_v19 = vmul.f32 0.125, %v3498_v10  ;;  %v12964_v57 = vmax.f32 %v3291_v61, %v3292_v60 }
 0x349   : > { %v3283_v2 = vrot.slane %v3282_v42, 4  ;;  %v3518_v31 = vrot.slane %v3517_v36, 1  ;;  %v2245_v20 = vrot.slane %v2244_v56, 1  ;;  %v3522_v30 = vadd.f32 %v3521_v8, %v3520_v37 }
 0x34a   : > { %v1194_v40 = vsel %vm1165_vm2, %v12962_v43, -inf  ;;  %v3985_v25 = vsel %vm3600_vm4, %v2280_v55, %v12887_v23  ;;  %v12972_v50 = vmax.f32 %v2644_v6, %v2645_v41  ;;  %v2870_v7 = vadd.f32 %v2869_v44, %v2868_v29 }
 0x34b   : > { %v2663_v58 = vsel %vm1165_vm2, %v2445_v12, -inf  ;;  %v3510_v10 = vadd.f32 %v3509_v27, %v3508_v24  ;;  %v2890_v61 = vrot.slane %v2889_v47, 2  ;;  %v2884_v60 = vadd.f32 %v2883_v14, %v2882_v63 }
 0x34c   : > { %v1195_v21 = vrot.slane %v1194_v40, 4  ;;  %v12975_v53 = vmax.f32 %v3272_v34, %v3273_v4  ;;  %v12978_v37 = vmax.f32 %v3282_v42, %v3283_v2  ;;  %v3523_v8 = vrot.slane %v3522_v30, 2  ;;  %v12987_v34 = vpop.permute.xlu1 %1100 }
 0x34d   : > { %v12982_v52 = vsel %vm3600_vm4, %v3560_v19, %v12912_v3  ;;  %v3519_v23 = vadd.f32 %v3518_v31, %v3517_v36  ;;  %v2246_v55 = vadd.f32 %v2245_v20, %v2244_v56  ;;  %v2647_v12 = vrot.slane %v12972_v50, 1  ;;  %v13002_v20 = vpop.permute.xlu0 %1110 }
 0x34e   : > { %v1196_v6 = vmax.f32 %v1194_v40, %v1195_v21  ;;  %v2871_v29 = vrot.slane %v2870_v7, 1  ;;  %v2664_v24 = vrot.slane %v2663_v58, 4  ;;  %v2016_v63 = vsel %vm1165_vm2, %v12923_v39, -inf }
 0x34f   : > { %v3511_v41 = vrot.slane %v3510_v10, 1  ;;  %v2891_v42 = vadd.f32 %v2890_v61, %v2889_v47  ;;  %v2885_v44 = vrot.slane %v2884_v60, 1  ;;  %v3524_v3 = vadd.f32 %v3523_v8, %v3522_v30  ;;  %v13000_v47 = vld [vmem:[%s16254_s3 + $0x18] sm:$0xff] }
 0x350   : > { %v1197_v27 = vrot.slane %v1196_v6, 2  ;;  %v16844_v36 = vrot.slane %v12457_v22, 1  ;;  %v3986_v4 = vsel %vm3602_vm5, %v12931_v62, %v3985_v25  ;;  %v12995_v19 = vmul.f32 0.125, %v3519_v23  ;;  %v16846_v62 = vld [vmem:[#allocation35_spill] sm:$0xff]  ;;  %10500 = vmatprep.subr.mxu1 %v13000_v47 }
 0x351   : > { %v2017_v2 = vrot.slane %v2016_v63, 4  ;;  %v2284_v39 = vmul.f32 0.125, %v2246_v55  ;;  %v2872_v30 = vadd.f32 %v2871_v29, %v2870_v7  ;;  %v2656_v40 = vsel %vm1165_vm2, %v12929_v17, -inf  ;;  %v13017_v29 = vpop.permute.xlu1 %1045 }
 0x352   : > { %v2253_v56 = vadd.f32 %v16844_v36, %v12457_v22  ;;  %v1198_v31 = vmax.f32 %v1196_v6, %v1197_v27  ;;  %v16845_v22 = vld [vmem:[#allocation107_spill] sm:$0xff]  ;;  %v13010_v25 = vmul.f32 %v12925_v45, %v16846_v62  ;;  %v3512_v21 = vadd.f32 %v3511_v41, %v3510_v10  ;;  %v16847_v36 = vld [vmem:[#allocation102_spill] sm:$0xff] }
 0x353   : > { %v3987_v61 = vsel %vm3604_vm6, %v16845_v22, %v3986_v4  ;;  %v2892_v8 = vrot.slane %v2891_v42, 1  ;;  %v2886_v23 = vadd.f32 %v2885_v44, %v2884_v60  ;;  %v3525_v6 = vrot.slane %v3524_v3, 1  ;;  %v16862_v62 = vld [vmem:[#allocation19_spill] sm:$0xff] }
 0x354   : > { %v1199_v55 = vrot.slane %v1198_v31, 1  ;;  %v2285_v27 = vmul.f32 0.125, %v2253_v56  ;;  %v3988_v7 = vsel %vm3606_vm8, %v16847_v36, %v3987_v61  ;;  %v1278_v17 = vsel %vm1165_vm2, %v13010_v25, -inf  ;;  %v16848_v61 = vld [vmem:[#allocation6_spill] sm:$0xff] }
 0x355   : > { %v2018_v4 = vmax.f32 %v2016_v63, %v2017_v2  ;;  %v2657_v22 = vrot.slane %v2656_v40, 4  ;;  %v3989_v0 = vsel %vm3608_vm7, %v2284_v39, %v3988_v7  ;;  %v2922_v14 = vmul.f32 0.125, %v2872_v30  ;;  %v13032_v39 = vpop.permute.xlu0 %1115 }
 0x356   : > { %v1200_v45 = vmax.f32 %v1198_v31, %v1199_v55  ;;  %v13020_v10 = vmax.f32 %v2663_v58, %v2664_v24  ;;  %v3990_v60 = vsel %vm3610_vm9, %v2285_v27, %v3989_v0  ;;  %v1279_v41 = vrot.slane %v1278_v17, 4  ;;  %v16849_v0 = vld [vmem:[#allocation100_spill] sm:$0xff] }
 0x357   : > { %v3296_v44 = vsel %vm1165_vm2, %v12946_v16, -inf  ;;  %v1138_v63 = vmul.f32 %v12893_v1, %v16848_v61  ;;  %3997 = vrot.lane.b32.xlu1 %v3990_v60, %s11092_s26  ;;  %v2893_v2 = vadd.f32 %v2892_v8, %v2891_v42  ;;  %v2924_v58 = vmul.f32 0.125, %v2886_v23  ;;  %v13042_v23 = vpop.permute.xlu1 %1105 }
 0x358   : > { %v13027_v56 = vsel %vm3604_vm6, %v1200_v45, %v12951_v48  ;;  %v3526_v24 = vadd.f32 %v3525_v6, %v3524_v3  ;;  %v1280_v31 = vmax.f32 %v1278_v17, %v1279_v41  ;;  %v4057_v30 = vsel %vm3600_vm4, %v16849_v0, %v12901_v15  ;;  %v16850_v48 = vld [vmem:[#allocation97_spill] sm:$0xff]  ;;  %v16851_v6 = vld [vmem:[#allocation104_spill] sm:$0xff]  ;;  %v16852_v15 = vld [vmem:[#allocation15_spill] sm:$0xff] }
 0x359   : > { %v3562_v16 = vmul.f32 0.125, %v3512_v21  ;;  %v2019_v55 = vrot.slane %v2018_v4, 2  ;;  %v2658_v27 = vmax.f32 %v2656_v40, %v2657_v22  ;;  %v4058_v36 = vsel %vm3602_vm5, %v16850_v48, %v4057_v30  ;;  %v16853_v40 = vld [vmem:[#allocation109_spill] sm:$0xff] }
 0x35a   : > { %v3297_v7 = vrot.slane %v3296_v44, 4  ;;  %v1418_v1 = vsel %vm1165_vm2, %v12962_v43, 0.0  ;;  %v1281_v42 = vrot.slane %v1280_v31, 2  ;;  %v4059_v8 = vsel %vm3604_vm6, %v2922_v14, %v4058_v36 }
 0x35b   : > { %v2925_v3 = vmul.f32 0.125, %v2893_v2  ;;  %v4060_v17 = vsel %vm3606_vm8, %v16851_v6, %v4059_v8  ;;  %v13048_v21 = vmul.f32 %v12942_v28, %v16852_v15  ;;  %v16854_v22 = vrot.slane %v16853_v40, 1  ;;  %v13059_v28 = vpop.permute.xlu0 %1120 }
 0x35c   : > { %v3564_v60 = vmul.f32 0.125, %v3526_v24  ;;  %v1425_v43 = vsel %vm1165_vm2, %v1138_v63, 0.0  ;;  %v1282_v41 = vmax.f32 %v1280_v31, %v1281_v42  ;;  %v4061_v14 = vsel %vm3608_vm7, %v2924_v58, %v4060_v17  ;;  %v16855_v31 = vld [vmem:[#allocation22_spill] sm:$0xff]  ;;  %v13072_v17 = vpop.permute.xlu1 %1075 }
 0x35d   : > { %v3533_v45 = vadd.f32 %v16854_v22, %v16853_v40  ;;  %v2020_v0 = vmax.f32 %v2018_v4, %v2019_v55  ;;  %v1419_v30 = vrot.slane %v1418_v1, 4  ;;  %v4062_v2 = vsel %vm3610_vm9, %v2925_v3, %v4061_v14 }
 0x35e   : > { %v4130_v48 = vsel %vm3602_vm5, %v12937_v51, %v12982_v52  ;;  %v1201_v36 = vsel %vm1165_vm2, %v1138_v63, -inf  ;;  %v1283_v8 = vrot.slane %v1282_v41, 1  ;;  %4069 = vrot.lane.b32.xlu1 %v4062_v2, %s11093_s27  ;;  %v1151_v58 = vmul.f32 %v12966_v18, %v16855_v31  ;;  %v16856_v2 = vld [vmem:[#allocation115_spill] sm:$0xff] }
 0x35f   : > { %v4131_v24 = vsel %vm3604_vm6, %v3562_v16, %v4130_v48  ;;  %v1426_v4 = vrot.slane %v1425_v43, 4  ;;  %v1432_v55 = vsel %vm1165_vm2, %v13048_v21, 0.0  ;;  %v3565_v42 = vmul.f32 0.125, %v3533_v45 }
 0x360   : > { %v4132_v52 = vsel %vm3606_vm8, %v12995_v19, %v4131_v24  ;;  %v3298_v51 = vmax.f32 %v3296_v44, %v3297_v7  ;;  %v1284_v3 = vmax.f32 %v1282_v41, %v1283_v8  ;;  %v1292_v6 = vsel %vm1165_vm2, %v1151_v58, -inf  ;;  %v16857_v19 = vld [vmem:[#allocation76_spill] sm:$0xff]  ;;  %v16858_v44 = vld [vmem:[#allocation43_spill] sm:$0xff]  ;;  %v13086_v8 = vpop.permute.xlu0 %1125 }
 0x361   : > { %v4133_v63 = vsel %vm3608_vm7, %v3564_v60, %v4132_v52  ;;  %v2659_v16 = vrot.slane %v2658_v27, 2  ;;  %v1420_v40 = vadd.f32 %v1419_v30, %v1418_v1  ;;  %v1293_v22 = vrot.slane %v1292_v6, 4 }
 0x362   : > { %v4134_v18 = vsel %vm3610_vm9, %v3565_v42, %v4133_v63  ;;  %v1202_v14 = vrot.slane %v1201_v36, 4  ;;  %v3619_v45 = vsel %vm3598_vm3, %v16856_v2, %v1284_v3  ;;  %v1433_v48 = vrot.slane %v1432_v55, 4  ;;  %v16860_v63 = vld [vmem:[#allocation75_spill] sm:$0xff] }
 0x363   : > { %4141 = vrot.lane.b32.xlu1 %v4134_v18, %s11094_s28  ;;  %v3821_v7 = vsel %vm3600_vm4, %v16858_v44, %v16857_v19  ;;  %v13084_v60 = vmax.f32 %v12972_v50, %v2647_v12  ;;  %v2021_v1 = vrot.slane %v2020_v0, 1  ;;  %v1427_v41 = vadd.f32 %v1426_v4, %v1425_v43  ;;  %v13101_v44 = vpop.permute.xlu1 %1080 }
 0x364   : > { %v1294_v30 = vmax.f32 %v1292_v6, %v1293_v22  ;;  %v16859_v24 = vrot.slane %v12978_v37, 2  ;;  %v3299_v52 = vrot.slane %v3298_v51, 2  ;;  %v1502_v3 = vsel %vm1165_vm2, %v13010_v25, 0.0  ;;  %v16861_v6 = vld [vmem:[#allocation47_spill] sm:$0xff] }
 0x365   : > { %v3822_v18 = vsel %vm3602_vm5, %v16860_v63, %v3821_v7  ;;  %v2666_v2 = vrot.slane %v13020_v10, 2  ;;  %v2660_v50 = vmax.f32 %v2658_v27, %v2659_v16  ;;  %v1421_v12 = vrot.slane %v1420_v40, 2 }
 0x366   : > { %v3286_v42 = vmax.f32 %v12978_v37, %v16859_v24  ;;  %v1295_v19 = vrot.slane %v1294_v30, 2  ;;  %v1203_v43 = vmax.f32 %v1201_v36, %v1202_v14  ;;  %v1434_v4 = vadd.f32 %v1433_v48, %v1432_v55  ;;  %v16864_v36 = vld [vmem:[#allocation13_spill] sm:$0xff] }
 0x367   : > { %v3823_v22 = vsel %vm3604_vm6, %v16861_v6, %v3822_v18  ;;  %v3692_v37 = vsel %vm3602_vm5, %v12914_v11, %v12955_v46  ;;  %v2022_v25 = vmax.f32 %v2020_v0, %v2021_v1  ;;  %v1428_v24 = vrot.slane %v1427_v41, 2  ;;  %v16865_v14 = vld [vmem:[#allocation105_spill] sm:$0xff]  ;;  %v16866_v46 = vld [vmem:[#allocation96_spill] sm:$0xff]  ;;  %v13113_v1 = vpop.permute.xlu0 %3697  ;;  %v13124_v15 = vpop.permute.xlu1 %1085 }
 0x368   : > { %v1503_v31 = vrot.slane %v1502_v3, 4  ;;  %v1296_v7 = vmax.f32 %v1294_v30, %v1295_v19  ;;  %v3300_v63 = vmax.f32 %v3298_v51, %v3299_v52  ;;  %v16863_v27 = vrot.slane %v16862_v62, 1 }
 0x369   : > { %v3824_v55 = vsel %vm3606_vm8, %v16864_v36, %v3823_v22  ;;  %v3693_v48 = vsel %vm3604_vm6, %v16865_v14, %v3692_v37  ;;  %v1422_v18 = vadd.f32 %v1421_v12, %v1420_v40  ;;  %v1516_v11 = vsel %vm1165_vm2, %v1151_v58, 0.0 }
 0x36a   : > { %v3197_v16 = vmax.f32 %v16862_v62, %v16863_v27  ;;  %v1297_v6 = vrot.slane %v1296_v7, 1  ;;  %v3825_v0 = vsel %vm3608_vm7, %v16866_v46, %v3824_v55  ;;  %v1204_v51 = vrot.slane %v1203_v43, 2  ;;  %v16867_v62 = vld [vmem:[#allocation101_spill] sm:$0xff]  ;;  %v16868_v55 = vld [vmem:[#allocation106_spill] sm:$0xff] }
 0x36b   : > { %v1435_v30 = vrot.slane %v1434_v4, 2  ;;  %v3694_v19 = vsel %vm3606_vm8, %v16867_v62, %v3693_v48  ;;  %v1429_v22 = vadd.f32 %v1428_v24, %v1427_v41  ;;  %v1504_v27 = vadd.f32 %v1503_v31, %v1502_v3 }
 0x36c   : > { %v3826_v52 = vsel %vm3610_vm9, %v3197_v16, %v3825_v0  ;;  %v1298_v36 = vmax.f32 %v1296_v7, %v1297_v6  ;;  %v3695_v40 = vsel %vm3608_vm7, %v2022_v25, %v3694_v19  ;;  %v3287_v58 = vrot.slane %v3286_v42, 1 }
 0x36d   : > { %3843 = vrot.lane.b32.xlu1 %v3826_v52, %s11094_s28  ;;  %v2667_v12 = vmax.f32 %v13020_v10, %v2666_v2  ;;  %v1517_v37 = vrot.slane %v1516_v11, 4  ;;  %v16869_v14 = vrot.slane %v16868_v55, 1  ;;  %v2661_v16 = vrot.slane %v2660_v50, 1  ;;  %v16870_v10 = vld [vmem:[#allocation26_spill] sm:$0xff]  ;;  %v16871_v52 = vld [vmem:[#allocation99_spill] sm:$0xff] }
 0x36e   : > { %v3301_v0 = vrot.slane %v3300_v63, 1  ;;  %v1208_v31 = vsel %vm1165_vm2, %v13048_v21, -inf  ;;  %v13129_v41 = vsel %vm3600_vm4, %v1298_v36, %v3619_v45  ;;  %v1423_v3 = vrot.slane %v1422_v18, 1  ;;  %v13138_v21 = vpop.permute.xlu0 %3769 }
 0x36f   : > { %v2029_v46 = vmax.f32 %v16868_v55, %v16869_v14  ;;  %v1436_v25 = vadd.f32 %v1435_v30, %v1434_v4  ;;  %v1147_v2 = vmul.f32 %v13017_v29, %v16870_v10  ;;  %v1205_v7 = vmax.f32 %v1203_v43, %v1204_v51 }
 0x370   : > { %v1430_v48 = vrot.slane %v1429_v22, 1  ;;  %v1505_v6 = vrot.slane %v1504_v27, 2  ;;  %v3763_v62 = vsel %vm3600_vm4, %v16871_v52, %v12897_v33  ;;  %v3835_v45 = vsel %vm3600_vm4, %v12975_v53, %v12907_v13  ;;  %v13149_v52 = vpop.permute.xlu1 %1090 }
 0x371   : > { %v3696_v24 = vsel %vm3610_vm9, %v2029_v46, %v3695_v40  ;;  %v16872_v4 = vrot.slane %v12964_v57, 1  ;;  %v1209_v29 = vrot.slane %v1208_v31, 4  ;;  %v1518_v43 = vadd.f32 %v1517_v37, %v1516_v11  ;;  %v16873_v46 = vld [vmem:[#allocation95_spill] sm:$0xff] }
 0x372   : > { %3703 = vrot.lane.b32.xlu1 %v3696_v24, %s11092_s26  ;;  %v3288_v51 = vmax.f32 %v3286_v42, %v3287_v58  ;;  %v2668_v19 = vrot.slane %v2667_v12, 1  ;;  %v2662_v36 = vmax.f32 %v2660_v50, %v2661_v16  ;;  %v3302_v40 = vmax.f32 %v3300_v63, %v3301_v0  ;;  %v16874_v37 = vld [vmem:[#allocation103_spill] sm:$0xff] }
 0x373   : > { %v3295_v30 = vmax.f32 %v12964_v57, %v16872_v4  ;;  %v1424_v55 = vadd.f32 %v1423_v3, %v1422_v18  ;;  %v1437_v14 = vrot.slane %v1436_v25, 1  ;;  %v1488_v33 = vsel %vm1165_vm2, %v1147_v2, 0.0  ;;  %v3992_v3 = vpop.permute.xlu0 %3991 }
 0x374   : > { %v3764_v24 = vsel %vm3602_vm5, %v16873_v46, %v3763_v62  ;;  %v1206_v13 = vrot.slane %v1205_v7, 1  ;;  %v1431_v53 = vadd.f32 %v1430_v48, %v1429_v22  ;;  %v1506_v10 = vadd.f32 %v1505_v6, %v1504_v27  ;;  %v16875_v22 = vld [vmem:[#allocation62_spill] sm:$0xff]  ;;  %v16876_v27 = vld [vmem:[#allocation53_spill] sm:$0xff] }
 0x375   : > { %v3765_v57 = vsel %vm3604_vm6, %v13084_v60, %v3764_v24  ;;  %v1210_v11 = vmax.f32 %v1208_v31, %v1209_v29  ;;  %v1519_v42 = vrot.slane %v1518_v43, 2  ;;  %v1264_v50 = vsel %vm1165_vm2, %v1147_v2, -inf }
 0x376   : > { %v3836_v63 = vsel %vm3602_vm5, %v12935_v59, %v3835_v45  ;;  %v1489_v18 = vrot.slane %v1488_v33, 4  ;;  %v2669_v58 = vmax.f32 %v2667_v12, %v2668_v19  ;;  %v3766_v16 = vsel %vm3606_vm8, %v16874_v37, %v3765_v57 }
 0x377   : > { %v3837_v0 = vsel %vm3604_vm6, %v3288_v51, %v3836_v63  ;;  %v3901_v48 = vsel %vm3602_vm5, %v16876_v27, %v16875_v22  ;;  %v1618_v60 = vmul.f32 0.125, %v1424_v55  ;;  %v1438_v31 = vadd.f32 %v1437_v14, %v1436_v25  ;;  %v16877_v51 = vld [vmem:[#allocation40_spill] sm:$0xff]  ;;  %v13171_v55 = vpop.permute.xlu1 %1130 }
 0x378   : > { %v3767_v6 = vsel %vm3608_vm7, %v2662_v36, %v3766_v16  ;;  %v13163_v2 = vmax.f32 %v1205_v7, %v1206_v13  ;;  %v1265_v62 = vrot.slane %v1264_v50, 4  ;;  %v3838_v12 = vsel %vm3606_vm8, %v3295_v30, %v3837_v0  ;;  %v16878_v14 = vld [vmem:[#allocation108_spill] sm:$0xff]  ;;  %v4064_v16 = vpop.permute.xlu0 %4063 }
 0x379   : > { %v3768_v59 = vsel %vm3610_vm9, %v2669_v58, %v3767_v6  ;;  %v1507_v45 = vrot.slane %v1506_v10, 1  ;;  %v1211_v4 = vrot.slane %v1210_v11, 2  ;;  %v3839_v29 = vsel %vm3608_vm7, %v3302_v40, %v3838_v12 }
 0x37a   : > { %3775 = vrot.lane.b32.xlu1 %v3768_v59, %s11093_s27  ;;  %v1153_v19 = vmul.f32 %v13072_v17, %v16877_v51  ;;  %v1619_v25 = vmul.f32 0.125, %v1431_v53  ;;  %v1520_v36 = vadd.f32 %v1519_v42, %v1518_v43  ;;  %v1490_v7 = vadd.f32 %v1489_v18, %v1488_v33  ;;  %v16880_v33 = vld [vmem:[#allocation39_spill] sm:$0xff] }
 0x37b   : > { %v16879_v46 = vrot.slane %v16878_v14, 1  ;;  %v3902_v30 = vsel %vm3604_vm6, %v1618_v60, %v3901_v48  ;;  %v1620_v13 = vmul.f32 0.125, %v1438_v31  ;;  %v1266_v40 = vmax.f32 %v1264_v50, %v1265_v62  ;;  %v13190_v31 = vpop.permute.xlu1 %3699 }
 0x37c   : > { %v1306_v57 = vsel %vm1165_vm2, %v1153_v19, -inf  ;;  %v1530_v63 = vsel %vm1165_vm2, %v1153_v19, 0.0  ;;  %v1508_v53 = vadd.f32 %v1507_v45, %v1506_v10  ;;  %v1212_v43 = vmax.f32 %v1210_v11, %v1211_v4  ;;  %v4136_v19 = vpop.permute.xlu0 %4135 }
 0x37d   : > { %v3309_v24 = vmax.f32 %v16878_v14, %v16879_v46  ;;  %v1307_v17 = vrot.slane %v1306_v57, 4  ;;  %v1531_v37 = vrot.slane %v1530_v63, 4  ;;  %v1154_v42 = vmul.f32 %v13101_v44, %v16880_v33 }
 0x37e   : > { %v1155_v18 = vmul.f32 %v13124_v15, %v16709_v5  ;;  %v1521_v0 = vrot.slane %v1520_v36, 1  ;;  %v1491_v22 = vrot.slane %v1490_v7, 2  ;;  %v3903_v50 = vsel %vm3606_vm8, %v1619_v25, %v3902_v30 }
 0x37f   : > { %v3840_v58 = vsel %vm3610_vm9, %v3309_v24, %v3839_v29  ;;  %v1532_v27 = vadd.f32 %v1531_v37, %v1530_v63  ;;  %v3904_v48 = vsel %vm3608_vm7, %v1620_v13, %v3903_v50  ;;  %v1313_v60 = vsel %vm1165_vm2, %v1154_v42, -inf }
 0x380   : > { %3847 = vrot.lane.b32.xlu1 %v3840_v58, %s11094_s28  ;;  %v1537_v10 = vsel %vm1165_vm2, %v1154_v42, 0.0  ;;  %v1320_v11 = vsel %vm1165_vm2, %v1155_v18, -inf  ;;  %v1267_v6 = vrot.slane %v1266_v40, 2  ;;  %v1308_v44 = vmax.f32 %v1306_v57, %v1307_v17 }
 0x381   : > { %v1533_v62 = vrot.slane %v1532_v27, 2  ;;  %v3905_v15 = vsel %vm3610_vm9, %v12601_v32, %v3904_v48  ;;  %v1314_v59 = vrot.slane %v1313_v60, 4  ;;  %v1538_v12 = vrot.slane %v1537_v10, 4 }
 0x382   : > { %v1321_v45 = vrot.slane %v1320_v11, 4  ;;  %v4147_v29 = vsel %vm1165_vm2, %v3905_v15, %v3992_v3  ;;  %v1492_v25 = vadd.f32 %v1491_v22, %v1490_v7  ;;  %v1630_v30 = vmul.f32 0.125, %v1508_v53  ;;  %v13199_v3 = vpop.permute.xlu1 %3771 }
 0x383   : > { %v1534_v4 = vadd.f32 %v1533_v62, %v1532_v27  ;;  %v4151_v14 = vsel %vm3857_vm11, %v4147_v29, %v4064_v16  ;;  %v1315_v46 = vmax.f32 %v1313_v60, %v1314_v59  ;;  %v1539_v24 = vadd.f32 %v1538_v12, %v1537_v10  ;;  %v16881_v16 = vld [vmem:[#allocation23_spill] sm:$0xff]  ;;  %v16882_v10 = vld [vmem:[#allocation116_spill] sm:$0xff] }
 0x384   : > { %v1309_v13 = vrot.slane %v1308_v44, 2  ;;  %v4155_v57 = vsel %vm3862_vm10, %v4151_v14, %v4136_v19  ;;  %v1544_v32 = vsel %vm1165_vm2, %v1155_v18, 0.0  ;;  %v1322_v17 = vmax.f32 %v1320_v11, %v1321_v45 }
 0x385   : > { %10494 = vmatprep.mubr.msk.f32.mxu1 %vm4159_vm12, %v4155_v57  ;;  %v1316_v63 = vrot.slane %v1315_v46, 2  ;;  %v1540_v58 = vrot.slane %v1539_v24, 2  ;;  %v1545_v37 = vrot.slane %v1544_v32, 4  ;;  %v1213_v42 = vrot.slane %v1212_v43, 1 }
 0x386   : > { %v1522_v7 = vadd.f32 %v1521_v0, %v1520_v36  ;;  %v1535_v22 = vrot.slane %v1534_v4, 1  ;;  %v1156_v27 = vmul.f32 %v13149_v52, %v16881_v16  ;;  %v1268_v53 = vmax.f32 %v1266_v40, %v1267_v6  ;;  %v3994_v57 = vpop.permute.xlu1 %3993 }
 0x387   : > { %v1493_v50 = vrot.slane %v1492_v25, 1  ;;  %v1541_v48 = vadd.f32 %v1540_v58, %v1539_v24  ;;  %v1546_v60 = vadd.f32 %v1545_v37, %v1544_v32  ;;  %v3913_v18 = vsel %vm3598_vm3, %v16882_v10, %v1630_v30 }
 0x388   : > { %v1310_v62 = vmax.f32 %v1308_v44, %v1309_v13  ;;  %v1327_v15 = vsel %vm1165_vm2, %v1156_v27, -inf  ;;  %v1551_v11 = vsel %vm1165_vm2, %v1156_v27, 0.0  ;;  %v1317_v59 = vmax.f32 %v1315_v46, %v1316_v63  ;;  %v16883_v46 = vld [vmem:[#allocation83_spill] sm:$0xff]  ;;  %v16884_v63 = vld [vmem:[#allocation80_spill] sm:$0xff] }
 0x389   : > { %v1542_v12 = vrot.slane %v1541_v48, 1  ;;  %v1323_v45 = vrot.slane %v1322_v17, 2  ;;  %v1547_v36 = vrot.slane %v1546_v60, 2  ;;  %v1632_v0 = vmul.f32 0.125, %v1522_v7 }
 0x38a   : > { %v1536_v29 = vadd.f32 %v1535_v22, %v1534_v4  ;;  %v1328_v19 = vrot.slane %v1327_v15, 4  ;;  %v1552_v52 = vrot.slane %v1551_v11, 4  ;;  %v1214_v40 = vmax.f32 %v1212_v43, %v1213_v42  ;;  %v3996_v42 = vpop.permute.xlu0 %3995 }
 0x38b   : > { %v1269_v6 = vrot.slane %v1268_v53, 1  ;;  %v1494_v14 = vadd.f32 %v1493_v50, %v1492_v25  ;;  %v1548_v24 = vadd.f32 %v1547_v36, %v1546_v60  ;;  %v1311_v32 = vrot.slane %v1310_v62, 1  ;;  %v16885_v36 = vld [vmem:[#allocation111_spill] sm:$0xff] }
 0x38c   : > { %v1543_v30 = vadd.f32 %v1542_v12, %v1541_v48  ;;  %v1329_v44 = vmax.f32 %v1327_v15, %v1328_v19  ;;  %v1553_v13 = vadd.f32 %v1552_v52, %v1551_v11  ;;  %v1318_v58 = vrot.slane %v1317_v59, 1  ;;  %v16886_v52 = vld [vmem:[#allocation122_spill] sm:$0xff] }
 0x38d   : > { %v1324_v37 = vmax.f32 %v1322_v17, %v1323_v45  ;;  %v1549_v27 = vrot.slane %v1548_v24, 1  ;;  %v3613_v10 = vsel %vm3600_vm4, %v16884_v63, %v16883_v46  ;;  %v3914_v4 = vsel %vm3600_vm4, %v1632_v0, %v3913_v18  ;;  %v16887_v18 = vld [vmem:[#allocation113_spill] sm:$0xff] }
 0x38e   : > { %v1634_v7 = vmul.f32 0.125, %v1536_v29  ;;  %v1330_v22 = vrot.slane %v1329_v44, 2  ;;  %v1554_v43 = vrot.slane %v1553_v13, 2  ;;  %v1270_v25 = vmax.f32 %v1268_v53, %v1269_v6  ;;  %v4066_v29 = vpop.permute.xlu1 %4065 }
 0x38f   : > { %v1628_v50 = vmul.f32 0.125, %v1494_v14  ;;  %v1550_v60 = vadd.f32 %v1549_v27, %v1548_v24  ;;  %v3614_v48 = vsel %vm3602_vm5, %v16885_v36, %v3613_v10  ;;  %v1312_v15 = vmax.f32 %v1310_v62, %v1311_v32  ;;  %v16888_v14 = vld [vmem:[#allocation58_spill] sm:$0xff]  ;;  %v16889_v24 = vld [vmem:[#allocation81_spill] sm:$0xff]  ;;  %v16893_v27 = vld [vmem:[#allocation112_spill] sm:$0xff] }
 0x390   : > { %v1635_v11 = vmul.f32 0.125, %v1543_v30  ;;  %v1331_v17 = vmax.f32 %v1329_v44, %v1330_v22  ;;  %v1555_v12 = vadd.f32 %v1554_v43, %v1553_v13  ;;  %v1319_v45 = vmax.f32 %v1317_v59, %v1318_v58  ;;  %v16890_v30 = vld [vmem:[#allocation121_spill] sm:$0xff]  ;;  %v4068_v43 = vpop.permute.xlu0 %4067 }
 0x391   : > { %v1325_v19 = vrot.slane %v1324_v37, 1  ;;  %v3915_v46 = vsel %vm3602_vm5, %v16886_v52, %v3914_v4  ;;  %v3615_v0 = vsel %vm3604_vm6, %v16887_v18, %v3614_v48  ;;  %v1636_v63 = vmul.f32 0.125, %v1550_v60  ;;  %v16892_v13 = vld [vmem:[#allocation117_spill] sm:$0xff]  ;;  %v16894_v60 = vld [vmem:[#allocation114_spill] sm:$0xff] }
 0x392   : > { %v1556_v53 = vrot.slane %v1555_v12, 1  ;;  %v3916_v6 = vsel %vm3604_vm6, %v1634_v7, %v3915_v46  ;;  %v3907_v62 = vsel %vm3600_vm4, %v16889_v24, %v16888_v14  ;;  %v1332_v32 = vrot.slane %v1331_v17, 1  ;;  %v16895_v46 = vld [vmem:[#allocation118_spill] sm:$0xff]  ;;  %v4138_v24 = vpop.permute.xlu1 %4137 }
 0x393   : > { %v16891_v44 = vrot.slane %v16890_v30, 1  ;;  %v3616_v58 = vsel %vm3606_vm8, %v16892_v13, %v3615_v0  ;;  %v3908_v10 = vsel %vm3602_vm5, %v16893_v27, %v3907_v62  ;;  %v3917_v22 = vsel %vm3606_vm8, %v1635_v11, %v3916_v6 }
 0x394   : > { %v1557_v4 = vadd.f32 %v1556_v53, %v1555_v12  ;;  %v3617_v7 = vsel %vm3608_vm7, %v1270_v25, %v3616_v58  ;;  %v3909_v36 = vsel %vm3604_vm6, %v16894_v60, %v3908_v10  ;;  %v1629_v52 = vmul.f32 0.125, %v12879_v9  ;;  %v16896_v9 = vld [vmem:[#allocation120_spill] sm:$0xff]  ;;  %v16898_v58 = vld [vmem:[#allocation110_spill] sm:$0xff] }
 0x395   : > { %v1277_v59 = vmax.f32 %v16890_v30, %v16891_v44  ;;  %v3910_v18 = vsel %vm3606_vm8, %v16895_v46, %v3909_v36  ;;  %v3607_v12 = vsel %vm3606_vm8, %v13163_v2, %v13027_v56  ;;  %v1326_v0 = vmax.f32 %v1324_v37, %v1325_v19  ;;  %v16897_v2 = vld [vmem:[#allocation119_spill] sm:$0xff] }
 0x396   : > { %v1637_v11 = vmul.f32 0.125, %v1557_v4  ;;  %v3918_v25 = vsel %vm3608_vm7, %v1636_v63, %v3917_v22  ;;  %v3911_v53 = vsel %vm3608_vm7, %v1628_v50, %v3910_v18  ;;  %v3609_v14 = vsel %vm3608_vm7, %v1214_v40, %v3607_v12  ;;  %v16899_v46 = vld [vmem:[#allocation31_spill] sm:$0xff] }
 0x397   : > { %v13233_v48 = vsel %vm3610_vm9, %v1277_v59, %v3617_v7  ;;  %v3912_v6 = vsel %vm3610_vm9, %v1629_v52, %v3911_v53  ;;  %v1333_v62 = vmax.f32 %v1331_v17, %v1332_v32  ;;  %v3621_v30 = vsel %vm3602_vm5, %v16896_v9, %v13129_v41  ;;  %v4140_v32 = vpop.permute.xlu0 %4139 }
 0x398   : > { %v3919_v44 = vsel %vm3610_vm9, %v1637_v11, %v3918_v25  ;;  %v4148_v56 = vsel %vm1165_vm2, %v3912_v6, %v3994_v57  ;;  %v13252_v37 = vsel %vm3610_vm9, %v16897_v2, %v3609_v14  ;;  %v3622_v50 = vsel %vm3604_vm6, %v1312_v15, %v3621_v30  ;;  %v507_v57 = vld [vmem:[%s16254_s3 + $0x10] sm:$0xff] }
 0x399   : > { %v4149_v19 = vsel %vm1165_vm2, %v3919_v44, %v3996_v42  ;;  %v4152_v40 = vsel %vm3857_vm11, %v4148_v56, %v4066_v29  ;;  %v3623_v17 = vsel %vm3606_vm8, %v1319_v45, %v3622_v50  ;;  %v506_v42 = vld [vmem:[%s16254_s3 + $0x8] sm:$0xff]  ;;  %v505_v45 = vld [vmem:[%s16254_s3] sm:$0xff]  ;;  %v1158_v29 = vmul.f32 %v12987_v34, %v16786_v38  ;;  %v16900_v25 = vld [vmem:[#allocation36_spill] sm:$0xff] }
 0x39a   : > { %v4153_v63 = vsel %vm3857_vm11, %v4149_v19, %v4068_v43  ;;  %v4156_v41 = vsel %vm3862_vm10, %v4152_v40, %v4138_v24  ;;  %v3624_v59 = vsel %vm3608_vm7, %v1326_v0, %v3623_v17  ;;  %v1157_v27 = vmul.f32 %v16898_v58, %v16795_v49 }
 0x39b   : > { %v4157_v13 = vsel %vm3862_vm10, %v4153_v63, %v4140_v32  ;;  %v13266_v15 = vsel %vm3610_vm9, %v1333_v62, %v3624_v59  ;;  %10495 = vmatmul.mubr.msk.f32.vlgmr.msra.gmra.mxu1 %vm4159_vm12, %v4156_v41  ;;  %v1565_v10 = vsel %vm1165_vm2, %v1158_v29, 0.0  ;;  %v13291_v7 = vmul.f32 %v13002_v20, %v16818_v54 }
 0x39c   : > { %10497 = vmatprep.mubr.msk.f32.mxu1 %vm4159_vm12, %v4157_v13  ;;  %10501 = vmatpush3.msra.mxu1 %v13000_v47  ;;  %v13281_v47 = vmul.f32 %v13042_v23, %v16826_v35  ;;  %v1558_v22 = vsel %vm1165_vm2, %v1157_v27, 0.0  ;;  %v1566_v34 = vrot.slane %v1565_v10, 4  ;;  %v13295_v23 = vmul.f32 %v13032_v39, %v16835_v26  ;;  %v16901_v39 = vld [vmem:[#allocation66_spill] sm:$0xff] }
 0x39d   : > { %10502 = vmatprep.subr.mxu1 %v507_v57  ;;  %v1559_v60 = vrot.slane %v1558_v22, 4  ;;  %v1579_v36 = vsel %vm1165_vm2, %v13291_v7, 0.0  ;;  %v13301_v18 = vmul.f32 %v13059_v28, %v16899_v46  ;;  %v13307_v53 = vmul.f32 %v13171_v55, %v16900_v25 }
 0x39e   : > { %10503 = vmatpush3.msra.mxu1 %v507_v57  ;;  %v1572_v4 = vsel %vm1165_vm2, %v13281_v47, 0.0  ;;  %v1567_v52 = vadd.f32 %v1566_v34, %v1565_v10  ;;  %v1580_v11 = vrot.slane %v1579_v36, 4  ;;  %v1586_v20 = vsel %vm1165_vm2, %v13295_v23, 0.0 }
 0x39f   : > { %10504 = vmatprep.subr.mxu1 %v506_v42  ;;  %v1573_v43 = vrot.slane %v1572_v4, 4  ;;  %v1560_v0 = vadd.f32 %v1559_v60, %v1558_v22  ;;  %v13311_v6 = vmul.f32 %v13086_v8, %v16901_v39  ;;  %v1587_v24 = vrot.slane %v1586_v20, 4 }
 0x3a0   : > { %10505 = vmatpush3.msra.mxu1 %v506_v42  ;;  %v1568_v14 = vrot.slane %v1567_v52, 2  ;;  %v1593_v28 = vsel %vm1165_vm2, %v13301_v18, 0.0  ;;  %v1581_v30 = vadd.f32 %v1580_v11, %v1579_v36  ;;  %v1607_v44 = vsel %vm1165_vm2, %v13307_v53, 0.0 }
 0x3a1   : > { %10506 = vmatprep.subr.mxu1 %v505_v45  ;;  %v1574_v12 = vadd.f32 %v1573_v43, %v1572_v4  ;;  %v1561_v9 = vrot.slane %v1560_v0, 2  ;;  %v1594_v56 = vrot.slane %v1593_v28, 4  ;;  %v1600_v55 = vsel %vm1165_vm2, %v13311_v6, 0.0 }
 0x3a2   : > { %10507 = vmatpush3.msra.mxu1 %v505_v45  ;;  %v1569_v2 = vadd.f32 %v1568_v14, %v1567_v52  ;;  %v1588_v50 = vadd.f32 %v1587_v24, %v1586_v20  ;;  %v1582_v40 = vrot.slane %v1581_v30, 2  ;;  %v1608_v17 = vrot.slane %v1607_v44, 4 }
 0x3a3   : > { %v1575_v62 = vrot.slane %v1574_v12, 2  ;;  %v1562_v8 = vadd.f32 %v1561_v9, %v1560_v0  ;;  %v1601_v63 = vrot.slane %v1600_v55, 4  ;;  %v1595_v32 = vadd.f32 %v1594_v56, %v1593_v28 }
 0x3a4   : > { %v1570_v41 = vrot.slane %v1569_v2, 1  ;;  %v1589_v59 = vrot.slane %v1588_v50, 2  ;;  %v1583_v42 = vadd.f32 %v1582_v40, %v1581_v30  ;;  %v1609_v45 = vadd.f32 %v1608_v17, %v1607_v44 }
 0x3a5   : > { %v1576_v19 = vadd.f32 %v1575_v62, %v1574_v12  ;;  %v1563_v13 = vrot.slane %v1562_v8, 1  ;;  %v1602_v58 = vadd.f32 %v1601_v63, %v1600_v55  ;;  %v1596_v10 = vrot.slane %v1595_v32, 2 }
 0x3a6   : > { %v1571_v4 = vadd.f32 %v1570_v41, %v1569_v2  ;;  %v1590_v22 = vadd.f32 %v1589_v59, %v1588_v50  ;;  %v1584_v60 = vrot.slane %v1583_v42, 1  ;;  %v1610_v36 = vrot.slane %v1609_v45, 2 }
 0x3a7   : > { %v1577_v57 = vrot.slane %v1576_v19, 1  ;;  %v1564_v43 = vadd.f32 %v1563_v13, %v1562_v8  ;;  %v1603_v52 = vrot.slane %v1602_v58, 2  ;;  %v1597_v12 = vadd.f32 %v1596_v10, %v1595_v32 }
 0x3a8   : > { %v1639_v0 = vmul.f32 0.125, %v1571_v4  ;;  %v1591_v11 = vrot.slane %v1590_v22, 1  ;;  %v1585_v24 = vadd.f32 %v1584_v60, %v1583_v42  ;;  %v1611_v28 = vadd.f32 %v1610_v36, %v1609_v45  ;;  %v3842_v42 = vpop.permute.xlu0 %3841 }
 0x3a9   : > { %v1578_v34 = vadd.f32 %v1577_v57, %v1576_v19  ;;  %v1638_v14 = vmul.f32 0.125, %v1564_v43  ;;  %v1604_v62 = vadd.f32 %v1603_v52, %v1602_v58  ;;  %v1341_v9 = vsel %vm1165_vm2, %v1158_v29, -inf }
 0x3aa   : > { %v1598_v30 = vrot.slane %v1597_v12, 1  ;;  %v1348_v56 = vsel %vm1165_vm2, %v13281_v47, -inf  ;;  %v1334_v55 = vsel %vm1165_vm2, %v1157_v27, -inf  ;;  %v1592_v2 = vadd.f32 %v1591_v11, %v1590_v22 }
 0x3ab   : > { %v1640_v20 = vmul.f32 0.125, %v1578_v34  ;;  %v3920_v44 = vsel %vm3598_vm3, %v1639_v0, %v1638_v14  ;;  %v1641_v19 = vmul.f32 0.125, %v1585_v24  ;;  %v1342_v8 = vrot.slane %v1341_v9, 4 }
 0x3ac   : > { %v1612_v40 = vrot.slane %v1611_v28, 1  ;;  %v1605_v17 = vrot.slane %v1604_v62, 1  ;;  %v1349_v63 = vrot.slane %v1348_v56, 4  ;;  %v1335_v32 = vrot.slane %v1334_v55, 4  ;;  %v3702_v24 = vpop.permute.xlu0 %3701 }
 0x3ad   : > { %v3921_v50 = vsel %vm3600_vm4, %v1640_v20, %v3920_v44  ;;  %v1599_v41 = vadd.f32 %v1598_v30, %v1597_v12  ;;  %v1355_v59 = vsel %vm1165_vm2, %v13291_v7, -inf  ;;  %v1642_v57 = vmul.f32 0.125, %v1592_v2 }
 0x3ae   : > { %v3922_v29 = vsel %vm3602_vm5, %v1641_v19, %v3921_v50  ;;  %v1343_v13 = vmax.f32 %v1341_v9, %v1342_v8  ;;  %v1613_v47 = vadd.f32 %v1612_v40, %v1611_v28  ;;  %v1606_v45 = vadd.f32 %v1605_v17, %v1604_v62 }
 0x3af   : > { %v1350_v58 = vmax.f32 %v1348_v56, %v1349_v63  ;;  %v3923_v10 = vsel %vm3604_vm6, %v1642_v57, %v3922_v29  ;;  %v1336_v4 = vmax.f32 %v1334_v55, %v1335_v32  ;;  %v1356_v22 = vrot.slane %v1355_v59, 4 }
 0x3b0   : > { %v1362_v34 = vsel %vm1165_vm2, %v13295_v23, -inf  ;;  %v1643_v43 = vmul.f32 0.125, %v1599_v41  ;;  %v1369_v60 = vsel %vm1165_vm2, %v13301_v18, -inf  ;;  %v1344_v36 = vrot.slane %v1343_v13, 2  ;;  %v3774_v29 = vpop.permute.xlu0 %3773 }
 0x3b1   : > { %v1645_v7 = vmul.f32 0.125, %v1613_v47  ;;  %v1363_v12 = vrot.slane %v1362_v34, 4  ;;  %v1644_v0 = vmul.f32 0.125, %v1606_v45  ;;  %v1351_v11 = vrot.slane %v1350_v58, 2 }
 0x3b2   : > { %v3924_v52 = vsel %vm3606_vm8, %v1643_v43, %v3923_v10  ;;  %v1337_v20 = vrot.slane %v1336_v4, 2  ;;  %v1357_v14 = vmax.f32 %v1355_v59, %v1356_v22  ;;  %v1370_v62 = vrot.slane %v1369_v60, 4 }
 0x3b3   : > { %v1383_v9 = vsel %vm1165_vm2, %v13307_v53, -inf  ;;  %v3925_v23 = vsel %vm3608_vm7, %v1644_v0, %v3924_v52  ;;  %v1376_v18 = vsel %vm1165_vm2, %v13311_v6, -inf  ;;  %v1345_v30 = vmax.f32 %v1343_v13, %v1344_v36 }
 0x3b4   : > { %v3853_v44 = vsel %vm1165_vm2, %v13252_v37, %v13113_v1  ;;  %v3926_v56 = vsel %vm3610_vm9, %v1645_v7, %v3925_v23  ;;  %v1364_v55 = vmax.f32 %v1362_v34, %v1363_v12  ;;  %v1352_v2 = vmax.f32 %v1350_v58, %v1351_v11 }
 0x3b5   : > { %v1338_v19 = vmax.f32 %v1336_v4, %v1337_v20  ;;  %v1358_v8 = vrot.slane %v1357_v14, 2  ;;  %v1384_v40 = vrot.slane %v1383_v9, 4  ;;  %v1377_v63 = vrot.slane %v1376_v18, 4 }
 0x3b6   : > { %v3858_v6 = vsel %vm3857_vm11, %v3853_v44, %v13138_v21  ;;  %v1371_v41 = vmax.f32 %v1369_v60, %v1370_v62  ;;  %v1346_v1 = vrot.slane %v1345_v30, 1  ;;  %v1365_v59 = vrot.slane %v1364_v55, 2  ;;  %v3846_v60 = vpop.permute.xlu0 %3845 }
 0x3b7   : > { %v3863_v37 = vsel %vm3862_vm10, %v3858_v6, %v3842_v42  ;;  %v1353_v57 = vrot.slane %v1352_v2, 1  ;;  %v1339_v13 = vrot.slane %v1338_v19, 1  ;;  %v1359_v47 = vmax.f32 %v1357_v14, %v1358_v8 }
 0x3b8   : > { %v1378_v45 = vmax.f32 %v1376_v18, %v1377_v63  ;;  %v1372_v58 = vrot.slane %v1371_v41, 2  ;;  %v1347_v10 = vmax.f32 %v1345_v30, %v1346_v1  ;;  %v1366_v21 = vmax.f32 %v1364_v55, %v1365_v59 }
 0x3b9   : > { %v1354_v4 = vmax.f32 %v1352_v2, %v1353_v57  ;;  %v1340_v22 = vmax.f32 %v1338_v19, %v1339_v13  ;;  %v1360_v34 = vrot.slane %v1359_v47, 1  ;;  %v3854_v42 = vsel %vm1165_vm2, %v13233_v48, %v13190_v31 }
 0x3ba   : > { %v1379_v36 = vrot.slane %v1378_v45, 2  ;;  %v3859_v7 = vsel %vm3857_vm11, %v3854_v42, %v13199_v3  ;;  %v3855_v52 = vsel %vm1165_vm2, %v13266_v15, %v3702_v24  ;;  %v1373_v0 = vmax.f32 %v1371_v41, %v1372_v58 }
 0x3bb   : > { %v3626_v11 = vsel %vm3598_vm3, %v1347_v10, %v1340_v22  ;;  %v3860_v20 = vsel %vm3857_vm11, %v3855_v52, %v3774_v29  ;;  %v1361_v48 = vmax.f32 %v1359_v47, %v1360_v34  ;;  %v4362_v59 = vlaneseq }
 0x3bc   : > { %v3627_v62 = vsel %vm3600_vm4, %v1354_v4, %v3626_v11  ;;  %v3865_v31 = vsel %vm3862_vm10, %v3860_v20, %v3846_v60  ;;  %v1380_v15 = vmax.f32 %v1378_v45, %v1379_v36  ;;  %v1374_v24 = vrot.slane %v1373_v0, 1 }
 0x3bd   : > { %v4363_v47 = vshrl.u32 %v4362_v59, 7 }
 0x3be   : > { %v1381_v44 = vrot.slane %v1380_v15, 1  ;;  %v1375_v55 = vmax.f32 %v1373_v0, %v1374_v24 }
 0x3bf   : > { %v13377_v34 = vsub.s32 0, %v4363_v47 }
 0x3c0   : > { %v1382_v19 = vmax.f32 %v1380_v15, %v1381_v44 }
 0x3c1   : > { %16903 = vst [vmem:[#allocation89_spill] sm:$0xff] %v13377_v34 }
 0x3c9   : > { %v3998_v27 = vpop.permute.xlu1 %3997 }
 0x3ca   : > { %v4150_v50 = vsel %vm1165_vm2, %v3926_v56, %v3998_v27  ;;  %v1385_v27 = vmax.f32 %v1383_v9, %v1384_v40  ;;  %v3628_v9 = vsel %vm3602_vm5, %v1361_v48, %v3627_v62 }
 0x3cc   : > { %v1386_v43 = vrot.slane %v1385_v27, 2 }
 0x3ce   : > { %v1387_v3 = vmax.f32 %v1385_v27, %v1386_v43 }
 0x3d0   : > { %v4070_v28 = vpop.permute.xlu1 %4069  ;;  %v1388_v18 = vrot.slane %v1387_v3, 1 }
 0x3d1   : > { %v4154_v53 = vsel %vm3857_vm11, %v4150_v50, %v4070_v28  ;;  %v1367_v28 = vrot.slane %v1366_v21, 1 }
 0x3d2   : > { %v1389_v2 = vmax.f32 %v1387_v3, %v1388_v18 }
 0x3d3   : > { %v1368_v23 = vmax.f32 %v1366_v21, %v1367_v28 }
 0x3d5   : > { %v4142_v17 = vpop.permute.xlu1 %4141  ;;  %v3629_v56 = vsel %vm3604_vm6, %v1368_v23, %v3628_v9 }
 0x3d6   : > { %v4158_v32 = vsel %vm3862_vm10, %v4154_v53, %v4142_v17  ;;  %v3630_v50 = vsel %vm3606_vm8, %v1375_v55, %v3629_v56 }
 0x3d7   : > { %10498 = vmatmul.mubr.msk.f32.gmra.mxu1 %vm4159_vm12, %v4158_v32  ;;  %v3631_v40 = vsel %vm3608_vm7, %v1382_v19, %v3630_v50 }
 0x3d8   : > { %10508 = vmatprep.mubr.msk.f32.mxu1 %vm4159_vm12, %v3863_v37  ;;  %v3632_v53 = vsel %vm3610_vm9, %v1389_v2, %v3631_v40  ;;  %v11095_v37 = vmov 1966171168  }
 0x3d9   : > { %v4360_v29 = vunpack.c.l.s4 %v11095_v37 }
 0x3db   : > { %v4361_v13 = vunpack.c.0.s8 %v4360_v29 }
 0x3dd   : > { %v13374_v45 = vsub.s32 %v4361_v13, %v4363_v47 }
 0x3df   : > { %v3844_v12 = vpop.permute.xlu1 %3843  ;;  %16902 = vst [vmem:[#allocation32_spill] sm:$0xff] %v13374_v45 }
 0x3e0   : > { %v3864_v14 = vsel %vm3862_vm10, %v3859_v7, %v3844_v12 }
 0x3e1   : > { %10509 = vmatmul.mubr.msk.f32.vlgmr.msra.gmra.mxu1 %vm4159_vm12, %v3864_v14 }
 0x3e2   : > { %10511 = vmatprep.mubr.msk.f32.mxu1 %vm4159_vm12, %v3865_v31 }
 0x3e4   : > { %v3704_v30 = vpop.permute.xlu1 %3703 }
 0x3e5   : > { %v3856_v17 = vsel %vm1165_vm2, %v3632_v53, %v3704_v30 }
 0x3ec   : > { %v3776_v8 = vpop.permute.xlu1 %3775 }
 0x3ed   : > { %v3861_v63 = vsel %vm3857_vm11, %v3856_v17, %v3776_v8 }
 0x3f2   : > { %v3848_v6 = vpop.permute.xlu1 %3847 }
 0x3f3   : > { %v3866_v32 = vsel %vm3862_vm10, %v3861_v63, %v3848_v6 }
 0x3f4   : > { %10512 = vmatmul.mubr.msk.f32.gmra.mxu1 %vm4159_vm12, %v3866_v32 }
 0x45b   : > { %v10496_v41 = vpop.f32.mrf.mxu1 }
 0x45d   : > { %v4238_v1 = vpop.f32.mrf.mxu1 }
 0x497   : > { %v10499_v57 = vpop.f32.mrf.mxu1 }
 0x499   : > { %v4248_v27 = vpop.f32.mrf.mxu1 }
 0x4a1   : > { %v10510_v58 = vpop.f32.mrf.mxu1 }
 0x4a2   : > { %v4341_v10 = vadd.f32 %v10510_v58, %v10496_v41 }
 0x4a3   : > { %v4335_v21 = vpop.f32.mrf.mxu1 }
 0x4a4   : > { %v4414_v4 = vrot.slane %v4341_v10, %v13374_v45  ;;  %v4336_v22 = vadd.f32 %v4335_v21, %v4238_v1  ;;  %v4407_v24 = vcombine.high %v4341_v10, %v4341_v10 }
 0x4a6   : > { %v4430_v43 = vrot.slane %v4414_v4, %v13374_v45  ;;  %v4358_v42 = vcombine.high %v4336_v22, %v4336_v22  ;;  %v4365_v60 = vrot.slane %v4336_v22, %v13374_v45  ;;  %v4422_v18 = vcombine.high %v4414_v4, %v4414_v4 }
 0x4a7   : > { %v4421_v55 = vrot.slane %v4407_v24, %v13374_v45 }
 0x4a8   : > { %v4589_v36 = vrot.slane %v4430_v43, %v13377_v34  ;;  %v4373_v7 = vcombine.high %v4365_v60, %v4365_v60  ;;  %v4381_v52 = vrot.slane %v4365_v60, %v13374_v45  ;;  %v4372_v12 = vrot.slane %v4358_v42, %v13374_v45 }
 0x4a9   : > { %v4452_v2 = vcombine.high %v4430_v43, %v4430_v43  ;;  %v4444_v19 = vrot.slane %v4422_v18, %v13374_v45  ;;  %v4437_v53 = vrot.slane %v4421_v55, %v13374_v45  ;;  %v4423_v6 = vcombine.high %v4421_v55, %v4421_v55 }
 0x4aa   : > { %v4395_v0 = vrot.slane %v4373_v7, %v13374_v45  ;;  %4698 = vrot.lane.b32.xlu0 %v4589_v36, %s11096_s20  ;;  %v4403_v11 = vcombine.high %v4381_v52, %v4381_v52  ;;  %v4557_v14 = vrot.slane %v4381_v52, %v13377_v34  ;;  %v4374_v62 = vcombine.high %v4372_v12, %v4372_v12 }
 0x4ab   : > { %v4388_v31 = vrot.slane %v4372_v12, %v13374_v45  ;;  %v4597_v63 = vrot.slane %v4452_v2, %v13377_v34  ;;  %v4454_v32 = vcombine.high %v4444_v19, %v4444_v19  ;;  %v4593_v41 = vrot.slane %v4444_v19, %v13377_v34 }
 0x4ac   : > { %v4405_v20 = vcombine.high %v4395_v0, %v4395_v0  ;;  %v4561_v28 = vrot.slane %v4395_v0, %v13377_v34  ;;  %v4565_v48 = vrot.slane %v4403_v11, %v13377_v34  ;;  %v4402_v15 = vrot.slane %v4374_v62, %v13374_v45 }
 0x4ad   : > { %v4404_v9 = vcombine.high %v4388_v31, %v4388_v31  ;;  %v4573_v23 = vrot.slane %v4388_v31, %v13377_v34  ;;  %v4453_v1 = vcombine.high %v4437_v53, %v4437_v53  ;;  %v4605_v59 = vrot.slane %v4437_v53, %v13377_v34 }
 0x4ae   : > { %4682 = vrot.lane.b32.xlu0 %v4557_v14, %s11096_s20  ;;  %4684 = vrot.lane.b32.xlu1 %v4561_v28, %s11096_s20  ;;  %v4569_v3 = vrot.slane %v4405_v20, %v13377_v34  ;;  %v4577_v44 = vrot.slane %v4402_v15, %v13377_v34  ;;  %v4406_v56 = vcombine.high %v4402_v15, %v4402_v15 }
 0x4af   : > { %v4581_v50 = vrot.slane %v4404_v9, %v13377_v34  ;;  %v4451_v13 = vrot.slane %v4423_v6, %v13374_v45  ;;  %v4601_v47 = vrot.slane %v4454_v32, %v13377_v34  ;;  %v4613_v10 = vrot.slane %v4453_v1, %v13377_v34 }
 0x4b0   : > { %v4585_v40 = vrot.slane %v4406_v56, %v13377_v34 }
 0x4b1   : > { %v4609_v4 = vrot.slane %v4451_v13, %v13377_v34  ;;  %v4455_v22 = vcombine.high %v4451_v13, %v4451_v13  ;;  %v16904_v13 = vld [vmem:[#allocation10_spill] sm:$0xff] }
 0x4b2   : > { %4686 = vrot.lane.b32.xlu0 %v4565_v48, %s11096_s20  ;;  %4688 = vrot.lane.b32.xlu1 %v4569_v3, %s11096_s20 }
 0x4b3   : > { %v4617_v7 = vrot.slane %v4455_v22, %v13377_v34 }
 0x4b4   : > { %v10513_v30 = vpop.f32.mrf.mxu1 }
 0x4b5   : > { %v4351_v37 = vadd.f32 %v10513_v30, %v10499_v57 }
 0x4b6   : > { %4690 = vrot.lane.b32.xlu0 %v4573_v23, %s11096_s20  ;;  %4692 = vrot.lane.b32.xlu1 %v4577_v44, %s11096_s20  ;;  %v4345_v8 = vpop.f32.mrf.mxu1 }
 0x4b7   : > { %v4346_v17 = vadd.f32 %v4345_v8, %v4248_v27  ;;  %v4512_v27 = vrot.slane %v4351_v37, %v13374_v45  ;;  %v4505_v48 = vcombine.high %v4351_v37, %v4351_v37 }
 0x4b9   : > { %v4463_v29 = vrot.slane %v4346_v17, %v13374_v45  ;;  %v4456_v21 = vcombine.high %v4346_v17, %v4346_v17  ;;  %v4528_v43 = vrot.slane %v4512_v27, %v13374_v45  ;;  %v4520_v24 = vcombine.high %v4512_v27, %v4512_v27 }
 0x4ba   : > { %4694 = vrot.lane.b32.xlu0 %v4581_v50, %s11096_s20  ;;  %4696 = vrot.lane.b32.xlu1 %v4585_v40, %s11096_s20  ;;  %v4519_v18 = vrot.slane %v4505_v48, %v13374_v45 }
 0x4bb   : > { %v4479_v58 = vrot.slane %v4463_v29, %v13374_v45  ;;  %v4471_v57 = vcombine.high %v4463_v29, %v4463_v29  ;;  %v4470_v60 = vrot.slane %v4456_v21, %v13374_v45  ;;  %v4653_v52 = vrot.slane %v4528_v43, %v13377_v34  ;;  %v4842_v29 = vld [vmem:[%s16256_s5] sm:$0xff] }
 0x4bc   : > { %v4550_v30 = vcombine.high %v4528_v43, %v4528_v43  ;;  %v4542_v56 = vrot.slane %v4520_v24, %v13374_v45  ;;  %v4535_v2 = vrot.slane %v4519_v18, %v13374_v45  ;;  %v4521_v19 = vcombine.high %v4519_v18, %v4519_v18  ;;  %10514 = vmatprep.subr.mxu1 %v4842_v29 }
 0x4bd   : > { %v4621_v42 = vrot.slane %v4479_v58, %v13377_v34  ;;  %v4493_v36 = vrot.slane %v4471_v57, %v13374_v45  ;;  %v4501_v12 = vcombine.high %v4479_v58, %v4479_v58  ;;  %v4472_v0 = vcombine.high %v4470_v60, %v4470_v60  ;;  %10515 = vmatpush3.msra.mxu1 %v4842_v29  ;;  %v16906_v57 = vld [vmem:[#allocation3_spill] sm:$0xff]  ;;  %v16917_v29 = vld [vmem:[#allocation16_spill] sm:$0xff] }
 0x4be   : > { %4702 = vrot.lane.b32.xlu0 %v4597_v63, %s11096_s20  ;;  %4700 = vrot.lane.b32.xlu1 %v4593_v41, %s11096_s20  ;;  %v4486_v14 = vrot.slane %v4470_v60, %v13374_v45  ;;  %v4661_v50 = vrot.slane %v4550_v30, %v13377_v34  ;;  %v4552_v8 = vcombine.high %v4542_v56, %v4542_v56  ;;  %v16912_v30 = vld [vmem:[#allocation14_spill] sm:$0xff] }
 0x4bf   : > { %v4503_v11 = vcombine.high %v4493_v36, %v4493_v36  ;;  %v4625_v20 = vrot.slane %v4493_v36, %v13377_v34  ;;  %v4629_v28 = vrot.slane %v4501_v12, %v13377_v34  ;;  %v4500_v62 = vrot.slane %v4472_v0, %v13374_v45  ;;  %v16908_v36 = vld [vmem:[#allocation5_spill] sm:$0xff]  ;;  %v16909_v0 = vld [vmem:[#allocation7_spill] sm:$0xff] }
 0x4c0   : > { %v4502_v3 = vcombine.high %v4486_v14, %v4486_v14  ;;  %v4637_v15 = vrot.slane %v4486_v14, %v13377_v34  ;;  %v4657_v40 = vrot.slane %v4542_v56, %v13377_v34  ;;  %v4551_v53 = vcombine.high %v4535_v2, %v4535_v2 }
 0x4c1   : > { %v4633_v31 = vrot.slane %v4503_v11, %v13377_v34  ;;  %v4641_v9 = vrot.slane %v4500_v62, %v13377_v34  ;;  %v4504_v23 = vcombine.high %v4500_v62, %v4500_v62  ;;  %v4669_v17 = vrot.slane %v4535_v2, %v13377_v34 }
 0x4c2   : > { %4706 = vrot.lane.b32.xlu0 %v4605_v59, %s11096_s20  ;;  %4704 = vrot.lane.b32.xlu1 %v4601_v47, %s11096_s20  ;;  %v4645_v44 = vrot.slane %v4502_v3, %v13377_v34  ;;  %v4549_v63 = vrot.slane %v4521_v19, %v13374_v45  ;;  %v4665_v6 = vrot.slane %v4552_v8, %v13377_v34  ;;  %v16911_v3 = vld [vmem:[#allocation8_spill] sm:$0xff]  ;;  %v16914_v8 = vld [vmem:[#allocation17_spill] sm:$0xff] }
 0x4c3   : > { %v4649_v55 = vrot.slane %v4504_v23, %v13377_v34  ;;  %v4677_v32 = vrot.slane %v4551_v53, %v13377_v34  ;;  %v16915_v53 = vld [vmem:[#allocation12_spill] sm:$0xff] }
 0x4c4   : > { %v4673_v41 = vrot.slane %v4549_v63, %v13377_v34  ;;  %v4553_v1 = vcombine.high %v4549_v63, %v4549_v63 }
 0x4c6   : > { %4710 = vrot.lane.b32.xlu0 %v4613_v10, %s11096_s20  ;;  %4708 = vrot.lane.b32.xlu1 %v4609_v4, %s11096_s20  ;;  %v4681_v37 = vrot.slane %v4553_v1, %v13377_v34  ;;  %v16905_v10 = vld [vmem:[#allocation2_spill] sm:$0xff] }
 0x4c7   : > { %v16916_v1 = vld [vmem:[#allocation26_spill] sm:$0xff] }
 0x4ca   : > { %4714 = vrot.lane.b32.xlu0 %v4621_v42, %s11096_s20  ;;  %4712 = vrot.lane.b32.xlu1 %v4617_v7, %s11096_s20  ;;  %v16907_v42 = vld [vmem:[#allocation4_spill] sm:$0xff] }
 0x4ce   : > { %4730 = vrot.lane.b32.xlu0 %v4653_v52, %s11096_s20  ;;  %4716 = vrot.lane.b32.xlu1 %v4625_v20, %s11096_s20 }
 0x4d2   : > { %4718 = vrot.lane.b32.xlu0 %v4629_v28, %s11096_s20  ;;  %4720 = vrot.lane.b32.xlu1 %v4633_v31, %s11096_s20  ;;  %v16910_v31 = vld [vmem:[#allocation15_spill] sm:$0xff] }
 0x4d6   : > { %4722 = vrot.lane.b32.xlu0 %v4637_v15, %s11096_s20  ;;  %4724 = vrot.lane.b32.xlu1 %v4641_v9, %s11096_s20 }
 0x4da   : > { %4726 = vrot.lane.b32.xlu0 %v4645_v44, %s11096_s20  ;;  %4728 = vrot.lane.b32.xlu1 %v4649_v55, %s11096_s20  ;;  %v16913_v44 = vld [vmem:[#allocation9_spill] sm:$0xff] }
 0x4de   : > { %4734 = vrot.lane.b32.xlu0 %v4661_v50, %s11096_s20  ;;  %4732 = vrot.lane.b32.xlu1 %v4657_v40, %s11096_s20 }
 0x4e2   : > { %4738 = vrot.lane.b32.xlu0 %v4669_v17, %s11096_s20  ;;  %4736 = vrot.lane.b32.xlu1 %v4665_v6, %s11096_s20 }
 0x4e6   : > { %4742 = vrot.lane.b32.xlu0 %v4677_v32, %s11096_s20  ;;  %4740 = vrot.lane.b32.xlu1 %v4673_v41, %s11096_s20 }
 0x4ea   : > { %4744 = vrot.lane.b32.xlu1 %v4681_v37, %s11096_s20 }
 0x51c   : > { %v4699_v59 = vpop.permute.xlu0 %4698 }
 0x51d   : > { %v4786_v47 = vadd.f32 %v4699_v59, %v16904_v13 }
 0x51f   : > { %10887 = vtanh.f32 %v4786_v47 }
 0x520   : > { %v4685_v27 = vpop.permute.xlu1 %4684  ;;  %v4683_v58 = vpop.permute.xlu0 %4682 }
 0x521   : > { %v4779_v21 = vadd.f32 %v4685_v27, %v16905_v10  ;;  %v4778_v4 = vadd.f32 %v4683_v58, %v16906_v57  ;;  %v16918_v10 = vld [vmem:[#allocation35_spill] sm:$0xff]  ;;  %v16919_v57 = vld [vmem:[#allocation18_spill] sm:$0xff] }
 0x523   : > { %10889 = vtanh.f32 %v4779_v21 }
 0x524   : > { %10891 = vtanh.f32 %v4778_v4  ;;  %v4689_v22 = vpop.permute.xlu1 %4688  ;;  %v4687_v43 = vpop.permute.xlu0 %4686 }
 0x525   : > { %v4781_v60 = vadd.f32 %v4689_v22, %v16907_v42  ;;  %v4780_v7 = vadd.f32 %v4687_v43, %v16908_v36 }
 0x527   : > { %10893 = vtanh.f32 %v4781_v60 }
 0x528   : > { %10895 = vtanh.f32 %v4780_v7  ;;  %v4691_v52 = vpop.permute.xlu0 %4690  ;;  %v4693_v12 = vpop.permute.xlu1 %4692  ;;  %v16920_v7 = vld [vmem:[#allocation20_spill] sm:$0xff] }
 0x529   : > { %v4782_v11 = vadd.f32 %v4691_v52, %v16909_v0  ;;  %v4783_v20 = vadd.f32 %v4693_v12, %v16848_v61 }
 0x52b   : > { %10897 = vtanh.f32 %v4782_v11 }
 0x52c   : > { %v10888_v14 = vpop.eup %10887  ;;  %10899 = vtanh.f32 %v4783_v20  ;;  %v4695_v28 = vpop.permute.xlu0 %4694 }
 0x52d   : > { %v4697_v62 = vpop.permute.xlu1 %4696  ;;  %v4784_v48 = vadd.f32 %v4695_v28, %v16910_v31  ;;  %4906 = vrot.lane.b32.xlu0 %v10888_v14, %s11097_s23  ;;  %v16921_v14 = vld [vmem:[#allocation22_spill] sm:$0xff] }
 0x52e   : > { %v4785_v15 = vadd.f32 %v4697_v62, %v16911_v3  ;;  %v16922_v62 = vld [vmem:[#allocation21_spill] sm:$0xff] }
 0x52f   : > { %10901 = vtanh.f32 %v4784_v48 }
 0x530   : > { %v10890_v24 = vpop.eup %10889  ;;  %10903 = vtanh.f32 %v4785_v15  ;;  %v4703_v9 = vpop.permute.xlu0 %4702 }
 0x531   : > { %v10892_v23 = vpop.eup %10891  ;;  %v4701_v18 = vpop.permute.xlu1 %4700  ;;  %v4788_v61 = vadd.f32 %v4703_v9, %v16912_v30  ;;  %4892 = vrot.lane.b32.xlu1 %v10890_v24, %s11097_s23 }
 0x532   : > { %v4787_v56 = vadd.f32 %v4701_v18, %v16913_v44  ;;  %4890 = vrot.lane.b32.xlu0 %v10892_v23, %s11097_s23 }
 0x533   : > { %10905 = vtanh.f32 %v4788_v61 }
 0x534   : > { %v10894_v55 = vpop.eup %10893  ;;  %10907 = vtanh.f32 %v4787_v56  ;;  %v4707_v2 = vpop.permute.xlu0 %4706 }
 0x535   : > { %v10896_v50 = vpop.eup %10895  ;;  %v4705_v19 = vpop.permute.xlu1 %4704  ;;  %v4790_v40 = vadd.f32 %v4707_v2, %v16914_v8  ;;  %4896 = vrot.lane.b32.xlu1 %v10894_v55, %s11097_s23 }
 0x536   : > { %v4789_v17 = vadd.f32 %v4705_v19, %v16915_v53  ;;  %4894 = vrot.lane.b32.xlu0 %v10896_v50, %s11097_s23 }
 0x537   : > { %10909 = vtanh.f32 %v4790_v40 }
 0x538   : > { %v10898_v63 = vpop.eup %10897  ;;  %10911 = vtanh.f32 %v4789_v17  ;;  %v4711_v6 = vpop.permute.xlu0 %4710 }
 0x539   : > { %v10900_v32 = vpop.eup %10899  ;;  %v4709_v41 = vpop.permute.xlu1 %4708  ;;  %v4792_v37 = vadd.f32 %v4711_v6, %v16916_v1 }
 0x53a   : > { %v4791_v59 = vadd.f32 %v4709_v41, %v16917_v29  ;;  %4900 = vrot.lane.b32.xlu1 %v10900_v32, %s11097_s23  ;;  %4898 = vrot.lane.b32.xlu0 %v10898_v63, %s11097_s23 }
 0x53b   : > { %10913 = vtanh.f32 %v4792_v37 }
 0x53c   : > { %v10902_v13 = vpop.eup %10901  ;;  %10915 = vtanh.f32 %v4791_v59  ;;  %v4715_v47 = vpop.permute.xlu0 %4714 }
 0x53d   : > { %v10904_v27 = vpop.eup %10903  ;;  %v4713_v58 = vpop.permute.xlu1 %4712  ;;  %v4794_v21 = vadd.f32 %v4715_v47, %v16918_v10 }
 0x53e   : > { %v4793_v4 = vadd.f32 %v4713_v58, %v16919_v57  ;;  %4904 = vrot.lane.b32.xlu1 %v10904_v27, %s11097_s23  ;;  %4902 = vrot.lane.b32.xlu0 %v10902_v13, %s11097_s23 }
 0x53f   : > { %10917 = vtanh.f32 %v4794_v21 }
 0x540   : > { %v10906_v22 = vpop.eup %10905  ;;  %10919 = vtanh.f32 %v4793_v4  ;;  %v4731_v43 = vpop.permute.xlu0 %4730 }
 0x541   : > { %v10908_v42 = vpop.eup %10907  ;;  %v4717_v60 = vpop.permute.xlu1 %4716  ;;  %v4802_v36 = vadd.f32 %v4731_v43, %v16795_v49 }
 0x542   : > { %v4795_v52 = vadd.f32 %v4717_v60, %v16920_v7  ;;  %4908 = vrot.lane.b32.xlu1 %v10908_v42, %s11097_s23  ;;  %4910 = vrot.lane.b32.xlu0 %v10906_v22, %s11097_s23 }
 0x543   : > { %10921 = vtanh.f32 %v4802_v36 }
 0x544   : > { %v10910_v12 = vpop.eup %10909  ;;  %10923 = vtanh.f32 %v4795_v52  ;;  %v4719_v0 = vpop.permute.xlu0 %4718 }
 0x545   : > { %v10912_v11 = vpop.eup %10911  ;;  %v4721_v20 = vpop.permute.xlu1 %4720  ;;  %v4796_v28 = vadd.f32 %v4719_v0, %v16921_v14 }
 0x546   : > { %v4797_v31 = vadd.f32 %v4721_v20, %v16922_v62  ;;  %4912 = vrot.lane.b32.xlu1 %v10912_v11, %s11097_s23  ;;  %4914 = vrot.lane.b32.xlu0 %v10910_v12, %s11097_s23 }
 0x547   : > { %10925 = vtanh.f32 %v4796_v28 }
 0x548   : > { %v10914_v49 = vpop.eup %10913  ;;  %10927 = vtanh.f32 %v4797_v31  ;;  %v4723_v48 = vpop.permute.xlu0 %4722 }
 0x549   : > { %v10916_v3 = vpop.eup %10915  ;;  %v4725_v15 = vpop.permute.xlu1 %4724  ;;  %v4798_v24 = vadd.f32 %v4723_v48, %v16877_v51 }
 0x54a   : > { %v4799_v9 = vadd.f32 %v4725_v15, %v16880_v33  ;;  %4916 = vrot.lane.b32.xlu1 %v10916_v3, %s11097_s23  ;;  %4918 = vrot.lane.b32.xlu0 %v10914_v49, %s11097_s23 }
 0x54b   : > { %10929 = vtanh.f32 %v4798_v24 }
 0x54c   : > { %v10918_v23 = vpop.eup %10917  ;;  %10931 = vtanh.f32 %v4799_v9  ;;  %v4727_v18 = vpop.permute.xlu0 %4726 }
 0x54d   : > { %v10920_v30 = vpop.eup %10919  ;;  %v4729_v61 = vpop.permute.xlu1 %4728  ;;  %v4800_v44 = vadd.f32 %v4727_v18, %v16709_v5 }
 0x54e   : > { %v4801_v56 = vadd.f32 %v4729_v61, %v16881_v16  ;;  %4920 = vrot.lane.b32.xlu1 %v10920_v30, %s11097_s23  ;;  %4922 = vrot.lane.b32.xlu0 %v10918_v23, %s11097_s23 }
 0x54f   : > { %10933 = vtanh.f32 %v4800_v44 }
 0x550   : > { %v10922_v51 = vpop.eup %10921  ;;  %10935 = vtanh.f32 %v4801_v56  ;;  %v4735_v33 = vpop.permute.xlu0 %4734  ;;  %v13568_v56 = vld [vmem:[%s16257_s6] ss:$0 sm:$0xff] }
 0x551   : > { %v10924_v55 = vpop.eup %10923  ;;  %v4733_v2 = vpop.permute.xlu1 %4732  ;;  %v4804_v50 = vadd.f32 %v4735_v33, %v16826_v35 }
 0x552   : > { %v4803_v19 = vadd.f32 %v4733_v2, %v16786_v38  ;;  %4924 = vrot.lane.b32.xlu1 %v10924_v55, %s11097_s23  ;;  %4938 = vrot.lane.b32.xlu0 %v10922_v51, %s11097_s23 }
 0x553   : > { %10937 = vtanh.f32 %v4804_v50 }
 0x554   : > { %v10926_v5 = vpop.eup %10925  ;;  %10939 = vtanh.f32 %v4803_v19  ;;  %v4739_v16 = vpop.permute.xlu0 %4738 }
 0x555   : > { %v10928_v8 = vpop.eup %10927  ;;  %v4737_v40 = vpop.permute.xlu1 %4736  ;;  %v4806_v53 = vadd.f32 %v4739_v16, %v16835_v26 }
 0x556   : > { %v4805_v17 = vadd.f32 %v4737_v40, %v16818_v54  ;;  %4928 = vrot.lane.b32.xlu1 %v10928_v8, %s11097_s23  ;;  %4926 = vrot.lane.b32.xlu0 %v10926_v5, %s11097_s23 }
 0x557   : > { %10941 = vtanh.f32 %v4806_v53 }
 0x558   : > { %v10930_v38 = vpop.eup %10929  ;;  %10943 = vtanh.f32 %v4805_v17  ;;  %v4743_v35 = vpop.permute.xlu0 %4742 }
 0x559   : > { %v10932_v63 = vpop.eup %10931  ;;  %v4741_v6 = vpop.permute.xlu1 %4740  ;;  %v4808_v32 = vadd.f32 %v4743_v35, %v16901_v39 }
 0x55a   : > { %v4807_v41 = vadd.f32 %v4741_v6, %v16899_v46  ;;  %4932 = vrot.lane.b32.xlu1 %v10932_v63, %s11097_s23  ;;  %4930 = vrot.lane.b32.xlu0 %v10930_v38, %s11097_s23 }
 0x55b   : > { %10945 = vtanh.f32 %v4808_v32 }
 0x55c   : > { %v10934_v54 = vpop.eup %10933  ;;  %10947 = vtanh.f32 %v4807_v41 }
 0x55d   : > { %v10936_v26 = vpop.eup %10935  ;;  %v4745_v1 = vpop.permute.xlu1 %4744 }
 0x55e   : > { %v4809_v37 = vadd.f32 %v4745_v1, %v16900_v25  ;;  %4936 = vrot.lane.b32.xlu1 %v10936_v26, %s11097_s23  ;;  %4934 = vrot.lane.b32.xlu0 %v10934_v54, %s11097_s23 }
 0x560   : > { %v10938_v29 = vpop.eup %10937  ;;  %10949 = vtanh.f32 %v4809_v37 }
 0x561   : > { %v10940_v39 = vpop.eup %10939 }
 0x562   : > { %4940 = vrot.lane.b32.xlu1 %v10940_v39, %s11097_s23  ;;  %4942 = vrot.lane.b32.xlu0 %v10938_v29, %s11097_s23 }
 0x564   : > { %v10942_v46 = vpop.eup %10941 }
 0x565   : > { %v10944_v59 = vpop.eup %10943 }
 0x566   : > { %4944 = vrot.lane.b32.xlu1 %v10944_v59, %s11097_s23  ;;  %4946 = vrot.lane.b32.xlu0 %v10942_v46, %s11097_s23 }
 0x568   : > { %v10946_v13 = vpop.eup %10945 }
 0x569   : > { %v10948_v47 = vpop.eup %10947 }
 0x56a   : > { %4948 = vrot.lane.b32.xlu1 %v10948_v47, %s11097_s23  ;;  %4950 = vrot.lane.b32.xlu0 %v10946_v13, %s11097_s23 }
 0x56d   : > { %v10950_v25 = vpop.eup %10949 }
 0x56e   : > { %4952 = vrot.lane.b32.xlu1 %v10950_v25, %s11097_s23 }
 0x59f   : > { %v4907_v27 = vpop.permute.xlu0 %4906 }
 0x5a3   : > { %v4893_v58 = vpop.permute.xlu1 %4892 }
 0x5a4   : > { %v4891_v10 = vpop.permute.xlu0 %4890 }
 0x5a5   : > { %10516 = vmatprep.mubr.msk.f32.mxu1 %vm1165_vm2, %v4891_v10 }
 0x5a6   : > { %10517 = vmatmul.mubr.msk.f32.vlgmr.msra.gmra.mxu1 %vm1165_vm2, %v4893_v58 }
 0x5a7   : > { %v4897_v21 = vpop.permute.xlu1 %4896 }
 0x5a8   : > { %v4895_v57 = vpop.permute.xlu0 %4894 }
 0x5a9   : > { %10519 = vmatprep.mubr.msk.f32.mxu1 %vm1165_vm2, %v4895_v57 }
 0x5aa   : > { %10520 = vmatmul.mubr.msk.f32.gmra.mxu1 %vm1165_vm2, %v4897_v21 }
 0x5ac   : > { %v4901_v4 = vpop.permute.xlu1 %4900  ;;  %v4899_v22 = vpop.permute.xlu0 %4898 }
 0x5ad   : > { %10522 = vmatprep.mubr.msk.f32.mxu1 %vm1165_vm2, %v4899_v22 }
 0x5ae   : > { %10523 = vmatmul.mubr.msk.f32.gmra.mxu1 %vm1165_vm2, %v4901_v4 }
 0x5b0   : > { %v4905_v43 = vpop.permute.xlu1 %4904  ;;  %v4903_v42 = vpop.permute.xlu0 %4902 }
 0x5b1   : > { %10525 = vmatprep.mubr.msk.f32.mxu1 %vm1165_vm2, %v4903_v42 }
 0x5b2   : > { %10526 = vmatmul.mubr.msk.f32.gmra.mxu1 %vm1165_vm2, %v4905_v43 }
 0x5b3   : > { %10528 = vmatprep.mubr.msk.f32.mxu1 %vm1165_vm2, %v4907_v27 }
 0x5b4   : > { %v4909_v60 = vpop.permute.xlu1 %4908  ;;  %v4911_v36 = vpop.permute.xlu0 %4910 }
 0x5b6   : > { %10529 = vmatmul.mubr.msk.f32.gmra.mxu1 %vm1165_vm2, %v4909_v60 }
 0x5b7   : > { %10531 = vmatprep.mubr.msk.f32.mxu1 %vm1165_vm2, %v4911_v36 }
 0x5b8   : > { %v4913_v7 = vpop.permute.xlu1 %4912  ;;  %v4915_v52 = vpop.permute.xlu0 %4914 }
 0x5ba   : > { %10532 = vmatmul.mubr.msk.f32.gmra.mxu1 %vm1165_vm2, %v4913_v7 }
 0x5bb   : > { %10534 = vmatprep.mubr.msk.f32.mxu1 %vm1165_vm2, %v4915_v52  ;;  %v16931_v52 = vmov 9  }
 0x5bc   : > { %v4917_v12 = vpop.permute.xlu1 %4916  ;;  %v4919_v0 = vpop.permute.xlu0 %4918 }
 0x5be   : > { %10535 = vmatmul.mubr.msk.f32.gmra.mxu1 %vm1165_vm2, %v4917_v12  ;;  %v16932_v12 = vmov 10  }
 0x5bf   : > { %10537 = vmatprep.mubr.msk.f32.mxu1 %vm1165_vm2, %v4919_v0 }
 0x5c0   : > { %v4921_v11 = vpop.permute.xlu1 %4920  ;;  %v4923_v20 = vpop.permute.xlu0 %4922 }
 0x5c2   : > { %10538 = vmatmul.mubr.msk.f32.gmra.mxu1 %vm1165_vm2, %v4921_v11 }
 0x5c3   : > { %10540 = vmatprep.mubr.msk.f32.mxu1 %vm1165_vm2, %v4923_v20 }
 0x5c4   : > { %v4925_v14 = vpop.permute.xlu1 %4924  ;;  %v4939_v28 = vpop.permute.xlu0 %4938 }
 0x5c6   : > { %10541 = vmatmul.mubr.msk.f32.gmra.mxu1 %vm1165_vm2, %v4925_v14 }
 0x5c8   : > { %v4929_v62 = vpop.permute.xlu1 %4928  ;;  %v4927_v31 = vpop.permute.xlu0 %4926 }
 0x5c9   : > { %10543 = vmatprep.mubr.msk.f32.mxu1 %vm1165_vm2, %v4927_v31  ;;  %v16933_v31 = vmov 11  }
 0x5ca   : > { %10544 = vmatmul.mubr.msk.f32.gmra.mxu1 %vm1165_vm2, %v4929_v62 }
 0x5cc   : > { %v4933_v49 = vpop.permute.xlu1 %4932  ;;  %v4931_v48 = vpop.permute.xlu0 %4930 }
 0x5cd   : > { %10546 = vmatprep.mubr.msk.f32.mxu1 %vm1165_vm2, %v4931_v48 }
 0x5ce   : > { %10547 = vmatmul.mubr.msk.f32.gmra.mxu1 %vm1165_vm2, %v4933_v49 }
 0x5d0   : > { %v4937_v3 = vpop.permute.xlu1 %4936  ;;  %v4935_v15 = vpop.permute.xlu0 %4934 }
 0x5d1   : > { %10549 = vmatprep.mubr.msk.f32.mxu1 %vm1165_vm2, %v4935_v15 }
 0x5d2   : > { %10550 = vmatmul.mubr.msk.f32.gmra.mxu1 %vm1165_vm2, %v4937_v3 }
 0x5d3   : > { %10552 = vmatprep.mubr.msk.f32.mxu1 %vm1165_vm2, %v4939_v28 }
 0x5d4   : > { %v4941_v24 = vpop.permute.xlu1 %4940  ;;  %v4943_v9 = vpop.permute.xlu0 %4942 }
 0x5d6   : > { %10553 = vmatmul.mubr.msk.f32.gmra.mxu1 %vm1165_vm2, %v4941_v24 }
 0x5d7   : > { %10555 = vmatprep.mubr.msk.f32.mxu1 %vm1165_vm2, %v4943_v9 }
 0x5d8   : > { %v4945_v23 = vpop.permute.xlu1 %4944  ;;  %v4947_v18 = vpop.permute.xlu0 %4946 }
 0x5da   : > { %10556 = vmatmul.mubr.msk.f32.gmra.mxu1 %vm1165_vm2, %v4945_v23 }
 0x5db   : > { %10558 = vmatprep.mubr.msk.f32.mxu1 %vm1165_vm2, %v4947_v18 }
 0x5dc   : > { %v4949_v30 = vpop.permute.xlu1 %4948  ;;  %v4951_v61 = vpop.permute.xlu0 %4950 }
 0x5de   : > { %10559 = vmatmul.mubr.msk.f32.gmra.mxu1 %vm1165_vm2, %v4949_v30 }
 0x5df   : > { %10561 = vmatprep.mubr.msk.f32.mxu1 %vm1165_vm2, %v4951_v61 }
 0x5e0   : > { %v4953_v44 = vpop.permute.xlu1 %4952 }
 0x5e2   : > { %10562 = vmatmul.mubr.msk.f32.gmra.mxu1 %vm1165_vm2, %v4953_v44 }
 0x666   : > { %v10518_v51 = vpop.f32.mrf.mxu1 }
 0x667   : > { %v13571_v33 = vadd.f32 %v10518_v51, %v13568_v56 }
 0x668   : > { %v5084_v55 = vpop.f32.mrf.mxu1 }
 0x669   : > { %16923 = vst [vmem:[#allocation45_spill] sm:$0xff] %v13571_v33  ;;  %v5244_v2 = vand.u32 2147483647, %v13571_v33  ;;  %v13575_v50 = vadd.f32 %v13568_v56, %v5084_v55 }
 0x66a   : > { %v10521_v19 = vpop.f32.mrf.mxu1 }
 0x66b   : > { %16924 = vst [vmem:[#allocation60_spill] sm:$0xff] %v13575_v50  ;;  %v5276_v5 = vsub.f32 0.0, %v5244_v2  ;;  %v5243_v16 = vand.u32 2147483647, %v13575_v50  ;;  %v13586_v1 = vadd.f32 %v10521_v19, %v13568_v56  ;;  %v16937_v19 = vmov 8  }
 0x66c   : > { %v5094_v8 = vpop.f32.mrf.mxu1 }
 0x66d   : > { %v5309_v40 = vmul.f32 1.442695, %v5276_v5  ;;  %v5275_v53 = vsub.f32 0.0, %v5243_v16  ;;  %16927 = vst [vmem:[#allocation82_spill] sm:$0xff] %v13586_v1  ;;  %v5246_v13 = vand.u32 2147483647, %v13586_v1  ;;  %v13627_v23 = vadd.f32 %v13568_v56, %v5094_v8 }
 0x66e   : > { %v10524_v17 = vpop.f32.mrf.mxu1 }
 0x66f   : > { %10951 = vpow2.f32 %v5309_v40  ;;  %v5307_v38 = vmul.f32 1.442695, %v5275_v53  ;;  %v13579_v35 = vadd.f32 %v10524_v17, %v13568_v56  ;;  %v5278_v57 = vsub.f32 0.0, %v5246_v13  ;;  %16934 = vst [vmem:[#allocation38_spill] sm:$0xff] %v13627_v23 }
 0x670   : > { %v5104_v63 = vpop.f32.mrf.mxu1  ;;  %v5245_v55 = vand.u32 2147483647, %v13627_v23 }
 0x671   : > { %16925 = vst [vmem:[#allocation30_spill] sm:$0xff] %v13579_v35  ;;  %v5248_v6 = vand.u32 2147483647, %v13579_v35  ;;  %v13583_v32 = vadd.f32 %v13568_v56, %v5104_v63  ;;  %10953 = vpow2.f32 %v5307_v38  ;;  %v5313_v0 = vmul.f32 1.442695, %v5278_v57 }
 0x672   : > { %v10527_v41 = vpop.f32.mrf.mxu1  ;;  %v5277_v53 = vsub.f32 0.0, %v5245_v55 }
 0x673   : > { %16926 = vst [vmem:[#allocation24_spill] sm:$0xff] %v13583_v32  ;;  %v5280_v26 = vsub.f32 0.0, %v5248_v6  ;;  %v5247_v37 = vand.u32 2147483647, %v13583_v32  ;;  %v13590_v39 = vadd.f32 %v10527_v41, %v13568_v56 }
 0x674   : > { %v5114_v54 = vpop.f32.mrf.mxu1  ;;  %v5311_v6 = vmul.f32 1.442695, %v5277_v53 }
 0x675   : > { %16928 = vst [vmem:[#allocation93_spill] sm:$0xff] %v13590_v39  ;;  %v5317_v59 = vmul.f32 1.442695, %v5280_v26  ;;  %v5279_v47 = vsub.f32 0.0, %v5247_v37  ;;  %v5250_v27 = vand.u32 2147483647, %v13590_v39  ;;  %v13597_v10 = vadd.f32 %v13568_v56, %v5114_v54 }
 0x676   : > { %v10530_v29 = vpop.f32.mrf.mxu1 }
 0x677   : > { %16929 = vst [vmem:[#allocation65_spill] sm:$0xff] %v13597_v10  ;;  %10955 = vpow2.f32 %v5317_v59  ;;  %v5315_v4 = vmul.f32 1.442695, %v5279_v47  ;;  %v5282_v43 = vsub.f32 0.0, %v5250_v27  ;;  %v5249_v42 = vand.u32 2147483647, %v13597_v10 }
 0x678   : > { %v5124_v46 = vpop.f32.mrf.mxu1  ;;  %v13607_v7 = vadd.f32 %v10530_v29, %v13568_v56 }
 0x679   : > { %10957 = vpow2.f32 %v5315_v4  ;;  %v5321_v20 = vmul.f32 1.442695, %v5282_v43  ;;  %v5281_v14 = vsub.f32 0.0, %v5249_v42  ;;  %v13642_v5 = vadd.f32 %v13568_v56, %v5124_v46 }
 0x67a   : > { %v13593_v25 = vpop.f32.mrf.mxu1  ;;  %16930 = vst [vmem:[#allocation25_spill] sm:$0xff] %v13607_v7  ;;  %v5252_v62 = vand.u32 2147483647, %v13607_v7  ;;  %10959 = vpow2.f32 %v5313_v0 }
 0x67b   : > { %10961 = vpow2.f32 %v5321_v20  ;;  %v5319_v48 = vmul.f32 1.442695, %v5281_v14  ;;  %16938 = vst [vmem:[#allocation64_spill] sm:$0xff] %v13642_v5  ;;  %v5251_v38 = vand.u32 2147483647, %v13642_v5  ;;  %v13655_v63 = vadd.f32 %v13593_v25, %v13568_v56 }
 0x67c   : > { %v10952_v58 = vpop.eup %10951  ;;  %v13599_v21 = vpop.f32.mrf.mxu1  ;;  %v5284_v15 = vsub.f32 0.0, %v5252_v62 }
 0x67d   : > { %5378 = vperm.xlu0 %10723, %v10952_v58   ;;  %6048 = vperm.xlu1 %10724, %v10952_v58   ;;  %10963 = vpow2.f32 %v5319_v48  ;;  %16940 = vst [vmem:[#allocation74_spill] sm:$0xff] %v13655_v63  ;;  %v5283_v41 = vsub.f32 0.0, %v5251_v38  ;;  %v5254_v26 = vand.u32 2147483647, %v13655_v63  ;;  %v13673_v13 = vadd.f32 %v13568_v56, %v13599_v21 }
 0x67e   : > { %v13601_v22 = vpop.f32.mrf.mxu1  ;;  %v10954_v36 = vpop.eup %10953  ;;  %v5325_v30 = vmul.f32 1.442695, %v5284_v15 }
 0x67f   : > { %v5323_v37 = vmul.f32 1.442695, %v5283_v41  ;;  %v5286_v29 = vsub.f32 0.0, %v5254_v26  ;;  %16942 = vst [vmem:[#allocation41_spill] sm:$0xff] %v13673_v13  ;;  %v5253_v25 = vand.u32 2147483647, %v13673_v13  ;;  %v13691_v4 = vadd.f32 %v13601_v22, %v13568_v56 }
 0x680   : > { %v13604_v60 = vpop.f32.mrf.mxu1  ;;  %10965 = vpow2.f32 %v5325_v30 }
 0x681   : > { %10727 = vset.pattern.permute.xlu0 %v16931_v52  ;;  %10725 = vset.pattern.permute.xlu1 %v16932_v12  ;;  %10967 = vpow2.f32 %v5311_v6  ;;  %v5329_v59 = vmul.f32 1.442695, %v5286_v29  ;;  %v5285_v27 = vsub.f32 0.0, %v5253_v25  ;;  %16943 = vst [vmem:[#allocation33_spill] sm:$0xff] %v13691_v4  ;;  %v5256_v43 = vand.u32 2147483647, %v13691_v4 }
 0x682   : > { %6688 = vperm.xlu1 %10725, %v10952_v58   ;;  %6044 = vperm.xlu0 %10727, %v10954_v36   ;;  %v13611_v11 = vpop.f32.mrf.mxu1  ;;  %10969 = vpow2.f32 %v5323_v37 }
 0x683   : > { %10971 = vpow2.f32 %v5329_v59  ;;  %v5327_v21 = vmul.f32 1.442695, %v5285_v27  ;;  %v5288_v42 = vsub.f32 0.0, %v5256_v43  ;;  %v13715_v14 = vadd.f32 %v13611_v11, %v13568_v56 }
 0x684   : > { %v13613_v28 = vpop.f32.mrf.mxu1  ;;  %v13622_v24 = vpop.eup %10955 }
 0x685   : > { %10973 = vpow2.f32 %v5327_v21  ;;  %v5333_v22 = vmul.f32 1.442695, %v5288_v42  ;;  %16945 = vst [vmem:[#allocation69_spill] sm:$0xff] %v13715_v14  ;;  %v5258_v48 = vand.u32 2147483647, %v13715_v14 }
 0x686   : > { %10726 = vset.pattern.permute.xlu1 %v16933_v31  ;;  %10728 = vset.pattern.permute.xlu0 %v16932_v12  ;;  %v13618_v49 = vpop.f32.mrf.mxu1  ;;  %v13633_v51 = vpop.eup %10957 }
 0x687   : > { %7328 = vperm.xlu1 %10726, %v10952_v58   ;;  %6684 = vperm.xlu0 %10728, %v10954_v36   ;;  %v10960_v40 = vpop.eup %10959  ;;  %10975 = vpow2.f32 %v5333_v22  ;;  %v5290_v11 = vsub.f32 0.0, %v5258_v48 }
 0x688   : > { %v13620_v3 = vpop.f32.mrf.mxu1  ;;  %v13648_v17 = vpop.eup %10961 }
 0x68a   : > { %v13624_v9 = vpop.f32.mrf.mxu1  ;;  %v13658_v54 = vpop.eup %10963 }
 0x68b   : > { %7324 = vperm.xlu1 %10726, %v10954_v36   ;;  %6704 = vperm.xlu0 %10728, %v13622_v24   ;;  %16941 = vst [vmem:[#allocation90_spill] sm:$0xff] %v13658_v54 }
 0x68c   : > { %v5174_v18 = vpop.f32.mrf.mxu1 }
 0x68d   : > { %v13631_v61 = vadd.f32 %v13568_v56, %v5174_v18  ;;  %v13664_v46 = vpop.eup %10965  ;;  %v5337_v18 = vmul.f32 1.442695, %v5290_v11 }
 0x68e   : > { %v10548_v44 = vpop.f32.mrf.mxu1  ;;  %v10968_v47 = vpop.eup %10967 }
 0x68f   : > { %16935 = vst [vmem:[#allocation54_spill] sm:$0xff] %v13631_v61  ;;  %v13637_v2 = vadd.f32 %v10548_v44, %v13568_v56  ;;  %10729 = vset.pattern.permute.xlu1 %v16937_v19  ;;  %10741 = vset.pattern.permute.xlu0 %v16931_v52  ;;  %v13680_v58 = vpop.eup %10969  ;;  %v13739_v44 = vadd.f32 %v13568_v56, %v13620_v3 }
 0x690   : > { %5373 = vperm.xlu1 %10729, %v10954_v36   ;;  %6060 = vperm.xlu0 %10741, %v13633_v51   ;;  %v5184_v16 = vpop.f32.mrf.mxu1  ;;  %v13685_v57 = vpop.eup %10971  ;;  %v13700_v36 = vadd.f32 %v13568_v56, %v13604_v60 }
 0x691   : > { %16936 = vst [vmem:[#allocation55_spill] sm:$0xff] %v13637_v2  ;;  %v13646_v8 = vadd.f32 %v13568_v56, %v5184_v16  ;;  %16947 = vst [vmem:[#allocation67_spill] sm:$0xff] %v13739_v44  ;;  %v5259_v16 = vand.u32 2147483647, %v13739_v44 }
 0x692   : > { %16944 = vst [vmem:[#allocation85_spill] sm:$0xff] %v13700_v36  ;;  %v5255_v0 = vand.u32 2147483647, %v13700_v36  ;;  %v13707_v20 = vpop.eup %10973  ;;  %v10551_v38 = vpop.f32.mrf.mxu1 }
 0x693   : > { %16939 = vst [vmem:[#allocation50_spill] sm:$0xff] %v13646_v8  ;;  %v5291_v53 = vsub.f32 0.0, %v5259_v16  ;;  %v13763_v26 = vadd.f32 %v10551_v38, %v13568_v56 }
 0x694   : > { %10730 = vset.pattern.permute.xlu1 %v16931_v52  ;;  %10746 = vset.pattern.permute.xlu0 %v16932_v12  ;;  %v5287_v60 = vsub.f32 0.0, %v5255_v0  ;;  %v13726_v15 = vpop.eup %10975  ;;  %v5194_v59 = vpop.f32.mrf.mxu1 }
 0x695   : > { %6056 = vperm.xlu1 %10730, %v10960_v40   ;;  %6712 = vperm.xlu0 %10746, %v13648_v17   ;;  %16949 = vst [vmem:[#allocation94_spill] sm:$0xff] %v13763_v26  ;;  %v5266_v29 = vand.u32 2147483647, %v13763_v26  ;;  %v13775_v25 = vadd.f32 %v13568_v56, %v5194_v59 }
 0x696   : > { %v5331_v62 = vmul.f32 1.442695, %v5287_v60  ;;  %v10554_v21 = vpop.f32.mrf.mxu1 }
 0x697   : > { %16950 = vst [vmem:[#allocation28_spill] sm:$0xff] %v13775_v25  ;;  %v5265_v42 = vand.u32 2147483647, %v13775_v25  ;;  %v13785_v22 = vadd.f32 %v10554_v21, %v13568_v56 }
 0x698   : > { %10977 = vpow2.f32 %v5331_v62  ;;  %v5204_v11 = vpop.f32.mrf.mxu1 }
 0x699   : > { %10731 = vset.pattern.permute.xlu1 %v16932_v12  ;;  %10748 = vset.pattern.permute.xlu0 %v16931_v52  ;;  %10979 = vpow2.f32 %v5337_v18  ;;  %16951 = vst [vmem:[#allocation42_spill] sm:$0xff] %v13785_v22  ;;  %v5297_v60 = vsub.f32 0.0, %v5265_v42  ;;  %v5268_v62 = vand.u32 2147483647, %v13785_v22 }
 0x69a   : > { %6696 = vperm.xlu1 %10731, %v10960_v40   ;;  %6068 = vperm.xlu0 %10748, %v13658_v54   ;;  %v10557_v16 = vpop.f32.mrf.mxu1 }
 0x69b   : > { %v5351_v48 = vmul.f32 1.442695, %v5297_v60  ;;  %v5300_v18 = vsub.f32 0.0, %v5268_v62  ;;  %v13810_v38 = vadd.f32 %v10557_v16, %v13568_v56 }
 0x69d   : > { %16955 = vst [vmem:[#allocation63_spill] sm:$0xff] %v13810_v38 }
 0x69e   : > { %10732 = vset.pattern.permute.xlu1 %v16933_v31  ;;  %10752 = vset.pattern.permute.xlu0 %v16932_v12 }
 0x69f   : > { %7336 = vperm.xlu1 %10732, %v10960_v40   ;;  %6720 = vperm.xlu0 %10752, %v13664_v46  }
 0x6a3   : > { %10733 = vset.pattern.permute.xlu1 %v16937_v19  ;;  %10753 = vset.pattern.permute.xlu0 %v16933_v31 }
 0x6a4   : > { %5388 = vperm.xlu1 %10733, %v10960_v40   ;;  %7360 = vperm.xlu0 %10753, %v13664_v46   ;;  %v13750_v40 = vadd.f32 %v13624_v9, %v13568_v56  ;;  %v5339_v9 = vmul.f32 1.442695, %v5291_v53 }
 0x6a5   : > { %v13745_v55 = vpop.eup %10977 }
 0x6a6   : > { %16948 = vst [vmem:[#allocation84_spill] sm:$0xff] %v13750_v40  ;;  %v13760_v41 = vpop.eup %10979 }
 0x6a8   : > { %10734 = vset.pattern.permute.xlu1 %v16931_v52  ;;  %10754 = vset.pattern.permute.xlu0 %v16937_v19 }
 0x6a9   : > { %6052 = vperm.xlu1 %10734, %v10968_v47   ;;  %5418 = vperm.xlu0 %10754, %v13664_v46  }
 0x6ad   : > { %10735 = vset.pattern.permute.xlu1 %v16932_v12  ;;  %10755 = vset.pattern.permute.xlu0 %v16931_v52 }
 0x6ae   : > { %6692 = vperm.xlu1 %10735, %v10968_v47   ;;  %6076 = vperm.xlu0 %10755, %v13680_v58  }
 0x6b2   : > { %10736 = vset.pattern.permute.xlu1 %v16933_v31  ;;  %10760 = vset.pattern.permute.xlu0 %v16932_v12 }
 0x6b3   : > { %7332 = vperm.xlu1 %10736, %v10968_v47   ;;  %6728 = vperm.xlu0 %10760, %v13685_v57  }
 0x6b7   : > { %10737 = vset.pattern.permute.xlu1 %v16937_v19  ;;  %10761 = vset.pattern.permute.xlu0 %v16933_v31 }
 0x6b8   : > { %5383 = vperm.xlu1 %10737, %v10968_v47   ;;  %7368 = vperm.xlu0 %10761, %v13685_v57   ;;  %v5298_v47 = vsub.f32 0.0, %v5266_v29  ;;  %v5270_v29 = vand.u32 2147483647, %v13810_v38 }
 0x6ba   : > { %v5353_v43 = vmul.f32 1.442695, %v5298_v47 }
 0x6bc   : > { %10738 = vset.pattern.permute.xlu1 %v16931_v52  ;;  %10762 = vset.pattern.permute.xlu0 %v16937_v19 }
 0x6bd   : > { %6064 = vperm.xlu1 %10738, %v13622_v24   ;;  %5428 = vperm.xlu0 %10762, %v13685_v57  }
 0x6c1   : > { %10739 = vset.pattern.permute.xlu1 %v16933_v31  ;;  %10763 = vset.pattern.permute.xlu0 %v16931_v52 }
 0x6c2   : > { %7344 = vperm.xlu1 %10739, %v13622_v24   ;;  %6084 = vperm.xlu0 %10763, %v13707_v20  }
 0x6c6   : > { %10740 = vset.pattern.permute.xlu1 %v16937_v19  ;;  %10764 = vset.pattern.permute.xlu0 %v16932_v12 }
 0x6c7   : > { %5398 = vperm.xlu1 %10740, %v13622_v24   ;;  %6724 = vperm.xlu0 %10764, %v13707_v20   ;;  %v13730_v24 = vadd.f32 %v13618_v49, %v13568_v56 }
 0x6c9   : > { %16946 = vst [vmem:[#allocation73_spill] sm:$0xff] %v13730_v24  ;;  %v5260_v30 = vand.u32 2147483647, %v13730_v24 }
 0x6cb   : > { %10742 = vset.pattern.permute.xlu1 %v16932_v12  ;;  %10766 = vset.pattern.permute.xlu0 %v16937_v19  ;;  %v5292_v49 = vsub.f32 0.0, %v5260_v30  ;;  %v13800_v30 = vadd.f32 %v13568_v56, %v5204_v11 }
 0x6cc   : > { %6700 = vperm.xlu1 %10742, %v13633_v51   ;;  %5423 = vperm.xlu0 %10766, %v13707_v20  }
 0x6cd   : > { %v5341_v3 = vmul.f32 1.442695, %v5292_v49  ;;  %16953 = vst [vmem:[#allocation78_spill] sm:$0xff] %v13800_v30  ;;  %v5357_v49 = vmul.f32 1.442695, %v5300_v18 }
 0x6ce   : > { %v5267_v53 = vand.u32 2147483647, %v13800_v30 }
 0x6cf   : > { %10981 = vpow2.f32 %v5341_v3 }
 0x6d0   : > { %10743 = vset.pattern.permute.xlu1 %v16933_v31  ;;  %10768 = vset.pattern.permute.xlu0 %v16932_v12  ;;  %10983 = vpow2.f32 %v5339_v9  ;;  %v13815_v9 = vadd.f32 %v13568_v56, %v13613_v28 }
 0x6d1   : > { %7340 = vperm.xlu1 %10743, %v13633_v51   ;;  %6736 = vperm.xlu0 %10768, %v13726_v15  }
 0x6d2   : > { %16956 = vst [vmem:[#allocation56_spill] sm:$0xff] %v13815_v9  ;;  %v5257_v47 = vand.u32 2147483647, %v13815_v9 }
 0x6d4   : > { %v5289_v62 = vsub.f32 0.0, %v5257_v47 }
 0x6d5   : > { %10744 = vset.pattern.permute.xlu1 %v16937_v19  ;;  %10769 = vset.pattern.permute.xlu0 %v16933_v31 }
 0x6d6   : > { %5393 = vperm.xlu1 %10744, %v13633_v51   ;;  %7376 = vperm.xlu0 %10769, %v13726_v15   ;;  %v5262_v51 = vand.u32 2147483647, %v13750_v40 }
 0x6d8   : > { %v5294_v6 = vsub.f32 0.0, %v5262_v51 }
 0x6da   : > { %10745 = vset.pattern.permute.xlu1 %v16931_v52  ;;  %7372 = vperm.xlu0 %10769, %v13745_v55   ;;  %v5345_v37 = vmul.f32 1.442695, %v5294_v6  ;;  %v5214_v6 = vpop.f32.mrf.mxu1 }
 0x6db   : > { %6072 = vperm.xlu1 %10745, %v13648_v17   ;;  %v13824_v59 = vadd.f32 %v13568_v56, %v5214_v6 }
 0x6dc   : > { %10985 = vpow2.f32 %v5345_v37  ;;  %v13777_v27 = vpop.eup %10981  ;;  %v10560_v28 = vpop.f32.mrf.mxu1 }
 0x6dd   : > { %v13787_v0 = vpop.eup %10983  ;;  %10987 = vpow2.f32 %v5353_v43  ;;  %16957 = vst [vmem:[#allocation98_spill] sm:$0xff] %v13824_v59  ;;  %v5302_v43 = vsub.f32 0.0, %v5270_v29  ;;  %v5269_v42 = vand.u32 2147483647, %v13824_v59 }
 0x6de   : > { %10771 = vset.pattern.permute.xlu0 %v16937_v19  ;;  %16952 = vst [vmem:[#allocation79_spill] sm:$0xff] %v13787_v0  ;;  %10989 = vpow2.f32 %v5351_v48  ;;  %v13835_v48 = vadd.f32 %v10560_v28, %v13568_v56  ;;  %v5224_v28 = vpop.f32.mrf.mxu1 }
 0x6df   : > { %10747 = vset.pattern.permute.xlu1 %v16933_v31  ;;  %5433 = vperm.xlu0 %10771, %v13745_v55   ;;  %10991 = vpow2.f32 %v5357_v49  ;;  %v5361_v49 = vmul.f32 1.442695, %v5302_v43  ;;  %v5301_v16 = vsub.f32 0.0, %v5269_v42  ;;  %v13853_v42 = vadd.f32 %v13568_v56, %v5224_v28 }
 0x6e0   : > { %7352 = vperm.xlu1 %10747, %v13648_v17   ;;  %16959 = vst [vmem:[#allocation86_spill] sm:$0xff] %v13835_v48 }
 0x6e1   : > { %v5359_v47 = vmul.f32 1.442695, %v5301_v16  ;;  %16961 = vst [vmem:[#allocation49_spill] sm:$0xff] %v13853_v42 }
 0x6e3   : > { %10772 = vset.pattern.permute.xlu0 %v16931_v52 }
 0x6e4   : > { %10749 = vset.pattern.permute.xlu1 %v16932_v12  ;;  %6104 = vperm.xlu0 %10772, %v13760_v41  }
 0x6e5   : > { %6708 = vperm.xlu1 %10749, %v13658_v54  }
 0x6e8   : > { %10773 = vset.pattern.permute.xlu0 %v16933_v31 }
 0x6e9   : > { %10750 = vset.pattern.permute.xlu1 %v16933_v31  ;;  %7384 = vperm.xlu0 %10773, %v13760_v41  }
 0x6ea   : > { %7348 = vperm.xlu1 %10750, %v13658_v54  }
 0x6ed   : > { %10778 = vset.pattern.permute.xlu0 %v16932_v12 }
 0x6ee   : > { %10751 = vset.pattern.permute.xlu1 %v16931_v52  ;;  %6752 = vperm.xlu0 %10778, %v13777_v27  }
 0x6ef   : > { %6080 = vperm.xlu1 %10751, %v13664_v46   ;;  %v13794_v46 = vpop.eup %10985 }
 0x6f0   : > { %v13807_v51 = vpop.eup %10987 }
 0x6f1   : > { %16954 = vst [vmem:[#allocation71_spill] sm:$0xff] %v13807_v51 }
 0x6f2   : > { %10780 = vset.pattern.permute.xlu0 %v16931_v52 }
 0x6f3   : > { %10756 = vset.pattern.permute.xlu1 %v16932_v12  ;;  %6108 = vperm.xlu0 %10780, %v13787_v0  }
 0x6f4   : > { %6716 = vperm.xlu1 %10756, %v13680_v58  }
 0x6f7   : > { %6120 = vperm.xlu0 %10780, %v13794_v46  }
 0x6f8   : > { %10757 = vset.pattern.permute.xlu1 %v16933_v31  ;;  %v6049_v3 = vpop.permute.xlu1 %6048  ;;  %v5379_v60 = vpop.permute.xlu0 %5378 }
 0x6f9   : > { %7356 = vperm.xlu1 %10757, %v13680_v58   ;;  %v5532_v18 = vmul.f32 %v5379_v60, %v13571_v33  ;;  %v10563_v60 = vpop.f32.mrf.mxu1  ;;  %v6172_v16 = vmul.f32 %v6049_v3, %v13571_v33 }
 0x6fa   : > { %v13863_v28 = vadd.f32 %v10563_v60, %v13568_v56  ;;  %v5264_v60 = vand.u32 2147483647, %v13637_v2 }
 0x6fb   : > { %10784 = vset.pattern.permute.xlu0 %v16933_v31  ;;  %v6210_v3 = vsel %vm1165_vm2, %v6172_v16, -inf  ;;  %v6434_v30 = vsel %vm1165_vm2, %v6172_v16, 0.0  ;;  %v5794_v2 = vsel %vm1165_vm2, %v5532_v18, 0.0 }
 0x6fc   : > { %7400 = vperm.xlu0 %10784, %v13794_v46   ;;  %16962 = vst [vmem:[#allocation27_spill] sm:$0xff] %v13863_v28  ;;  %v6211_v59 = vrot.slane %v6210_v3, 4 }
 0x6fd   : > { %10758 = vset.pattern.permute.xlu1 %v16937_v19  ;;  %v13819_v37 = vpop.permute.xlu1 %6688 }
 0x6fe   : > { %5413 = vperm.xlu1 %10758, %v13680_v58   ;;  %v5299_v58 = vsub.f32 0.0, %v5267_v53  ;;  %v5335_v53 = vmul.f32 1.442695, %v5289_v62  ;;  %v5261_v62 = vand.u32 2147483647, %v13631_v61  ;;  %v6812_v26 = vmul.f32 %v13819_v37, %v13571_v33 }
 0x700   : > { %10794 = vset.pattern.permute.xlu0 %v16931_v52  ;;  %v5355_v21 = vmul.f32 1.442695, %v5299_v58  ;;  %v5570_v58 = vsel %vm1165_vm2, %v5532_v18, -inf  ;;  %v6212_v18 = vmax.f32 %v6210_v3, %v6211_v59  ;;  %v7074_v3 = vsel %vm1165_vm2, %v6812_v26, 0.0 }
 0x701   : > { %6136 = vperm.xlu0 %10794, %v13807_v51   ;;  %v5571_v43 = vrot.slane %v5570_v58, 4  ;;  %v7075_v14 = vrot.slane %v7074_v3, 4 }
 0x702   : > { %10759 = vset.pattern.permute.xlu1 %v16931_v52  ;;  %v13837_v11 = vpop.permute.xlu1 %7328  ;;  %10993 = vpow2.f32 %v5355_v21 }
 0x703   : > { %6088 = vperm.xlu1 %10759, %v13685_v57   ;;  %v13832_v57 = vpop.eup %10989  ;;  %10995 = vpow2.f32 %v5361_v49 }
 0x704   : > { %16958 = vst [vmem:[#allocation37_spill] sm:$0xff] %v13832_v57  ;;  %v13844_v6 = vpop.eup %10991  ;;  %10997 = vpow2.f32 %v5335_v53  ;;  %v5572_v53 = vmax.f32 %v5570_v58, %v5571_v43 }
 0x705   : > { %10796 = vset.pattern.permute.xlu0 %v16933_v31  ;;  %16960 = vst [vmem:[#allocation46_spill] sm:$0xff] %v13844_v6  ;;  %10999 = vpow2.f32 %v5359_v47 }
 0x706   : > { %7416 = vperm.xlu0 %10796, %v13807_v51   ;;  %v13848_v29 = vpop.permute.xlu1 %7324  ;;  %v5573_v58 = vrot.slane %v5572_v53, 2 }
 0x707   : > { %10765 = vset.pattern.permute.xlu1 %v16933_v31 }
 0x708   : > { %7364 = vperm.xlu1 %10765, %v13707_v20   ;;  %v5272_v20 = vand.u32 2147483647, %v13835_v48  ;;  %v5574_v22 = vmax.f32 %v5572_v53, %v5573_v58 }
 0x70a   : > { %7412 = vperm.xlu0 %10796, %v13832_v57   ;;  %v5304_v21 = vsub.f32 0.0, %v5272_v20  ;;  %v5271_v20 = vand.u32 2147483647, %v13853_v42 }
 0x70b   : > { %v5374_v49 = vpop.permute.xlu1 %5373 }
 0x70c   : > { %10767 = vset.pattern.permute.xlu1 %v16931_v52  ;;  %v5365_v34 = vmul.f32 1.442695, %v5304_v21  ;;  %v13868_v45 = vmul.f32 %v5374_v49, %v13575_v50  ;;  %v5293_v21 = vsub.f32 0.0, %v5261_v62  ;;  %v5303_v61 = vsub.f32 0.0, %v5271_v20  ;;  %v5234_v62 = vpop.f32.mrf.mxu1 }
 0x70d   : > { %6096 = vperm.xlu1 %10767, %v13726_v15   ;;  %v5274_v49 = vand.u32 2147483647, %v13863_v28  ;;  %v5296_v28 = vsub.f32 0.0, %v5264_v60  ;;  %v5575_v60 = vrot.slane %v5574_v22, 1 }
 0x70e   : > { %10800 = vset.pattern.permute.xlu0 %v16932_v12  ;;  %11001 = vpow2.f32 %v5365_v34  ;;  %v5563_v43 = vsel %vm1165_vm2, %v13868_v45, -inf  ;;  %v5343_v34 = vmul.f32 1.442695, %v5293_v21  ;;  %v5363_v21 = vmul.f32 1.442695, %v5303_v61 }
 0x70f   : > { %6784 = vperm.xlu0 %10800, %v13844_v6   ;;  %v13865_v47 = vpop.eup %10993  ;;  %v5564_v42 = vrot.slane %v5563_v43, 4  ;;  %v5306_v25 = vsub.f32 0.0, %v5274_v49  ;;  %v5263_v61 = vand.u32 2147483647, %v13646_v8 }
 0x710   : > { %v13878_v48 = vpop.eup %10995  ;;  %11003 = vpow2.f32 %v5343_v34  ;;  %v6213_v34 = vrot.slane %v6212_v18, 2 }
 0x711   : > { %6092 = vperm.xlu1 %10767, %v13745_v55   ;;  %v13882_v38 = vpop.eup %10997  ;;  %v5565_v20 = vmax.f32 %v5563_v43, %v5564_v42  ;;  %v6435_v42 = vrot.slane %v6434_v30, 4  ;;  %v5795_v43 = vrot.slane %v5794_v2, 4  ;;  %11005 = vpow2.f32 %v5363_v21 }
 0x712   : > { %16963 = vst [vmem:[#allocation72_spill] sm:$0xff] %v13882_v38  ;;  %v13894_v58 = vpop.eup %10999  ;;  %v6850_v21 = vsel %vm1165_vm2, %v6812_v26, -inf  ;;  %v5295_v54 = vsub.f32 0.0, %v5263_v61  ;;  %v6214_v61 = vmax.f32 %v6212_v18, %v6213_v34 }
 0x713   : > { %10801 = vset.pattern.permute.xlu0 %v16933_v31  ;;  %v5566_v53 = vrot.slane %v5565_v20, 2  ;;  %16965 = vst [vmem:[#allocation68_spill] sm:$0xff] %v13894_v58  ;;  %v6436_v8 = vadd.f32 %v6435_v42, %v6434_v30  ;;  %v6851_v42 = vrot.slane %v6850_v21, 4 }
 0x714   : > { %7424 = vperm.xlu0 %10801, %v13844_v6  }
 0x715   : > { %10770 = vset.pattern.permute.xlu1 %v16932_v12  ;;  %v5567_v49 = vmax.f32 %v5565_v20, %v5566_v53  ;;  %v5796_v20 = vadd.f32 %v5795_v43, %v5794_v2  ;;  %v13919_v43 = vpop.permute.xlu1 %6056  ;;  %v6852_v34 = vmax.f32 %v6850_v21, %v6851_v42 }
 0x716   : > { %6732 = vperm.xlu1 %10770, %v13745_v55   ;;  %v6045_v55 = vpop.permute.xlu0 %6044 }
 0x717   : > { %v6171_v9 = vmul.f32 %v6045_v55, %v13575_v50  ;;  %v13890_v55 = vadd.f32 %v13568_v56, %v5234_v62  ;;  %v5349_v56 = vmul.f32 1.442695, %v5296_v28  ;;  %v5369_v62 = vmul.f32 1.442695, %v5306_v25 }
 0x718   : > { %10802 = vset.pattern.permute.xlu0 %v16931_v52  ;;  %v5568_v24 = vrot.slane %v5567_v49, 1  ;;  %v5576_v25 = vmax.f32 %v5574_v22, %v5575_v60  ;;  %v7451_v22 = vmul.f32 %v13848_v29, %v13575_v50  ;;  %v5347_v29 = vmul.f32 1.442695, %v5295_v54 }
 0x719   : > { %6140 = vperm.xlu0 %10802, %v13865_v47   ;;  %16964 = vst [vmem:[#allocation77_spill] sm:$0xff] %v13890_v55  ;;  %v6427_v40 = vsel %vm1165_vm2, %v6171_v9, 0.0  ;;  %v5273_v59 = vand.u32 2147483647, %v13890_v55  ;;  %v6203_v53 = vsel %vm1165_vm2, %v6171_v9, -inf  ;;  %11007 = vpow2.f32 %v5369_v62 }
 0x71a   : > { %6744 = vperm.xlu1 %10770, %v13760_v41   ;;  %v6685_v16 = vpop.permute.xlu0 %6684  ;;  %v6428_v44 = vrot.slane %v6427_v40, 4  ;;  %v5569_v55 = vmax.f32 %v5567_v49, %v5568_v24  ;;  %v6204_v2 = vrot.slane %v6203_v53, 4  ;;  %v6437_v9 = vrot.slane %v6436_v8, 2 }
 0x71b   : > { %v6811_v37 = vmul.f32 %v6685_v16, %v13575_v50  ;;  %v13905_v28 = vpop.eup %11001  ;;  %v7452_v16 = vmul.f32 %v13837_v11, %v13571_v33  ;;  %v5305_v24 = vsub.f32 0.0, %v5273_v59  ;;  %v5797_v11 = vrot.slane %v5796_v20, 2 }
 0x71c   : > { %v6429_v30 = vadd.f32 %v6428_v44, %v6427_v40  ;;  %v13916_v26 = vsel %vm3598_vm3, %v5576_v25, %v5569_v55  ;;  %11009 = vpow2.f32 %v5349_v56  ;;  %v7076_v55 = vadd.f32 %v7075_v14, %v7074_v3 }
 0x71d   : > { %10806 = vset.pattern.permute.xlu0 %v16932_v12  ;;  %v7067_v36 = vsel %vm1165_vm2, %v6811_v37, 0.0  ;;  %16966 = vst [vmem:[#allocation11_spill] sm:$0xff] %v13916_v26  ;;  %v7714_v60 = vsel %vm1165_vm2, %v7452_v16, 0.0  ;;  %v6843_v44 = vsel %vm1165_vm2, %v6811_v37, -inf  ;;  %v6205_v49 = vmax.f32 %v6203_v53, %v6204_v2  ;;  %v13930_v3 = vpop.eup %11003 }
 0x71e   : > { %10774 = vset.pattern.permute.xlu1 %v16931_v52  ;;  %6792 = vperm.xlu0 %10806, %v13878_v48   ;;  %v7068_v40 = vrot.slane %v7067_v36, 4  ;;  %v6430_v62 = vrot.slane %v6429_v30, 2  ;;  %v7490_v59 = vsel %vm1165_vm2, %v7452_v16, -inf  ;;  %v7707_v25 = vsel %vm1165_vm2, %v7451_v22, 0.0  ;;  %v6705_v33 = vpop.permute.xlu0 %6704  ;;  %16967 = vst [vmem:[#allocation61_spill] sm:$0xff] %v13930_v3  ;;  %v13936_v21 = vpop.eup %11005 }
 0x71f   : > { %6100 = vperm.xlu1 %10774, %v13882_v38   ;;  %v6438_v18 = vadd.f32 %v6437_v9, %v6436_v8  ;;  %v7715_v50 = vrot.slane %v7714_v60, 4  ;;  %v5367_v56 = vmul.f32 1.442695, %v5305_v24  ;;  %v6215_v54 = vrot.slane %v6214_v61, 1  ;;  %v13934_v8 = vpop.permute.xlu1 %6696 }
 0x720   : > { %v5798_v14 = vadd.f32 %v5797_v11, %v5796_v20  ;;  %v7069_v37 = vadd.f32 %v7068_v40, %v7067_v36  ;;  %v7491_v53 = vrot.slane %v7490_v59, 4  ;;  %v7483_v16 = vsel %vm1165_vm2, %v7451_v22, -inf }
 0x721   : > { %v7708_v2 = vrot.slane %v7707_v25, 4  ;;  %v6816_v4 = vmul.f32 %v6705_v33, %v13579_v35  ;;  %11011 = vpow2.f32 %v5347_v29  ;;  %v7077_v9 = vrot.slane %v7076_v55, 2 }
 0x722   : > { %6788 = vperm.xlu0 %10806, %v13894_v58   ;;  %v6206_v24 = vrot.slane %v6205_v49, 2  ;;  %v6431_v42 = vadd.f32 %v6430_v62, %v6429_v30  ;;  %v6439_v36 = vrot.slane %v6438_v18, 1  ;;  %v6853_v20 = vrot.slane %v6852_v34, 2  ;;  %v6061_v63 = vpop.permute.xlu0 %6060 }
 0x723   : > { %10775 = vset.pattern.permute.xlu1 %v16932_v12  ;;  %v7716_v11 = vadd.f32 %v7715_v50, %v7714_v60  ;;  %11013 = vpow2.f32 %v5367_v56  ;;  %v5799_v22 = vrot.slane %v5798_v14, 1  ;;  %v7070_v58 = vrot.slane %v7069_v37, 2 }
 0x724   : > { %6740 = vperm.xlu1 %10775, %v13882_v38   ;;  %v7484_v33 = vrot.slane %v7483_v16, 4  ;;  %v13941_v13 = vmax.f32 %v6214_v61, %v6215_v54  ;;  %v7492_v29 = vmax.f32 %v7490_v59, %v7491_v53  ;;  %v7709_v6 = vadd.f32 %v7708_v2, %v7707_v25  ;;  %v13948_v61 = vpop.permute.xlu1 %7336 }
 0x725   : > { %v6878_v30 = vsel %vm1165_vm2, %v6816_v4, -inf  ;;  %v7078_v50 = vadd.f32 %v7077_v9, %v7076_v55  ;;  %v6432_v60 = vrot.slane %v6431_v42, 1  ;;  %v6440_v56 = vadd.f32 %v6439_v36, %v6438_v18 }
 0x726   : > { %10810 = vset.pattern.permute.xlu0 %v16931_v52  ;;  %v13945_v62 = vpop.eup %11007  ;;  %v6854_v35 = vmax.f32 %v6852_v34, %v6853_v20  ;;  %v7717_v57 = vrot.slane %v7716_v11, 2  ;;  %v7071_v59 = vadd.f32 %v7070_v58, %v7069_v37  ;;  %v7485_v25 = vmax.f32 %v7483_v16, %v7484_v33 }
 0x727   : > { %6160 = vperm.xlu0 %10810, %v13905_v28   ;;  %16968 = vst [vmem:[#allocation51_spill] sm:$0xff] %v13945_v62  ;;  %v6879_v54 = vrot.slane %v6878_v30, 4  ;;  %v5787_v53 = vsel %vm1165_vm2, %v13868_v45, 0.0  ;;  %v5800_v55 = vadd.f32 %v5799_v22, %v5798_v14  ;;  %v7710_v2 = vrot.slane %v7709_v6, 2 }
 0x728   : > { %10776 = vset.pattern.permute.xlu1 %v16933_v31  ;;  %v7079_v18 = vrot.slane %v7078_v50, 1  ;;  %v6175_v36 = vmul.f32 %v6061_v63, %v13583_v32  ;;  %v6652_v58 = vmul.f32 0.125, %v6440_v56  ;;  %v7718_v37 = vadd.f32 %v7717_v57, %v7716_v11  ;;  %v13962_v63 = vpop.permute.xlu1 %5388  ;;  %v6713_v11 = vpop.permute.xlu0 %6712 }
 0x729   : > { %7380 = vperm.xlu1 %10776, %v13882_v38   ;;  %v6844_v38 = vrot.slane %v6843_v44, 4  ;;  %v5788_v20 = vrot.slane %v5787_v53, 4  ;;  %v6855_v45 = vrot.slane %v6854_v35, 1  ;;  %v7072_v14 = vrot.slane %v7071_v59, 1 }
 0x72a   : > { %v7486_v22 = vrot.slane %v7485_v25, 2  ;;  %v6880_v33 = vmax.f32 %v6878_v30, %v6879_v54  ;;  %v13960_v26 = vmul.f32 0.125, %v5800_v55  ;;  %v7080_v32 = vadd.f32 %v7079_v18, %v7078_v50 }
 0x72b   : > { %10811 = vset.pattern.permute.xlu0 %v16932_v12  ;;  %v6845_v40 = vmax.f32 %v6843_v44, %v6844_v38  ;;  %v6207_v38 = vmax.f32 %v6205_v49, %v6206_v24  ;;  %v7102_v44 = vsel %vm1165_vm2, %v6816_v4, 0.0  ;;  %v7493_v49 = vrot.slane %v7492_v29, 2  ;;  %v13954_v4 = vpop.eup %11009 }
 0x72c   : > { %6800 = vperm.xlu0 %10811, %v13905_v28   ;;  %v7103_v9 = vrot.slane %v7102_v44, 4  ;;  %16969 = vst [vmem:[#allocation29_spill] sm:$0xff] %v13954_v4  ;;  %v6433_v24 = vadd.f32 %v6432_v60, %v6431_v42  ;;  %v7711_v42 = vadd.f32 %v7710_v2, %v7709_v6  ;;  %v7719_v30 = vrot.slane %v7718_v37, 1 }
 0x72d   : > { %10777 = vset.pattern.permute.xlu1 %v16931_v52  ;;  %v6846_v51 = vrot.slane %v6845_v40, 2  ;;  %v6208_v34 = vrot.slane %v6207_v38, 1  ;;  %v7494_v5 = vmax.f32 %v7492_v29, %v7493_v49  ;;  %v6455_v55 = vsel %vm1165_vm2, %v6175_v36, 0.0 }
 0x72e   : > { %6112 = vperm.xlu1 %10777, %v13777_v27   ;;  %v7104_v60 = vadd.f32 %v7103_v9, %v7102_v44  ;;  %v6651_v57 = vmul.f32 0.125, %v6433_v24  ;;  %v6856_v6 = vmax.f32 %v6854_v35, %v6855_v45  ;;  %v7073_v29 = vadd.f32 %v7072_v14, %v7071_v59  ;;  %v13983_v45 = vpop.permute.xlu1 %6052 }
 0x72f   : > { %v6847_v16 = vmax.f32 %v6845_v40, %v6846_v51  ;;  %v6209_v56 = vmax.f32 %v6207_v38, %v6208_v34  ;;  %v6231_v51 = vsel %vm1165_vm2, %v6175_v36, -inf  ;;  %v13966_v40 = vpop.eup %11011  ;;  %v7487_v44 = vmax.f32 %v7485_v25, %v7486_v22  ;;  %v6069_v22 = vpop.permute.xlu0 %6068 }
 0x730   : > { %10812 = vset.pattern.permute.xlu0 %v16931_v52  ;;  %16970 = vst [vmem:[#allocation59_spill] sm:$0xff] %v13966_v40  ;;  %v6881_v50 = vrot.slane %v6880_v33, 2  ;;  %v13971_v38 = vpop.eup %11013  ;;  %v7495_v49 = vrot.slane %v7494_v5, 1  ;;  %v7712_v2 = vrot.slane %v7711_v42, 1  ;;  %v7105_v9 = vrot.slane %v7104_v60, 2 }
 0x731   : > { %6156 = vperm.xlu0 %10812, %v13936_v21   ;;  %v6848_v54 = vrot.slane %v6847_v16, 1  ;;  %16971 = vst [vmem:[#allocation57_spill] sm:$0xff] %v13971_v38  ;;  %v6232_v18 = vrot.slane %v6231_v51, 4  ;;  %v7292_v34 = vmul.f32 0.125, %v7080_v32  ;;  %v6456_v24 = vrot.slane %v6455_v55, 4 }
 0x732   : > { %10779 = vset.pattern.permute.xlu1 %v16933_v31  ;;  %v6174_v35 = vmul.f32 %v13919_v43, %v13586_v1  ;;  %v13981_v59 = vsel %vm3598_vm3, %v6652_v58, %v6651_v57  ;;  %v7720_v25 = vadd.f32 %v7719_v30, %v7718_v37  ;;  %v7488_v32 = vrot.slane %v7487_v44, 1 }
 0x733   : > { %7392 = vperm.xlu1 %10779, %v13777_v27   ;;  %v6849_v36 = vmax.f32 %v6847_v16, %v6848_v54  ;;  %v6882_v14 = vmax.f32 %v6880_v33, %v6881_v50  ;;  %v7713_v43 = vadd.f32 %v7712_v2, %v7711_v42  ;;  %v6233_v58 = vmax.f32 %v6231_v51, %v6232_v18 }
 0x734   : > { %v6457_v37 = vadd.f32 %v6456_v24, %v6455_v55  ;;  %v6224_v16 = vsel %vm1165_vm2, %v6174_v35, -inf  ;;  %v6448_v57 = vsel %vm1165_vm2, %v6174_v35, 0.0  ;;  %v6814_v30 = vmul.f32 %v13934_v8, %v13586_v1 }
 0x735   : > { %6168 = vperm.xlu0 %10812, %v13945_v62   ;;  %v7932_v33 = vmul.f32 0.125, %v7720_v25  ;;  %v6234_v55 = vrot.slane %v6233_v58, 2  ;;  %v6449_v50 = vrot.slane %v6448_v57, 4 }
 0x736   : > { %v6458_v2 = vrot.slane %v6457_v37, 2 }
 0x737   : > { %10781 = vset.pattern.permute.xlu1 %v16932_v12 }
 0x738   : > { %6748 = vperm.xlu1 %10781, %v13787_v0  }
 0x739   : > { %10816 = vset.pattern.permute.xlu0 %v16933_v31 }
 0x73a   : > { %7448 = vperm.xlu0 %10816, %v13945_v62   ;;  %v5789_v62 = vadd.f32 %v5788_v20, %v5787_v53  ;;  %v13976_v53 = vsel %vm3598_vm3, %v13941_v13, %v6209_v56  ;;  %v6818_v13 = vmul.f32 %v6713_v11, %v13590_v39  ;;  %v7496_v56 = vmax.f32 %v7494_v5, %v7495_v49  ;;  %v14003_v49 = vpop.permute.xlu1 %6692 }
 0x73b   : > { %v13994_v11 = vsel %vm3598_vm3, %v6856_v6, %v6849_v36  ;;  %v6177_v5 = vmul.f32 %v6069_v22, %v13597_v10 }
 0x73c   : > { %10782 = vset.pattern.permute.xlu1 %v16933_v31  ;;  %v5790_v20 = vrot.slane %v5789_v62, 2  ;;  %v6892_v51 = vsel %vm1165_vm2, %v6818_v13, -inf  ;;  %v7116_v8 = vsel %vm1165_vm2, %v6818_v13, 0.0  ;;  %v6450_v13 = vadd.f32 %v6449_v50, %v6448_v57 }
 0x73d   : > { %7388 = vperm.xlu1 %10782, %v13787_v0   ;;  %v7106_v0 = vadd.f32 %v7105_v9, %v7104_v60  ;;  %v7489_v60 = vmax.f32 %v7487_v44, %v7488_v32  ;;  %v6864_v44 = vsel %vm1165_vm2, %v6814_v30, -inf  ;;  %v6893_v18 = vrot.slane %v6892_v51, 4 }
 0x73e   : > { %10821 = vset.pattern.permute.xlu0 %v16937_v19  ;;  %v5791_v54 = vadd.f32 %v5790_v20, %v5789_v62  ;;  %v7931_v62 = vmul.f32 0.125, %v7713_v43  ;;  %v6469_v24 = vsel %vm1165_vm2, %v6177_v5, 0.0  ;;  %v7117_v25 = vrot.slane %v7116_v8, 4  ;;  %v6721_v43 = vpop.permute.xlu0 %6720 }
 0x73f   : > { %5458 = vperm.xlu0 %10821, %v13777_v27   ;;  %v7291_v27 = vmul.f32 0.125, %v7073_v29  ;;  %v6225_v29 = vrot.slane %v6224_v16, 4  ;;  %v7107_v6 = vrot.slane %v7106_v0, 1  ;;  %v14011_v35 = vsel %vm3598_vm3, %v7496_v56, %v7489_v60 }
 0x740   : > { %v5792_v9 = vrot.slane %v5791_v54, 1  ;;  %v6245_v36 = vsel %vm1165_vm2, %v6177_v5, -inf  ;;  %v7454_v20 = vmul.f32 %v13948_v61, %v13586_v1  ;;  %v6865_v22 = vrot.slane %v6864_v44, 4 }
 0x741   : > { %10783 = vset.pattern.permute.xlu1 %v16932_v12  ;;  %v13998_v42 = vsel %vm3598_vm3, %v7292_v34, %v7291_v27  ;;  %v7088_v34 = vsel %vm1165_vm2, %v6814_v30, 0.0  ;;  %v6235_v27 = vmax.f32 %v6233_v58, %v6234_v55  ;;  %v6226_v32 = vmax.f32 %v6224_v16, %v6225_v29  ;;  %v14021_v58 = vpop.permute.xlu1 %7332 }
 0x742   : > { %6760 = vperm.xlu1 %10783, %v13794_v46   ;;  %v6459_v19 = vadd.f32 %v6458_v2, %v6457_v37  ;;  %v7089_v56 = vrot.slane %v7088_v34, 4  ;;  %v6470_v60 = vrot.slane %v6469_v24, 4  ;;  %v7108_v5 = vadd.f32 %v7107_v6, %v7106_v0 }
 0x743   : > { %5438 = vperm.xlu0 %10821, %v13726_v15   ;;  %v6883_v15 = vrot.slane %v6882_v14, 1  ;;  %v5793_v10 = vadd.f32 %v5792_v9, %v5791_v54  ;;  %v6894_v39 = vmax.f32 %v6892_v51, %v6893_v18  ;;  %v6246_v61 = vrot.slane %v6245_v36, 4 }
 0x744   : > { %v7118_v16 = vadd.f32 %v7117_v25, %v7116_v8  ;;  %v7504_v57 = vsel %vm1165_vm2, %v7454_v20, -inf  ;;  %v7728_v55 = vsel %vm1165_vm2, %v7454_v20, 0.0  ;;  %v6451_v37 = vrot.slane %v6450_v13, 2 }
 0x745   : > { %v14018_v30 = vmax.f32 %v6882_v14, %v6883_v15  ;;  %v6236_v14 = vrot.slane %v6235_v27, 1  ;;  %v6227_v15 = vrot.slane %v6226_v32, 2  ;;  %v6866_v29 = vmax.f32 %v6864_v44, %v6865_v22 }
 0x746   : > { %10785 = vset.pattern.permute.xlu1 %v16931_v52  ;;  %v14028_v0 = vsel %vm3598_vm3, %v7932_v33, %v7931_v62  ;;  %v6460_v54 = vrot.slane %v6459_v19, 1  ;;  %v7090_v51 = vadd.f32 %v7089_v56, %v7088_v34  ;;  %v6471_v50 = vadd.f32 %v6470_v60, %v6469_v24  ;;  %v5384_v24 = vpop.permute.xlu1 %5383 }
 0x747   : > { %6116 = vperm.xlu1 %10785, %v13930_v3   ;;  %5493 = vperm.xlu0 %10821, %v13865_v47   ;;  %16972 = vst [vmem:[#allocation44_spill] sm:$0xff] %v14018_v30  ;;  %v14031_v8 = vmul.f32 0.125, %v7108_v5  ;;  %v6247_v6 = vmax.f32 %v6245_v36, %v6246_v61  ;;  %v7505_v2 = vrot.slane %v7504_v57, 4  ;;  %v7729_v9 = vrot.slane %v7728_v55, 4 }
 0x748   : > { %v6011_v18 = vmul.f32 0.125, %v5793_v10  ;;  %v6895_v25 = vrot.slane %v6894_v39, 2  ;;  %v7119_v44 = vrot.slane %v7118_v16, 2  ;;  %v14035_v20 = vmax.f32 %v6235_v27, %v6236_v14  ;;  %v7361_v14 = vpop.permute.xlu0 %7360 }
 0x749   : > { %16973 = vst [vmem:[#allocation70_spill] sm:$0xff] %v14031_v8  ;;  %v6228_v33 = vmax.f32 %v6226_v32, %v6227_v15  ;;  %v6452_v62 = vadd.f32 %v6451_v37, %v6450_v13  ;;  %v6867_v34 = vrot.slane %v6866_v29, 2  ;;  %v6461_v22 = vadd.f32 %v6460_v54, %v6459_v19 }
 0x74a   : > { %v6472_v36 = vrot.slane %v6471_v50, 2  ;;  %v6248_v60 = vrot.slane %v6247_v6, 2  ;;  %v7506_v5 = vmax.f32 %v7504_v57, %v7505_v2  ;;  %v7730_v10 = vadd.f32 %v7729_v9, %v7728_v55 }
 0x74b   : > { %10786 = vset.pattern.permute.xlu1 %v16932_v12  ;;  %5408 = vperm.xlu0 %10821, %v13648_v17   ;;  %v6820_v17 = vmul.f32 %v6721_v43, %v13607_v7  ;;  %v7091_v43 = vrot.slane %v7090_v51, 2  ;;  %v14042_v27 = vsel %vm3598_vm3, %v13960_v26, %v6011_v18  ;;  %v14044_v32 = vmax.f32 %v6894_v39, %v6895_v25 }
 0x74c   : > { %6756 = vperm.xlu1 %10786, %v13930_v3   ;;  %v14046_v13 = vadd.f32 %v7119_v44, %v7118_v16  ;;  %v14049_v19 = vmul.f32 %v5384_v24, %v13627_v23  ;;  %v6868_v57 = vmax.f32 %v6866_v29, %v6867_v34  ;;  %v14053_v15 = vmul.f32 0.125, %v6461_v22  ;;  %v5419_v18 = vpop.permute.xlu0 %5418 }
 0x74d   : > { %v7130_v56 = vsel %vm1165_vm2, %v6820_v17, 0.0  ;;  %16974 = vst [vmem:[#allocation34_spill] sm:$0xff] %v14044_v32  ;;  %v7092_v26 = vadd.f32 %v7091_v43, %v7090_v51  ;;  %v6473_v37 = vadd.f32 %v6472_v36, %v6471_v50  ;;  %v5534_v39 = vmul.f32 %v13962_v63, %v13586_v1  ;;  %v16988_v32 = vld [vmem:[#allocation71_spill] sm:$0xff] }
 0x74e   : > { %16975 = vst [vmem:[#allocation87_spill] sm:$0xff] %v14046_v13  ;;  %v7131_v55 = vrot.slane %v7130_v56, 4  ;;  %16976 = vst [vmem:[#allocation88_spill] sm:$0xff] %v14053_v15  ;;  %v6249_v16 = vmax.f32 %v6247_v6, %v6248_v60  ;;  %v7507_v54 = vrot.slane %v7506_v5, 2  ;;  %v7731_v2 = vrot.slane %v7730_v10, 2 }
 0x74f   : > { %5468 = vperm.xlu0 %10821, %v13794_v46   ;;  %v6906_v46 = vsel %vm1165_vm2, %v6820_v17, -inf  ;;  %v6453_v17 = vrot.slane %v6452_v62, 1  ;;  %v7460_v29 = vmul.f32 %v7361_v14, %v13607_v7  ;;  %v5577_v44 = vsel %vm1165_vm2, %v14049_v19, -inf }
 0x750   : > { %10787 = vset.pattern.permute.xlu1 %v16933_v31  ;;  %v6907_v61 = vrot.slane %v6906_v46, 4  ;;  %v6869_v34 = vrot.slane %v6868_v57, 1  ;;  %v7132_v63 = vadd.f32 %v7131_v55, %v7130_v56  ;;  %v7093_v6 = vrot.slane %v7092_v26, 1 }
 0x751   : > { %7396 = vperm.xlu1 %10787, %v13930_v3   ;;  %v6454_v50 = vadd.f32 %v6453_v17, %v6452_v62  ;;  %v5584_v24 = vsel %vm1165_vm2, %v5534_v39, -inf  ;;  %v5578_v22 = vrot.slane %v5577_v44, 4  ;;  %v6250_v43 = vrot.slane %v6249_v16, 1 }
 0x752   : > { %v6908_v9 = vmax.f32 %v6906_v46, %v6907_v61  ;;  %v6474_v46 = vrot.slane %v6473_v37, 1  ;;  %v7508_v36 = vmax.f32 %v7506_v5, %v7507_v54  ;;  %v7732_v60 = vadd.f32 %v7731_v2, %v7730_v10 }
 0x753   : > { %5448 = vperm.xlu0 %10821, %v13760_v41   ;;  %v6229_v41 = vrot.slane %v6228_v33, 1  ;;  %v5808_v14 = vsel %vm1165_vm2, %v5534_v39, 0.0  ;;  %v7770_v62 = vsel %vm1165_vm2, %v7460_v29, 0.0  ;;  %v5579_v56 = vmax.f32 %v5577_v44, %v5578_v22 }
 0x754   : > { %v6909_v61 = vrot.slane %v6908_v9, 2  ;;  %v7133_v17 = vrot.slane %v7132_v63, 2  ;;  %v5585_v55 = vrot.slane %v5584_v24, 4  ;;  %v6173_v25 = vmul.f32 %v13983_v45, %v13627_v23 }
 0x755   : > { %10788 = vset.pattern.permute.xlu1 %v16931_v52  ;;  %v14063_v51 = vmax.f32 %v6228_v33, %v6229_v41  ;;  %v7546_v33 = vsel %vm1165_vm2, %v7460_v29, -inf  ;;  %v14071_v41 = vmul.f32 0.125, %v6454_v50  ;;  %v14077_v5 = vmax.f32 %v6868_v57, %v6869_v34 }
 0x756   : > { %6128 = vperm.xlu1 %10788, %v13954_v4   ;;  %v7094_v10 = vadd.f32 %v7093_v6, %v7092_v26  ;;  %v6475_v39 = vadd.f32 %v6474_v46, %v6473_v37  ;;  %v5580_v54 = vrot.slane %v5579_v56, 2  ;;  %v14080_v2 = vmax.f32 %v6249_v16, %v6250_v43 }
 0x757   : > { %5508 = vperm.xlu0 %10821, %v13878_v48   ;;  %16977 = vst [vmem:[#allocation91_spill] sm:$0xff] %v14071_v41  ;;  %16978 = vst [vmem:[#allocation92_spill] sm:$0xff] %v14077_v5  ;;  %v5809_v29 = vrot.slane %v5808_v14, 4  ;;  %v7547_v44 = vrot.slane %v7546_v33, 4  ;;  %v7771_v50 = vrot.slane %v7770_v62, 4  ;;  %v7509_v22 = vrot.slane %v7508_v36, 1 }
 0x758   : > { %v7733_v1 = vrot.slane %v7732_v60, 1  ;;  %v6910_v45 = vmax.f32 %v6908_v9, %v6909_v61  ;;  %v5581_v8 = vmax.f32 %v5579_v56, %v5580_v54  ;;  %v7134_v13 = vadd.f32 %v7133_v17, %v7132_v63 }
 0x759   : > { %v5586_v15 = vmax.f32 %v5584_v24, %v5585_v55  ;;  %v6441_v41 = vsel %vm1165_vm2, %v6173_v25, 0.0  ;;  %v5540_v57 = vmul.f32 %v5419_v18, %v13607_v7  ;;  %v14085_v26 = vmul.f32 0.125, %v7094_v10  ;;  %v6077_v24 = vpop.permute.xlu0 %6076 }
 0x75a   : > { %10789 = vset.pattern.permute.xlu1 %v16932_v12  ;;  %v14087_v37 = vmul.f32 0.125, %v6475_v39  ;;  %v6813_v16 = vmul.f32 %v14003_v49, %v13627_v23  ;;  %v5582_v34 = vrot.slane %v5581_v8, 1  ;;  %v5810_v9 = vadd.f32 %v5809_v29, %v5808_v14  ;;  %v16983_v39 = vld [vmem:[#allocation11_spill] sm:$0xff] }
 0x75b   : > { %6768 = vperm.xlu1 %10789, %v13954_v4   ;;  %5513 = vperm.xlu0 %10821, %v13936_v21   ;;  %16979 = vst [vmem:[#allocation48_spill] sm:$0xff] %v14085_v26  ;;  %v7548_v6 = vmax.f32 %v7546_v33, %v7547_v44  ;;  %v7772_v63 = vadd.f32 %v7771_v50, %v7770_v62  ;;  %v6217_v46 = vsel %vm1165_vm2, %v6173_v25, -inf  ;;  %v6911_v43 = vrot.slane %v6910_v45, 1  ;;  %v16982_v62 = vld [vmem:[#allocation64_spill] sm:$0xff] }
 0x75c   : > { %16980 = vst [vmem:[#allocation52_spill] sm:$0xff] %v14087_v37  ;;  %v7734_v18 = vadd.f32 %v7733_v1, %v7732_v60  ;;  %v6442_v61 = vrot.slane %v6441_v41, 4  ;;  %v5583_v56 = vmax.f32 %v5581_v8, %v5582_v34  ;;  %v14094_v17 = vmax.f32 %v7508_v36, %v7509_v22  ;;  %v14104_v1 = vpop.permute.xlu1 %6064 }
 0x75d   : > { %v7135_v55 = vrot.slane %v7134_v13, 1  ;;  %v5587_v10 = vrot.slane %v5586_v15, 2  ;;  %v5626_v49 = vsel %vm1165_vm2, %v5540_v57, -inf  ;;  %v6218_v14 = vrot.slane %v6217_v46, 4 }
 0x75e   : > { %16981 = vst [vmem:[#allocation107_spill] sm:$0xff] %v14094_v17  ;;  %v7081_v33 = vsel %vm1165_vm2, %v6813_v16, 0.0  ;;  %v6179_v25 = vmul.f32 %v6077_v24, %v16982_v62  ;;  %v14102_v54 = vsel %vm3600_vm4, %v5583_v56, %v16983_v39  ;;  %v5811_v8 = vrot.slane %v5810_v9, 2 }
 0x75f   : > { %10790 = vset.pattern.permute.xlu1 %v16933_v31  ;;  %5518 = vperm.xlu0 %10821, %v13905_v28   ;;  %v7549_v36 = vrot.slane %v7548_v6, 2  ;;  %v7773_v60 = vrot.slane %v7772_v63, 2  ;;  %v5850_v29 = vsel %vm1165_vm2, %v5540_v57, 0.0  ;;  %v14108_v44 = vmul.f32 0.125, %v7734_v18  ;;  %v6729_v18 = vpop.permute.xlu0 %6728 }
 0x760   : > { %7408 = vperm.xlu1 %10790, %v13954_v4   ;;  %v14110_v50 = vmax.f32 %v6910_v45, %v6911_v43  ;;  %v6443_v22 = vadd.f32 %v6442_v61, %v6441_v41  ;;  %v7453_v34 = vmul.f32 %v14021_v58, %v13627_v23  ;;  %v7136_v24 = vadd.f32 %v7135_v55, %v7134_v13  ;;  %v14120_v55 = vpop.permute.xlu1 %7344 }
 0x761   : > { %16984 = vst [vmem:[#allocation102_spill] sm:$0xff] %v14108_v44  ;;  %v5627_v56 = vrot.slane %v5626_v49, 4  ;;  %v6857_v39 = vsel %vm1165_vm2, %v6813_v16, -inf  ;;  %v7082_v4 = vrot.slane %v7081_v33, 4  ;;  %v5588_v26 = vmax.f32 %v5586_v15, %v5587_v10  ;;  %v16986_v10 = vld [vmem:[#allocation74_spill] sm:$0xff] }
 0x762   : > { %16985 = vst [vmem:[#allocation6_spill] sm:$0xff] %v14110_v50  ;;  %v6219_v37 = vmax.f32 %v6217_v46, %v6218_v14  ;;  %v5851_v57 = vrot.slane %v5850_v29, 4  ;;  %v6483_v7 = vsel %vm1165_vm2, %v6179_v25, 0.0  ;;  %v5812_v44 = vadd.f32 %v5811_v8, %v5810_v9 }
 0x763   : > { %5523 = vperm.xlu0 %10821, %v13971_v38   ;;  %v7550_v45 = vmax.f32 %v7548_v6, %v7549_v36  ;;  %v7774_v43 = vadd.f32 %v7773_v60, %v7772_v63  ;;  %v6259_v41 = vsel %vm1165_vm2, %v6179_v25, -inf  ;;  %v6444_v61 = vrot.slane %v6443_v22, 2  ;;  %v7369_v5 = vpop.permute.xlu0 %7368 }
 0x764   : > { %10791 = vset.pattern.permute.xlu1 %v16931_v52  ;;  %v6858_v58 = vrot.slane %v6857_v39, 4  ;;  %v7497_v23 = vsel %vm1165_vm2, %v7453_v34, -inf  ;;  %v7721_v13 = vsel %vm1165_vm2, %v7453_v34, 0.0  ;;  %v5628_v15 = vmax.f32 %v5626_v49, %v5627_v56  ;;  %v14131_v30 = vpop.permute.xlu1 %5398 }
 0x765   : > { %6124 = vperm.xlu1 %10791, %v13966_v40   ;;  %v7083_v16 = vadd.f32 %v7082_v4, %v7081_v33  ;;  %v6484_v46 = vrot.slane %v6483_v7, 4  ;;  %v6822_v14 = vmul.f32 %v6729_v18, %v16986_v10  ;;  %v5589_v9 = vrot.slane %v5588_v26, 1 }
 0x766   : > { %v6220_v6 = vrot.slane %v6219_v37, 2  ;;  %v5852_v63 = vadd.f32 %v5851_v57, %v5850_v29  ;;  %v6260_v25 = vrot.slane %v6259_v41, 4  ;;  %v5813_v8 = vrot.slane %v5812_v44, 1 }
 0x767   : > { %10822 = vset.pattern.permute.xlu0 %v16933_v31  ;;  %v7551_v36 = vrot.slane %v7550_v45, 1  ;;  %v7498_v60 = vrot.slane %v7497_v23, 4  ;;  %v7722_v50 = vrot.slane %v7721_v13, 4  ;;  %v14125_v34 = vmul.f32 0.125, %v7136_v24 }
 0x768   : > { %v7775_v62 = vrot.slane %v7774_v43, 1  ;;  %v6445_v3 = vadd.f32 %v6444_v61, %v6443_v22  ;;  %v6859_v17 = vmax.f32 %v6857_v39, %v6858_v58  ;;  %v5629_v49 = vrot.slane %v5628_v15, 2 }
 0x769   : > { %10792 = vset.pattern.permute.xlu1 %v16932_v12  ;;  %16987 = vst [vmem:[#allocation100_spill] sm:$0xff] %v14125_v34  ;;  %v7084_v4 = vrot.slane %v7083_v16, 2  ;;  %v6485_v33 = vadd.f32 %v6484_v46, %v6483_v7  ;;  %v7144_v56 = vsel %vm1165_vm2, %v6822_v14, 0.0  ;;  %v14129_v18 = vmax.f32 %v5588_v26, %v5589_v9 }
 0x76a   : > { %6764 = vperm.xlu1 %10792, %v13966_v40   ;;  %v6221_v29 = vmax.f32 %v6219_v37, %v6220_v6  ;;  %v5853_v57 = vrot.slane %v5852_v63, 2  ;;  %v5814_v24 = vadd.f32 %v5813_v8, %v5812_v44  ;;  %v14134_v34 = vmax.f32 %v7550_v45, %v7551_v36  ;;  %v14144_v36 = vpop.permute.xlu1 %6700 }
 0x76b   : > { %v7499_v22 = vmax.f32 %v7497_v23, %v7498_v60  ;;  %v7723_v39 = vadd.f32 %v7722_v50, %v7721_v13  ;;  %v7776_v61 = vadd.f32 %v7775_v62, %v7774_v43  ;;  %v6446_v7 = vrot.slane %v6445_v3, 1  ;;  %v16990_v43 = vld [vmem:[#allocation37_spill] sm:$0xff] }
 0x76c   : > { %16989 = vst [vmem:[#allocation97_spill] sm:$0xff] %v14134_v34  ;;  %v6860_v58 = vrot.slane %v6859_v17, 2  ;;  %v7145_v46 = vrot.slane %v7144_v56, 4  ;;  %v7085_v38 = vadd.f32 %v7084_v4, %v7083_v16  ;;  %v6486_v26 = vrot.slane %v6485_v33, 2 }
 0x76d   : > { %v6920_v37 = vsel %vm1165_vm2, %v6822_v14, -inf  ;;  %v6222_v9 = vrot.slane %v6221_v29, 1  ;;  %v5630_v6 = vmax.f32 %v5628_v15, %v5629_v49  ;;  %v14140_v23 = vmul.f32 0.125, %v5814_v24 }
 0x76e   : > { %10793 = vset.pattern.permute.xlu1 %v16933_v31  ;;  %v7500_v62 = vrot.slane %v7499_v22, 2  ;;  %v7724_v50 = vrot.slane %v7723_v39, 2  ;;  %v7462_v45 = vmul.f32 %v7369_v5, %v16986_v10  ;;  %v6447_v13 = vadd.f32 %v6446_v7, %v6445_v3 }
 0x76f   : > { %7404 = vperm.xlu1 %10793, %v13966_v40   ;;  %v6261_v40 = vmax.f32 %v6259_v41, %v6260_v25  ;;  %v5801_v41 = vsel %vm1165_vm2, %v14049_v19, 0.0  ;;  %v5854_v25 = vadd.f32 %v5853_v57, %v5852_v63  ;;  %v6921_v16 = vrot.slane %v6920_v37, 4 }
 0x770   : > { %v7146_v14 = vadd.f32 %v7145_v46, %v7144_v56  ;;  %v5802_v8 = vrot.slane %v5801_v41, 4  ;;  %v14146_v19 = vmul.f32 0.125, %v7776_v61  ;;  %v6861_v15 = vmax.f32 %v6859_v17, %v6860_v58  ;;  %v16992_v58 = vld [vmem:[#allocation30_spill] sm:$0xff] }
 0x771   : > { %v6262_v44 = vrot.slane %v6261_v40, 2  ;;  %v7086_v63 = vrot.slane %v7085_v38, 1  ;;  %v6487_v60 = vadd.f32 %v6486_v26, %v6485_v33  ;;  %v6223_v49 = vmax.f32 %v6221_v29, %v6222_v9 }
 0x772   : > { %16991 = vst [vmem:[#allocation104_spill] sm:$0xff] %v14146_v19  ;;  %v5631_v4 = vrot.slane %v5630_v6, 1  ;;  %v5855_v57 = vrot.slane %v5854_v25, 1  ;;  %v7501_v34 = vmax.f32 %v7499_v22, %v7500_v62  ;;  %v7560_v5 = vsel %vm1165_vm2, %v7462_v45, -inf }
 0x773   : > { %10795 = vset.pattern.permute.xlu1 %v16932_v12  ;;  %v6263_v24 = vmax.f32 %v6261_v40, %v6262_v44  ;;  %v7784_v3 = vsel %vm1165_vm2, %v7462_v45, 0.0  ;;  %v6653_v56 = vmul.f32 0.125, %v6447_v13  ;;  %v6922_v7 = vmax.f32 %v6920_v37, %v6921_v16  ;;  %v14160_v44 = vpop.permute.xlu1 %7340  ;;  %v5429_v45 = vpop.permute.xlu0 %5428 }
 0x774   : > { %6776 = vperm.xlu1 %10795, %v16988_v32   ;;  %v7725_v32 = vadd.f32 %v7724_v50, %v7723_v39  ;;  %v7147_v46 = vrot.slane %v7146_v14, 2  ;;  %v5803_v61 = vadd.f32 %v5802_v8, %v5801_v41  ;;  %v6862_v17 = vrot.slane %v6861_v15, 1 }
 0x775   : > { %v7087_v33 = vadd.f32 %v7086_v63, %v7085_v38  ;;  %v6488_v29 = vrot.slane %v6487_v60, 1  ;;  %v6176_v40 = vmul.f32 %v14104_v1, %v16992_v58  ;;  %v14156_v22 = vsel %vm3600_vm4, %v6223_v49, %v13976_v53  ;;  %v16993_v49 = vld [vmem:[#allocation46_spill] sm:$0xff] }
 0x776   : > { %v14158_v39 = vmax.f32 %v5630_v6, %v5631_v4  ;;  %v7561_v26 = vrot.slane %v7560_v5, 4  ;;  %v7785_v9 = vrot.slane %v7784_v3, 4  ;;  %v5856_v37 = vadd.f32 %v5855_v57, %v5854_v25 }
 0x777   : > { %v6264_v41 = vrot.slane %v6263_v24, 1  ;;  %v7502_v62 = vrot.slane %v7501_v34, 1  ;;  %v7726_v50 = vrot.slane %v7725_v32, 1  ;;  %v14164_v38 = vsel %vm3600_vm4, %v6653_v56, %v13981_v59 }
 0x778   : > { %10797 = vset.pattern.permute.xlu1 %v16931_v52  ;;  %v6923_v1 = vrot.slane %v6922_v7, 2  ;;  %v7148_v13 = vadd.f32 %v7147_v46, %v7146_v14  ;;  %v5804_v16 = vrot.slane %v5803_v61, 2  ;;  %v6863_v53 = vmax.f32 %v6861_v15, %v6862_v17 }
 0x779   : > { %6132 = vperm.xlu1 %10797, %v16990_v43   ;;  %v7293_v6 = vmul.f32 0.125, %v7087_v33  ;;  %v6489_v8 = vadd.f32 %v6488_v29, %v6487_v60  ;;  %v6238_v63 = vsel %vm1165_vm2, %v6176_v40, -inf  ;;  %v7562_v25 = vmax.f32 %v7560_v5, %v7561_v26  ;;  %v5394_v33 = vpop.permute.xlu1 %5393 }
 0x77a   : > { %v7786_v4 = vadd.f32 %v7785_v9, %v7784_v3  ;;  %v6462_v57 = vsel %vm1165_vm2, %v6176_v40, 0.0  ;;  %v5542_v19 = vmul.f32 %v5429_v45, %v16986_v10  ;;  %v14171_v59 = vmul.f32 0.125, %v5856_v37  ;;  %v16997_v9 = vld [vmem:[#allocation24_spill] sm:$0xff] }
 0x77b   : > { %v14173_v56 = vmax.f32 %v6263_v24, %v6264_v41  ;;  %v7503_v14 = vmax.f32 %v7501_v34, %v7502_v62  ;;  %v7727_v46 = vadd.f32 %v7726_v50, %v7725_v32  ;;  %v7149_v15 = vrot.slane %v7148_v13, 1 }
 0x77c   : > { %16994 = vst [vmem:[#allocation109_spill] sm:$0xff] %v14171_v59  ;;  %v5805_v17 = vadd.f32 %v5804_v16, %v5803_v61  ;;  %v6239_v60 = vrot.slane %v6238_v63, 4  ;;  %v14177_v29 = vsel %vm3600_vm4, %v6863_v53, %v13994_v11  ;;  %v14181_v5 = vsel %vm3600_vm4, %v7293_v6, %v13998_v42  ;;  %v6085_v61 = vpop.permute.xlu0 %6084 }
 0x77d   : > { %10798 = vset.pattern.permute.xlu1 %v16932_v12  ;;  %16995 = vst [vmem:[#allocation115_spill] sm:$0xff] %v14173_v56  ;;  %v14183_v3 = vmul.f32 0.125, %v6489_v8  ;;  %v6463_v40 = vrot.slane %v6462_v57, 4  ;;  %v7563_v34 = vrot.slane %v7562_v25, 2  ;;  %v7787_v32 = vrot.slane %v7786_v4, 2 }
 0x77e   : > { %6772 = vperm.xlu1 %10798, %v16990_v43   ;;  %v6924_v43 = vmax.f32 %v6922_v7, %v6923_v1  ;;  %v5864_v24 = vsel %vm1165_vm2, %v5542_v19, 0.0  ;;  %v7456_v7 = vmul.f32 %v14120_v55, %v16992_v58  ;;  %v7933_v11 = vmul.f32 0.125, %v7727_v46  ;;  %v16998_v55 = vld [vmem:[#allocation41_spill] sm:$0xff] }
 0x77f   : > { %16996 = vst [vmem:[#allocation76_spill] sm:$0xff] %v14183_v3  ;;  %v14192_v42 = vsel %vm3600_vm4, %v7503_v14, %v14011_v35  ;;  %v5640_v26 = vsel %vm1165_vm2, %v5542_v19, -inf  ;;  %v14196_v37 = vmul.f32 %v5394_v33, %v16997_v9  ;;  %v7150_v62 = vadd.f32 %v7149_v15, %v7148_v13 }
 0x780   : > { %v6925_v41 = vrot.slane %v6924_v43, 1  ;;  %v5806_v50 = vrot.slane %v5805_v17, 1  ;;  %v6240_v45 = vmax.f32 %v6238_v63, %v6239_v60  ;;  %v6464_v1 = vadd.f32 %v6463_v40, %v6462_v57 }
 0x781   : > { %v5865_v16 = vrot.slane %v5864_v24, 4  ;;  %v6181_v53 = vmul.f32 %v6085_v61, %v16998_v55  ;;  %v5591_v6 = vsel %vm1165_vm2, %v14196_v37, -inf  ;;  %v7564_v8 = vmax.f32 %v7562_v25, %v7563_v34 }
 0x782   : > { %10799 = vset.pattern.permute.xlu1 %v16931_v52  ;;  %v7788_v46 = vadd.f32 %v7787_v32, %v7786_v4  ;;  %v5641_v35 = vrot.slane %v5640_v26, 4  ;;  %v7518_v14 = vsel %vm1165_vm2, %v7456_v7, -inf  ;;  %v7742_v19 = vsel %vm1165_vm2, %v7456_v7, 0.0 }
 0x783   : > { %6144 = vperm.xlu1 %10799, %v16993_v49   ;;  %v5536_v13 = vmul.f32 %v14131_v30, %v16992_v58  ;;  %v5592_v63 = vrot.slane %v5591_v6, 4  ;;  %v7997_v57 = vsel %vm3602_vm5, %v14129_v18, %v14102_v54  ;;  %v14212_v25 = vsel %vm3600_vm4, %v7933_v11, %v14028_v0  ;;  %v6073_v11 = vpop.permute.xlu1 %6072 }
 0x784   : > { %16999 = vst [vmem:[#allocation43_spill] sm:$0xff] %v14212_v25  ;;  %v14214_v4 = vmax.f32 %v6924_v43, %v6925_v41  ;;  %v5807_v15 = vadd.f32 %v5806_v50, %v5805_v17  ;;  %v6241_v60 = vrot.slane %v6240_v45, 2  ;;  %v6465_v33 = vrot.slane %v6464_v1, 2 }
 0x785   : > { %v5866_v40 = vadd.f32 %v5865_v16, %v5864_v24  ;;  %v6497_v34 = vsel %vm1165_vm2, %v6181_v53, 0.0  ;;  %v5593_v30 = vmax.f32 %v5591_v6, %v5592_v63  ;;  %v14217_v32 = vmul.f32 0.125, %v7150_v62 }
 0x786   : > { %17000 = vst [vmem:[#allocation75_spill] sm:$0xff] %v14214_v4  ;;  %v7565_v7 = vrot.slane %v7564_v8, 1  ;;  %v7519_v61 = vrot.slane %v7518_v14, 4  ;;  %v7743_v54 = vrot.slane %v7742_v19, 4  ;;  %v7789_v18 = vrot.slane %v7788_v46, 1  ;;  %v17002_v4 = vld [vmem:[#allocation93_spill] sm:$0xff] }
 0x787   : > { %10803 = vset.pattern.permute.xlu1 %v16932_v12  ;;  %17001 = vst [vmem:[#allocation47_spill] sm:$0xff] %v14217_v32  ;;  %v5822_v58 = vsel %vm1165_vm2, %v5536_v13, 0.0  ;;  %v5594_v0 = vrot.slane %v5593_v30, 2  ;;  %v6242_v43 = vmax.f32 %v6240_v45, %v6241_v60  ;;  %v6273_v17 = vsel %vm1165_vm2, %v6181_v53, -inf  ;;  %v6725_v32 = vpop.permute.xlu0 %6724 }
 0x788   : > { %6780 = vperm.xlu1 %10803, %v13865_v47   ;;  %v6498_v24 = vrot.slane %v6497_v34, 4  ;;  %v5598_v41 = vsel %vm1165_vm2, %v5536_v13, -inf  ;;  %v6013_v62 = vmul.f32 0.125, %v5807_v15  ;;  %v6466_v50 = vadd.f32 %v6465_v33, %v6464_v1 }
 0x789   : > { %v5867_v16 = vrot.slane %v5866_v40, 2  ;;  %v5595_v6 = vmax.f32 %v5593_v30, %v5594_v0  ;;  %v7520_v63 = vmax.f32 %v7518_v14, %v7519_v61  ;;  %v14225_v59 = vmul.f32 %v6073_v11, %v17002_v4 }
 0x78a   : > { %v6274_v45 = vrot.slane %v6273_v17, 4  ;;  %v5599_v60 = vrot.slane %v5598_v41, 4  ;;  %v14227_v56 = vmax.f32 %v7564_v8, %v7565_v7  ;;  %v7790_v13 = vadd.f32 %v7789_v18, %v7788_v46 }
 0x78b   : > { %v5596_v53 = vrot.slane %v5595_v6, 1  ;;  %v6243_v10 = vrot.slane %v6242_v43, 1  ;;  %v6499_v25 = vadd.f32 %v6498_v24, %v6497_v34  ;;  %v6467_v1 = vrot.slane %v6466_v50, 1 }
 0x78c   : > { %10804 = vset.pattern.permute.xlu1 %v16933_v31  ;;  %17003 = vst [vmem:[#allocation19_spill] sm:$0xff] %v14227_v56  ;;  %v5868_v15 = vadd.f32 %v5867_v16, %v5866_v40  ;;  %v6821_v14 = vmul.f32 %v6725_v32, %v16998_v55  ;;  %v7521_v33 = vrot.slane %v7520_v63, 2  ;;  %v6275_v7 = vmax.f32 %v6273_v17, %v6274_v45 }
 0x78d   : > { %7420 = vperm.xlu1 %10804, %v13865_v47   ;;  %v5642_v47 = vmax.f32 %v5640_v26, %v5641_v35  ;;  %v7744_v26 = vadd.f32 %v7743_v54, %v7742_v19  ;;  %v5823_v35 = vrot.slane %v5822_v58, 4  ;;  %v5597_v19 = vmax.f32 %v5595_v6, %v5596_v53 }
 0x78e   : > { %v6252_v54 = vsel %vm1165_vm2, %v14225_v59, -inf  ;;  %v5600_v46 = vmax.f32 %v5598_v41, %v5599_v60  ;;  %v14239_v40 = vsel %vm3600_vm4, %v6013_v62, %v14042_v27  ;;  %v14241_v32 = vmul.f32 0.125, %v7790_v13  ;;  %v17006_v41 = vld [vmem:[#allocation68_spill] sm:$0xff] }
 0x78f   : > { %v5643_v3 = vrot.slane %v5642_v47, 2  ;;  %v7745_v30 = vrot.slane %v7744_v26, 2  ;;  %v5824_v61 = vadd.f32 %v5823_v35, %v5822_v58  ;;  %v14235_v34 = vsel %vm3604_vm6, %v5597_v19, %v7997_v57 }
 0x790   : > { %17004 = vst [vmem:[#allocation13_spill] sm:$0xff] %v14235_v34  ;;  %17005 = vst [vmem:[#allocation105_spill] sm:$0xff] %v14241_v32  ;;  %v6500_v18 = vrot.slane %v6499_v25, 2  ;;  %v6468_v58 = vadd.f32 %v6467_v1, %v6466_v50  ;;  %v5869_v0 = vrot.slane %v5868_v15, 1  ;;  %v7137_v11 = vsel %vm1165_vm2, %v6821_v14, 0.0  ;;  %v14255_v1 = vpop.permute.xlu1 %7352 }
 0x791   : > { %10805 = vset.pattern.permute.xlu1 %v16931_v52  ;;  %v5644_v8 = vmax.f32 %v5642_v47, %v5643_v3  ;;  %v5424_v3 = vpop.permute.xlu0 %5423  ;;  %v6253_v47 = vrot.slane %v6252_v54, 4  ;;  %v7522_v57 = vmax.f32 %v7520_v63, %v7521_v33  ;;  %v7746_v17 = vadd.f32 %v7745_v30, %v7744_v26 }
 0x792   : > { %6152 = vperm.xlu1 %10805, %v13878_v48   ;;  %v5825_v24 = vrot.slane %v5824_v61, 2  ;;  %v6913_v27 = vsel %vm1165_vm2, %v6821_v14, -inf  ;;  %v14249_v62 = vmax.f32 %v6242_v43, %v6243_v10  ;;  %v6276_v6 = vrot.slane %v6275_v7, 2 }
 0x793   : > { %v5645_v16 = vrot.slane %v5644_v8, 1  ;;  %v6501_v50 = vadd.f32 %v6500_v18, %v6499_v25  ;;  %v7138_v35 = vrot.slane %v7137_v11, 4  ;;  %v5541_v60 = vmul.f32 %v5424_v3, %v16998_v55 }
 0x794   : > { %v14253_v53 = vmul.f32 0.125, %v6468_v58  ;;  %v5870_v63 = vadd.f32 %v5869_v0, %v5868_v15  ;;  %v6914_v26 = vrot.slane %v6913_v27, 4  ;;  %v6254_v13 = vmax.f32 %v6252_v54, %v6253_v47 }
 0x795   : > { %v7523_v14 = vrot.slane %v7522_v57, 1  ;;  %v7747_v19 = vrot.slane %v7746_v17, 1  ;;  %v5826_v10 = vadd.f32 %v5825_v24, %v5824_v61  ;;  %v14259_v25 = vmax.f32 %v5644_v8, %v5645_v16 }
 0x796   : > { %10807 = vset.pattern.permute.xlu1 %v16933_v31  ;;  %v6277_v33 = vmax.f32 %v6275_v7, %v6276_v6  ;;  %v7455_v18 = vmul.f32 %v14160_v44, %v16997_v9  ;;  %v6502_v15 = vrot.slane %v6501_v50, 1  ;;  %v7139_v58 = vadd.f32 %v7138_v35, %v7137_v11  ;;  %v6737_v6 = vpop.permute.xlu0 %6736  ;;  %v6709_v11 = vpop.permute.xlu1 %6708 }
 0x797   : > { %7432 = vperm.xlu1 %10807, %v13878_v48   ;;  %v6815_v48 = vmul.f32 %v14144_v36, %v16997_v9  ;;  %v5601_v36 = vrot.slane %v5600_v46, 2  ;;  %17007 = vst [vmem:[#allocation96_spill] sm:$0xff] %v14259_v25  ;;  %v5633_v0 = vsel %vm1165_vm2, %v5541_v60, -inf  ;;  %v6915_v3 = vmax.f32 %v6913_v27, %v6914_v26 }
 0x798   : > { %v6255_v47 = vrot.slane %v6254_v13, 2  ;;  %v14266_v24 = vmul.f32 0.125, %v5870_v63  ;;  %v14268_v8 = vmax.f32 %v7522_v57, %v7523_v14  ;;  %v7748_v7 = vadd.f32 %v7747_v19, %v7746_v17 }
 0x799   : > { %v7095_v45 = vsel %vm1165_vm2, %v6815_v48, 0.0  ;;  %v6871_v43 = vsel %vm1165_vm2, %v6815_v48, -inf  ;;  %v5602_v54 = vmax.f32 %v5600_v46, %v5601_v36  ;;  %v5857_v48 = vsel %vm1165_vm2, %v5541_v60, 0.0 }
 0x79a   : > { %v7096_v30 = vrot.slane %v7095_v45, 4  ;;  %v6872_v61 = vrot.slane %v6871_v43, 4  ;;  %17008 = vst [vmem:[#allocation101_spill] sm:$0xff] %v14266_v24  ;;  %v5827_v16 = vrot.slane %v5826_v10, 1  ;;  %v6278_v44 = vrot.slane %v6277_v33, 1  ;;  %v17009_v24 = vld [vmem:[#allocation33_spill] sm:$0xff] }
 0x79b   : > { %10808 = vset.pattern.permute.xlu1 %v16931_v52  ;;  %v5634_v25 = vrot.slane %v5633_v0, 4  ;;  %v7735_v46 = vsel %vm1165_vm2, %v7455_v18, 0.0  ;;  %v6503_v27 = vadd.f32 %v6502_v15, %v6501_v50  ;;  %v5603_v36 = vrot.slane %v5602_v54, 1 }
 0x79c   : > { %6148 = vperm.xlu1 %10808, %v17006_v41   ;;  %v7097_v9 = vadd.f32 %v7096_v30, %v7095_v45  ;;  %v7140_v35 = vrot.slane %v7139_v58, 2  ;;  %v5858_v60 = vrot.slane %v5857_v48, 4  ;;  %v6916_v26 = vrot.slane %v6915_v3, 2  ;;  %v17010_v45 = vld [vmem:[#allocation65_spill] sm:$0xff] }
 0x79d   : > { %v6873_v63 = vmax.f32 %v6871_v43, %v6872_v61  ;;  %v6824_v57 = vmul.f32 %v6737_v6, %v17009_v24  ;;  %v6256_v14 = vmax.f32 %v6254_v13, %v6255_v47  ;;  %v5828_v17 = vadd.f32 %v5827_v16, %v5826_v10 }
 0x79e   : > { %v7511_v19 = vsel %vm1165_vm2, %v7455_v18, -inf  ;;  %v7736_v34 = vrot.slane %v7735_v46, 4  ;;  %v14275_v30 = vmul.f32 %v6709_v11, %v17010_v45  ;;  %v14277_v32 = vmul.f32 0.125, %v7748_v7 }
 0x79f   : > { %v14279_v56 = vmax.f32 %v6277_v33, %v6278_v44  ;;  %v5635_v50 = vmax.f32 %v5633_v0, %v5634_v25  ;;  %v14282_v15 = vmul.f32 0.125, %v6503_v27  ;;  %v14284_v43 = vmax.f32 %v5602_v54, %v5603_v36 }
 0x7a0   : > { %10809 = vset.pattern.permute.xlu1 %v16933_v31  ;;  %v7141_v13 = vadd.f32 %v7140_v35, %v7139_v58  ;;  %v5859_v10 = vadd.f32 %v5858_v60, %v5857_v48  ;;  %v6874_v18 = vrot.slane %v6873_v63, 2  ;;  %v7512_v61 = vrot.slane %v7511_v19, 4  ;;  %v7349_v58 = vpop.permute.xlu1 %7348 }
 0x7a1   : > { %7428 = vperm.xlu1 %10809, %v17006_v41   ;;  %17011 = vst [vmem:[#allocation106_spill] sm:$0xff] %v14279_v56  ;;  %17012 = vst [vmem:[#allocation99_spill] sm:$0xff] %v14282_v15  ;;  %v7158_v47 = vsel %vm1165_vm2, %v6824_v57, 0.0  ;;  %v6257_v7 = vrot.slane %v6256_v14, 1  ;;  %v14288_v16 = vmul.f32 0.125, %v5828_v17  ;;  %v6917_v33 = vmax.f32 %v6915_v3, %v6916_v26  ;;  %v7377_v3 = vpop.permute.xlu0 %7376 }
 0x7a2   : > { %17013 = vst [vmem:[#allocation95_spill] sm:$0xff] %v14284_v43  ;;  %v7737_v6 = vadd.f32 %v7736_v34, %v7735_v46  ;;  %v6885_v25 = vsel %vm1165_vm2, %v14275_v30, -inf  ;;  %v5636_v44 = vrot.slane %v5635_v50, 2  ;;  %v5815_v54 = vsel %vm1165_vm2, %v14196_v37, 0.0 }
 0x7a3   : > { %17014 = vst [vmem:[#allocation103_spill] sm:$0xff] %v14288_v16  ;;  %v8061_v48 = vsel %vm3602_vm5, %v14063_v51, %v14156_v22  ;;  %v7142_v11 = vrot.slane %v7141_v13, 1  ;;  %v5860_v27 = vrot.slane %v5859_v10, 2  ;;  %v6934_v36 = vsel %vm1165_vm2, %v6824_v57, -inf }
 0x7a4   : > { %v7159_v35 = vrot.slane %v7158_v47, 4  ;;  %v6875_v34 = vmax.f32 %v6873_v63, %v6874_v18  ;;  %v7513_v46 = vmax.f32 %v7511_v19, %v7512_v61  ;;  %v6258_v60 = vmax.f32 %v6256_v14, %v6257_v7 }
 0x7a5   : > { %7440 = vperm.xlu1 %10809, %v13905_v28   ;;  %v7098_v28 = vrot.slane %v7097_v9, 2  ;;  %v7738_v37 = vrot.slane %v7737_v6, 2  ;;  %v5816_v26 = vrot.slane %v5815_v54, 4  ;;  %v14301_v17 = vmul.f32 %v7349_v58, %v17010_v45 }
 0x7a6   : > { %v8062_v51 = vsel %vm3604_vm6, %v14035_v20, %v8061_v48  ;;  %v5637_v57 = vmax.f32 %v5635_v50, %v5636_v44  ;;  %v6918_v63 = vrot.slane %v6917_v33, 1  ;;  %v5861_v19 = vadd.f32 %v5860_v27, %v5859_v10 }
 0x7a7   : > { %v7099_v0 = vadd.f32 %v7098_v28, %v7097_v9  ;;  %v6886_v9 = vrot.slane %v6885_v25, 4  ;;  %v6935_v28 = vrot.slane %v6934_v36, 4  ;;  %v8063_v16 = vsel %vm3606_vm8, %v14249_v62, %v8062_v51  ;;  %v7373_v62 = vpop.permute.xlu0 %7372 }
 0x7a8   : > { %v7160_v18 = vadd.f32 %v7159_v35, %v7158_v47  ;;  %v7143_v14 = vadd.f32 %v7142_v11, %v7141_v13  ;;  %v14311_v61 = vmul.f32 %v14255_v1, %v17002_v4  ;;  %v7514_v50 = vrot.slane %v7513_v46, 2 }
 0x7a9   : > { %10813 = vset.pattern.permute.xlu1 %v16932_v12  ;;  %v7100_v22 = vrot.slane %v7099_v0, 1  ;;  %v6887_v7 = vmax.f32 %v6885_v25, %v6886_v9  ;;  %v7739_v44 = vadd.f32 %v7738_v37, %v7737_v6  ;;  %v5817_v58 = vadd.f32 %v5816_v26, %v5815_v54  ;;  %v17017_v6 = vld [vmem:[#allocation85_spill] sm:$0xff] }
 0x7aa   : > { %6796 = vperm.xlu1 %10813, %v13936_v21   ;;  %v7525_v10 = vsel %vm1165_vm2, %v14301_v17, -inf  ;;  %v6876_v13 = vrot.slane %v6875_v34, 1  ;;  %v5638_v1 = vrot.slane %v5637_v57, 1  ;;  %v14319_v25 = vmax.f32 %v6917_v33, %v6918_v63 }
 0x7ab   : > { %v7101_v47 = vadd.f32 %v7100_v22, %v7099_v0  ;;  %v5862_v48 = vrot.slane %v5861_v19, 1  ;;  %v7161_v11 = vrot.slane %v7160_v18, 2  ;;  %v7464_v27 = vmul.f32 %v7377_v3, %v17009_v24 }
 0x7ac   : > { %17016 = vst [vmem:[#allocation62_spill] sm:$0xff] %v14319_v25  ;;  %v7463_v54 = vmul.f32 %v7373_v62, %v17017_v6  ;;  %v7532_v35 = vsel %vm1165_vm2, %v14311_v61, -inf  ;;  %v6888_v9 = vrot.slane %v6887_v7, 2  ;;  %v14325_v37 = vmul.f32 0.125, %v7143_v14 }
 0x7ad   : > { %v7515_v26 = vmax.f32 %v7513_v46, %v7514_v50  ;;  %v7740_v51 = vrot.slane %v7739_v44, 1  ;;  %v5818_v0 = vrot.slane %v5817_v58, 2  ;;  %v6877_v33 = vmax.f32 %v6875_v34, %v6876_v13  ;;  %v5434_v50 = vpop.permute.xlu0 %5433 }
 0x7ae   : > { %10814 = vset.pattern.permute.xlu1 %v16933_v31  ;;  %17018 = vst [vmem:[#allocation53_spill] sm:$0xff] %v14325_v37  ;;  %v14330_v22 = vmax.f32 %v5637_v57, %v5638_v1  ;;  %v7162_v63 = vadd.f32 %v7161_v11, %v7160_v18  ;;  %v7533_v14 = vrot.slane %v7532_v35, 4  ;;  %v5863_v62 = vadd.f32 %v5862_v48, %v5861_v19  ;;  %v14337_v1 = vpop.permute.xlu1 %6080 }
 0x7af   : > { %7436 = vperm.xlu1 %10814, %v13936_v21   ;;  %v8064_v21 = vsel %vm3608_vm7, %v14080_v2, %v8063_v16  ;;  %v17015_v2 = vld [vmem:[#allocation51_spill] sm:$0xff]  ;;  %v6936_v16 = vmax.f32 %v6934_v36, %v6935_v28  ;;  %v14328_v36 = vmul.f32 0.125, %v7101_v47  ;;  %v17020_v28 = vld [vmem:[#allocation57_spill] sm:$0xff]  ;;  %v7567_v46 = vsel %vm1165_vm2, %v7463_v54, -inf }
 0x7b0   : > { %v8065_v20 = vsel %vm3610_vm9, %v6258_v60, %v8064_v21  ;;  %v7526_v60 = vrot.slane %v7525_v10, 4  ;;  %17019 = vst [vmem:[#allocation40_spill] sm:$0xff] %v14330_v22  ;;  %v7574_v21 = vsel %vm1165_vm2, %v7464_v27, -inf  ;;  %v6889_v43 = vmax.f32 %v6887_v7, %v6888_v9 }
 0x7b1   : > { %8087 = vrot.lane.b32.xlu0 %v8065_v20, %s11092_s26  ;;  %v6937_v3 = vrot.slane %v6936_v16, 2  ;;  %v7798_v20 = vsel %vm1165_vm2, %v7464_v27, 0.0  ;;  %v7516_v34 = vrot.slane %v7515_v26, 1  ;;  %v7741_v13 = vadd.f32 %v7740_v51, %v7739_v44 }
 0x7b2   : > { %v5819_v47 = vadd.f32 %v5818_v0, %v5817_v58  ;;  %v7791_v57 = vsel %vm1165_vm2, %v7463_v54, 0.0  ;;  %v7575_v18 = vrot.slane %v7574_v21, 4  ;;  %v7799_v11 = vrot.slane %v7798_v20, 4  ;;  %v14356_v45 = vpop.permute.xlu1 %6716 }
 0x7b3   : > { %10815 = vset.pattern.permute.xlu1 %v16932_v12  ;;  %v6938_v22 = vmax.f32 %v6936_v16, %v6937_v3  ;;  %v6476_v27 = vsel %vm1165_vm2, %v14225_v59, 0.0  ;;  %v7163_v19 = vrot.slane %v7162_v63, 1  ;;  %v7568_v48 = vrot.slane %v7567_v46, 4 }
 0x7b4   : > { %6808 = vperm.xlu1 %10815, %v17015_v2   ;;  %v5543_v7 = vmul.f32 %v5434_v50, %v17017_v6  ;;  %v14344_v44 = vmul.f32 0.125, %v5863_v62  ;;  %v7792_v58 = vrot.slane %v7791_v57, 4  ;;  %v6890_v54 = vrot.slane %v6889_v43, 1 }
 0x7b5   : > { %v14346_v16 = vmax.f32 %v7515_v26, %v7516_v34  ;;  %v14351_v59 = vsel %vm3602_vm5, %v14140_v23, %v14239_v40  ;;  %v14353_v51 = vmul.f32 0.125, %v7741_v13  ;;  %v6939_v0 = vrot.slane %v6938_v22, 1 }
 0x7b6   : > { %17021 = vst [vmem:[#allocation108_spill] sm:$0xff] %v14344_v44  ;;  %v7800_v3 = vadd.f32 %v7799_v11, %v7798_v20  ;;  %v7569_v62 = vmax.f32 %v7567_v46, %v7568_v48  ;;  %v5871_v50 = vsel %vm1165_vm2, %v5543_v7, 0.0  ;;  %v7793_v26 = vadd.f32 %v7792_v58, %v7791_v57  ;;  %v17022_v20 = vld [vmem:[#allocation92_spill] sm:$0xff]  ;;  %v6105_v57 = vpop.permute.xlu0 %6104 }
 0x7b7   : > { %v6891_v34 = vmax.f32 %v6889_v43, %v6890_v54  ;;  %v7109_v23 = vsel %vm1165_vm2, %v14275_v30, 0.0  ;;  %v8133_v46 = vsel %vm3602_vm5, %v17022_v20, %v14177_v29  ;;  %v17023_v30 = vld [vmem:[#allocation34_spill] sm:$0xff]  ;;  %v17028_v20 = vld [vmem:[#allocation79_spill] sm:$0xff] }
 0x7b8   : > { %10817 = vset.pattern.permute.xlu1 %v16931_v52  ;;  %v7527_v52 = vmax.f32 %v7525_v10, %v7526_v60  ;;  %v7534_v10 = vmax.f32 %v7532_v35, %v7533_v14  ;;  %v5820_v60 = vrot.slane %v5819_v47, 1  ;;  %v7576_v35 = vmax.f32 %v7574_v21, %v7575_v18 }
 0x7b9   : > { %6164 = vperm.xlu1 %10817, %v17020_v28   ;;  %v7164_v14 = vadd.f32 %v7163_v19, %v7162_v63  ;;  %v5647_v63 = vsel %vm1165_vm2, %v5543_v7, -inf  ;;  %v7801_v11 = vrot.slane %v7800_v3, 2  ;;  %v5872_v19 = vrot.slane %v5871_v50, 4 }
 0x7ba   : > { %v7528_v9 = vrot.slane %v7527_v52, 2  ;;  %v7535_v44 = vrot.slane %v7534_v10, 2  ;;  %v5821_v13 = vadd.f32 %v5820_v60, %v5819_v47  ;;  %v7577_v18 = vrot.slane %v7576_v35, 2  ;;  %v17025_v47 = vld [vmem:[#allocation44_spill] sm:$0xff] }
 0x7bb   : > { %v7110_v48 = vrot.slane %v7109_v23, 4  ;;  %v7794_v7 = vrot.slane %v7793_v26, 2  ;;  %v5648_v58 = vrot.slane %v5647_v63, 4  ;;  %v14374_v60 = vmax.f32 %v6938_v22, %v6939_v0 }
 0x7bc   : > { %v7529_v40 = vmax.f32 %v7527_v52, %v7528_v9  ;;  %v7536_v43 = vmax.f32 %v7534_v10, %v7535_v44  ;;  %v17024_v52 = vrot.slane %v17023_v30, 1  ;;  %v17026_v9 = vmov 8  }
 0x7bd   : > { %10818 = vset.pattern.permute.xlu1 %v16932_v12  ;;  %v6477_v12 = vrot.slane %v6476_v27, 4  ;;  %17027 = vst [vmem:[#allocation39_spill] sm:$0xff] %v14374_v60  ;;  %v7756_v22 = vsel %vm1165_vm2, %v14311_v61, 0.0  ;;  %v7111_v0 = vadd.f32 %v7110_v48, %v7109_v23 }
 0x7be   : > { %6804 = vperm.xlu1 %10818, %v17020_v28   ;;  %v7530_v54 = vrot.slane %v7529_v40, 1 }
 0x7bf   : > { %v6478_v21 = vadd.f32 %v6477_v12, %v6476_v27  ;;  %v14377_v12 = vpop.permute.xlu1 %7356  ;;  %v7112_v23 = vrot.slane %v7111_v0, 2 }
 0x7c0   : > { %v7531_v37 = vmax.f32 %v7529_v40, %v7530_v54 }
 0x7c1   : > { %v6479_v10 = vrot.slane %v6478_v21, 2 }
 0x7c2   : > { %10819 = vset.pattern.permute.xlu1 %v16933_v31  ;;  %v8134_v31 = vsel %vm3604_vm6, %v6877_v33, %v8133_v46  ;;  %v7570_v33 = vrot.slane %v7569_v62, 2  ;;  %v14380_v46 = vmul.f32 0.125, %v7164_v14  ;;  %v7749_v14 = vsel %vm1165_vm2, %v14301_v17, 0.0 }
 0x7c3   : > { %7444 = vperm.xlu1 %10819, %v17020_v28   ;;  %v6898_v28 = vmax.f32 %v17023_v30, %v17024_v52  ;;  %v8135_v27 = vsel %vm3606_vm8, %v17025_v47, %v8134_v31  ;;  %v6015_v31 = vmul.f32 0.125, %v5821_v13  ;;  %v5873_v30 = vadd.f32 %v5872_v19, %v5871_v50  ;;  %v17030_v52 = vld [vmem:[#allocation69_spill] sm:$0xff]  ;;  %v17031_v50 = vld [vmem:[#allocation107_spill] sm:$0xff]  ;;  %v17032_v19 = vld [vmem:[#allocation90_spill] sm:$0xff]  ;;  %v5414_v17 = vpop.permute.xlu1 %5413 }
 0x7c4   : > { %v8136_v29 = vsel %vm3608_vm7, %v6891_v34, %v8135_v27  ;;  %17029 = vst [vmem:[#allocation23_spill] sm:$0xff] %v14380_v46  ;;  %v6186_v47 = vmul.f32 %v6105_v57, %v17030_v52  ;;  %v7802_v34 = vadd.f32 %v7801_v11, %v7800_v3  ;;  %v7537_v27 = vrot.slane %v7536_v43, 1 }
 0x7c5   : > { %v8137_v44 = vsel %vm3610_vm9, %v6898_v28, %v8136_v29  ;;  %v7795_v28 = vadd.f32 %v7794_v7, %v7793_v26  ;;  %v5649_v29 = vmax.f32 %v5647_v63, %v5648_v58  ;;  %v7571_v15 = vmax.f32 %v7569_v62, %v7570_v33  ;;  %v7385_v58 = vpop.permute.xlu0 %7384  ;;  %v17033_v33 = vld [vmem:[#allocation61_spill] sm:$0xff] }
 0x7c6   : > { %8159 = vrot.lane.b32.xlu0 %v8137_v44, %s11093_s27  ;;  %v8205_v13 = vsel %vm3602_vm5, %v17031_v50, %v14192_v42  ;;  %v5874_v3 = vrot.slane %v5873_v30, 2  ;;  %v7757_v11 = vrot.slane %v7756_v22, 4  ;;  %v6308_v61 = vsel %vm1165_vm2, %v6186_v47, -inf }
 0x7c7   : > { %10820 = vset.pattern.permute.xlu1 %v17026_v9  ;;  %v7578_v9 = vmax.f32 %v7576_v35, %v7577_v18  ;;  %v8206_v35 = vsel %vm3604_vm6, %v14346_v16, %v8205_v13  ;;  %v7803_v26 = vrot.slane %v7802_v34, 1  ;;  %v7538_v62 = vmax.f32 %v7536_v43, %v7537_v27 }
 0x7c8   : > { %5453 = vperm.xlu1 %10820, %v17028_v20   ;;  %v6480_v20 = vadd.f32 %v6479_v10, %v6478_v21  ;;  %v8207_v40 = vsel %vm3606_vm8, %v14268_v8, %v8206_v35  ;;  %v7796_v21 = vrot.slane %v7795_v28, 1  ;;  %v5650_v63 = vrot.slane %v5649_v29, 2  ;;  %v17034_v8 = vld [vmem:[#allocation64_spill] sm:$0xff] }
 0x7c9   : > { %v7750_v18 = vrot.slane %v7749_v14, 4  ;;  %v8208_v42 = vsel %vm3608_vm7, %v7531_v37, %v8207_v40  ;;  %v7579_v57 = vrot.slane %v7578_v9, 1  ;;  %v6309_v7 = vrot.slane %v6308_v61, 4 }
 0x7ca   : > { %v6481_v48 = vrot.slane %v6480_v20, 1  ;;  %v8209_v54 = vsel %vm3610_vm9, %v7538_v62, %v8208_v42  ;;  %v5875_v16 = vadd.f32 %v5874_v3, %v5873_v30  ;;  %v7758_v10 = vadd.f32 %v7757_v11, %v7756_v22  ;;  %v17041_v42 = vld [vmem:[#allocation72_spill] sm:$0xff] }
 0x7cb   : > { %v6532_v43 = vsel %vm1165_vm2, %v6186_v47, 0.0  ;;  %8231 = vrot.lane.b32.xlu0 %v8209_v54, %s11094_s28  ;;  %v14403_v44 = vmul.f32 %v5414_v17, %v17034_v8  ;;  %v14407_v37 = vsel %vm3604_vm6, %v6015_v31, %v14351_v59  ;;  %v7804_v27 = vadd.f32 %v7803_v26, %v7802_v34 }
 0x7cc   : > { %5403 = vperm.xlu1 %10820, %v17032_v19   ;;  %17035 = vst [vmem:[#allocation116_spill] sm:$0xff] %v14407_v37  ;;  %v7572_v50 = vrot.slane %v7571_v15, 1  ;;  %v7113_v13 = vadd.f32 %v7112_v23, %v7111_v0  ;;  %v7797_v19 = vadd.f32 %v7796_v21, %v7795_v28  ;;  %v5651_v35 = vmax.f32 %v5649_v29, %v5650_v63  ;;  %v6753_v29 = vpop.permute.xlu0 %6752 }
 0x7cd   : > { %v7751_v62 = vadd.f32 %v7750_v18, %v7749_v14  ;;  %v5619_v30 = vsel %vm1165_vm2, %v14403_v44, -inf  ;;  %v6310_v22 = vmax.f32 %v6308_v61, %v6309_v7  ;;  %v6533_v47 = vrot.slane %v6532_v43, 4  ;;  %v17042_v7 = vld [vmem:[#allocation88_spill] sm:$0xff] }
 0x7ce   : > { %v5620_v3 = vrot.slane %v5619_v30, 4  ;;  %v6482_v11 = vadd.f32 %v6481_v48, %v6480_v20  ;;  %v14412_v40 = vmax.f32 %v7578_v9, %v7579_v57  ;;  %v5876_v17 = vrot.slane %v5875_v16, 1  ;;  %v17040_v20 = vld [vmem:[#allocation91_spill] sm:$0xff] }
 0x7cf   : > { %v7759_v59 = vrot.slane %v7758_v10, 2  ;;  %v7466_v31 = vmul.f32 %v7385_v58, %v17030_v52  ;;  %v14415_v34 = vmul.f32 0.125, %v7804_v27  ;;  %v14417_v0 = vmax.f32 %v7571_v15, %v7572_v50 }
 0x7d0   : > { %5463 = vperm.xlu1 %10820, %v17033_v33   ;;  %17036 = vst [vmem:[#allocation83_spill] sm:$0xff] %v14412_v40  ;;  %v7114_v28 = vrot.slane %v7113_v13, 1  ;;  %v5621_v14 = vmax.f32 %v5619_v30, %v5620_v3  ;;  %v14419_v26 = vmul.f32 0.125, %v7797_v19  ;;  %v5652_v61 = vrot.slane %v5651_v35, 1  ;;  %v17043_v33 = vld [vmem:[#allocation73_spill] sm:$0xff] }
 0x7d1   : > { %17037 = vst [vmem:[#allocation80_spill] sm:$0xff] %v14415_v34  ;;  %17038 = vst [vmem:[#allocation111_spill] sm:$0xff] %v14417_v0  ;;  %v7752_v23 = vrot.slane %v7751_v62, 2  ;;  %v6311_v9 = vrot.slane %v6310_v22, 2  ;;  %v6534_v21 = vadd.f32 %v6533_v47, %v6532_v43  ;;  %v6658_v18 = vmul.f32 0.125, %v6482_v11  ;;  %v17045_v30 = vld [vmem:[#allocation25_spill] sm:$0xff] }
 0x7d2   : > { %17039 = vst [vmem:[#allocation122_spill] sm:$0xff] %v14419_v26  ;;  %v5622_v63 = vrot.slane %v5621_v14, 2  ;;  %v5877_v57 = vadd.f32 %v5876_v17, %v5875_v16  ;;  %v14425_v15 = vadd.f32 %v7759_v59, %v7758_v10  ;;  %v7588_v48 = vsel %vm1165_vm2, %v7466_v31, -inf  ;;  %v17046_v10 = vld [vmem:[#allocation52_spill] sm:$0xff]  ;;  %v6109_v17 = vpop.permute.xlu0 %6108 }
 0x7d3   : > { %v7115_v54 = vadd.f32 %v7114_v28, %v7113_v13  ;;  %v6828_v27 = vmul.f32 %v6753_v29, %v17043_v33  ;;  %v14433_v43 = vmax.f32 %v5651_v35, %v5652_v61  ;;  %v7753_v19 = vadd.f32 %v7752_v23, %v7751_v62 }
 0x7d4   : > { %5498 = vperm.xlu1 %10820, %v16993_v49   ;;  %v8353_v49 = vsel %vm3602_vm5, %v17040_v20, %v14164_v38  ;;  %v5623_v50 = vmax.f32 %v5621_v14, %v5622_v63  ;;  %v6180_v16 = vmul.f32 %v14337_v1, %v17045_v30  ;;  %v14439_v3 = vmax.f32 %v6310_v22, %v6311_v9  ;;  %v17049_v14 = vld [vmem:[#allocation87_spill] sm:$0xff] }
 0x7d5   : > { %v8354_v58 = vsel %vm3604_vm6, %v17042_v7, %v8353_v49  ;;  %17044 = vst [vmem:[#allocation113_spill] sm:$0xff] %v14433_v43  ;;  %v6535_v11 = vrot.slane %v6534_v21, 2  ;;  %v14443_v28 = vmul.f32 0.125, %v5877_v57  ;;  %v7589_v35 = vrot.slane %v7588_v48, 4  ;;  %v17051_v9 = vld [vmem:[#allocation67_spill] sm:$0xff]  ;;  %v17053_v57 = vld [vmem:[#allocation48_spill] sm:$0xff] }
 0x7d6   : > { %v8355_v38 = vsel %vm3606_vm8, %v14253_v53, %v8354_v58  ;;  %17047 = vst [vmem:[#allocation58_spill] sm:$0xff] %v14439_v3  ;;  %v5624_v13 = vrot.slane %v5623_v50, 1  ;;  %v7761_v53 = vrot.slane %v14425_v15, 1  ;;  %v7812_v62 = vsel %vm1165_vm2, %v7466_v31, 0.0  ;;  %v17054_v58 = vld [vmem:[#allocation59_spill] sm:$0xff] }
 0x7d7   : > { %v8356_v47 = vsel %vm3608_vm7, %v17046_v10, %v8355_v38  ;;  %17048 = vst [vmem:[#allocation81_spill] sm:$0xff] %v14443_v28  ;;  %v7297_v1 = vmul.f32 0.125, %v7115_v54  ;;  %v7186_v22 = vsel %vm1165_vm2, %v6828_v27, 0.0  ;;  %v17050_v61 = vrot.slane %v17049_v14, 1 }
 0x7d8   : > { %5443 = vperm.xlu1 %10820, %v17041_v42   ;;  %v8357_v59 = vsel %vm3610_vm9, %v6658_v18, %v8356_v47  ;;  %v5625_v29 = vmax.f32 %v5623_v50, %v5624_v13  ;;  %v7754_v20 = vrot.slane %v7753_v19, 1  ;;  %v6490_v49 = vsel %vm1165_vm2, %v6180_v16, 0.0 }
 0x7d9   : > { %8379 = vrot.lane.b32.xlu0 %v8357_v59, %s11092_s26  ;;  %v7122_v23 = vadd.f32 %v17050_v61, %v17049_v14  ;;  %v6187_v63 = vmul.f32 %v6109_v17, %v17051_v9  ;;  %v6266_v18 = vsel %vm1165_vm2, %v6180_v16, -inf  ;;  %v6819_v31 = vmul.f32 %v14356_v45, %v17034_v8  ;;  %v17055_v45 = vld [vmem:[#allocation70_spill] sm:$0xff]  ;;  %v17057_v61 = vld [vmem:[#allocation29_spill] sm:$0xff] }
 0x7da   : > { %v14460_v42 = vsel %vm3598_vm3, %v14158_v39, %v5625_v29  ;;  %v8425_v7 = vsel %vm3602_vm5, %v17053_v57, %v14181_v5  ;;  %v7590_v54 = vmax.f32 %v7588_v48, %v7589_v35  ;;  %v7187_v50 = vrot.slane %v7186_v22, 4  ;;  %v14471_v29 = vpop.permute.xlu1 %6088 }
 0x7db   : > { %17052 = vst [vmem:[#allocation121_spill] sm:$0xff] %v14460_v42  ;;  %v8426_v38 = vsel %vm3604_vm6, %v14328_v36, %v8425_v7  ;;  %v6491_v10 = vrot.slane %v6490_v49, 4  ;;  %v7298_v47 = vmul.f32 0.125, %v7122_v23  ;;  %v7755_v39 = vadd.f32 %v7754_v20, %v7753_v19  ;;  %v6121_v7 = vpop.permute.xlu0 %6120 }
 0x7dc   : > { %5503 = vperm.xlu1 %10820, %v17006_v41   ;;  %v6962_v41 = vsel %vm1165_vm2, %v6828_v27, -inf  ;;  %v7813_v27 = vrot.slane %v7812_v62, 4  ;;  %v8427_v17 = vsel %vm3606_vm8, %v17055_v45, %v8426_v38  ;;  %v6267_v13 = vrot.slane %v6266_v18, 4 }
 0x7dd   : > { %v6963_v16 = vrot.slane %v6962_v41, 4  ;;  %v6539_v59 = vsel %vm1165_vm2, %v6187_v63, 0.0  ;;  %v8428_v5 = vsel %vm3608_vm7, %v7297_v1, %v8427_v17  ;;  %v14475_v35 = vadd.f32 %v6535_v11, %v6534_v21 }
 0x7de   : > { %v6899_v36 = vsel %vm1165_vm2, %v6819_v31, -inf  ;;  %v8429_v14 = vsel %vm3610_vm9, %v7298_v47, %v8428_v5  ;;  %v7591_v23 = vrot.slane %v7590_v54, 2  ;;  %v7814_v57 = vadd.f32 %v7813_v27, %v7812_v62 }
 0x7df   : > { %17056 = vst [vmem:[#allocation117_spill] sm:$0xff] %v14475_v35  ;;  %v7188_v19 = vadd.f32 %v7187_v50, %v7186_v22  ;;  %v7123_v20 = vsel %vm1165_vm2, %v6819_v31, 0.0  ;;  %8451 = vrot.lane.b32.xlu0 %v8429_v14, %s11093_s27  ;;  %v6492_v1 = vadd.f32 %v6491_v10, %v6490_v49  ;;  %v6315_v38 = vsel %vm1165_vm2, %v6187_v63, -inf  ;;  %v17059_v22 = vld [vmem:[#allocation43_spill] sm:$0xff]  ;;  %v17060_v31 = vld [vmem:[#allocation102_spill] sm:$0xff]  ;;  %v7401_v30 = vpop.permute.xlu0 %7400 }
 0x7e0   : > { %5473 = vperm.xlu1 %10820, %v17054_v58   ;;  %v6964_v58 = vmax.f32 %v6962_v41, %v6963_v16  ;;  %v6540_v21 = vrot.slane %v6539_v59, 4  ;;  %v7937_v11 = vmul.f32 0.125, %v7755_v39  ;;  %v6268_v45 = vmax.f32 %v6266_v18, %v6267_v13  ;;  %v17061_v41 = vld [vmem:[#allocation37_spill] sm:$0xff]  ;;  %v14491_v16 = vpop.permute.xlu1 %7364 }
 0x7e1   : > { %v6900_v17 = vrot.slane %v6899_v36, 4  ;;  %v7762_v47 = vadd.f32 %v7761_v53, %v14425_v15  ;;  %v7124_v5 = vrot.slane %v7123_v20, 4  ;;  %v7459_v62 = vmul.f32 %v14377_v12, %v17034_v8 }
 0x7e2   : > { %v8497_v27 = vsel %vm3602_vm5, %v17060_v31, %v17059_v22  ;;  %v7815_v49 = vrot.slane %v7814_v57, 2  ;;  %v7189_v63 = vrot.slane %v7188_v19, 2  ;;  %v6316_v50 = vrot.slane %v6315_v38, 4 }
 0x7e3   : > { %v8498_v15 = vsel %vm3604_vm6, %v14353_v51, %v8497_v27  ;;  %v14495_v53 = vmax.f32 %v7590_v54, %v7591_v23  ;;  %v6965_v18 = vrot.slane %v6964_v58, 2  ;;  %v6493_v10 = vrot.slane %v6492_v1, 2  ;;  %v17063_v51 = vld [vmem:[#allocation71_spill] sm:$0xff] }
 0x7e4   : > { %5478 = vperm.xlu1 %10820, %v17057_v61   ;;  %v17058_v61 = vld [vmem:[#allocation84_spill] sm:$0xff]  ;;  %v6541_v39 = vadd.f32 %v6540_v21, %v6539_v59  ;;  %v6269_v12 = vrot.slane %v6268_v45, 2  ;;  %v6901_v13 = vmax.f32 %v6899_v36, %v6900_v17  ;;  %v7938_v14 = vmul.f32 0.125, %v7762_v47 }
 0x7e5   : > { %v6190_v48 = vmul.f32 %v6121_v7, %v17058_v61  ;;  %17062 = vst [vmem:[#allocation112_spill] sm:$0xff] %v14495_v53  ;;  %v8499_v7 = vsel %vm3606_vm8, %v14277_v32, %v8498_v15  ;;  %v7125_v22 = vadd.f32 %v7124_v5, %v7123_v20  ;;  %v14503_v54 = vadd.f32 %v7815_v49, %v7814_v57  ;;  %v14510_v15 = vpop.permute.xlu1 %6096 }
 0x7e6   : > { %v8500_v8 = vsel %vm3608_vm7, %v7937_v11, %v8499_v7  ;;  %v7190_v23 = vadd.f32 %v7189_v63, %v7188_v19  ;;  %v6317_v59 = vmax.f32 %v6315_v38, %v6316_v50  ;;  %v6494_v21 = vadd.f32 %v6493_v10, %v6492_v1 }
 0x7e7   : > { %v6560_v31 = vsel %vm1165_vm2, %v6190_v48, 0.0  ;;  %17064 = vst [vmem:[#allocation114_spill] sm:$0xff] %v14503_v54  ;;  %v8501_v36 = vsel %vm3610_vm9, %v7938_v14, %v8500_v8  ;;  %v6542_v17 = vrot.slane %v6541_v39, 2  ;;  %v6336_v32 = vsel %vm1165_vm2, %v6190_v48, -inf  ;;  %v17072_v54 = vld [vmem:[#allocation28_spill] sm:$0xff] }
 0x7e8   : > { %5483 = vperm.xlu1 %10820, %v17061_v41   ;;  %v7763_v41 = vsel %vm1165_vm2, %v7459_v62, 0.0  ;;  %v7539_v20 = vsel %vm1165_vm2, %v7459_v62, -inf  ;;  %8523 = vrot.lane.b32.xlu0 %v8501_v36, %s11094_s28  ;;  %v6966_v47 = vmax.f32 %v6964_v58, %v6965_v18  ;;  %v6561_v5 = vrot.slane %v6560_v31, 4  ;;  %v6137_v58 = vpop.permute.xlu0 %6136 }
 0x7e9   : > { %v7764_v27 = vrot.slane %v7763_v41, 4  ;;  %v7470_v11 = vmul.f32 %v7401_v30, %v17058_v61  ;;  %v6270_v19 = vmax.f32 %v6268_v45, %v6269_v12  ;;  %v6902_v38 = vrot.slane %v6901_v13, 2  ;;  %v14520_v43 = vpop.permute.xlu1 %6092 }
 0x7ea   : > { %v7126_v8 = vrot.slane %v7125_v22, 2  ;;  %v7191_v1 = vrot.slane %v7190_v23, 1  ;;  %v6337_v62 = vrot.slane %v6336_v32, 4  ;;  %v7540_v49 = vrot.slane %v7539_v20, 4 }
 0x7eb   : > { %v6495_v63 = vrot.slane %v6494_v21, 1  ;;  %v6318_v50 = vrot.slane %v6317_v59, 2  ;;  %v6543_v18 = vadd.f32 %v6542_v17, %v6541_v39  ;;  %v6967_v30 = vrot.slane %v6966_v47, 1 }
 0x7ec   : > { %5488 = vperm.xlu1 %10820, %v17063_v51   ;;  %v6562_v10 = vadd.f32 %v6561_v5, %v6560_v31  ;;  %v7765_v14 = vadd.f32 %v7764_v27, %v7763_v41  ;;  %v7616_v7 = vsel %vm1165_vm2, %v7470_v11, -inf  ;;  %v6271_v45 = vrot.slane %v6270_v19, 1  ;;  %v7417_v42 = vpop.permute.xlu0 %7416 }
 0x7ed   : > { %v6903_v12 = vmax.f32 %v6901_v13, %v6902_v38  ;;  %v7127_v51 = vadd.f32 %v7126_v8, %v7125_v22  ;;  %v7192_v36 = vadd.f32 %v7191_v1, %v7190_v23  ;;  %v6338_v57 = vmax.f32 %v6336_v32, %v6337_v62  ;;  %v17065_v1 = vld [vmem:[#allocation74_spill] sm:$0xff] }
 0x7ee   : > { %v7541_v48 = vmax.f32 %v7539_v20, %v7540_v49  ;;  %v7840_v28 = vsel %vm1165_vm2, %v7470_v11, 0.0  ;;  %v6496_v39 = vadd.f32 %v6495_v63, %v6494_v21  ;;  %v6319_v17 = vmax.f32 %v6317_v59, %v6318_v50 }
 0x7ef   : > { %v6544_v31 = vrot.slane %v6543_v18, 1  ;;  %v7617_v41 = vrot.slane %v7616_v7, 4  ;;  %v14522_v5 = vmax.f32 %v6966_v47, %v6967_v30  ;;  %v6563_v27 = vrot.slane %v6562_v10, 2 }
 0x7f0   : > { %5528 = vperm.xlu1 %10820, %v17015_v2   ;;  %v5843_v2 = vsel %vm1165_vm2, %v14403_v44, 0.0  ;;  %v7766_v13 = vrot.slane %v7765_v14, 2  ;;  %v6272_v38 = vmax.f32 %v6270_v19, %v6271_v45  ;;  %v6904_v8 = vrot.slane %v6903_v12, 1  ;;  %v14530_v45 = vpop.permute.xlu1 %6732 }
 0x7f1   : > { %v5844_v22 = vrot.slane %v5843_v2, 4  ;;  %v7128_v44 = vrot.slane %v7127_v51, 1  ;;  %v7841_v23 = vrot.slane %v7840_v28, 4  ;;  %v14524_v32 = vmul.f32 0.125, %v7192_v36  ;;  %v17066_v36 = vld [vmem:[#allocation115_spill] sm:$0xff] }
 0x7f2   : > { %v6339_v20 = vrot.slane %v6338_v57, 2  ;;  %v7542_v11 = vrot.slane %v7541_v48, 2  ;;  %v6182_v62 = vmul.f32 %v14471_v29, %v17065_v1  ;;  %v6660_v21 = vmul.f32 0.125, %v6496_v39 }
 0x7f3   : > { %v6320_v59 = vrot.slane %v6319_v17, 1  ;;  %v6545_v49 = vadd.f32 %v6544_v31, %v6543_v18  ;;  %v7618_v63 = vmax.f32 %v7616_v7, %v7617_v41  ;;  %v6564_v47 = vadd.f32 %v6563_v27, %v6562_v10  ;;  %v17067_v18 = vld [vmem:[#allocation94_spill] sm:$0xff] }
 0x7f4   : > { %v7767_v50 = vadd.f32 %v7766_v13, %v7765_v14  ;;  %v5845_v30 = vadd.f32 %v5844_v22, %v5843_v2  ;;  %v7461_v19 = vmul.f32 %v14491_v16, %v16998_v55  ;;  %v14534_v37 = vsel %vm3598_vm3, %v6272_v38, %v17066_v36  ;;  %v17068_v14 = vld [vmem:[#allocation76_spill] sm:$0xff] }
 0x7f5   : > { %v6905_v34 = vmax.f32 %v6903_v12, %v6904_v8  ;;  %v7129_v26 = vadd.f32 %v7128_v44, %v7127_v51  ;;  %v7842_v29 = vadd.f32 %v7841_v23, %v7840_v28  ;;  %v6340_v39 = vmax.f32 %v6338_v57, %v6339_v20  ;;  %v17070_v57 = vld [vmem:[#allocation6_spill] sm:$0xff]  ;;  %v7413_v23 = vpop.permute.xlu0 %7412  ;;  %v14553_v20 = vpop.permute.xlu1 %6744 }
 0x7f6   : > { %v7543_v1 = vmax.f32 %v7541_v48, %v7542_v11  ;;  %v6194_v7 = vmul.f32 %v6137_v58, %v17067_v18  ;;  %v6504_v10 = vsel %vm1165_vm2, %v6182_v62, 0.0  ;;  %v14540_v2 = vsel %vm3598_vm3, %v6660_v21, %v17068_v14 }
 0x7f7   : > { %17069 = vst [vmem:[#allocation118_spill] sm:$0xff] %v14540_v2  ;;  %v14542_v16 = vmax.f32 %v6319_v17, %v6320_v59  ;;  %v14544_v31 = vmul.f32 0.125, %v6545_v49  ;;  %v7619_v41 = vrot.slane %v7618_v63, 2  ;;  %v6565_v27 = vrot.slane %v6564_v47, 1  ;;  %v17073_v2 = vld [vmem:[#allocation100_spill] sm:$0xff] }
 0x7f8   : > { %v7768_v13 = vrot.slane %v7767_v50, 1  ;;  %v5846_v12 = vrot.slane %v5845_v30, 2  ;;  %v7777_v28 = vsel %vm1165_vm2, %v7461_v19, 0.0  ;;  %v14549_v48 = vsel %vm3598_vm3, %v17070_v57, %v6905_v34 }
 0x7f9   : > { %17071 = vst [vmem:[#allocation120_spill] sm:$0xff] %v14549_v48  ;;  %v7843_v58 = vrot.slane %v7842_v29, 2  ;;  %v6280_v51 = vsel %vm1165_vm2, %v6182_v62, -inf  ;;  %v6505_v22 = vrot.slane %v6504_v10, 4  ;;  %v7299_v38 = vmul.f32 0.125, %v7129_v26 }
 0x7fa   : > { %v6341_v8 = vrot.slane %v6340_v39, 1  ;;  %v7544_v17 = vrot.slane %v7543_v1, 1  ;;  %v6364_v44 = vsel %vm1165_vm2, %v6194_v7, -inf  ;;  %v7620_v11 = vmax.f32 %v7618_v63, %v7619_v41 }
 0x7fb   : > { %v6588_v21 = vsel %vm1165_vm2, %v6194_v7, 0.0  ;;  %v7553_v59 = vsel %vm1165_vm2, %v7461_v19, -inf  ;;  %v7778_v49 = vrot.slane %v7777_v28, 4  ;;  %v6566_v34 = vadd.f32 %v6565_v27, %v6564_v47 }
 0x7fc   : > { %v7769_v36 = vadd.f32 %v7768_v13, %v7767_v50  ;;  %v5847_v14 = vadd.f32 %v5846_v12, %v5845_v30  ;;  %v6281_v57 = vrot.slane %v6280_v51, 4  ;;  %v7844_v62 = vadd.f32 %v7843_v58, %v7842_v29  ;;  %v14567_v13 = vpop.permute.xlu1 %6100 }
 0x7fd   : > { %v6365_v55 = vrot.slane %v6364_v44, 4  ;;  %v6506_v26 = vadd.f32 %v6505_v22, %v6504_v10  ;;  %v7473_v46 = vmul.f32 %v7413_v23, %v17072_v54  ;;  %v14560_v35 = vsel %vm3598_vm3, %v17073_v2, %v7299_v38 }
 0x7fe   : > { %17074 = vst [vmem:[#allocation119_spill] sm:$0xff] %v14560_v35  ;;  %v6589_v53 = vrot.slane %v6588_v21, 4  ;;  %v7474_v63 = vmul.f32 %v7417_v42, %v17067_v18  ;;  %v7554_v7 = vrot.slane %v7553_v59, 4  ;;  %v14563_v41 = vmax.f32 %v6340_v39, %v6341_v8  ;;  %v17077_v8 = vld [vmem:[#allocation97_spill] sm:$0xff] }
 0x7ff   : > { %v7545_v19 = vmax.f32 %v7543_v1, %v7544_v17  ;;  %v7621_v47 = vrot.slane %v7620_v11, 1  ;;  %v7779_v50 = vadd.f32 %v7778_v49, %v7777_v28  ;;  %v14565_v30 = vmul.f32 0.125, %v6566_v34 }
 0x800   : > { %17075 = vst [vmem:[#allocation110_spill] sm:$0xff] %v14563_v41  ;;  %v7939_v29 = vmul.f32 0.125, %v7769_v36  ;;  %v5848_v27 = vrot.slane %v5847_v14, 1  ;;  %v6282_v10 = vmax.f32 %v6280_v51, %v6281_v57  ;;  %v7845_v12 = vrot.slane %v7844_v62, 1 }
 0x801   : > { %17076 = vst [vmem:[#allocation31_spill] sm:$0xff] %v14565_v30  ;;  %v6366_v58 = vmax.f32 %v6364_v44, %v6365_v55  ;;  %v6507_v2 = vrot.slane %v6506_v26, 2  ;;  %v7861_v22 = vsel %vm1165_vm2, %v7473_v46, 0.0  ;;  %v6590_v38 = vadd.f32 %v6589_v53, %v6588_v21  ;;  %v6785_v21 = vpop.permute.xlu0 %6784 }
 0x802   : > { %v7644_v42 = vsel %vm1165_vm2, %v7474_v63, -inf  ;;  %v7868_v39 = vsel %vm1165_vm2, %v7474_v63, 0.0  ;;  %v7555_v1 = vmax.f32 %v7553_v59, %v7554_v7  ;;  %v14574_v28 = vsel %vm3598_vm3, %v17077_v8, %v7545_v19  ;;  %v17079_v63 = vld [vmem:[#allocation104_spill] sm:$0xff]  ;;  %v14585_v8 = vpop.permute.xlu1 %6740 }
 0x803   : > { %v14576_v17 = vmax.f32 %v7620_v11, %v7621_v47  ;;  %v7780_v51 = vrot.slane %v7779_v50, 2  ;;  %v6184_v23 = vmul.f32 %v14510_v15, %v17009_v24  ;;  %v5849_v55 = vadd.f32 %v5848_v27, %v5847_v14 }
 0x804   : > { %v6283_v44 = vrot.slane %v6282_v10, 2  ;;  %v7637_v49 = vsel %vm1165_vm2, %v7473_v46, -inf  ;;  %v7862_v53 = vrot.slane %v7861_v22, 4  ;;  %v7846_v34 = vadd.f32 %v7845_v12, %v7844_v62  ;;  %v17080_v46 = vld [vmem:[#allocation42_spill] sm:$0xff] }
 0x805   : > { %17078 = vst [vmem:[#allocation36_spill] sm:$0xff] %v14576_v17  ;;  %v6508_v36 = vadd.f32 %v6507_v2, %v6506_v26  ;;  %v7645_v57 = vrot.slane %v7644_v42, 4  ;;  %v7869_v59 = vrot.slane %v7868_v39, 4  ;;  %v14583_v7 = vsel %vm3598_vm3, %v17079_v63, %v7939_v29 }
 0x806   : > { %v6367_v11 = vrot.slane %v6366_v58, 2  ;;  %v6591_v19 = vrot.slane %v6590_v38, 2  ;;  %v7556_v47 = vrot.slane %v7555_v1, 2  ;;  %v7781_v15 = vadd.f32 %v7780_v51, %v7779_v50 }
 0x807   : > { %v7638_v14 = vrot.slane %v7637_v49, 4  ;;  %v6294_v27 = vsel %vm1165_vm2, %v6184_v23, -inf  ;;  %v6836_v17 = vmul.f32 %v6785_v21, %v17080_v46  ;;  %v6019_v30 = vmul.f32 0.125, %v5849_v55 }
 0x808   : > { %v6284_v62 = vmax.f32 %v6282_v10, %v6283_v44  ;;  %v7863_v26 = vadd.f32 %v7862_v53, %v7861_v22  ;;  %v6518_v12 = vsel %vm1165_vm2, %v6184_v23, 0.0  ;;  %v14590_v2 = vmul.f32 0.125, %v7846_v34  ;;  %v17084_v10 = vld [vmem:[#allocation109_spill] sm:$0xff] }
 0x809   : > { %v6509_v29 = vrot.slane %v6508_v36, 1  ;;  %v7646_v63 = vmax.f32 %v7644_v42, %v7645_v57  ;;  %v7870_v41 = vadd.f32 %v7869_v59, %v7868_v39  ;;  %v14592_v35 = vmax.f32 %v6366_v58, %v6367_v11  ;;  %v7425_v58 = vpop.permute.xlu0 %7424  ;;  %v14603_v39 = vpop.permute.xlu1 %7380 }
 0x80a   : > { %17081 = vst [vmem:[#allocation66_spill] sm:$0xff] %v14590_v2  ;;  %v14594_v40 = vadd.f32 %v6591_v19, %v6590_v38  ;;  %v7557_v50 = vmax.f32 %v7555_v1, %v7556_v47  ;;  %v6295_v51 = vrot.slane %v6294_v27, 4  ;;  %v7782_v0 = vrot.slane %v7781_v15, 1  ;;  %v17093_v2 = vld [vmem:[#allocation63_spill] sm:$0xff] }
 0x80b   : > { %17082 = vst [vmem:[#allocation10_spill] sm:$0xff] %v14592_v35  ;;  %v7639_v60 = vmax.f32 %v7637_v49, %v7638_v14  ;;  %v6519_v25 = vrot.slane %v6518_v12, 4  ;;  %v7242_v55 = vsel %vm1165_vm2, %v6836_v17, 0.0  ;;  %v14599_v22 = vsel %vm3598_vm3, %v17084_v10, %v6019_v30 }
 0x80c   : > { %17083 = vst [vmem:[#allocation2_spill] sm:$0xff] %v14594_v40  ;;  %17085 = vst [vmem:[#allocation3_spill] sm:$0xff] %v14599_v22  ;;  %v6285_v23 = vrot.slane %v6284_v62, 1  ;;  %v7864_v44 = vrot.slane %v7863_v26, 2  ;;  %v6183_v42 = vmul.f32 %v14520_v43, %v17017_v6  ;;  %v6510_v38 = vadd.f32 %v6509_v29, %v6508_v36 }
 0x80d   : > { %v7647_v1 = vrot.slane %v7646_v63, 2  ;;  %v7871_v53 = vrot.slane %v7870_v41, 2  ;;  %v7018_v49 = vsel %vm1165_vm2, %v6836_v17, -inf  ;;  %v7558_v34 = vrot.slane %v7557_v50, 1 }
 0x80e   : > { %v6296_v57 = vmax.f32 %v6294_v27, %v6295_v51  ;;  %v7243_v59 = vrot.slane %v7242_v55, 4  ;;  %v7783_v11 = vadd.f32 %v7782_v0, %v7781_v15  ;;  %v7640_v19 = vrot.slane %v7639_v60, 2  ;;  %v14619_v15 = vpop.permute.xlu1 %6112 }
 0x80f   : > { %v6520_v47 = vadd.f32 %v6519_v25, %v6518_v12  ;;  %v7865_v14 = vadd.f32 %v7864_v44, %v7863_v26  ;;  %v7019_v43 = vrot.slane %v7018_v49, 4  ;;  %v6511_v10 = vsel %vm1165_vm2, %v6183_v42, 0.0  ;;  %v6141_v25 = vpop.permute.xlu0 %6140 }
 0x810   : > { %v7476_v36 = vmul.f32 %v7425_v58, %v17080_v46  ;;  %v14610_v29 = vmax.f32 %v6284_v62, %v6285_v23  ;;  %v14612_v22 = vmul.f32 0.125, %v6510_v38  ;;  %v14614_v17 = vmax.f32 %v7646_v63, %v7647_v1 }
 0x811   : > { %v14616_v21 = vadd.f32 %v7871_v53, %v7870_v41  ;;  %v7559_v27 = vmax.f32 %v7557_v50, %v7558_v34  ;;  %v6297_v51 = vrot.slane %v6296_v57, 2  ;;  %v7244_v30 = vadd.f32 %v7243_v59, %v7242_v55 }
 0x812   : > { %17086 = vst [vmem:[#allocation4_spill] sm:$0xff] %v14610_v29  ;;  %17087 = vst [vmem:[#allocation5_spill] sm:$0xff] %v14612_v22  ;;  %v6287_v0 = vsel %vm1165_vm2, %v6183_v42, -inf  ;;  %v7641_v26 = vmax.f32 %v7639_v60, %v7640_v19  ;;  %v6521_v12 = vrot.slane %v6520_v47, 2  ;;  %v6512_v44 = vrot.slane %v6511_v10, 4  ;;  %v17090_v42 = vld [vmem:[#allocation78_spill] sm:$0xff] }
 0x813   : > { %17088 = vst [vmem:[#allocation7_spill] sm:$0xff] %v14614_v17  ;;  %17089 = vst [vmem:[#allocation15_spill] sm:$0xff] %v14616_v21  ;;  %v6823_v62 = vmul.f32 %v14530_v45, %v17017_v6  ;;  %v7941_v23 = vmul.f32 0.125, %v7783_v11  ;;  %v7866_v58 = vrot.slane %v7865_v14, 1  ;;  %v7020_v63 = vmax.f32 %v7018_v49, %v7019_v43  ;;  %v6793_v6 = vpop.permute.xlu0 %6792  ;;  %v14637_v17 = vpop.permute.xlu1 %7392 }
 0x814   : > { %v7882_v41 = vsel %vm1165_vm2, %v7476_v36, 0.0  ;;  %v6288_v38 = vrot.slane %v6287_v0, 4  ;;  %v6195_v1 = vmul.f32 %v6141_v25, %v17090_v42  ;;  %v14629_v60 = vsel %vm3600_vm4, %v7559_v27, %v14574_v28 }
 0x815   : > { %17091 = vst [vmem:[#allocation8_spill] sm:$0xff] %v14629_v60  ;;  %v6298_v53 = vmax.f32 %v6296_v57, %v6297_v51  ;;  %v7245_v34 = vrot.slane %v7244_v30, 2  ;;  %v7658_v45 = vsel %vm1165_vm2, %v7476_v36, -inf  ;;  %v6522_v59 = vadd.f32 %v6521_v12, %v6520_v47 }
 0x816   : > { %v6513_v11 = vadd.f32 %v6512_v44, %v6511_v10  ;;  %v7883_v49 = vrot.slane %v7882_v41, 4  ;;  %v7151_v19 = vsel %vm1165_vm2, %v6823_v62, 0.0  ;;  %v14635_v43 = vsel %vm3600_vm4, %v7941_v23, %v14583_v7 }
 0x817   : > { %17092 = vst [vmem:[#allocation14_spill] sm:$0xff] %v14635_v43  ;;  %v7642_v50 = vrot.slane %v7641_v26, 1  ;;  %v7867_v55 = vadd.f32 %v7866_v58, %v7865_v14  ;;  %v7021_v25 = vrot.slane %v7020_v63, 2  ;;  %v6289_v28 = vmax.f32 %v6287_v0, %v6288_v38 }
 0x818   : > { %v7659_v57 = vrot.slane %v7658_v45, 4  ;;  %v6927_v27 = vsel %vm1165_vm2, %v6823_v62, -inf  ;;  %v6371_v47 = vsel %vm1165_vm2, %v6195_v1, -inf  ;;  %v6299_v10 = vrot.slane %v6298_v53, 1 }
 0x819   : > { %v7246_v36 = vadd.f32 %v7245_v34, %v7244_v30  ;;  %v7152_v51 = vrot.slane %v7151_v19, 4  ;;  %v6595_v12 = vsel %vm1165_vm2, %v6195_v1, 0.0  ;;  %v6523_v44 = vrot.slane %v6522_v59, 1 }
 0x81a   : > { %v6514_v7 = vrot.slane %v6513_v11, 2  ;;  %v7884_v23 = vadd.f32 %v7883_v49, %v7882_v41  ;;  %v6838_v14 = vmul.f32 %v6793_v6, %v17093_v2  ;;  %v7022_v58 = vmax.f32 %v7020_v63, %v7021_v25  ;;  %v14651_v41 = vpop.permute.xlu1 %6748 }
 0x81b   : > { %v6928_v21 = vrot.slane %v6927_v27, 4  ;;  %v6372_v40 = vrot.slane %v6371_v47, 4  ;;  %v6826_v0 = vmul.f32 %v14553_v20, %v17030_v52  ;;  %v14645_v38 = vmax.f32 %v7641_v26, %v7642_v50 }
 0x81c   : > { %v6290_v62 = vrot.slane %v6289_v28, 2  ;;  %v7660_v43 = vmax.f32 %v7658_v45, %v7659_v57  ;;  %v6596_v35 = vrot.slane %v6595_v12, 4  ;;  %v14647_v30 = vmul.f32 0.125, %v7867_v55 }
 0x81d   : > { %17094 = vst [vmem:[#allocation9_spill] sm:$0xff] %v14645_v38  ;;  %v14649_v34 = vmax.f32 %v6298_v53, %v6299_v10  ;;  %v7247_v1 = vrot.slane %v7246_v36, 1  ;;  %v7153_v42 = vadd.f32 %v7152_v51, %v7151_v19  ;;  %v6524_v6 = vadd.f32 %v6523_v44, %v6522_v59  ;;  %v17097_v51 = vld [vmem:[#allocation56_spill] sm:$0xff] }
 0x81e   : > { %17095 = vst [vmem:[#allocation17_spill] sm:$0xff] %v14647_v30  ;;  %v6515_v63 = vadd.f32 %v6514_v7, %v6513_v11  ;;  %v7885_v49 = vrot.slane %v7884_v23, 2  ;;  %v7256_v25 = vsel %vm1165_vm2, %v6838_v14, 0.0  ;;  %v7023_v2 = vrot.slane %v7022_v58, 1 }
 0x81f   : > { %17096 = vst [vmem:[#allocation12_spill] sm:$0xff] %v14649_v34  ;;  %v6929_v20 = vmax.f32 %v6927_v27, %v6928_v21  ;;  %v6373_v26 = vmax.f32 %v6371_v47, %v6372_v40  ;;  %v6948_v50 = vsel %vm1165_vm2, %v6826_v0, -inf  ;;  %v6291_v45 = vmax.f32 %v6289_v28, %v6290_v62  ;;  %v14661_v47 = vpop.permute.xlu1 %7388  ;;  %v6789_v62 = vpop.permute.xlu0 %6788 }
 0x820   : > { %v7661_v57 = vrot.slane %v7660_v43, 2  ;;  %v6597_v55 = vadd.f32 %v6596_v35, %v6595_v12  ;;  %v7032_v53 = vsel %vm1165_vm2, %v6838_v14, -inf  ;;  %v7248_v10 = vadd.f32 %v7247_v1, %v7246_v36 }
 0x821   : > { %v7154_v38 = vrot.slane %v7153_v42, 2  ;;  %v7257_v19 = vrot.slane %v7256_v25, 4  ;;  %v6185_v59 = vmul.f32 %v14567_v13, %v17097_v51  ;;  %v6516_v11 = vrot.slane %v6515_v63, 1 }
 0x822   : > { %v7886_v44 = vadd.f32 %v7885_v49, %v7884_v23  ;;  %v6949_v7 = vrot.slane %v6948_v50, 4  ;;  %v7172_v30 = vsel %vm1165_vm2, %v6826_v0, 0.0  ;;  %v14659_v21 = vmul.f32 0.125, %v6524_v6 }
 0x823   : > { %v6930_v40 = vrot.slane %v6929_v20, 2  ;;  %v6374_v27 = vrot.slane %v6373_v26, 2  ;;  %v7033_v28 = vrot.slane %v7032_v53, 4  ;;  %v14663_v35 = vmax.f32 %v7022_v58, %v7023_v2 }
 0x824   : > { %17098 = vst [vmem:[#allocation26_spill] sm:$0xff] %v14659_v21  ;;  %v6292_v36 = vrot.slane %v6291_v45, 1  ;;  %v7662_v12 = vmax.f32 %v7660_v43, %v7661_v57  ;;  %v6598_v14 = vrot.slane %v6597_v55, 2  ;;  %v7155_v1 = vadd.f32 %v7154_v38, %v7153_v42 }
 0x825   : > { %17099 = vst [vmem:[#allocation16_spill] sm:$0xff] %v14663_v35  ;;  %v7173_v13 = vrot.slane %v7172_v30, 4  ;;  %v7258_v46 = vadd.f32 %v7257_v19, %v7256_v25  ;;  %v6301_v23 = vsel %vm1165_vm2, %v6185_v59, -inf  ;;  %v14666_v49 = vmul.f32 0.125, %v7248_v10  ;;  %v17102_v35 = vld [vmem:[#allocation98_spill] sm:$0xff]  ;;  %v14672_v10 = vpop.permute.xlu1 %6760 }
 0x826   : > { %v6517_v0 = vadd.f32 %v6516_v11, %v6515_v63  ;;  %v7887_v6 = vrot.slane %v7886_v44, 1  ;;  %v6950_v21 = vmax.f32 %v6948_v50, %v6949_v7  ;;  %v6931_v22 = vmax.f32 %v6929_v20, %v6930_v40 }
 0x827   : > { %17100 = vst [vmem:[#allocation35_spill] sm:$0xff] %v14666_v49  ;;  %v6375_v60 = vmax.f32 %v6373_v26, %v6374_v27  ;;  %v7034_v48 = vmax.f32 %v7032_v53, %v7033_v28  ;;  %v6525_v2 = vsel %vm1165_vm2, %v6185_v59, 0.0  ;;  %v14669_v58 = vmax.f32 %v6291_v45, %v6292_v36  ;;  %v6161_v53 = vpop.permute.xlu0 %6160 }
 0x828   : > { %v6599_v43 = vadd.f32 %v6598_v14, %v6597_v55  ;;  %v6302_v57 = vrot.slane %v6301_v23, 4  ;;  %v6837_v42 = vmul.f32 %v6789_v62, %v17102_v35  ;;  %v7663_v38 = vrot.slane %v7662_v12, 1 }
 0x829   : > { %17101 = vst [vmem:[#allocation18_spill] sm:$0xff] %v14669_v58  ;;  %v7156_v25 = vrot.slane %v7155_v1, 1  ;;  %v7174_v19 = vadd.f32 %v7173_v13, %v7172_v30  ;;  %v7259_v34 = vrot.slane %v7258_v46, 2  ;;  %v14674_v63 = vmul.f32 0.125, %v6517_v0 }
 0x82a   : > { %v7888_v50 = vadd.f32 %v7887_v6, %v7886_v44  ;;  %v6951_v20 = vrot.slane %v6950_v21, 2  ;;  %v6526_v26 = vrot.slane %v6525_v2, 4  ;;  %v6932_v11 = vrot.slane %v6931_v22, 1  ;;  %v17107_v6 = vld [vmem:[#allocation86_spill] sm:$0xff] }
 0x82b   : > { %17103 = vst [vmem:[#allocation20_spill] sm:$0xff] %v14674_v63  ;;  %v6376_v59 = vrot.slane %v6375_v60, 1  ;;  %v7035_v45 = vrot.slane %v7034_v48, 2  ;;  %v6825_v55 = vmul.f32 %v14585_v8, %v17097_v51  ;;  %v6600_v7 = vrot.slane %v6599_v43, 1 }
 0x82c   : > { %v6303_v40 = vmax.f32 %v6301_v23, %v6302_v57  ;;  %v7025_v27 = vsel %vm1165_vm2, %v6837_v42, -inf  ;;  %v7249_v30 = vsel %vm1165_vm2, %v6837_v42, 0.0  ;;  %v14680_v28 = vmax.f32 %v7662_v12, %v7663_v38  ;;  %v14688_v57 = vpop.permute.xlu1 %6116 }
 0x82d   : > { %v7157_v36 = vadd.f32 %v7156_v25, %v7155_v1  ;;  %v7175_v14 = vrot.slane %v7174_v19, 2  ;;  %v7260_v44 = vadd.f32 %v7259_v34, %v7258_v46  ;;  %v14682_v62 = vmul.f32 0.125, %v7888_v50  ;;  %v6801_v34 = vpop.permute.xlu0 %6800 }
 0x82e   : > { %17104 = vst [vmem:[#allocation22_spill] sm:$0xff] %v14680_v28  ;;  %v14684_v13 = vmax.f32 %v6950_v21, %v6951_v20  ;;  %v6527_v0 = vadd.f32 %v6526_v26, %v6525_v2  ;;  %v6200_v49 = vmul.f32 %v6161_v53, %v17107_v6  ;;  %v7036_v35 = vmax.f32 %v7034_v48, %v7035_v45 }
 0x82f   : > { %17105 = vst [vmem:[#allocation21_spill] sm:$0xff] %v14682_v62  ;;  %v7026_v8 = vrot.slane %v7025_v27, 4  ;;  %v7250_v63 = vrot.slane %v7249_v30, 4  ;;  %v7165_v23 = vsel %vm1165_vm2, %v6825_v55, 0.0  ;;  %v14690_v42 = vmax.f32 %v6931_v22, %v6932_v11 }
 0x830   : > { %17106 = vst [vmem:[#allocation11_spill] sm:$0xff] %v14684_v13  ;;  %v14692_v12 = vmax.f32 %v6375_v60, %v6376_v59  ;;  %v6601_v1 = vadd.f32 %v6600_v7, %v6599_v43  ;;  %v6304_v46 = vrot.slane %v6303_v40, 2  ;;  %v14694_v38 = vmul.f32 0.125, %v7157_v36 }
 0x831   : > { %17108 = vst [vmem:[#allocation46_spill] sm:$0xff] %v14690_v42  ;;  %v14696_v21 = vadd.f32 %v7175_v14, %v7174_v19  ;;  %v7261_v2 = vrot.slane %v7260_v44, 1  ;;  %v6941_v48 = vsel %vm1165_vm2, %v6825_v55, -inf  ;;  %v6528_v25 = vrot.slane %v6527_v0, 2 }
 0x832   : > { %17109 = vst [vmem:[#allocation68_spill] sm:$0xff] %v14692_v12  ;;  %17110 = vst [vmem:[#allocation51_spill] sm:$0xff] %v14694_v38  ;;  %v7166_v50 = vrot.slane %v7165_v23, 4  ;;  %v6630_v20 = vsel %vm1165_vm2, %v6200_v49, 0.0  ;;  %v7465_v22 = vmul.f32 %v14603_v39, %v17097_v51  ;;  %v7037_v26 = vrot.slane %v7036_v35, 1  ;;  %v14710_v39 = vpop.permute.xlu1 %6756 }
 0x833   : > { %17111 = vst [vmem:[#allocation57_spill] sm:$0xff] %v14696_v21  ;;  %v7027_v43 = vmax.f32 %v7025_v27, %v7026_v8  ;;  %v7251_v53 = vadd.f32 %v7250_v63, %v7249_v30  ;;  %v14703_v11 = vmul.f32 0.125, %v6601_v1  ;;  %v6305_v59 = vmax.f32 %v6303_v40, %v6304_v46  ;;  %v6157_v30 = vpop.permute.xlu0 %6156 }
 0x834   : > { %v6942_v19 = vrot.slane %v6941_v48, 4  ;;  %v6840_v45 = vmul.f32 %v6801_v34, %v17107_v6  ;;  %v6406_v7 = vsel %vm1165_vm2, %v6200_v49, -inf  ;;  %v6631_v36 = vrot.slane %v6630_v20, 4 }
 0x835   : > { %17112 = vst [vmem:[#allocation92_spill] sm:$0xff] %v14703_v11  ;;  %v6188_v14 = vmul.f32 %v14619_v15, %v17043_v33  ;;  %v7262_v60 = vadd.f32 %v7261_v2, %v7260_v44  ;;  %v6529_v51 = vadd.f32 %v6528_v25, %v6527_v0  ;;  %v7167_v27 = vadd.f32 %v7166_v50, %v7165_v23  ;;  %v17114_v0 = vld [vmem:[#allocation49_spill] sm:$0xff] }
 0x836   : > { %v7581_v63 = vsel %vm1165_vm2, %v7465_v22, -inf  ;;  %v14713_v40 = vmax.f32 %v7036_v35, %v7037_v26  ;;  %v7028_v8 = vrot.slane %v7027_v43, 2  ;;  %v7252_v1 = vrot.slane %v7251_v53, 2 }
 0x837   : > { %v7805_v46 = vsel %vm1165_vm2, %v7465_v22, 0.0  ;;  %v6306_v34 = vrot.slane %v6305_v59, 1  ;;  %v6943_v49 = vmax.f32 %v6941_v48, %v6942_v19  ;;  %v6407_v55 = vrot.slane %v6406_v7, 4  ;;  %v14722_v48 = vpop.permute.xlu1 %7396 }
 0x838   : > { %17113 = vst [vmem:[#allocation34_spill] sm:$0xff] %v14713_v40  ;;  %v7270_v28 = vsel %vm1165_vm2, %v6840_v45, 0.0  ;;  %v6632_v15 = vadd.f32 %v6631_v36, %v6630_v20  ;;  %v7582_v62 = vrot.slane %v7581_v63, 4  ;;  %v6546_v44 = vsel %vm1165_vm2, %v6188_v14, 0.0 }
 0x839   : > { %v6199_v23 = vmul.f32 %v6157_v30, %v17114_v0  ;;  %v14719_v2 = vmul.f32 0.125, %v7262_v60  ;;  %v6530_v25 = vrot.slane %v6529_v51, 1  ;;  %v7168_v35 = vrot.slane %v7167_v27, 2 }
 0x83a   : > { %v7806_v50 = vrot.slane %v7805_v46, 4  ;;  %v7029_v26 = vmax.f32 %v7027_v43, %v7028_v8  ;;  %v7253_v40 = vadd.f32 %v7252_v1, %v7251_v53  ;;  %v7046_v22 = vsel %vm1165_vm2, %v6840_v45, -inf }
 0x83b   : > { %17115 = vst [vmem:[#allocation44_spill] sm:$0xff] %v14719_v2  ;;  %v7271_v11 = vrot.slane %v7270_v28, 4  ;;  %v6944_v19 = vrot.slane %v6943_v49, 2  ;;  %v6408_v12 = vmax.f32 %v6406_v7, %v6407_v55  ;;  %v6322_v20 = vsel %vm1165_vm2, %v6188_v14, -inf  ;;  %v14731_v42 = vpop.permute.xlu1 %6128 }
 0x83c   : > { %v6547_v36 = vrot.slane %v6546_v44, 4  ;;  %v14725_v6 = vmax.f32 %v6305_v59, %v6306_v34  ;;  %v6633_v30 = vrot.slane %v6632_v15, 2  ;;  %v7583_v60 = vmax.f32 %v7581_v63, %v7582_v62 }
 0x83d   : > { %v6623_v2 = vsel %vm1165_vm2, %v6199_v23, 0.0  ;;  %v6531_v0 = vadd.f32 %v6530_v25, %v6529_v51  ;;  %v7169_v38 = vadd.f32 %v7168_v35, %v7167_v27  ;;  %v7807_v43 = vadd.f32 %v7806_v50, %v7805_v46 }
 0x83e   : > { %17116 = vst [vmem:[#allocation79_spill] sm:$0xff] %v14725_v6  ;;  %v7047_v53 = vrot.slane %v7046_v22, 4  ;;  %v7254_v8 = vrot.slane %v7253_v40, 1  ;;  %v7272_v45 = vadd.f32 %v7271_v11, %v7270_v28  ;;  %v6323_v1 = vrot.slane %v6322_v20, 4 }
 0x83f   : > { %v7468_v21 = vmul.f32 %v14637_v17, %v17043_v33  ;;  %v6409_v55 = vrot.slane %v6408_v12, 2  ;;  %v6548_v7 = vadd.f32 %v6547_v36, %v6546_v44  ;;  %v6399_v14 = vsel %vm1165_vm2, %v6199_v23, -inf  ;;  %v14739_v18 = vpop.permute.xlu1 %6768 }
 0x840   : > { %v6624_v59 = vrot.slane %v6623_v2, 4  ;;  %v7030_v34 = vrot.slane %v7029_v26, 1  ;;  %v6945_v13 = vmax.f32 %v6943_v49, %v6944_v19  ;;  %v6634_v62 = vadd.f32 %v6633_v30, %v6632_v15 }
 0x841   : > { %v7584_v63 = vrot.slane %v7583_v60, 2  ;;  %v14733_v51 = vmul.f32 0.125, %v6531_v0  ;;  %v7170_v27 = vrot.slane %v7169_v38, 1  ;;  %v7808_v46 = vrot.slane %v7807_v43, 2 }
 0x842   : > { %v7048_v28 = vmax.f32 %v7046_v22, %v7047_v53  ;;  %v7273_v11 = vrot.slane %v7272_v45, 2  ;;  %v6324_v25 = vmax.f32 %v6322_v20, %v6323_v1  ;;  %v6400_v35 = vrot.slane %v6399_v14, 4  ;;  %v6169_v22 = vpop.permute.xlu0 %6168 }
 0x843   : > { %17117 = vst [vmem:[#allocation107_spill] sm:$0xff] %v14733_v51  ;;  %v7602_v17 = vsel %vm1165_vm2, %v7468_v21, -inf  ;;  %v7255_v44 = vadd.f32 %v7254_v8, %v7253_v40  ;;  %v6410_v50 = vmax.f32 %v6408_v12, %v6409_v55  ;;  %v6549_v23 = vrot.slane %v6548_v7, 2 }
 0x844   : > { %v6625_v36 = vadd.f32 %v6624_v59, %v6623_v2  ;;  %v14736_v6 = vmax.f32 %v7029_v26, %v7030_v34  ;;  %v6946_v49 = vrot.slane %v6945_v13, 1  ;;  %v6635_v15 = vrot.slane %v6634_v62, 1 }
 0x845   : > { %v7585_v19 = vmax.f32 %v7583_v60, %v7584_v63  ;;  %v7809_v30 = vadd.f32 %v7808_v46, %v7807_v43  ;;  %v7049_v0 = vrot.slane %v7048_v28, 2  ;;  %v7603_v51 = vrot.slane %v7602_v17, 4  ;;  %v17121_v63 = vld [vmem:[#allocation27_spill] sm:$0xff] }
 0x846   : > { %17118 = vst [vmem:[#allocation90_spill] sm:$0xff] %v14736_v6  ;;  %v7826_v3 = vsel %vm1165_vm2, %v7468_v21, 0.0  ;;  %v7171_v53 = vadd.f32 %v7170_v27, %v7169_v38  ;;  %v7274_v20 = vadd.f32 %v7273_v11, %v7272_v45  ;;  %v6325_v1 = vrot.slane %v6324_v25, 2 }
 0x847   : > { %v6401_v58 = vmax.f32 %v6399_v14, %v6400_v35  ;;  %v14741_v12 = vmul.f32 0.125, %v7255_v44  ;;  %v6411_v40 = vrot.slane %v6410_v50, 1  ;;  %v6550_v2 = vadd.f32 %v6549_v23, %v6548_v7 }
 0x848   : > { %v6626_v26 = vrot.slane %v6625_v36, 2  ;;  %v14743_v8 = vmax.f32 %v6945_v13, %v6946_v49  ;;  %v6636_v60 = vadd.f32 %v6635_v15, %v6634_v62  ;;  %v7586_v43 = vrot.slane %v7585_v19, 1  ;;  %v7449_v62 = vpop.permute.xlu0 %7448 }
 0x849   : > { %17119 = vst [vmem:[#allocation61_spill] sm:$0xff] %v14741_v12  ;;  %v7827_v55 = vrot.slane %v7826_v3, 4  ;;  %v7810_v59 = vrot.slane %v7809_v30, 1  ;;  %v7050_v34 = vmax.f32 %v7048_v28, %v7049_v0  ;;  %v7604_v21 = vmax.f32 %v7602_v17, %v7603_v51  ;;  %v14758_v17 = vpop.permute.xlu1 %7408 }
 0x84a   : > { %17120 = vst [vmem:[#allocation91_spill] sm:$0xff] %v14743_v8  ;;  %v6202_v38 = vmul.f32 %v6169_v22, %v17121_v63  ;;  %v14746_v45 = vmul.f32 0.125, %v7171_v53  ;;  %v7275_v14 = vrot.slane %v7274_v20, 1  ;;  %v6326_v27 = vmax.f32 %v6324_v25, %v6325_v1 }
 0x84b   : > { %v6402_v46 = vrot.slane %v6401_v58, 2  ;;  %v14748_v11 = vmax.f32 %v6410_v50, %v6411_v40  ;;  %v6551_v35 = vrot.slane %v6550_v2, 1  ;;  %v6627_v7 = vadd.f32 %v6626_v26, %v6625_v36 }
 0x84c   : > { %17122 = vst [vmem:[#allocation72_spill] sm:$0xff] %v14746_v45  ;;  %v6827_v13 = vmul.f32 %v14651_v41, %v17051_v9  ;;  %v14752_v44 = vmul.f32 0.125, %v6636_v60  ;;  %v14754_v23 = vmax.f32 %v7585_v19, %v7586_v43  ;;  %v7828_v51 = vadd.f32 %v7827_v55, %v7826_v3  ;;  %v5459_v55 = vpop.permute.xlu0 %5458 }
 0x84d   : > { %17123 = vst [vmem:[#allocation88_spill] sm:$0xff] %v14748_v11  ;;  %v7467_v28 = vmul.f32 %v14661_v47, %v17051_v9  ;;  %v7811_v25 = vadd.f32 %v7810_v59, %v7809_v30  ;;  %v7051_v49 = vrot.slane %v7050_v34, 1  ;;  %v7605_v50 = vrot.slane %v7604_v21, 2 }
 0x84e   : > { %17124 = vst [vmem:[#allocation52_spill] sm:$0xff] %v14752_v44  ;;  %17125 = vst [vmem:[#allocation87_spill] sm:$0xff] %v14754_v23  ;;  %v6420_v15 = vsel %vm1165_vm2, %v6202_v38, -inf  ;;  %v7276_v36 = vadd.f32 %v7275_v14, %v7274_v20  ;;  %v6327_v0 = vrot.slane %v6326_v27, 1  ;;  %v6403_v22 = vmax.f32 %v6401_v58, %v6402_v46  ;;  %v14772_v46 = vpop.permute.xlu1 %6124 }
 0x84f   : > { %v6644_v41 = vsel %vm1165_vm2, %v6202_v38, 0.0  ;;  %v6552_v53 = vadd.f32 %v6551_v35, %v6550_v2  ;;  %v6628_v1 = vrot.slane %v6627_v7, 1  ;;  %v6955_v19 = vsel %vm1165_vm2, %v6827_v13, -inf }
 0x850   : > { %v7179_v3 = vsel %vm1165_vm2, %v6827_v13, 0.0  ;;  %v7829_v40 = vrot.slane %v7828_v51, 2  ;;  %v6421_v47 = vrot.slane %v6420_v15, 4  ;;  %v7482_v26 = vmul.f32 %v7449_v62, %v17121_v63 }
 0x851   : > { %v7819_v30 = vsel %vm1165_vm2, %v7467_v28, 0.0  ;;  %v14766_v60 = vmul.f32 0.125, %v7811_v25  ;;  %v14768_v43 = vmax.f32 %v7050_v34, %v7051_v49  ;;  %v7606_v20 = vmax.f32 %v7604_v21, %v7605_v50 }
 0x852   : > { %v6645_v58 = vrot.slane %v6644_v41, 4  ;;  %v14770_v59 = vmul.f32 0.125, %v7276_v36  ;;  %v6328_v2 = vmax.f32 %v6326_v27, %v6327_v0  ;;  %v6956_v38 = vrot.slane %v6955_v19, 4 }
 0x853   : > { %17126 = vst [vmem:[#allocation48_spill] sm:$0xff] %v14766_v60  ;;  %17127 = vst [vmem:[#allocation59_spill] sm:$0xff] %v14768_v43  ;;  %v7180_v14 = vrot.slane %v7179_v3, 4  ;;  %v6668_v35 = vmul.f32 0.125, %v6552_v53  ;;  %v6404_v13 = vrot.slane %v6403_v22, 1  ;;  %v6629_v6 = vadd.f32 %v6628_v1, %v6627_v7 }
 0x854   : > { %17128 = vst [vmem:[#allocation70_spill] sm:$0xff] %v14770_v59  ;;  %v7820_v62 = vrot.slane %v7819_v30, 4  ;;  %v7830_v12 = vadd.f32 %v7829_v40, %v7828_v51  ;;  %v6422_v44 = vmax.f32 %v6420_v15, %v6421_v47  ;;  %v7700_v25 = vsel %vm1165_vm2, %v7482_v26, -inf  ;;  %v5439_v40 = vpop.permute.xlu0 %5438 }
 0x855   : > { %v7595_v34 = vsel %vm1165_vm2, %v7467_v28, -inf  ;;  %v7607_v21 = vrot.slane %v7606_v20, 1  ;;  %v6646_v49 = vadd.f32 %v6645_v58, %v6644_v41  ;;  %v7924_v50 = vsel %vm1165_vm2, %v7482_v26, 0.0  ;;  %v14792_v58 = vpop.permute.xlu1 %6764 }
 0x856   : > { %v5548_v27 = vmul.f32 %v5459_v55, %v17043_v33  ;;  %v14780_v36 = vsel %vm3598_vm3, %v6328_v2, %v14542_v16  ;;  %v6957_v0 = vmax.f32 %v6955_v19, %v6956_v38  ;;  %v7181_v53 = vadd.f32 %v7180_v14, %v7179_v3 }
 0x857   : > { %v6830_v7 = vmul.f32 %v14672_v10, %v17058_v61  ;;  %v14784_v51 = vmax.f32 %v6403_v22, %v6404_v13  ;;  %v7701_v15 = vrot.slane %v7700_v25, 4  ;;  %v7596_v1 = vrot.slane %v7595_v34, 4 }
 0x858   : > { %v7821_v28 = vadd.f32 %v7820_v62, %v7819_v30  ;;  %v14788_v41 = vsel %vm3598_vm3, %v6668_v35, %v14544_v31  ;;  %v14790_v47 = vmul.f32 0.125, %v6629_v6  ;;  %v6423_v26 = vrot.slane %v6422_v44, 2 }
 0x859   : > { %17129 = vst [vmem:[#allocation29_spill] sm:$0xff] %v14784_v51  ;;  %v7925_v16 = vrot.slane %v7924_v50, 4  ;;  %v14794_v19 = vmax.f32 %v7606_v20, %v7607_v21  ;;  %v7831_v3 = vrot.slane %v7830_v12, 1  ;;  %v6647_v10 = vrot.slane %v6646_v49, 2  ;;  %v17131_v20 = vld [vmem:[#allocation54_spill] sm:$0xff] }
 0x85a   : > { %17130 = vst [vmem:[#allocation43_spill] sm:$0xff] %v14790_v47  ;;  %v5906_v22 = vsel %vm1165_vm2, %v5548_v27, 0.0  ;;  %v6958_v55 = vrot.slane %v6957_v0, 2  ;;  %v7182_v2 = vrot.slane %v7181_v53, 2  ;;  %v7200_v30 = vsel %vm1165_vm2, %v6830_v7, 0.0 }
 0x85b   : > { %v5544_v38 = vmul.f32 %v5439_v40, %v17009_v24  ;;  %v7702_v31 = vmax.f32 %v7700_v25, %v7701_v15  ;;  %v7597_v14 = vmax.f32 %v7595_v34, %v7596_v1  ;;  %v7822_v6 = vrot.slane %v7821_v28, 2  ;;  %v14804_v34 = vpop.permute.xlu1 %7404 }
 0x85c   : > { %v5682_v35 = vsel %vm1165_vm2, %v5548_v27, -inf  ;;  %v6424_v13 = vmax.f32 %v6422_v44, %v6423_v26  ;;  %v7926_v62 = vadd.f32 %v7925_v16, %v7924_v50  ;;  %v5907_v33 = vrot.slane %v5906_v22, 4 }
 0x85d   : > { %v6189_v21 = vmul.f32 %v14688_v57, %v17131_v20  ;;  %v7832_v43 = vadd.f32 %v7831_v3, %v7830_v12  ;;  %v6648_v59 = vadd.f32 %v6647_v10, %v6646_v49  ;;  %v6976_v47 = vsel %vm1165_vm2, %v6830_v7, -inf  ;;  %v14808_v49 = vpop.permute.xlu0 %5493 }
 0x85e   : > { %v7201_v11 = vrot.slane %v7200_v30, 4  ;;  %v6959_v51 = vmax.f32 %v6957_v0, %v6958_v55  ;;  %v7183_v9 = vadd.f32 %v7182_v2, %v7181_v53  ;;  %v5683_v63 = vrot.slane %v5682_v35, 4  ;;  %17132 = vst [vmem:[#allocation102_spill] sm:$0xff] %v14808_v49 }
 0x85f   : > { %v5878_v25 = vsel %vm1165_vm2, %v5544_v38, 0.0  ;;  %v7703_v15 = vrot.slane %v7702_v31, 2  ;;  %v7598_v27 = vrot.slane %v7597_v14, 2  ;;  %v7823_v44 = vadd.f32 %v7822_v6, %v7821_v28  ;;  %v14811_v45 = vpop.permute.xlu1 %6776 }
 0x860   : > { %v5654_v50 = vsel %vm1165_vm2, %v5544_v38, -inf  ;;  %v7927_v1 = vrot.slane %v7926_v62, 2  ;;  %v5908_v40 = vadd.f32 %v5907_v33, %v5906_v22  ;;  %v6977_v57 = vrot.slane %v6976_v47, 4 }
 0x861   : > { %v6329_v12 = vsel %vm1165_vm2, %v6189_v21, -inf  ;;  %v7948_v7 = vmul.f32 0.125, %v7832_v43  ;;  %v6425_v0 = vrot.slane %v6424_v13, 1  ;;  %v7202_v53 = vadd.f32 %v7201_v11, %v7200_v30 }
 0x862   : > { %v5879_v26 = vrot.slane %v5878_v25, 4  ;;  %v6960_v16 = vrot.slane %v6959_v51, 1  ;;  %v7184_v3 = vrot.slane %v7183_v9, 1  ;;  %v5684_v10 = vmax.f32 %v5682_v35, %v5683_v63 }
 0x863   : > { %v5655_v55 = vrot.slane %v5654_v50, 4  ;;  %v7599_v2 = vmax.f32 %v7597_v14, %v7598_v27  ;;  %v7824_v24 = vrot.slane %v7823_v44, 1  ;;  %v6330_v28 = vrot.slane %v6329_v12, 4  ;;  %v5409_v14 = vpop.permute.xlu0 %5408 }
 0x864   : > { %v6553_v38 = vsel %vm1165_vm2, %v6189_v21, 0.0  ;;  %v7704_v6 = vmax.f32 %v7702_v31, %v7703_v15  ;;  %v7928_v33 = vadd.f32 %v7927_v1, %v7926_v62  ;;  %v5909_v22 = vrot.slane %v5908_v40, 2 }
 0x865   : > { %v6978_v60 = vmax.f32 %v6976_v47, %v6977_v57  ;;  %v14813_v49 = vmax.f32 %v6424_v13, %v6425_v0  ;;  %v6649_v43 = vrot.slane %v6648_v59, 1  ;;  %v7203_v11 = vrot.slane %v7202_v53, 2 }
 0x866   : > { %v5880_v30 = vadd.f32 %v5879_v26, %v5878_v25  ;;  %v6961_v23 = vmax.f32 %v6959_v51, %v6960_v16  ;;  %v5685_v8 = vrot.slane %v5684_v10, 2  ;;  %v5656_v63 = vmax.f32 %v5654_v50, %v5655_v55  ;;  %v14822_v26 = vpop.permute.xlu1 %6132 }
 0x867   : > { %v6554_v35 = vrot.slane %v6553_v38, 4  ;;  %v7185_v27 = vadd.f32 %v7184_v3, %v7183_v9  ;;  %v7600_v29 = vrot.slane %v7599_v2, 1  ;;  %v7825_v56 = vadd.f32 %v7824_v24, %v7823_v44 }
 0x868   : > { %v6331_v21 = vmax.f32 %v6329_v12, %v6330_v28  ;;  %v7705_v31 = vrot.slane %v7704_v6, 1  ;;  %v7929_v62 = vrot.slane %v7928_v33, 1  ;;  %v5910_v15 = vadd.f32 %v5909_v22, %v5908_v40 }
 0x869   : > { %v6979_v47 = vrot.slane %v6978_v60, 2  ;;  %v14815_v1 = vadd.f32 %v6649_v43, %v6648_v59  ;;  %v7204_v13 = vadd.f32 %v7203_v11, %v7202_v53  ;;  %v5881_v57 = vrot.slane %v5880_v30, 2 }
 0x86a   : > { %v5538_v0 = vmul.f32 %v5409_v14, %v17002_v4  ;;  %v14820_v51 = vsel %vm3598_vm3, %v14522_v5, %v6961_v23  ;;  %v5686_v25 = vmax.f32 %v5684_v10, %v5685_v8  ;;  %v5657_v50 = vrot.slane %v5656_v63, 2  ;;  %v14845_v11 = vpop.permute.xlu1 %6772 }
 0x86b   : > { %v6555_v9 = vadd.f32 %v6554_v35, %v6553_v38  ;;  %v7307_v24 = vmul.f32 0.125, %v7185_v27  ;;  %v7601_v44 = vmax.f32 %v7599_v2, %v7600_v29  ;;  %v7947_v12 = vmul.f32 0.125, %v7825_v56 }
 0x86c   : > { %v6332_v40 = vrot.slane %v6331_v21, 2  ;;  %v14824_v16 = vmax.f32 %v7704_v6, %v7705_v31  ;;  %v14826_v59 = vadd.f32 %v7929_v62, %v7928_v33  ;;  %v5911_v53 = vrot.slane %v5910_v15, 1  ;;  %v17134_v31 = vld [vmem:[#allocation55_spill] sm:$0xff] }
 0x86d   : > { %v6980_v3 = vmax.f32 %v6978_v60, %v6979_v47  ;;  %v7205_v55 = vrot.slane %v7204_v13, 1  ;;  %v5882_v28 = vadd.f32 %v5881_v57, %v5880_v30  ;;  %v5836_v5 = vsel %vm1165_vm2, %v5538_v0, 0.0 }
 0x86e   : > { %17133 = vst [vmem:[#allocation37_spill] sm:$0xff] %v14824_v16  ;;  %v6829_v8 = vmul.f32 %v14710_v39, %v17131_v20  ;;  %v5687_v23 = vrot.slane %v5686_v25, 1  ;;  %v5658_v10 = vmax.f32 %v5656_v63, %v5657_v50  ;;  %v6556_v38 = vrot.slane %v6555_v9, 2 }
 0x86f   : > { %v7469_v56 = vmul.f32 %v14722_v48, %v17131_v20  ;;  %v14835_v29 = vsel %vm3598_vm3, %v14524_v32, %v7307_v24  ;;  %v14839_v60 = vsel %vm3598_vm3, %v14794_v19, %v7601_v44  ;;  %v14842_v2 = vsel %vm3598_vm3, %v7948_v7, %v7947_v12 }
 0x870   : > { %v6333_v6 = vmax.f32 %v6331_v21, %v6332_v40  ;;  %v5912_v33 = vadd.f32 %v5911_v53, %v5910_v15  ;;  %v6981_v39 = vrot.slane %v6980_v3, 1  ;;  %v5612_v22 = vsel %vm1165_vm2, %v5538_v0, -inf  ;;  %v5469_v40 = vpop.permute.xlu0 %5468  ;;  %v14867_v53 = vpop.permute.xlu1 %6144 }
 0x871   : > { %v5837_v43 = vrot.slane %v5836_v5, 4  ;;  %v7206_v48 = vadd.f32 %v7205_v55, %v7204_v13  ;;  %v5883_v30 = vrot.slane %v5882_v28, 1  ;;  %v6969_v32 = vsel %vm1165_vm2, %v6829_v8, -inf }
 0x872   : > { %v7193_v63 = vsel %vm1165_vm2, %v6829_v8, 0.0  ;;  %v14849_v35 = vmax.f32 %v5686_v25, %v5687_v23  ;;  %v5659_v19 = vrot.slane %v5658_v10, 1  ;;  %v6557_v14 = vadd.f32 %v6556_v38, %v6555_v9 }
 0x873   : > { %v7833_v7 = vsel %vm1165_vm2, %v7469_v56, 0.0  ;;  %v6334_v27 = vrot.slane %v6333_v6, 1  ;;  %v5613_v21 = vrot.slane %v5612_v22, 4  ;;  %v6192_v62 = vmul.f32 %v14731_v42, %v17134_v31 }
 0x874   : > { %v6832_v15 = vmul.f32 %v14739_v18, %v17134_v31  ;;  %v14856_v47 = vmul.f32 0.125, %v5912_v33  ;;  %v5838_v13 = vadd.f32 %v5837_v43, %v5836_v5  ;;  %v6970_v57 = vrot.slane %v6969_v32, 4 }
 0x875   : > { %v7194_v0 = vrot.slane %v7193_v63, 4  ;;  %v14858_v50 = vmax.f32 %v6980_v3, %v6981_v39  ;;  %v14860_v25 = vmul.f32 0.125, %v7206_v48  ;;  %v5884_v9 = vadd.f32 %v5883_v30, %v5882_v28 }
 0x876   : > { %17135 = vst [vmem:[#allocation71_spill] sm:$0xff] %v14856_v47  ;;  %v7834_v24 = vrot.slane %v7833_v7, 4  ;;  %v14862_v44 = vmax.f32 %v5658_v10, %v5659_v19  ;;  %v6558_v12 = vrot.slane %v6557_v14, 1  ;;  %v7609_v42 = vsel %vm1165_vm2, %v7469_v56, -inf }
 0x877   : > { %v7472_v18 = vmul.f32 %v14758_v17, %v17134_v31  ;;  %v6335_v55 = vmax.f32 %v6333_v6, %v6334_v27  ;;  %v5614_v5 = vmax.f32 %v5612_v22, %v5613_v21  ;;  %v6574_v3 = vsel %vm1165_vm2, %v6192_v62, 0.0 }
 0x878   : > { %17136 = vst [vmem:[#allocation115_spill] sm:$0xff] %v14862_v44  ;;  %v7214_v8 = vsel %vm1165_vm2, %v6832_v15, 0.0  ;;  %v5839_v23 = vrot.slane %v5838_v13, 2  ;;  %v6971_v28 = vmax.f32 %v6969_v32, %v6970_v57  ;;  %v7195_v38 = vadd.f32 %v7194_v0, %v7193_v63 }
 0x879   : > { %v7854_v10 = vsel %vm1165_vm2, %v7472_v18, 0.0  ;;  %v14872_v33 = vmul.f32 0.125, %v5884_v9  ;;  %v5550_v56 = vmul.f32 %v5469_v40, %v17058_v61  ;;  %v7610_v39 = vrot.slane %v7609_v42, 4  ;;  %v14882_v9 = vpop.permute.xlu1 %6780 }
 0x87a   : > { %v7835_v43 = vadd.f32 %v7834_v24, %v7833_v7  ;;  %v6559_v17 = vadd.f32 %v6558_v12, %v6557_v14  ;;  %v6350_v48 = vsel %vm1165_vm2, %v6192_v62, -inf  ;;  %v6575_v6 = vrot.slane %v6574_v3, 4 }
 0x87b   : > { %17137 = vst [vmem:[#allocation76_spill] sm:$0xff] %v14872_v33  ;;  %v7215_v22 = vrot.slane %v7214_v8, 4  ;;  %v14878_v30 = vsel %vm3600_vm4, %v6335_v55, %v14780_v36  ;;  %v5615_v19 = vrot.slane %v5614_v5, 2  ;;  %v6990_v32 = vsel %vm1165_vm2, %v6832_v15, -inf }
 0x87c   : > { %v7855_v63 = vrot.slane %v7854_v10, 4  ;;  %v5840_v27 = vadd.f32 %v5839_v23, %v5838_v13  ;;  %v6972_v21 = vrot.slane %v6971_v28, 2  ;;  %v7196_v57 = vrot.slane %v7195_v38, 2 }
 0x87d   : > { %v7630_v0 = vsel %vm1165_vm2, %v7472_v18, -inf  ;;  %v5696_v14 = vsel %vm1165_vm2, %v5550_v56, -inf  ;;  %v7611_v7 = vmax.f32 %v7609_v42, %v7610_v39  ;;  %v7836_v62 = vrot.slane %v7835_v43, 2  ;;  %v17139_v42 = vld [vmem:[#allocation50_spill] sm:$0xff] }
 0x87e   : > { %v6351_v24 = vrot.slane %v6350_v48, 4  ;;  %v6669_v12 = vmul.f32 0.125, %v6559_v17  ;;  %v6576_v40 = vadd.f32 %v6575_v6, %v6574_v3  ;;  %v6991_v36 = vrot.slane %v6990_v32, 4 }
 0x87f   : > { %v7216_v55 = vadd.f32 %v7215_v22, %v7214_v8  ;;  %v14885_v61 = vmax.f32 %v5614_v5, %v5615_v19  ;;  %v5920_v15 = vsel %vm1165_vm2, %v5550_v56, 0.0  ;;  %v7631_v13 = vrot.slane %v7630_v0, 4  ;;  %v14894_v56 = vpop.permute.xlu1 %7420 }
 0x880   : > { %v7856_v23 = vadd.f32 %v7855_v63, %v7854_v10  ;;  %v5841_v4 = vrot.slane %v5840_v27, 1  ;;  %v6973_v47 = vmax.f32 %v6971_v28, %v6972_v21  ;;  %v7197_v18 = vadd.f32 %v7196_v57, %v7195_v38  ;;  %v5449_v63 = vpop.permute.xlu0 %5448 }
 0x881   : > { %17138 = vst [vmem:[#allocation6_spill] sm:$0xff] %v14885_v61  ;;  %v5697_v33 = vrot.slane %v5696_v14, 4  ;;  %v7612_v44 = vrot.slane %v7611_v7, 2  ;;  %v7837_v31 = vadd.f32 %v7836_v62, %v7835_v43  ;;  %v6352_v16 = vmax.f32 %v6350_v48, %v6351_v24 }
 0x882   : > { %v6191_v39 = vmul.f32 %v14772_v46, %v17139_v42  ;;  %v14892_v3 = vsel %vm3600_vm4, %v6669_v12, %v14788_v41  ;;  %v6577_v5 = vrot.slane %v6576_v40, 2  ;;  %v6992_v8 = vmax.f32 %v6990_v32, %v6991_v36 }
 0x883   : > { %v7217_v17 = vrot.slane %v7216_v55, 2  ;;  %v5921_v10 = vrot.slane %v5920_v15, 4  ;;  %v7632_v6 = vmax.f32 %v7630_v0, %v7631_v13  ;;  %v7857_v28 = vrot.slane %v7856_v23, 2 }
 0x884   : > { %v6831_v38 = vmul.f32 %v14792_v58, %v17139_v42  ;;  %v14898_v43 = vadd.f32 %v5841_v4, %v5840_v27  ;;  %v6974_v48 = vrot.slane %v6973_v47, 1  ;;  %v7198_v22 = vrot.slane %v7197_v18, 1 }
 0x885   : > { %v14900_v46 = vmax.f32 %v5696_v14, %v5697_v33  ;;  %v7613_v19 = vmax.f32 %v7611_v7, %v7612_v44  ;;  %v7838_v41 = vrot.slane %v7837_v31, 1  ;;  %v6353_v21 = vrot.slane %v6352_v16, 2  ;;  %v14908_v7 = vpop.permute.xlu1 %6152 }
 0x886   : > { %17140 = vst [vmem:[#allocation100_spill] sm:$0xff] %v14898_v43  ;;  %v6343_v32 = vsel %vm1165_vm2, %v6191_v39, -inf  ;;  %v6578_v57 = vadd.f32 %v6577_v5, %v6576_v40  ;;  %v6993_v62 = vrot.slane %v6992_v8, 2  ;;  %v7218_v24 = vadd.f32 %v7217_v17, %v7216_v55 }
 0x887   : > { %17141 = vst [vmem:[#allocation97_spill] sm:$0xff] %v14900_v46  ;;  %v6567_v0 = vsel %vm1165_vm2, %v6191_v39, 0.0  ;;  %v14904_v12 = vadd.f32 %v5921_v10, %v5920_v15  ;;  %v7633_v58 = vrot.slane %v7632_v6, 2  ;;  %v7858_v4 = vadd.f32 %v7857_v28, %v7856_v23 }
 0x888   : > { %v6983_v27 = vsel %vm1165_vm2, %v6831_v38, -inf  ;;  %v6975_v36 = vmax.f32 %v6973_v47, %v6974_v48  ;;  %v7199_v33 = vadd.f32 %v7198_v22, %v7197_v18  ;;  %v5546_v44 = vmul.f32 %v5449_v63, %v17030_v52 }
 0x889   : > { %17142 = vst [vmem:[#allocation104_spill] sm:$0xff] %v14904_v12  ;;  %v6344_v14 = vrot.slane %v6343_v32, 4  ;;  %v7614_v13 = vrot.slane %v7613_v19, 1  ;;  %v7839_v43 = vadd.f32 %v7838_v41, %v7837_v31  ;;  %v6354_v40 = vmax.f32 %v6352_v16, %v6353_v21  ;;  %v14919_v23 = vpop.permute.xlu1 %7432 }
 0x88a   : > { %v6568_v5 = vrot.slane %v6567_v0, 4  ;;  %v6579_v55 = vrot.slane %v6578_v57, 1  ;;  %v6994_v17 = vmax.f32 %v6992_v8, %v6993_v62  ;;  %v7219_v39 = vrot.slane %v7218_v24, 1 }
 0x88b   : > { %v6984_v15 = vrot.slane %v6983_v27, 4  ;;  %v7634_v28 = vmax.f32 %v7632_v6, %v7633_v58  ;;  %v7859_v47 = vrot.slane %v7858_v4, 1  ;;  %v7309_v18 = vmul.f32 0.125, %v7199_v33 }
 0x88c   : > { %v14914_v48 = vsel %vm3600_vm4, %v6975_v36, %v14820_v51  ;;  %v14917_v22 = vsel %vm1165_vm2, %v5546_v44, -inf  ;;  %v6345_v16 = vmax.f32 %v6343_v32, %v6344_v14  ;;  %v7615_v31 = vmax.f32 %v7613_v19, %v7614_v13 }
 0x88d   : > { %v7949_v41 = vmul.f32 0.125, %v7839_v43  ;;  %v6355_v8 = vrot.slane %v6354_v40, 1  ;;  %v6569_v63 = vadd.f32 %v6568_v5, %v6567_v0  ;;  %v6580_v21 = vadd.f32 %v6579_v55, %v6578_v57  ;;  %v17144_v5 = vld [vmem:[#allocation106_spill] sm:$0xff] }
 0x88e   : > { %v6995_v62 = vrot.slane %v6994_v17, 1  ;;  %v7220_v10 = vadd.f32 %v7219_v39, %v7218_v24  ;;  %v6985_v52 = vmax.f32 %v6983_v27, %v6984_v15  ;;  %v7635_v6 = vrot.slane %v7634_v28, 1  ;;  %v14959_v39 = vpop.permute.xlu1 %6148 }
 0x88f   : > { %v7860_v58 = vadd.f32 %v7859_v47, %v7858_v4  ;;  %v7207_v33 = vsel %vm1165_vm2, %v6831_v38, 0.0  ;;  %v6193_v51 = vmul.f32 %v14822_v26, %v17072_v54  ;;  %v14926_v32 = vsel %vm3600_vm4, %v7309_v18, %v14835_v29  ;;  %v17145_v47 = vld [vmem:[#allocation4_spill] sm:$0xff] }
 0x890   : > { %v14929_v43 = vsel %vm1165_vm2, %v5546_v44, 0.0  ;;  %v6346_v19 = vrot.slane %v6345_v16, 2  ;;  %v7471_v57 = vmul.f32 %v14804_v34, %v17139_v42  ;;  %v14935_v24 = vsel %vm3600_vm4, %v7615_v31, %v14839_v60  ;;  %v17146_v31 = vld [vmem:[#allocation94_spill] sm:$0xff] }
 0x891   : > { %17143 = vst [vmem:[#allocation109_spill] sm:$0xff] %v14929_v43  ;;  %v14939_v38 = vsel %vm3600_vm4, %v7949_v41, %v14842_v2  ;;  %v14941_v26 = vmax.f32 %v6354_v40, %v6355_v8  ;;  %v6570_v0 = vrot.slane %v6569_v63, 2  ;;  %v14943_v29 = vmul.f32 0.125, %v6580_v21  ;;  %v17147_v8 = vld [vmem:[#allocation18_spill] sm:$0xff] }
 0x892   : > { %v6986_v4 = vrot.slane %v6985_v52, 2  ;;  %v7208_v27 = vrot.slane %v7207_v33, 4  ;;  %v6357_v36 = vsel %vm1165_vm2, %v6193_v51, -inf  ;;  %v14946_v44 = vmax.f32 %v6994_v17, %v6995_v62 }
 0x893   : > { %v14948_v34 = vmul.f32 0.125, %v7220_v10  ;;  %v14950_v14 = vmax.f32 %v7634_v28, %v7635_v6  ;;  %v14952_v60 = vmul.f32 0.125, %v7860_v58  ;;  %v6347_v13 = vmax.f32 %v6345_v16, %v6346_v19  ;;  %v17150_v58 = vld [vmem:[#allocation12_spill] sm:$0xff] }
 0x894   : > { %v7623_v2 = vsel %vm1165_vm2, %v7471_v57, -inf  ;;  %v7847_v40 = vsel %vm1165_vm2, %v7471_v57, 0.0  ;;  %v8067_v55 = vsel %vm3600_vm4, %v17144_v5, %v14534_v37  ;;  %v6571_v15 = vadd.f32 %v6570_v0, %v6569_v63  ;;  %v17148_v37 = vld [vmem:[#allocation58_spill] sm:$0xff]  ;;  %v17151_v19 = vld [vmem:[#allocation120_spill] sm:$0xff] }
 0x895   : > { %v6358_v17 = vrot.slane %v6357_v36, 4  ;;  %v6581_v10 = vsel %vm1165_vm2, %v6193_v51, 0.0  ;;  %v8068_v28 = vsel %vm3602_vm5, %v17145_v47, %v8067_v55  ;;  %v14964_v18 = vmax.f32 %v6985_v52, %v6986_v4  ;;  %v17152_v57 = vld [vmem:[#allocation62_spill] sm:$0xff] }
 0x896   : > { %v7209_v16 = vadd.f32 %v7208_v27, %v7207_v33  ;;  %v6834_v41 = vmul.f32 %v14811_v45, %v17146_v31  ;;  %v8069_v21 = vsel %vm3604_vm6, %v17147_v8, %v8068_v28  ;;  %v7624_v62 = vrot.slane %v7623_v2, 4  ;;  %v17153_v33 = vld [vmem:[#allocation79_spill] sm:$0xff]  ;;  %v17155_v8 = vld [vmem:[#allocation46_spill] sm:$0xff] }
 0x897   : > { %v17149_v6 = vrot.slane %v17148_v37, 1  ;;  %v8070_v51 = vsel %vm3606_vm8, %v17150_v58, %v8069_v21  ;;  %v8139_v52 = vsel %vm3600_vm4, %v17152_v57, %v17151_v19  ;;  %v6582_v0 = vrot.slane %v6581_v10, 4  ;;  %v17154_v45 = vld [vmem:[#allocation75_spill] sm:$0xff]  ;;  %v14991_v57 = vpop.permute.xlu1 %7428 }
 0x898   : > { %v8071_v4 = vsel %vm3608_vm7, %v17153_v33, %v8070_v51  ;;  %v8140_v27 = vsel %vm3602_vm5, %v17154_v45, %v8139_v52  ;;  %v6833_v5 = vmul.f32 %v14845_v11, %v17072_v54  ;;  %v7848_v55 = vrot.slane %v7847_v40, 4  ;;  %v17156_v51 = vld [vmem:[#allocation39_spill] sm:$0xff] }
 0x899   : > { %v6314_v63 = vmax.f32 %v17148_v37, %v17149_v6  ;;  %v6359_v47 = vmax.f32 %v6357_v36, %v6358_v17  ;;  %v8141_v21 = vsel %vm3604_vm6, %v17155_v8, %v8140_v27  ;;  %v6348_v37 = vrot.slane %v6347_v13, 1  ;;  %v17157_v36 = vld [vmem:[#allocation11_spill] sm:$0xff] }
 0x89a   : > { %v6572_v6 = vrot.slane %v6571_v15, 1  ;;  %v7228_v58 = vsel %vm1165_vm2, %v6834_v41, 0.0  ;;  %v8142_v19 = vsel %vm3606_vm8, %v17156_v51, %v8141_v21  ;;  %v7210_v52 = vrot.slane %v7209_v16, 2  ;;  %v17159_v33 = vld [vmem:[#allocation91_spill] sm:$0xff] }
 0x89b   : > { %v8072_v28 = vsel %vm3610_vm9, %v6314_v63, %v8071_v4  ;;  %v7004_v11 = vsel %vm1165_vm2, %v6834_v41, -inf  ;;  %v17158_v17 = vrot.slane %v17157_v36, 1  ;;  %v8143_v4 = vsel %vm3608_vm7, %v17159_v33, %v8142_v19  ;;  %v17161_v31 = vld [vmem:[#allocation19_spill] sm:$0xff]  ;;  %v17164_v19 = vld [vmem:[#allocation112_spill] sm:$0xff] }
 0x89c   : > { %8089 = vrot.lane.b32.xlu1 %v8072_v28, %s11092_s26  ;;  %v7625_v45 = vmax.f32 %v7623_v2, %v7624_v62  ;;  %v6583_v27 = vadd.f32 %v6582_v0, %v6581_v10  ;;  %v7221_v8 = vsel %vm1165_vm2, %v6833_v5, 0.0  ;;  %v17160_v28 = vld [vmem:[#allocation8_spill] sm:$0xff]  ;;  %v7229_v51 = vrot.slane %v7228_v58, 4  ;;  %v17162_v41 = vld [vmem:[#allocation111_spill] sm:$0xff] }
 0x89d   : > { %v6954_v63 = vmax.f32 %v17157_v36, %v17158_v17  ;;  %v8212_v21 = vsel %vm3602_vm5, %v17161_v31, %v17160_v28  ;;  %v6360_v54 = vrot.slane %v6359_v47, 2  ;;  %v7849_v17 = vadd.f32 %v7848_v55, %v7847_v40  ;;  %v17163_v2 = vld [vmem:[#allocation83_spill] sm:$0xff]  ;;  %v17167_v36 = vld [vmem:[#allocation117_spill] sm:$0xff] }
 0x89e   : > { %v8213_v61 = vsel %vm3604_vm6, %v17162_v41, %v8212_v21  ;;  %v7005_v12 = vrot.slane %v7004_v11, 4  ;;  %v7211_v62 = vadd.f32 %v7210_v52, %v7209_v16  ;;  %v7222_v0 = vrot.slane %v7221_v8, 4  ;;  %v17166_v28 = vld [vmem:[#allocation87_spill] sm:$0xff]  ;;  %v17169_v52 = vld [vmem:[#allocation118_spill] sm:$0xff] }
 0x89f   : > { %v8144_v42 = vsel %vm3610_vm9, %v6954_v63, %v8143_v4  ;;  %v8214_v10 = vsel %vm3606_vm8, %v17163_v2, %v8213_v61  ;;  %v17165_v31 = vrot.slane %v17164_v19, 1  ;;  %v6349_v4 = vmax.f32 %v6347_v13, %v6348_v37  ;;  %v17170_v2 = vld [vmem:[#allocation99_spill] sm:$0xff]  ;;  %v17171_v37 = vld [vmem:[#allocation5_spill] sm:$0xff] }
 0x8a0   : > { %8161 = vrot.lane.b32.xlu1 %v8144_v42, %s11093_s27  ;;  %v8215_v63 = vsel %vm3608_vm7, %v17166_v28, %v8214_v10  ;;  %v7626_v21 = vrot.slane %v7625_v45, 2  ;;  %v6584_v41 = vrot.slane %v6583_v27, 2  ;;  %v17168_v40 = vrot.slane %v17167_v36, 1  ;;  %v15018_v42 = vpop.permute.xlu1 %7440 }
 0x8a1   : > { %v7594_v33 = vmax.f32 %v17164_v19, %v17165_v31  ;;  %v7230_v46 = vadd.f32 %v7229_v51, %v7228_v58  ;;  %v6361_v61 = vmax.f32 %v6359_v47, %v6360_v54  ;;  %v8359_v19 = vsel %vm3600_vm4, %v17170_v2, %v17169_v52  ;;  %v17172_v58 = vld [vmem:[#allocation20_spill] sm:$0xff] }
 0x8a2   : > { %v6538_v55 = vadd.f32 %v17168_v40, %v17167_v36  ;;  %v6573_v31 = vadd.f32 %v6572_v6, %v6571_v15  ;;  %v7850_v43 = vrot.slane %v7849_v17, 2  ;;  %v6997_v13 = vsel %vm1165_vm2, %v6833_v5, -inf }
 0x8a3   : > { %v8216_v16 = vsel %vm3610_vm9, %v7594_v33, %v8215_v63  ;;  %v8360_v10 = vsel %vm3602_vm5, %v17171_v37, %v8359_v19  ;;  %v7212_v36 = vrot.slane %v7211_v62, 1  ;;  %v7006_v28 = vmax.f32 %v7004_v11, %v7005_v12  ;;  %v17173_v63 = vld [vmem:[#allocation26_spill] sm:$0xff] }
 0x8a4   : > { %8233 = vrot.lane.b32.xlu1 %v8216_v16, %s11094_s28  ;;  %v7223_v40 = vadd.f32 %v7222_v0, %v7221_v8  ;;  %v8361_v54 = vsel %vm3604_vm6, %v17172_v58, %v8360_v10  ;;  %v15030_v47 = vmax.f32 %v7625_v45, %v7626_v21  ;;  %v6585_v51 = vadd.f32 %v6584_v41, %v6583_v27  ;;  %v17174_v16 = vld [vmem:[#allocation107_spill] sm:$0xff]  ;;  %v17175_v12 = vld [vmem:[#allocation42_spill] sm:$0xff]  ;;  %v17176_v45 = vld [vmem:[#allocation57_spill] sm:$0xff]  ;;  %v15044_v21 = vpop.permute.xlu1 %6796 }
 0x8a5   : > { %v6666_v33 = vmul.f32 0.125, %v6538_v55  ;;  %v8362_v15 = vsel %vm3606_vm8, %v17173_v63, %v8361_v54  ;;  %v7231_v6 = vrot.slane %v7230_v46, 2  ;;  %v6362_v5 = vrot.slane %v6361_v61, 1  ;;  %v17178_v10 = vld [vmem:[#allocation119_spill] sm:$0xff] }
 0x8a6   : > { %v6998_v52 = vrot.slane %v6997_v13, 4  ;;  %v8363_v2 = vsel %vm3608_vm7, %v17174_v16, %v8362_v15  ;;  %v15036_v19 = vmul.f32 0.125, %v6573_v31  ;;  %v6196_v11 = vmul.f32 %v14867_v53, %v17175_v12  ;;  %v17179_v31 = vld [vmem:[#allocation53_spill] sm:$0xff]  ;;  %v17180_v63 = vld [vmem:[#allocation47_spill] sm:$0xff]  ;;  %v17184_v53 = vld [vmem:[#allocation78_spill] sm:$0xff] }
 0x8a7   : > { %v8364_v8 = vsel %vm3610_vm9, %v6666_v33, %v8363_v2  ;;  %v17177_v27 = vrot.slane %v17176_v45, 1  ;;  %v15046_v41 = vadd.f32 %v7850_v43, %v7849_v17  ;;  %v7007_v55 = vrot.slane %v7006_v28, 2  ;;  %v17181_v17 = vld [vmem:[#allocation51_spill] sm:$0xff] }
 0x8a8   : > { %v7224_v37 = vrot.slane %v7223_v40, 2  ;;  %8381 = vrot.lane.b32.xlu1 %v8364_v8, %s11092_s26  ;;  %v8431_v58 = vsel %vm3600_vm4, %v17179_v31, %v17178_v10  ;;  %v7213_v54 = vadd.f32 %v7212_v36, %v7211_v62  ;;  %v6586_v33 = vrot.slane %v6585_v51, 1  ;;  %v17182_v12 = vld [vmem:[#allocation23_spill] sm:$0xff]  ;;  %v17183_v62 = vld [vmem:[#allocation110_spill] sm:$0xff] }
 0x8a9   : > { %v7178_v0 = vadd.f32 %v17177_v27, %v17176_v45  ;;  %v8432_v15 = vsel %vm3602_vm5, %v17180_v63, %v8431_v58  ;;  %v15055_v16 = vadd.f32 %v7231_v6, %v7230_v46  ;;  %v6363_v2 = vmax.f32 %v6361_v61, %v6362_v5  ;;  %v17185_v6 = vld [vmem:[#allocation72_spill] sm:$0xff]  ;;  %v15073_v58 = vpop.permute.xlu1 %7436 }
 0x8aa   : > { %v6999_v43 = vmax.f32 %v6997_v13, %v6998_v52  ;;  %v8433_v45 = vsel %vm3604_vm6, %v17181_v17, %v8432_v15  ;;  %v6602_v8 = vsel %vm1165_vm2, %v6196_v11, 0.0  ;;  %v8075_v36 = vsel %vm3602_vm5, %v17183_v62, %v14878_v30  ;;  %v4851_v30 = vld [vmem:[%s16259_s8 + $0x18] sm:$0xff] }
 0x8ab   : > { %v7306_v27 = vmul.f32 0.125, %v7178_v0  ;;  %v8434_v10 = vsel %vm3606_vm8, %v17182_v12, %v8433_v45  ;;  %v7225_v31 = vadd.f32 %v7224_v37, %v7223_v40  ;;  %v6835_v46 = vmul.f32 %v14882_v9, %v17184_v53  ;;  %v4850_v9 = vld [vmem:[%s16259_s8 + $0x10] sm:$0xff]  ;;  %10564 = vmatprep.subr.mxu0 %v4851_v30 }
 0x8ac   : > { %v8435_v61 = vsel %vm3608_vm7, %v17185_v6, %v8434_v10  ;;  %v8076_v13 = vsel %vm3604_vm6, %v6349_v4, %v8075_v36  ;;  %v7852_v5 = vrot.slane %v15046_v41, 1  ;;  %v6587_v52 = vadd.f32 %v6586_v33, %v6585_v51  ;;  %v17186_v4 = vld [vmem:[#allocation10_spill] sm:$0xff]  ;;  %10565 = vmatpush3.msra.mxu0 %v4851_v30 }
 0x8ad   : > { %v6378_v0 = vsel %vm1165_vm2, %v6196_v11, -inf  ;;  %v8436_v12 = vsel %vm3610_vm9, %v7306_v27, %v8435_v61  ;;  %v7000_v40 = vrot.slane %v6999_v43, 2  ;;  %v6603_v37 = vrot.slane %v6602_v8, 4  ;;  %v17188_v36 = vld [vmem:[#allocation114_spill] sm:$0xff]  ;;  %10566 = vmatprep.subr.mxu0 %v4850_v9 }
 0x8ae   : > { %8453 = vrot.lane.b32.xlu1 %v8436_v12, %s11093_s27  ;;  %v17187_v51 = vrot.slane %v17186_v4, 1  ;;  %v8077_v33 = vsel %vm3606_vm8, %v14941_v26, %v8076_v13  ;;  %v7311_v63 = vmul.f32 0.125, %v7213_v54  ;;  %v15087_v15 = vmax.f32 %v7006_v28, %v7007_v55  ;;  %v17190_v28 = vld [vmem:[#allocation14_spill] sm:$0xff]  ;;  %v17191_v55 = vld [vmem:[#allocation105_spill] sm:$0xff]  ;;  %10567 = vmatpush3.msra.mxu0 %v4850_v9  ;;  %v17197_v9 = vld [vmem:[#allocation48_spill] sm:$0xff] }
 0x8af   : > { %v7233_v17 = vrot.slane %v15055_v16, 1  ;;  %v8078_v45 = vsel %vm3608_vm7, %v6363_v2, %v8077_v33  ;;  %v7226_v27 = vrot.slane %v7225_v31, 1  ;;  %v7235_v10 = vsel %vm1165_vm2, %v6835_v46, 0.0  ;;  %v17192_v2 = vld [vmem:[#allocation2_spill] sm:$0xff] }
 0x8b0   : > { %v6370_v11 = vmax.f32 %v17186_v4, %v17187_v51  ;;  %v17189_v6 = vrot.slane %v17188_v36, 1  ;;  %v6673_v26 = vmul.f32 0.125, %v6587_v52  ;;  %v6379_v13 = vrot.slane %v6378_v0, 4  ;;  %v4849_v4 = vld [vmem:[%s16259_s8 + $0x8] sm:$0xff]  ;;  %v17194_v33 = vld [vmem:[#allocation122_spill] sm:$0xff] }
 0x8b1   : > { %v8504_v54 = vsel %vm3602_vm5, %v17191_v55, %v17190_v28  ;;  %v17193_v12 = vrot.slane %v17192_v2, 1  ;;  %v7001_v51 = vmax.f32 %v6999_v43, %v7000_v40  ;;  %v7475_v52 = vmul.f32 %v14894_v56, %v17184_v53  ;;  %v17195_v28 = vld [vmem:[#allocation80_spill] sm:$0xff]  ;;  %10568 = vmatprep.subr.mxu0 %v4849_v4 }
 0x8b2   : > { %v8079_v62 = vsel %vm3610_vm9, %v6370_v11, %v8078_v45  ;;  %v7818_v61 = vadd.f32 %v17189_v6, %v17188_v36  ;;  %v6604_v11 = vadd.f32 %v6603_v37, %v6602_v8  ;;  %v8505_v45 = vsel %vm3604_vm6, %v17194_v33, %v8504_v54  ;;  %v15118_v8 = vpop.permute.xlu1 %6808  ;;  %10569 = vmatpush3.msra.mxu0 %v4849_v4 }
 0x8b3   : > { %8091 = vrot.lane.b32.xlu0 %v8079_v62, %s11092_s26  ;;  %v6594_v30 = vadd.f32 %v17193_v12, %v17192_v2  ;;  %v4848_v62 = vld [vmem:[%s16259_s8] sm:$0xff]  ;;  %v7236_v36 = vrot.slane %v7235_v10, 4  ;;  %v8506_v55 = vsel %vm3606_vm8, %v17195_v28, %v8505_v45  ;;  %v17196_v2 = vld [vmem:[#allocation31_spill] sm:$0xff]  ;;  %v7227_v56 = vadd.f32 %v7226_v27, %v7225_v31 }
 0x8b4   : > { %v7946_v6 = vmul.f32 0.125, %v7818_v61  ;;  %v8367_v43 = vsel %vm3602_vm5, %v17196_v2, %v14892_v3  ;;  %v7011_v40 = vsel %vm1165_vm2, %v6835_v46, -inf  ;;  %v8507_v37 = vsel %vm3608_vm7, %v17197_v9, %v8506_v55  ;;  %10570 = vmatprep.subr.mxu0 %v4848_v62 }
 0x8b5   : > { %v8368_v54 = vsel %vm3604_vm6, %v15036_v19, %v8367_v43  ;;  %v6380_v61 = vmax.f32 %v6378_v0, %v6379_v13  ;;  %v6674_v33 = vmul.f32 0.125, %v6594_v30  ;;  %v7853_v45 = vadd.f32 %v7852_v5, %v15046_v41  ;;  %10571 = vmatpush3.msra.mxu0 %v4848_v62 }
 0x8b6   : > { %v8508_v12 = vsel %vm3610_vm9, %v7946_v6, %v8507_v37  ;;  %v8369_v3 = vsel %vm3606_vm8, %v14943_v29, %v8368_v54  ;;  %v6605_v31 = vrot.slane %v6604_v11, 2  ;;  %v7875_v46 = vsel %vm1165_vm2, %v7475_v52, 0.0 }
 0x8b7   : > { %8525 = vrot.lane.b32.xlu1 %v8508_v12, %s11094_s28  ;;  %v8370_v27 = vsel %vm3608_vm7, %v6673_v26, %v8369_v3  ;;  %v7012_v28 = vrot.slane %v7011_v40, 4  ;;  %v7237_v19 = vadd.f32 %v7236_v36, %v7235_v10  ;;  %v7234_v13 = vadd.f32 %v7233_v17, %v15055_v16  ;;  %v17200_v26 = vld [vmem:[#allocation63_spill] sm:$0xff]  ;;  %v15148_v17 = vpop.permute.xlu1 %6164 }
 0x8b8   : > { %v8371_v0 = vsel %vm3610_vm9, %v6674_v33, %v8370_v27  ;;  %v17198_v30 = vrot.slane %v14964_v18, 1  ;;  %v17199_v41 = vrot.slane %v15030_v47, 1  ;;  %v7313_v4 = vmul.f32 0.125, %v7227_v56 }
 0x8b9   : > { %8383 = vrot.lane.b32.xlu0 %v8371_v0, %s11092_s26  ;;  %v6198_v10 = vmul.f32 %v14908_v7, %v17200_v26  ;;  %v7002_v36 = vrot.slane %v7001_v51, 1  ;;  %v6381_v6 = vrot.slane %v6380_v61, 2  ;;  %v7876_v55 = vrot.slane %v7875_v46, 4 }
 0x8ba   : > { %v6989_v29 = vmax.f32 %v14964_v18, %v17198_v30  ;;  %v15140_v5 = vmax.f32 %v15030_v47, %v17199_v41  ;;  %v8439_v16 = vsel %vm3602_vm5, %v14860_v25, %v14926_v32  ;;  %v7951_v18 = vmul.f32 0.125, %v7853_v45  ;;  %v17201_v32 = vld [vmem:[#allocation15_spill] sm:$0xff] }
 0x8bb   : > { %v7009_v62 = vrot.slane %v15087_v15, 1  ;;  %v6606_v47 = vadd.f32 %v6605_v31, %v6604_v11  ;;  %v8440_v2 = vsel %vm3604_vm6, %v7311_v63, %v8439_v16  ;;  %v7013_v43 = vmax.f32 %v7011_v40, %v7012_v28 }
 0x8bc   : > { %v7238_v56 = vrot.slane %v7237_v19, 2  ;;  %v7314_v9 = vmul.f32 0.125, %v7234_v13  ;;  %v8441_v7 = vsel %vm3606_vm8, %v14948_v34, %v8440_v2  ;;  %v7651_v37 = vsel %vm1165_vm2, %v7475_v52, -inf  ;;  %v17203_v52 = vld [vmem:[#allocation66_spill] sm:$0xff] }
 0x8bd   : > { %v6616_v54 = vsel %vm1165_vm2, %v6198_v10, 0.0  ;;  %v8442_v25 = vsel %vm3608_vm7, %v7313_v4, %v8441_v7  ;;  %v17202_v12 = vrot.slane %v17201_v32, 1  ;;  %v7003_v3 = vmax.f32 %v7001_v51, %v7002_v36  ;;  %v17204_v36 = vld [vmem:[#allocation17_spill] sm:$0xff] }
 0x8be   : > { %v6382_v11 = vmax.f32 %v6380_v61, %v6381_v6  ;;  %v7877_v45 = vadd.f32 %v7876_v55, %v7875_v46  ;;  %v8443_v63 = vsel %vm3610_vm9, %v7314_v9, %v8442_v25  ;;  %v6607_v40 = vrot.slane %v6606_v47, 1  ;;  %v15169_v61 = vpop.permute.xlu1 %6804 }
 0x8bf   : > { %v7874_v33 = vadd.f32 %v17202_v12, %v17201_v32  ;;  %v6392_v31 = vsel %vm1165_vm2, %v6198_v10, -inf  ;;  %8455 = vrot.lane.b32.xlu0 %v8443_v63, %s11093_s27  ;;  %v7478_v34 = vmul.f32 %v14919_v23, %v17200_v26  ;;  %v8511_v27 = vsel %vm3602_vm5, %v17203_v52, %v14939_v38  ;;  %v17206_v63 = vld [vmem:[#allocation36_spill] sm:$0xff] }
 0x8c0   : > { %v7014_v28 = vrot.slane %v7013_v43, 2  ;;  %v7652_v0 = vrot.slane %v7651_v37, 4  ;;  %v6617_v13 = vrot.slane %v6616_v54, 4  ;;  %v8512_v51 = vsel %vm3604_vm6, %v7951_v18, %v8511_v27  ;;  %v17209_v27 = vld [vmem:[#allocation9_spill] sm:$0xff] }
 0x8c1   : > { %v7239_v46 = vadd.f32 %v7238_v56, %v7237_v19  ;;  %v7954_v30 = vmul.f32 0.125, %v7874_v33  ;;  %v8513_v41 = vsel %vm3606_vm8, %v14952_v60, %v8512_v51  ;;  %v8147_v23 = vsel %vm3602_vm5, %v14858_v50, %v14914_v48  ;;  %v17205_v48 = vld [vmem:[#allocation98_spill] sm:$0xff] }
 0x8c2   : > { %v7878_v4 = vrot.slane %v7877_v45, 2  ;;  %v6393_v10 = vrot.slane %v6392_v31, 4  ;;  %v8514_v38 = vsel %vm3608_vm7, %v17204_v36, %v8513_v41  ;;  %v8148_v6 = vsel %vm3604_vm6, %v6989_v29, %v8147_v23 }
 0x8c3   : > { %v6383_v55 = vrot.slane %v6382_v11, 1  ;;  %v7896_v16 = vsel %vm1165_vm2, %v7478_v34, 0.0  ;;  %v8515_v19 = vsel %vm3610_vm9, %v7954_v30, %v8514_v38  ;;  %v8149_v18 = vsel %vm3606_vm8, %v14946_v44, %v8148_v6 }
 0x8c4   : > { %v7653_v60 = vmax.f32 %v7651_v37, %v7652_v0  ;;  %v6618_v2 = vadd.f32 %v6617_v13, %v6616_v54  ;;  %8527 = vrot.lane.b32.xlu0 %v8515_v19, %s11094_s28  ;;  %v8150_v50 = vsel %vm3608_vm7, %v7003_v3, %v8149_v18  ;;  %v6197_v56 = vmul.f32 %v14959_v39, %v17205_v48  ;;  %v15191_v37 = vpop.permute.xlu1 %7444 }
 0x8c5   : > { %v6608_v9 = vadd.f32 %v6607_v40, %v6606_v47  ;;  %v7015_v7 = vmax.f32 %v7013_v43, %v7014_v28  ;;  %v7240_v29 = vrot.slane %v7239_v46, 1  ;;  %v7010_v25 = vmax.f32 %v15087_v15, %v7009_v62  ;;  %v17207_v40 = vld [vmem:[#allocation7_spill] sm:$0xff]  ;;  %v17210_v28 = vld [vmem:[#allocation86_spill] sm:$0xff] }
 0x8c6   : > { %v7879_v32 = vadd.f32 %v7878_v4, %v7877_v45  ;;  %v6394_v12 = vmax.f32 %v6392_v31, %v6393_v10  ;;  %v7897_v33 = vrot.slane %v7896_v16, 4  ;;  %v8219_v44 = vsel %vm3602_vm5, %v17206_v63, %v14935_v24  ;;  %v17212_v63 = vld [vmem:[#allocation49_spill] sm:$0xff] }
 0x8c7   : > { %v8151_v54 = vsel %vm3610_vm9, %v7010_v25, %v8150_v50  ;;  %v6609_v3 = vsel %vm1165_vm2, %v6197_v56, 0.0  ;;  %v8220_v39 = vsel %vm3604_vm6, %v15140_v5, %v8219_v44  ;;  %v7477_v47 = vmul.f32 %v14991_v57, %v17205_v48  ;;  %v17211_v25 = vld [vmem:[#allocation68_spill] sm:$0xff] }
 0x8c8   : > { %v7654_v15 = vrot.slane %v7653_v60, 2  ;;  %v6619_v62 = vrot.slane %v6618_v2, 2  ;;  %v7672_v43 = vsel %vm1165_vm2, %v7478_v34, -inf  ;;  %8163 = vrot.lane.b32.xlu0 %v8151_v54, %s11093_s27  ;;  %v8221_v24 = vsel %vm3606_vm8, %v14950_v14, %v8220_v39  ;;  %v15216_v6 = vpop.permute.xlu1 %5453  ;;  %v17213_v39 = vld [vmem:[#allocation92_spill] sm:$0xff] }
 0x8c9   : > { %v6385_v45 = vsel %vm1165_vm2, %v6197_v56, -inf  ;;  %v17208_v31 = vrot.slane %v17207_v40, 1  ;;  %v8222_v5 = vsel %vm3608_vm7, %v17209_v27, %v8221_v24  ;;  %v15211_v57 = vmul.f32 %v15018_v42, %v17210_v28 }
 0x8ca   : > { %v7880_v0 = vrot.slane %v7879_v32, 1  ;;  %v7898_v34 = vadd.f32 %v7897_v33, %v7896_v16  ;;  %v6610_v13 = vrot.slane %v6609_v3, 4  ;;  %v7889_v51 = vsel %vm1165_vm2, %v7477_v47, 0.0 }
 0x8cb   : > { %v7650_v52 = vmax.f32 %v17207_v40, %v17208_v31  ;;  %v6384_v30 = vmax.f32 %v6382_v11, %v6383_v55  ;;  %v6395_v14 = vrot.slane %v6394_v12, 2  ;;  %v7890_v23 = vrot.slane %v7889_v51, 4 }
 0x8cc   : > { %v6676_v4 = vmul.f32 0.125, %v6608_v9  ;;  %v6620_v10 = vadd.f32 %v6619_v62, %v6618_v2  ;;  %v7673_v36 = vrot.slane %v7672_v43, 4  ;;  %v6386_v38 = vrot.slane %v6385_v45, 4 }
 0x8cd   : > { %v8223_v41 = vsel %vm3610_vm9, %v7650_v52, %v8222_v5  ;;  %v7016_v42 = vrot.slane %v7015_v7, 1  ;;  %v7241_v19 = vadd.f32 %v7240_v29, %v7239_v46  ;;  %v7655_v18 = vmax.f32 %v7653_v60, %v7654_v15 }
 0x8ce   : > { %8235 = vrot.lane.b32.xlu0 %v8223_v41, %s11094_s28  ;;  %v7910_v16 = vsel %vm1165_vm2, %v15211_v57, 0.0  ;;  %v7881_v50 = vadd.f32 %v7880_v0, %v7879_v32  ;;  %v7899_v11 = vrot.slane %v7898_v34, 2  ;;  %v6611_v55 = vadd.f32 %v6610_v13, %v6609_v3 }
 0x8cf   : > { %v7665_v56 = vsel %vm1165_vm2, %v7477_v47, -inf  ;;  %v15223_v2 = vsel %vm3598_vm3, %v6384_v30, %v17211_v25  ;;  %v6396_v9 = vmax.f32 %v6394_v12, %v6395_v14  ;;  %v7891_v33 = vadd.f32 %v7890_v23, %v7889_v51  ;;  %v15231_v12 = vpop.permute.xlu1 %5403  ;;  %v17214_v51 = vld [vmem:[#allocation16_spill] sm:$0xff]  ;;  %v17215_v30 = vld [vmem:[#allocation35_spill] sm:$0xff] }
 0x8d0   : > { %v6839_v44 = vmul.f32 %v15044_v21, %v17212_v63  ;;  %v6621_v54 = vrot.slane %v6620_v10, 1  ;;  %v7674_v46 = vmax.f32 %v7672_v43, %v7673_v36  ;;  %v6387_v60 = vmax.f32 %v6385_v45, %v6386_v38 }
 0x8d1   : > { %v7911_v29 = vrot.slane %v7910_v16, 4  ;;  %v15229_v32 = vsel %vm3598_vm3, %v6676_v4, %v17213_v39  ;;  %v7017_v3 = vmax.f32 %v7015_v7, %v7016_v42  ;;  %v7315_v15 = vmul.f32 0.125, %v7241_v19  ;;  %v17216_v42 = vld [vmem:[#allocation21_spill] sm:$0xff] }
 0x8d2   : > { %v7666_v47 = vrot.slane %v7665_v56, 4  ;;  %v7656_v62 = vrot.slane %v7655_v18, 1  ;;  %v7955_v24 = vmul.f32 0.125, %v7881_v50  ;;  %v7900_v40 = vadd.f32 %v7899_v11, %v7898_v34 }
 0x8d3   : > { %v6612_v31 = vrot.slane %v6611_v55, 2  ;;  %v6397_v52 = vrot.slane %v6396_v9, 1  ;;  %v7892_v27 = vrot.slane %v7891_v33, 2  ;;  %v7039_v21 = vsel %vm1165_vm2, %v6839_v44, -inf }
 0x8d4   : > { %v7263_v43 = vsel %vm1165_vm2, %v6839_v44, 0.0  ;;  %v6622_v45 = vadd.f32 %v6621_v54, %v6620_v10  ;;  %v7675_v5 = vrot.slane %v7674_v46, 2  ;;  %v6388_v0 = vrot.slane %v6387_v60, 2  ;;  %v15259_v44 = vpop.permute.xlu1 %5463 }
 0x8d5   : > { %v7912_v13 = vadd.f32 %v7911_v29, %v7910_v16  ;;  %v15237_v7 = vsel %vm3598_vm3, %v17214_v51, %v7017_v3  ;;  %v15241_v34 = vsel %vm3598_vm3, %v17215_v30, %v7315_v15  ;;  %v7667_v14 = vmax.f32 %v7665_v56, %v7666_v47  ;;  %v17217_v29 = vld [vmem:[#allocation77_spill] sm:$0xff]  ;;  %v17218_v47 = vld [vmem:[#allocation27_spill] sm:$0xff] }
 0x8d6   : > { %v15245_v41 = vmul.f32 %v15073_v58, %v17212_v63  ;;  %v7901_v23 = vrot.slane %v7900_v40, 1  ;;  %v6613_v4 = vadd.f32 %v6612_v31, %v6611_v55  ;;  %v7040_v36 = vrot.slane %v7039_v21, 4 }
 0x8d7   : > { %v7264_v10 = vrot.slane %v7263_v43, 4  ;;  %v15247_v38 = vmax.f32 %v7655_v18, %v7656_v62  ;;  %v15251_v19 = vsel %vm3598_vm3, %v17216_v42, %v7955_v24  ;;  %v15253_v16 = vmax.f32 %v6396_v9, %v6397_v52 }
 0x8d8   : > { %v7893_v50 = vadd.f32 %v7892_v27, %v7891_v33  ;;  %v15255_v11 = vmul.f32 0.125, %v6622_v45  ;;  %v15257_v56 = vmax.f32 %v7674_v46, %v7675_v5  ;;  %v6389_v25 = vmax.f32 %v6387_v60, %v6388_v0  ;;  %v15281_v30 = vpop.permute.xlu1 %5498 }
 0x8d9   : > { %v7913_v58 = vrot.slane %v7912_v13, 2  ;;  %v7668_v55 = vrot.slane %v7667_v14, 2  ;;  %v7686_v18 = vsel %vm1165_vm2, %v15211_v57, -inf  ;;  %v7903_v54 = vsel %vm1165_vm2, %v15245_v41, 0.0  ;;  %v15273_v57 = vpop.permute.xlu0 %5508 }
 0x8da   : > { %v6201_v9 = vmul.f32 %v15148_v17, %v17217_v29  ;;  %v7902_v39 = vadd.f32 %v7901_v23, %v7900_v40  ;;  %v6614_v33 = vrot.slane %v6613_v4, 1  ;;  %v7041_v3 = vmax.f32 %v7039_v21, %v7040_v36 }
 0x8db   : > { %v7265_v15 = vadd.f32 %v7264_v10, %v7263_v43  ;;  %v7894_v46 = vrot.slane %v7893_v50, 1  ;;  %v15269_v60 = vmul.f32 %v15118_v8, %v17218_v47  ;;  %v6390_v31 = vrot.slane %v6389_v25, 1 }
 0x8dc   : > { %v6413_v62 = vsel %vm1165_vm2, %v6201_v9, -inf  ;;  %v6637_v24 = vsel %vm1165_vm2, %v6201_v9, 0.0  ;;  %v7687_v52 = vrot.slane %v7686_v18, 4  ;;  %v7914_v27 = vadd.f32 %v7913_v58, %v7912_v13 }
 0x8dd   : > { %v7904_v45 = vrot.slane %v7903_v54, 4  ;;  %v7669_v17 = vmax.f32 %v7667_v14, %v7668_v55  ;;  %v6414_v40 = vrot.slane %v6413_v62, 4  ;;  %v6638_v5 = vrot.slane %v6637_v24, 4 }
 0x8de   : > { %v15277_v21 = vmul.f32 %v15169_v61, %v17217_v29  ;;  %v15279_v43 = vmul.f32 0.125, %v7902_v39  ;;  %v6615_v8 = vadd.f32 %v6614_v33, %v6613_v4  ;;  %v7042_v0 = vrot.slane %v7041_v3, 2  ;;  %v15289_v33 = vpop.permute.xlu0 %5513 }
 0x8df   : > { %v7266_v51 = vrot.slane %v7265_v15, 2  ;;  %v7895_v23 = vadd.f32 %v7894_v46, %v7893_v50  ;;  %v7284_v36 = vsel %vm1165_vm2, %v15269_v60, 0.0  ;;  %v6415_v13 = vmax.f32 %v6413_v62, %v6414_v40 }
 0x8e0   : > { %v6639_v10 = vadd.f32 %v6638_v5, %v6637_v24  ;;  %v6391_v14 = vmax.f32 %v6389_v25, %v6390_v31  ;;  %v15285_v42 = vmax.f32 %v7686_v18, %v7687_v52  ;;  %v7915_v58 = vrot.slane %v7914_v27, 1  ;;  %v15298_v5 = vpop.permute.xlu1 %5443 }
 0x8e1   : > { %v7905_v55 = vadd.f32 %v7904_v45, %v7903_v54  ;;  %v7670_v61 = vrot.slane %v7669_v17, 1  ;;  %v6416_v9 = vrot.slane %v6415_v13, 2  ;;  %v7277_v4 = vsel %vm1165_vm2, %v15277_v21, 0.0 }
 0x8e2   : > { %v6640_v39 = vrot.slane %v6639_v10, 2  ;;  %v6677_v47 = vmul.f32 0.125, %v6615_v8  ;;  %v15291_v50 = vmax.f32 %v7041_v3, %v7042_v0  ;;  %v7285_v46 = vrot.slane %v7284_v36, 4 }
 0x8e3   : > { %v7481_v62 = vmul.f32 %v15191_v37, %v17217_v29  ;;  %v7957_v25 = vmul.f32 0.125, %v7895_v23  ;;  %v7267_v18 = vadd.f32 %v7266_v51, %v7265_v15  ;;  %v6417_v24 = vmax.f32 %v6415_v13, %v6416_v9 }
 0x8e4   : > { %v7278_v31 = vrot.slane %v7277_v4, 4  ;;  %v7916_v52 = vadd.f32 %v7915_v58, %v7914_v27  ;;  %v7679_v45 = vsel %vm1165_vm2, %v15245_v41, -inf  ;;  %v7906_v40 = vrot.slane %v7905_v55, 2 }
 0x8e5   : > { %v8081_v3 = vsel %vm3600_vm4, %v6391_v14, %v15223_v2  ;;  %v15302_v8 = vmax.f32 %v7669_v17, %v7670_v61  ;;  %v6418_v0 = vrot.slane %v6417_v24, 1  ;;  %v6641_v37 = vadd.f32 %v6640_v39, %v6639_v10  ;;  %v15312_v2 = vpop.permute.xlu0 %5518  ;;  %v17220_v61 = vld [vmem:[#allocation67_spill] sm:$0xff]  ;;  %v17221_v39 = vld [vmem:[#allocation65_spill] sm:$0xff] }
 0x8e6   : > { %v8373_v15 = vsel %vm3600_vm4, %v6677_v47, %v15229_v32  ;;  %v7286_v51 = vadd.f32 %v7285_v46, %v7284_v36  ;;  %v7279_v23 = vadd.f32 %v7278_v31, %v7277_v4  ;;  %v7917_v27 = vsel %vm1165_vm2, %v7481_v62, 0.0  ;;  %17219 = vst [vmem:[#allocation106_spill] sm:$0xff] %v15312_v2 }
 0x8e7   : > { %v15309_v41 = vsel %vm3600_vm4, %v7957_v25, %v15251_v19  ;;  %v7268_v58 = vrot.slane %v7267_v18, 1  ;;  %v7680_v9 = vrot.slane %v7679_v45, 4  ;;  %v15314_v17 = vmul.f32 0.125, %v7916_v52 }
 0x8e8   : > { %v7907_v10 = vadd.f32 %v7906_v40, %v7905_v55  ;;  %v7918_v14 = vrot.slane %v7917_v27, 4  ;;  %v15318_v32 = vmul.f32 %v15216_v6, %v17220_v61  ;;  %v6419_v47 = vmax.f32 %v6417_v24, %v6418_v0  ;;  %v15326_v55 = vpop.permute.xlu1 %5503  ;;  %v17222_v0 = vld [vmem:[#allocation29_spill] sm:$0xff] }
 0x8e9   : > { %v6642_v36 = vrot.slane %v6641_v37, 1  ;;  %v8082_v19 = vsel %vm3602_vm5, %v15253_v16, %v8081_v3  ;;  %v5537_v4 = vmul.f32 %v15231_v12, %v17221_v39  ;;  %v7287_v46 = vrot.slane %v7286_v51, 2 }
 0x8ea   : > { %v7280_v25 = vrot.slane %v7279_v23, 2  ;;  %v7919_v31 = vadd.f32 %v7918_v14, %v7917_v27  ;;  %v5675_v52 = vsel %vm1165_vm2, %v15318_v32, -inf  ;;  %v7269_v40 = vadd.f32 %v7268_v58, %v7267_v18  ;;  %v17223_v27 = vld [vmem:[#allocation88_spill] sm:$0xff] }
 0x8eb   : > { %v15330_v6 = vsel %vm1165_vm2, %v15269_v60, -inf  ;;  %v5676_v24 = vrot.slane %v5675_v52, 4  ;;  %v8083_v16 = vsel %vm3604_vm6, %v17222_v0, %v8082_v19  ;;  %v7908_v3 = vrot.slane %v7907_v10, 1  ;;  %v15340_v60 = vpop.permute.xlu0 %5523 }
 0x8ec   : > { %v7053_v12 = vsel %vm1165_vm2, %v15277_v21, -inf  ;;  %v7920_v13 = vrot.slane %v7919_v31, 2  ;;  %v8084_v14 = vsel %vm3606_vm8, %v17223_v27, %v8083_v16  ;;  %v6643_v54 = vadd.f32 %v6642_v36, %v6641_v37  ;;  %17224 = vst [vmem:[#allocation4_spill] sm:$0xff] %v15340_v60  ;;  %v15348_v27 = vpop.permute.xlu1 %5473 }
 0x8ed   : > { %v5677_v39 = vmax.f32 %v5675_v52, %v5676_v24  ;;  %v8085_v18 = vsel %vm3608_vm7, %v6419_v47, %v8084_v14  ;;  %v5605_v58 = vsel %vm1165_vm2, %v5537_v4, -inf  ;;  %v7681_v61 = vmax.f32 %v7679_v45, %v7680_v9  ;;  %v17225_v9 = vld [vmem:[#allocation13_spill] sm:$0xff] }
 0x8ee   : > { %v7288_v29 = vadd.f32 %v7287_v46, %v7286_v51  ;;  %v7281_v2 = vadd.f32 %v7280_v25, %v7279_v23  ;;  %v8086_v19 = vsel %vm3610_vm9, %v14813_v49, %v8085_v18  ;;  %v7061_v21 = vrot.slane %v15330_v6, 4  ;;  %v17226_v49 = vld [vmem:[#allocation95_spill] sm:$0xff] }
 0x8ef   : > { %v5678_v0 = vrot.slane %v5677_v39, 2  ;;  %8093 = vrot.lane.b32.xlu1 %v8086_v19, %s11092_s26  ;;  %v5606_v16 = vrot.slane %v5605_v58, 4  ;;  %v5829_v37 = vsel %vm1165_vm2, %v5537_v4, 0.0  ;;  %v7909_v36 = vadd.f32 %v7908_v3, %v7907_v10  ;;  %v17227_v19 = vld [vmem:[#allocation43_spill] sm:$0xff] }
 0x8f0   : > { %v7054_v47 = vrot.slane %v7053_v12, 4  ;;  %v7693_v52 = vsel %vm1165_vm2, %v7481_v62, -inf  ;;  %v7921_v24 = vadd.f32 %v7920_v13, %v7919_v31  ;;  %v6681_v45 = vmul.f32 0.125, %v6643_v54  ;;  %v15364_v13 = vld [vmem:[%s16258_s7 + $0x18] sm:$0xff]  ;;  %v15376_v60 = vpop.permute.xlu1 %5478 }
 0x8f1   : > { %v5679_v51 = vmax.f32 %v5677_v39, %v5678_v0  ;;  %v5607_v23 = vmax.f32 %v5605_v58, %v5606_v16  ;;  %v7999_v46 = vsel %vm3606_vm8, %v17226_v49, %v17225_v9  ;;  %v7289_v25 = vrot.slane %v7288_v29, 1  ;;  %v15366_v39 = vpop.permute.xlu0 %8087  ;;  %10578 = vmatprep.subr.mxu0 %v15364_v13 }
 0x8f2   : > { %v7282_v14 = vrot.slane %v7281_v2, 1  ;;  %v5830_v18 = vrot.slane %v5829_v37, 4  ;;  %v8374_v4 = vsel %vm3602_vm5, %v15255_v11, %v8373_v15  ;;  %v15359_v54 = vmul.f32 %v15259_v44, %v17131_v20  ;;  %17228 = vst [vmem:[#allocation18_spill] sm:$0xff] %v15366_v39  ;;  %v17229_v15 = vld [vmem:[#allocation52_spill] sm:$0xff] }
 0x8f3   : > { %v5680_v10 = vrot.slane %v5679_v51, 1  ;;  %v5608_v3 = vrot.slane %v5607_v23, 2  ;;  %v8375_v62 = vsel %vm3604_vm6, %v17227_v19, %v8374_v4  ;;  %v7694_v31 = vrot.slane %v7693_v52, 4 }
 0x8f4   : > { %v7922_v58 = vrot.slane %v7921_v24, 1  ;;  %v6682_v11 = vmul.f32 0.125, %v14815_v1  ;;  %v8376_v0 = vsel %vm3606_vm8, %v17229_v15, %v8375_v62  ;;  %v5689_v49 = vsel %vm1165_vm2, %v15359_v54, -inf }
 0x8f5   : > { %v5681_v16 = vmax.f32 %v5679_v51, %v5680_v10  ;;  %v5609_v9 = vmax.f32 %v5607_v23, %v5608_v3  ;;  %v8377_v44 = vsel %vm3608_vm7, %v6681_v45, %v8376_v0  ;;  %v7055_v4 = vmax.f32 %v7053_v12, %v7054_v47 }
 0x8f6   : > { %v7283_v19 = vadd.f32 %v7282_v14, %v7281_v2  ;;  %v8378_v20 = vsel %vm3610_vm9, %v6682_v11, %v8377_v44  ;;  %v5690_v39 = vrot.slane %v5689_v49, 4  ;;  %v7682_v1 = vrot.slane %v7681_v61, 2  ;;  %v17230_v14 = vld [vmem:[#allocation61_spill] sm:$0xff]  ;;  %v15385_v11 = vpop.permute.xlu0 %8159 }
 0x8f7   : > { %v8009_v62 = vsel %vm3598_vm3, %v14849_v35, %v5681_v16  ;;  %v5610_v15 = vrot.slane %v5609_v9, 1  ;;  %v5831_v28 = vadd.f32 %v5830_v18, %v5829_v37  ;;  %8385 = vrot.lane.b32.xlu1 %v8378_v20, %s11092_s26  ;;  %v7319_v51 = vmul.f32 0.125, %v7269_v40  ;;  %s10222_s26 = sshll.u32 %s10215_s30, 2 }
 0x8f8   : > { %v7695_v45 = vmax.f32 %v7693_v52, %v7694_v31  ;;  %v7923_v23 = vadd.f32 %v7922_v58, %v7921_v24  ;;  %v5691_v10 = vmax.f32 %v5689_v49, %v5690_v39  ;;  %v7062_v12 = vmax.f32 %v15330_v6, %v7061_v21  ;;  %v17231_v52 = vld [vmem:[#allocation44_spill] sm:$0xff]  ;;  %v17232_v31 = vld [vmem:[#allocation70_spill] sm:$0xff]  ;;  %p466_p4 = scmp.lt.s32.totalorder %s10222_s26, 7 }
 0x8f9   : > { %v7290_v2 = vadd.f32 %v7289_v25, %v7288_v29  ;;  %v5611_v47 = vmax.f32 %v5609_v9, %v5610_v15  ;;  %v8445_v3 = vsel %vm3600_vm4, %v17230_v14, %v15241_v34  ;;  %v7959_v0 = vmul.f32 0.125, %v7909_v36  ;;  %v15393_v34 = vpop.permute.xlu1 %5483 }
 0x8fa   : > { %v7056_v35 = vrot.slane %v7055_v4, 2  ;;  %v7321_v16 = vmul.f32 0.125, %v7283_v19  ;;  %v5692_v37 = vrot.slane %v5691_v10, 2  ;;  %v7683_v18 = vmax.f32 %v7681_v61, %v7682_v1  ;;  %s17335_s26 = smov (!%p466_p4, %s10222_s26), 7 }
 0x8fb   : > { %v5832_v20 = vrot.slane %v5831_v28, 2  ;;  %v15388_v40 = vsel %vm3608_vm7, %v5611_v47, %v7999_v46  ;;  %v8446_v6 = vsel %vm3602_vm5, %v17231_v52, %v8445_v3  ;;  %v7696_v29 = vrot.slane %v7695_v45, 2  ;;  %v17237_v52 = vld [vmem:[#allocation22_spill] sm:$0xff] }
 0x8fc   : > { %v7961_v21 = vmul.f32 0.125, %v7923_v23  ;;  %v5693_v24 = vmax.f32 %v5691_v10, %v5692_v37  ;;  %v8447_v25 = vsel %vm3604_vm6, %v7319_v51, %v8446_v6  ;;  %v7063_v39 = vrot.slane %v7062_v12, 2  ;;  %v15406_v23 = vpop.permute.xlu0 %8231 }
 0x8fd   : > { %v7322_v36 = vmul.f32 0.125, %v7290_v2  ;;  %v8448_v58 = vsel %vm3606_vm8, %v17232_v31, %v8447_v25  ;;  %v8518_v61 = vsel %vm3602_vm5, %v15279_v43, %v15309_v41  ;;  %v7057_v46 = vmax.f32 %v7055_v4, %v7056_v35  ;;  %v17235_v35 = vld [vmem:[#allocation90_spill] sm:$0xff]  ;;  %v15424_v37 = vpop.permute.xlu1 %5488 }
 0x8fe   : > { %v5694_v9 = vrot.slane %v5693_v24, 1  ;;  %v8449_v44 = vsel %vm3608_vm7, %v7321_v16, %v8448_v58  ;;  %v8519_v49 = vsel %vm3604_vm6, %v7959_v0, %v8518_v61  ;;  %v5833_v19 = vadd.f32 %v5832_v20, %v5831_v28  ;;  %v17239_v31 = vld [vmem:[#allocation34_spill] sm:$0xff]  ;;  %v17240_v61 = vld [vmem:[#allocation97_spill] sm:$0xff] }
 0x8ff   : > { %v8450_v1 = vsel %vm3610_vm9, %v7322_v36, %v8449_v44  ;;  %v7962_v15 = vmul.f32 0.125, %v14826_v59  ;;  %v8520_v51 = vsel %vm3606_vm8, %v15314_v17, %v8519_v49  ;;  %v7684_v10 = vrot.slane %v7683_v18, 1 }
 0x900   : > { %v7697_v2 = vmax.f32 %v7695_v45, %v7696_v29  ;;  %v5695_v47 = vmax.f32 %v5693_v24, %v5694_v9  ;;  %8457 = vrot.lane.b32.xlu1 %v8450_v1, %s11093_s27  ;;  %v8521_v43 = vsel %vm3608_vm7, %v7961_v21, %v8520_v51  ;;  %v7677_v41 = vrot.slane %v15257_v56, 1  ;;  %v17238_v24 = vld [vmem:[#allocation56_spill] sm:$0xff]  ;;  %v8380_v49 = vpop.permute.xlu0 %8379 }
 0x901   : > { %v17233_v28 = vrot.slane %v15285_v42, 2  ;;  %v7064_v14 = vmax.f32 %v7062_v12, %v7063_v39  ;;  %v8522_v59 = vsel %vm3610_vm9, %v7962_v15, %v8521_v43  ;;  %v17234_v17 = vrot.slane %v15291_v50, 1 }
 0x902   : > { %v7058_v0 = vrot.slane %v7057_v46, 1  ;;  %v15419_v45 = vsel %vm3600_vm4, %v5695_v47, %v8009_v62  ;;  %v8153_v16 = vsel %vm3600_vm4, %v17235_v35, %v15237_v7  ;;  %v5669_v20 = vrot.slane %v14917_v22, 4 }
 0x903   : > { %v7690_v4 = vmax.f32 %v15285_v42, %v17233_v28  ;;  %v7045_v3 = vmax.f32 %v15291_v50, %v17234_v17  ;;  %v17236_v42 = vld [vmem:[#allocation109_spill] sm:$0xff]  ;;  %v8224_v6 = vsel %vm3598_vm3, %v17237_v52, %v15247_v38  ;;  %v5834_v29 = vrot.slane %v5833_v19, 1 }
 0x904   : > { %v5893_v12 = vrot.slane %v17236_v42, 4  ;;  %v8225_v50 = vsel %vm3600_vm4, %v15302_v8, %v8224_v6  ;;  %v7685_v62 = vmax.f32 %v7683_v18, %v7684_v10  ;;  %v7698_v21 = vrot.slane %v7697_v2, 1  ;;  %8529 = vrot.lane.b32.xlu1 %v8522_v59, %s11094_s28  ;;  %v17242_v8 = vld [vmem:[#allocation104_spill] sm:$0xff]  ;;  %v15457_v59 = vpop.permute.xlu1 %5528  ;;  %v8452_v52 = vpop.permute.xlu0 %8451 }
 0x905   : > { %v5545_v7 = vmul.f32 %v15298_v5, %v17238_v24  ;;  %v7678_v25 = vmax.f32 %v15257_v56, %v7677_v41  ;;  %v7691_v39 = vrot.slane %v7690_v4, 1  ;;  %v7065_v36 = vrot.slane %v7064_v14, 1 }
 0x906   : > { %v8154_v58 = vsel %vm3602_vm5, %v17239_v31, %v8153_v16  ;;  %v17241_v38 = vrot.slane %v17240_v61, 2  ;;  %v17243_v18 = vrot.slane %v17242_v8, 2  ;;  %v7059_v1 = vmax.f32 %v7057_v46, %v7058_v0 }
 0x907   : > { %v8155_v5 = vsel %vm3604_vm6, %v7045_v3, %v8154_v58  ;;  %v5670_v56 = vmax.f32 %v14917_v22, %v5669_v20  ;;  %v5899_v15 = vsel %vm1165_vm2, %v15318_v32, 0.0  ;;  %v5835_v51 = vadd.f32 %v5834_v29, %v5833_v19  ;;  %v17244_v22 = vld [vmem:[#allocation59_spill] sm:$0xff]  ;;  %v17245_v32 = vld [vmem:[#allocation6_spill] sm:$0xff] }
 0x908   : > { %v15442_v9 = vmax.f32 %v17240_v61, %v17241_v38  ;;  %v15447_v44 = vadd.f32 %v17243_v18, %v17242_v8  ;;  %v8226_v10 = vsel %vm3602_vm5, %v7678_v25, %v8225_v50  ;;  %v5894_v47 = vadd.f32 %v5893_v12, %v17236_v42  ;;  %v17246_v50 = vld [vmem:[#allocation50_spill] sm:$0xff]  ;;  %v17248_v61 = vld [vmem:[#allocation116_spill] sm:$0xff]  ;;  %v17249_v38 = vld [vmem:[#allocation103_spill] sm:$0xff] }
 0x909   : > { %v7699_v43 = vmax.f32 %v7697_v2, %v7698_v21  ;;  %v5661_v41 = vsel %vm1165_vm2, %v5545_v7, -inf  ;;  %v8227_v28 = vsel %vm3604_vm6, %v7685_v62, %v8226_v10  ;;  %v7692_v46 = vmax.f32 %v7690_v4, %v7691_v39  ;;  %v17247_v21 = vld [vmem:[#allocation100_spill] sm:$0xff] }
 0x90a   : > { %v7066_v17 = vmax.f32 %v7064_v14, %v7065_v36  ;;  %v5885_v3 = vsel %vm1165_vm2, %v5545_v7, 0.0  ;;  %v8156_v0 = vsel %vm3606_vm8, %v17244_v22, %v8155_v5  ;;  %v5900_v35 = vrot.slane %v5899_v15, 4  ;;  %v17250_v5 = vld [vmem:[#allocation37_spill] sm:$0xff] }
 0x90b   : > { %v5913_v16 = vsel %vm1165_vm2, %v15359_v54, 0.0  ;;  %v8157_v2 = vsel %vm3608_vm7, %v7059_v1, %v8156_v0  ;;  %v6017_v20 = vmul.f32 0.125, %v5835_v51  ;;  %v5662_v42 = vrot.slane %v5661_v41, 4 }
 0x90c   : > { %v8158_v12 = vsel %vm3610_vm9, %v7066_v17, %v8157_v2  ;;  %v8228_v4 = vsel %vm3606_vm8, %v7692_v46, %v8227_v28  ;;  %v5671_v14 = vrot.slane %v5670_v56, 2  ;;  %v5886_v6 = vrot.slane %v5885_v3, 4  ;;  %v17251_v46 = vld [vmem:[#allocation55_spill] sm:$0xff] }
 0x90d   : > { %8165 = vrot.lane.b32.xlu1 %v8158_v12, %s11093_s27  ;;  %v8229_v29 = vsel %vm3608_vm7, %v7699_v43, %v8228_v4  ;;  %v5551_v62 = vmul.f32 %v15348_v27, %v17246_v50  ;;  %v6018_v54 = vmul.f32 0.125, %v17247_v21  ;;  %v5701_v7 = vrot.slane %v15442_v9, 1  ;;  %s10223_s27 = sshll.u32 %s17335_s26, 3 }
 0x90e   : > { %v5895_v39 = vrot.slane %v5894_v47, 2  ;;  %v5901_v36 = vadd.f32 %v5900_v35, %v5899_v15  ;;  %v5914_v31 = vrot.slane %v5913_v16, 4  ;;  %v8291_v8 = vsel %vm3606_vm8, %v17249_v38, %v17248_v61  ;;  %v15479_v18 = vpop.permute.xlu1 %8089  ;;  %v17253_v61 = vld [vmem:[#allocation94_spill] sm:$0xff] }
 0x90f   : > { %v5703_v58 = vsel %vm1165_vm2, %v5551_v62, -inf  ;;  %v5663_v1 = vmax.f32 %v5661_v41, %v5662_v42  ;;  %v8230_v27 = vsel %vm3610_vm9, %v17250_v5, %v8229_v29  ;;  %v8292_v10 = vsel %vm3608_vm7, %v6017_v20, %v8291_v8  ;;  %v17252_v41 = vld [vmem:[#allocation28_spill] sm:$0xff]  ;;  %v8524_v42 = vpop.permute.xlu0 %8523 }
 0x910   : > { %v5704_v51 = vrot.slane %v5703_v58, 4  ;;  %v5672_v43 = vmax.f32 %v5670_v56, %v5671_v14  ;;  %v5887_v28 = vadd.f32 %v5886_v6, %v5885_v3  ;;  %v8293_v15 = vsel %vm3610_vm9, %v6018_v54, %v8292_v10 }
 0x911   : > { %8237 = vrot.lane.b32.xlu1 %v8230_v27, %s11094_s28  ;;  %v5552_v17 = vmul.f32 %v15376_v60, %v17251_v46  ;;  %v5896_v22 = vadd.f32 %v5895_v39, %v5894_v47  ;;  %v8535_v35 = vsel %vm1165_vm2, %v8293_v15, %v8380_v49  ;;  %v5553_v2 = vmul.f32 %v15393_v34, %v17252_v41 }
 0x912   : > { %v5705_v0 = vmax.f32 %v5703_v58, %v5704_v51  ;;  %v5902_v12 = vrot.slane %v5901_v36, 2  ;;  %v5927_v20 = vsel %vm1165_vm2, %v5551_v62, 0.0  ;;  %v8539_v56 = vsel %vm3857_vm11, %v8535_v35, %v8452_v52  ;;  %v15498_v21 = vpop.permute.xlu1 %8161 }
 0x913   : > { %v5710_v3 = vsel %vm1165_vm2, %v5552_v17, -inf  ;;  %v5915_v4 = vadd.f32 %v5914_v31, %v5913_v16  ;;  %v5664_v14 = vrot.slane %v5663_v1, 2  ;;  %v8543_v6 = vsel %vm3862_vm10, %v8539_v56, %v8524_v42 }
 0x914   : > { %v5711_v60 = vrot.slane %v5710_v3, 4  ;;  %v5673_v47 = vrot.slane %v5672_v43, 1  ;;  %v5888_v29 = vrot.slane %v5887_v28, 2  ;;  %10572 = vmatprep.mubr.msk.f32.mxu0 %vm4159_vm12, %v8543_v6  ;;  %v5934_v49 = vsel %vm1165_vm2, %v5552_v17, 0.0 }
 0x915   : > { %v5717_v34 = vsel %vm1165_vm2, %v5553_v2, -inf  ;;  %v5706_v62 = vrot.slane %v5705_v0, 2  ;;  %v5928_v54 = vrot.slane %v5927_v20, 4  ;;  %v5935_v39 = vrot.slane %v5934_v49, 4 }
 0x916   : > { %v5712_v52 = vmax.f32 %v5710_v3, %v5711_v60  ;;  %v5897_v58 = vrot.slane %v5896_v22, 1  ;;  %v5718_v16 = vrot.slane %v5717_v34, 4  ;;  %v5941_v31 = vsel %vm1165_vm2, %v5553_v2, 0.0  ;;  %v8234_v41 = vpop.permute.xlu1 %8233 }
 0x917   : > { %v5554_v38 = vmul.f32 %v15424_v37, %v17253_v61  ;;  %v5903_v8 = vadd.f32 %v5902_v12, %v5901_v36  ;;  %v5916_v5 = vrot.slane %v5915_v4, 2  ;;  %v5665_v27 = vmax.f32 %v5663_v1, %v5664_v14 }
 0x918   : > { %v5713_v51 = vrot.slane %v5712_v52, 2  ;;  %v5719_v10 = vmax.f32 %v5717_v34, %v5718_v16  ;;  %v5942_v15 = vrot.slane %v5941_v31, 4  ;;  %v5889_v42 = vadd.f32 %v5888_v29, %v5887_v28 }
 0x919   : > { %v5724_v17 = vsel %vm1165_vm2, %v5554_v38, -inf  ;;  %v5948_v35 = vsel %vm1165_vm2, %v5554_v38, 0.0  ;;  %v5707_v56 = vmax.f32 %v5705_v0, %v5706_v62  ;;  %v5929_v3 = vadd.f32 %v5928_v54, %v5927_v20 }
 0x91a   : > { %v5936_v6 = vadd.f32 %v5935_v39, %v5934_v49  ;;  %v5714_v60 = vmax.f32 %v5712_v52, %v5713_v51  ;;  %v5720_v19 = vrot.slane %v5719_v10, 2  ;;  %v5725_v2 = vrot.slane %v5724_v17, 4  ;;  %v17254_v51 = vld [vmem:[#allocation121_spill] sm:$0xff] }
 0x91b   : > { %v5949_v25 = vrot.slane %v5948_v35, 4  ;;  %v5702_v37 = vmax.f32 %v15442_v9, %v5701_v7  ;;  %v5904_v36 = vrot.slane %v5903_v8, 1  ;;  %v5917_v1 = vadd.f32 %v5916_v5, %v5915_v4  ;;  %v17255_v9 = vld [vmem:[#allocation40_spill] sm:$0xff] }
 0x91c   : > { %v5943_v12 = vadd.f32 %v5942_v15, %v5941_v31  ;;  %v5666_v14 = vrot.slane %v5665_v27, 1  ;;  %v5721_v34 = vmax.f32 %v5719_v10, %v5720_v19  ;;  %v5726_v16 = vmax.f32 %v5724_v17, %v5725_v2  ;;  %v17256_v15 = vld [vmem:[#allocation96_spill] sm:$0xff] }
 0x91d   : > { %v5950_v61 = vadd.f32 %v5949_v25, %v5948_v35  ;;  %v5674_v46 = vmax.f32 %v5672_v43, %v5673_v47  ;;  %v5890_v38 = vrot.slane %v5889_v42, 1  ;;  %v5708_v28 = vrot.slane %v5707_v56, 1  ;;  %v8382_v25 = vpop.permute.xlu1 %8381  ;;  %v17257_v35 = vld [vmem:[#allocation113_spill] sm:$0xff] }
 0x91e   : > { %v5930_v0 = vrot.slane %v5929_v3, 2  ;;  %v5898_v20 = vadd.f32 %v5897_v58, %v5896_v22  ;;  %v5715_v29 = vrot.slane %v5714_v60, 1  ;;  %v5937_v49 = vrot.slane %v5936_v6, 2 }
 0x91f   : > { %v5727_v62 = vrot.slane %v5726_v16, 2  ;;  %v5905_v54 = vadd.f32 %v5904_v36, %v5903_v8  ;;  %v5722_v52 = vrot.slane %v5721_v34, 1  ;;  %v5944_v39 = vrot.slane %v5943_v12, 2 }
 0x920   : > { %v8003_v7 = vsel %vm3600_vm4, %v17255_v9, %v17254_v51  ;;  %v5918_v4 = vrot.slane %v5917_v1, 1  ;;  %v5667_v31 = vmax.f32 %v5665_v27, %v5666_v14  ;;  %v5951_v5 = vrot.slane %v5950_v61, 2  ;;  %v17258_v51 = vld [vmem:[#allocation115_spill] sm:$0xff]  ;;  %v17261_v9 = vld [vmem:[#allocation101_spill] sm:$0xff] }
 0x921   : > { %v5728_v19 = vmax.f32 %v5726_v16, %v5727_v62  ;;  %v5891_v43 = vadd.f32 %v5890_v38, %v5889_v42  ;;  %v5709_v47 = vmax.f32 %v5707_v56, %v5708_v28  ;;  %v5931_v10 = vadd.f32 %v5930_v0, %v5929_v3 }
 0x922   : > { %v8004_v22 = vsel %vm3602_vm5, %v17256_v15, %v8003_v7  ;;  %v5716_v58 = vmax.f32 %v5714_v60, %v5715_v29  ;;  %v5938_v17 = vadd.f32 %v5937_v49, %v5936_v6  ;;  %v5723_v36 = vmax.f32 %v5721_v34, %v5722_v52  ;;  %v17259_v49 = vld [vmem:[#allocation3_spill] sm:$0xff] }
 0x923   : > { %v5729_v8 = vrot.slane %v5728_v19, 1  ;;  %v8005_v2 = vsel %vm3604_vm6, %v17257_v35, %v8004_v22  ;;  %v5945_v50 = vadd.f32 %v5944_v39, %v5943_v12  ;;  %v8011_v14 = vsel %vm3602_vm5, %v5702_v37, %v15419_v45  ;;  %v17260_v45 = vld [vmem:[#allocation108_spill] sm:$0xff] }
 0x924   : > { %v8006_v27 = vsel %vm3606_vm8, %v17258_v51, %v8005_v2  ;;  %v6027_v42 = vmul.f32 0.125, %v5905_v54  ;;  %v5952_v3 = vadd.f32 %v5951_v5, %v5950_v61  ;;  %v5919_v38 = vadd.f32 %v5918_v4, %v5917_v1  ;;  %v8454_v61 = vpop.permute.xlu1 %8453  ;;  %v17262_v5 = vld [vmem:[#allocation81_spill] sm:$0xff]  ;;  %v17264_v22 = vld [vmem:[#allocation76_spill] sm:$0xff] }
 0x925   : > { %v5730_v56 = vmax.f32 %v5728_v19, %v5729_v8  ;;  %v8007_v16 = vsel %vm3608_vm7, %v5667_v31, %v8006_v27  ;;  %v5932_v60 = vrot.slane %v5931_v10, 1  ;;  %v8012_v28 = vsel %vm3604_vm6, %v5709_v47, %v8011_v14  ;;  %v8092_v0 = vpop.permute.xlu0 %8091 }
 0x926   : > { %v8008_v6 = vsel %vm3610_vm9, %v5674_v46, %v8007_v16  ;;  %v5939_v34 = vrot.slane %v5938_v17, 1  ;;  %v8013_v29 = vsel %vm3606_vm8, %v5716_v58, %v8012_v28  ;;  %v8295_v37 = vsel %vm3600_vm4, %v17260_v45, %v17259_v49  ;;  %v4844_v49 = vld [vmem:[%s16258_s7] sm:$0xff] }
 0x927   : > { %v8244_v12 = vsel %vm1165_vm2, %v8008_v6, %v15479_v18  ;;  %v6025_v62 = vmul.f32 0.125, %v5891_v43  ;;  %v5946_v54 = vrot.slane %v5945_v50, 1  ;;  %v8014_v46 = vsel %vm3608_vm7, %v5723_v36, %v8013_v29 }
 0x928   : > { %v8248_v1 = vsel %vm3857_vm11, %v8244_v12, %v15498_v21  ;;  %v5953_v52 = vrot.slane %v5952_v3, 1  ;;  %v8015_v18 = vsel %vm3610_vm9, %v5730_v56, %v8014_v46  ;;  %v8296_v7 = vsel %vm3602_vm5, %v17261_v9, %v8295_v37  ;;  %v4845_v12 = vld [vmem:[%s16258_s7 + $0x8] sm:$0xff]  ;;  %v17268_v46 = vld [vmem:[#allocation102_spill] sm:$0xff] }
 0x929   : > { %v15530_v39 = vsel %vm3862_vm10, %v8248_v1, %v8234_v41  ;;  %v6029_v4 = vmul.f32 0.125, %v5919_v38  ;;  %v5933_v31 = vadd.f32 %v5932_v60, %v5931_v10  ;;  %v15536_v19 = vsel %vm1165_vm2, %v8015_v18, %v8092_v0  ;;  %v17265_v10 = vld [vmem:[#allocation71_spill] sm:$0xff]  ;;  %v8526_v14 = vpop.permute.xlu1 %8525 }
 0x92a   : > { %v8297_v43 = vsel %vm3604_vm6, %v17262_v5, %v8296_v7  ;;  %v17263_v21 = vrot.slane %v15447_v44, 1  ;;  %v6026_v15 = vmul.f32 0.125, %v5898_v20  ;;  %v5940_v41 = vadd.f32 %v5939_v34, %v5938_v17 }
 0x92b   : > { %v8298_v58 = vsel %vm3606_vm8, %v17264_v22, %v8297_v43  ;;  %v5947_v8 = vadd.f32 %v5946_v54, %v5945_v50  ;;  %v8384_v2 = vpop.permute.xlu0 %8383  ;;  %v8301_v36 = vsel %vm3598_vm3, %v17265_v10, %v6027_v42  ;;  %v5954_v51 = vadd.f32 %v5953_v52, %v5952_v3  ;;  %v4846_v3 = vld [vmem:[%s16258_s7 + $0x10] sm:$0xff]  ;;  %v17267_v54 = vld [vmem:[#allocation42_spill] sm:$0xff]  ;;  %v17271_v10 = vld [vmem:[#allocation27_spill] sm:$0xff] }
 0x92c   : > { %v5926_v47 = vadd.f32 %v17263_v21, %v15447_v44  ;;  %v8299_v35 = vsel %vm3608_vm7, %v6025_v62, %v8298_v58  ;;  %v17266_v56 = vrot.slane %v17245_v32, 1  ;;  %v8302_v20 = vsel %vm3600_vm4, %v6029_v4, %v8301_v36  ;;  %v17270_v22 = vld [vmem:[#allocation106_spill] sm:$0xff]  ;;  %v17272_v36 = vld [vmem:[#allocation77_spill] sm:$0xff] }
 0x92d   : > { %v8300_v27 = vsel %vm3610_vm9, %v6026_v15, %v8299_v35  ;;  %v6031_v17 = vmul.f32 0.125, %v5933_v31  ;;  %v6032_v38 = vmul.f32 0.125, %v5940_v41  ;;  %v6033_v6 = vmul.f32 0.125, %v5947_v8 }
 0x92e   : > { %v5618_v44 = vmax.f32 %v17245_v32, %v17266_v56  ;;  %v8536_v16 = vsel %vm1165_vm2, %v8300_v27, %v8382_v25  ;;  %v6030_v50 = vmul.f32 0.125, %v5926_v47  ;;  %v6034_v32 = vmul.f32 0.125, %v5954_v51  ;;  %v17273_v51 = vld [vmem:[#allocation4_spill] sm:$0xff] }
 0x92f   : > { %v8540_v60 = vsel %vm3857_vm11, %v8536_v16, %v8454_v61  ;;  %v5556_v1 = vmul.f32 %v15281_v30, %v17267_v54  ;;  %v5555_v52 = vmul.f32 %v17268_v46, %v17184_v53  ;;  %v5557_v18 = vmul.f32 %v15326_v55, %v17205_v48  ;;  %v17269_v55 = vld [vmem:[#allocation86_spill] sm:$0xff] }
 0x930   : > { %v8544_v42 = vsel %vm3862_vm10, %v8540_v60, %v8526_v14  ;;  %v15561_v28 = vsel %vm3610_vm9, %v5618_v44, %v15388_v40  ;;  %v8303_v0 = vsel %vm3602_vm5, %v6030_v50, %v8302_v20  ;;  %v5558_v31 = vmul.f32 %v15273_v57, %v17200_v26 }
 0x931   : > { %10573 = vmatmul.mubr.msk.f32.vlgmr.msra.gmra.mxu0 %vm4159_vm12, %v8544_v42  ;;  %v8304_v25 = vsel %vm3604_vm6, %v6031_v17, %v8303_v0  ;;  %v8456_v34 = vpop.permute.xlu0 %8455  ;;  %v5962_v9 = vsel %vm1165_vm2, %v5556_v1, 0.0  ;;  %v5955_v7 = vsel %vm1165_vm2, %v5555_v52, 0.0  ;;  %v5969_v4 = vsel %vm1165_vm2, %v5557_v18, 0.0 }
 0x932   : > { %10579 = vmatpush3.msra.mxu0 %v15364_v13  ;;  %v8305_v29 = vsel %vm3606_vm8, %v6032_v38, %v8304_v25  ;;  %v5963_v5 = vrot.slane %v5962_v9, 4  ;;  %v5956_v43 = vrot.slane %v5955_v7, 4  ;;  %v5970_v21 = vrot.slane %v5969_v4, 4 }
 0x933   : > { %10580 = vmatprep.subr.mxu0 %v4846_v3  ;;  %v8306_v40 = vsel %vm3608_vm7, %v6033_v6, %v8305_v29  ;;  %v5559_v30 = vmul.f32 %v15289_v33, %v17212_v63  ;;  %v5976_v47 = vsel %vm1165_vm2, %v5558_v31, 0.0  ;;  %v5560_v58 = vmul.f32 %v17270_v22, %v17269_v55 }
 0x934   : > { %10581 = vmatpush3.msra.mxu0 %v4846_v3  ;;  %v8307_v45 = vsel %vm3610_vm9, %v6034_v32, %v8306_v40  ;;  %v5964_v15 = vadd.f32 %v5963_v5, %v5962_v9  ;;  %v5957_v41 = vadd.f32 %v5956_v43, %v5955_v7  ;;  %v5971_v8 = vadd.f32 %v5970_v21, %v5969_v4 }
 0x935   : > { %10582 = vmatprep.subr.mxu0 %v4845_v12  ;;  %v8537_v37 = vsel %vm1165_vm2, %v8307_v45, %v8384_v2  ;;  %v5977_v35 = vrot.slane %v5976_v47, 4  ;;  %v5983_v2 = vsel %vm1165_vm2, %v5559_v30, 0.0  ;;  %v5562_v57 = vmul.f32 %v15457_v59, %v17271_v10 }
 0x936   : > { %10583 = vmatpush3.msra.mxu0 %v4845_v12  ;;  %v8541_v13 = vsel %vm3857_vm11, %v8537_v37, %v8456_v34  ;;  %v8528_v61 = vpop.permute.xlu0 %8527  ;;  %v15601_v27 = vmul.f32 %v17273_v51, %v17272_v36  ;;  %v5965_v14 = vrot.slane %v5964_v15, 2  ;;  %v5958_v33 = vrot.slane %v5957_v41, 2 }
 0x937   : > { %10584 = vmatprep.subr.mxu0 %v4844_v49  ;;  %v8545_v62 = vsel %vm3862_vm10, %v8541_v13, %v8528_v61  ;;  %v5984_v56 = vrot.slane %v5983_v2, 4  ;;  %v5990_v44 = vsel %vm1165_vm2, %v5560_v58, 0.0  ;;  %v5972_v20 = vrot.slane %v5971_v8, 2 }
 0x938   : > { %10585 = vmatpush3.msra.mxu0 %v4844_v49  ;;  %10575 = vmatprep.mubr.msk.f32.mxu0 %vm4159_vm12, %v8545_v62  ;;  %v5978_v17 = vadd.f32 %v5977_v35, %v5976_v47  ;;  %v6004_v16 = vsel %vm1165_vm2, %v5562_v57, 0.0  ;;  %v5731_v50 = vsel %vm1165_vm2, %v5555_v52, -inf  ;;  %v5991_v38 = vrot.slane %v5990_v44, 4 }
 0x939   : > { %v5997_v60 = vsel %vm1165_vm2, %v15601_v27, 0.0  ;;  %v5966_v59 = vadd.f32 %v5965_v14, %v5964_v15  ;;  %v5959_v6 = vadd.f32 %v5958_v33, %v5957_v41  ;;  %v5985_v42 = vadd.f32 %v5984_v56, %v5983_v2 }
 0x93a   : > { %v5738_v3 = vsel %vm1165_vm2, %v5556_v1, -inf  ;;  %v5973_v32 = vadd.f32 %v5972_v20, %v5971_v8  ;;  %v5979_v0 = vrot.slane %v5978_v17, 2  ;;  %v5745_v25 = vsel %vm1165_vm2, %v5557_v18, -inf }
 0x93b   : > { %v6005_v34 = vrot.slane %v6004_v16, 4  ;;  %v5732_v12 = vrot.slane %v5731_v50, 4  ;;  %v5998_v29 = vrot.slane %v5997_v60, 4  ;;  %v5992_v40 = vadd.f32 %v5991_v38, %v5990_v44 }
 0x93c   : > { %v5739_v49 = vrot.slane %v5738_v3, 4  ;;  %v5967_v45 = vrot.slane %v5966_v59, 1  ;;  %v5960_v37 = vrot.slane %v5959_v6, 1  ;;  %v5986_v13 = vrot.slane %v5985_v42, 2 }
 0x93d   : > { %v5746_v61 = vrot.slane %v5745_v25, 4  ;;  %v5974_v62 = vrot.slane %v5973_v32, 1  ;;  %v5980_v46 = vadd.f32 %v5979_v0, %v5978_v17  ;;  %v6006_v52 = vadd.f32 %v6005_v34, %v6004_v16 }
 0x93e   : > { %v5733_v9 = vmax.f32 %v5731_v50, %v5732_v12  ;;  %v5752_v7 = vsel %vm1165_vm2, %v5558_v31, -inf  ;;  %v5999_v1 = vadd.f32 %v5998_v29, %v5997_v60  ;;  %v5993_v4 = vrot.slane %v5992_v40, 2 }
 0x93f   : > { %v5740_v5 = vmax.f32 %v5738_v3, %v5739_v49  ;;  %v5968_v43 = vadd.f32 %v5967_v45, %v5966_v59  ;;  %v5961_v18 = vadd.f32 %v5960_v37, %v5959_v6  ;;  %v5987_v21 = vadd.f32 %v5986_v13, %v5985_v42 }
 0x940   : > { %v5747_v47 = vmax.f32 %v5745_v25, %v5746_v61  ;;  %v5975_v15 = vadd.f32 %v5974_v62, %v5973_v32  ;;  %v5753_v41 = vrot.slane %v5752_v7, 4  ;;  %v5981_v22 = vrot.slane %v5980_v46, 1 }
 0x941   : > { %v5759_v8 = vsel %vm1165_vm2, %v5559_v30, -inf  ;;  %v6007_v35 = vrot.slane %v6006_v52, 2  ;;  %v5734_v2 = vrot.slane %v5733_v9, 2  ;;  %v6000_v51 = vrot.slane %v5999_v1, 2 }
 0x942   : > { %v5766_v14 = vsel %vm1165_vm2, %v5560_v58, -inf  ;;  %v5994_v33 = vadd.f32 %v5993_v4, %v5992_v40  ;;  %v5741_v56 = vrot.slane %v5740_v5, 2  ;;  %v6036_v31 = vmul.f32 0.125, %v5968_v43 }
 0x943   : > { %v5760_v44 = vrot.slane %v5759_v8, 4  ;;  %v5988_v20 = vrot.slane %v5987_v21, 1  ;;  %v5748_v17 = vrot.slane %v5747_v47, 2  ;;  %v6037_v16 = vmul.f32 0.125, %v5975_v15 }
 0x944   : > { %v6035_v50 = vmul.f32 0.125, %v5961_v18  ;;  %v5754_v38 = vmax.f32 %v5752_v7, %v5753_v41  ;;  %v5982_v60 = vadd.f32 %v5981_v22, %v5980_v46  ;;  %v6008_v59 = vadd.f32 %v6007_v35, %v6006_v52 }
 0x945   : > { %v5735_v6 = vmax.f32 %v5733_v9, %v5734_v2  ;;  %v5767_v42 = vrot.slane %v5766_v14, 4  ;;  %v6001_v3 = vadd.f32 %v6000_v51, %v5999_v1  ;;  %v5780_v30 = vsel %vm1165_vm2, %v5562_v57, -inf }
 0x946   : > { %v5995_v32 = vrot.slane %v5994_v33, 1  ;;  %v5773_v58 = vsel %vm1165_vm2, %v15601_v27, -inf  ;;  %v5742_v0 = vmax.f32 %v5740_v5, %v5741_v56  ;;  %v8308_v25 = vsel %vm3598_vm3, %v6036_v31, %v6035_v50 }
 0x947   : > { %v5761_v12 = vmax.f32 %v5759_v8, %v5760_v44  ;;  %v5989_v29 = vadd.f32 %v5988_v20, %v5987_v21  ;;  %v5749_v40 = vmax.f32 %v5747_v47, %v5748_v17  ;;  %v8309_v49 = vsel %vm3600_vm4, %v6037_v16, %v8308_v25 }
 0x948   : > { %v5755_v45 = vrot.slane %v5754_v38, 2  ;;  %v6038_v37 = vmul.f32 0.125, %v5982_v60  ;;  %v5781_v13 = vrot.slane %v5780_v30, 4  ;;  %v6009_v61 = vrot.slane %v6008_v59, 1 }
 0x949   : > { %v5774_v62 = vrot.slane %v5773_v58, 4  ;;  %v6002_v57 = vrot.slane %v6001_v3, 1  ;;  %v5768_v46 = vmax.f32 %v5766_v14, %v5767_v42  ;;  %v5996_v52 = vadd.f32 %v5995_v32, %v5994_v33 }
 0x94a   : > { %v5743_v9 = vrot.slane %v5742_v0, 1  ;;  %v8310_v27 = vsel %vm3602_vm5, %v6038_v37, %v8309_v49  ;;  %v5736_v7 = vrot.slane %v5735_v6, 1  ;;  %v5762_v1 = vrot.slane %v5761_v12, 2 }
 0x94b   : > { %v6039_v4 = vmul.f32 0.125, %v5989_v29  ;;  %v5750_v5 = vrot.slane %v5749_v40, 1  ;;  %v5756_v43 = vmax.f32 %v5754_v38, %v5755_v45  ;;  %v5782_v18 = vmax.f32 %v5780_v30, %v5781_v13  ;;  %v8164_v30 = vpop.permute.xlu0 %8163 }
 0x94c   : > { %v6010_v21 = vadd.f32 %v6009_v61, %v6008_v59  ;;  %v5775_v15 = vmax.f32 %v5773_v58, %v5774_v62  ;;  %v6003_v41 = vadd.f32 %v6002_v57, %v6001_v3  ;;  %v5769_v8 = vrot.slane %v5768_v46, 2  ;;  %v17274_v59 = vld [vmem:[#allocation18_spill] sm:$0xff] }
 0x94d   : > { %v8311_v22 = vsel %vm3604_vm6, %v6039_v4, %v8310_v27  ;;  %v6040_v35 = vmul.f32 0.125, %v5996_v52  ;;  %v5744_v2 = vmax.f32 %v5742_v0, %v5743_v9  ;;  %v5737_v51 = vmax.f32 %v5735_v6, %v5736_v7 }
 0x94e   : > { %v5763_v14 = vmax.f32 %v5761_v12, %v5762_v1  ;;  %v5751_v33 = vmax.f32 %v5749_v40, %v5750_v5  ;;  %v5757_v56 = vrot.slane %v5756_v43, 1  ;;  %v5783_v31 = vrot.slane %v5782_v18, 2 }
 0x94f   : > { %v6042_v44 = vmul.f32 0.125, %v6010_v21  ;;  %v8312_v20 = vsel %vm3606_vm8, %v6040_v35, %v8311_v22  ;;  %v5776_v17 = vrot.slane %v5775_v15, 2  ;;  %v6041_v16 = vmul.f32 0.125, %v6003_v41  ;;  %v8236_v52 = vpop.permute.xlu0 %8235 }
 0x950   : > { %v5770_v50 = vmax.f32 %v5768_v46, %v5769_v8  ;;  %v8016_v38 = vsel %vm3598_vm3, %v5744_v2, %v5737_v51  ;;  %v8243_v42 = vsel %vm1165_vm2, %v15561_v28, %v17274_v59  ;;  %v5764_v3 = vrot.slane %v5763_v14, 1 }
 0x951   : > { %v8017_v6 = vsel %vm3600_vm4, %v5751_v33, %v8016_v38  ;;  %v8313_v32 = vsel %vm3608_vm7, %v6041_v16, %v8312_v20  ;;  %v5758_v58 = vmax.f32 %v5756_v43, %v5757_v56  ;;  %v5784_v0 = vmax.f32 %v5782_v18, %v5783_v31  ;;  %v17275_v33 = vld [vmem:[#allocation32_spill] sm:$0xff] }
 0x952   : > { %v8314_v25 = vsel %vm3610_vm9, %v6042_v44, %v8313_v32  ;;  %v5777_v12 = vmax.f32 %v5775_v15, %v5776_v17  ;;  %v8247_v40 = vsel %vm3857_vm11, %v8243_v42, %v15385_v11  ;;  %v5771_v49 = vrot.slane %v5770_v50, 1 }
 0x953   : > { %v8018_v45 = vsel %vm3602_vm5, %v5758_v58, %v8017_v6  ;;  %v5765_v13 = vmax.f32 %v5763_v14, %v5764_v3  ;;  %v5785_v62 = vrot.slane %v5784_v0, 1  ;;  %v8251_v57 = vsel %vm3862_vm10, %v8247_v40, %v15406_v23 }
 0x954   : > { %v5778_v46 = vrot.slane %v5777_v12, 1  ;;  %v5772_v11 = vmax.f32 %v5770_v50, %v5771_v49  ;;  %v8249_v27 = vsel %vm3857_vm11, %v15536_v19, %v8164_v30  ;;  %v17276_v50 = vld [vmem:[#allocation89_spill] sm:$0xff] }
 0x955   : > { %v8019_v9 = vsel %vm3604_vm6, %v5765_v13, %v8018_v45  ;;  %v5786_v7 = vmax.f32 %v5784_v0, %v5785_v62  ;;  %v8253_v1 = vsel %vm3862_vm10, %v8249_v27, %v8236_v52 }
 0x956   : > { %v8020_v4 = vsel %vm3606_vm8, %v5772_v11, %v8019_v9  ;;  %v5779_v5 = vmax.f32 %v5777_v12, %v5778_v46 }
 0x958   : > { %v8021_v43 = vsel %vm3608_vm7, %v5779_v5, %v8020_v4 }
 0x959   : > { %v8022_v18 = vsel %vm3610_vm9, %v5786_v7, %v8021_v43 }
 0x961   : > { %v15617_v34 = vpop.permute.xlu1 %8093 }
 0x962   : > { %v8246_v21 = vsel %vm1165_vm2, %v8022_v18, %v15617_v34 }
 0x969   : > { %v8386_v47 = vpop.permute.xlu1 %8385 }
 0x96a   : > { %v8538_v29 = vsel %vm1165_vm2, %v8314_v25, %v8386_v47 }
 0x972   : > { %v8458_v60 = vpop.permute.xlu1 %8457 }
 0x973   : > { %v8542_v28 = vsel %vm3857_vm11, %v8538_v29, %v8458_v60 }
 0x976   : > { %v8530_v37 = vpop.permute.xlu1 %8529 }
 0x977   : > { %v8546_v61 = vsel %vm3862_vm10, %v8542_v28, %v8530_v37 }
 0x978   : > { %10576 = vmatmul.mubr.msk.f32.gmra.mxu0 %vm4159_vm12, %v8546_v61 }
 0x979   : > { %10586 = vmatprep.mubr.msk.f32.mxu0 %vm4159_vm12, %v8251_v57 }
 0x97c   : > { %10587 = vmatmul.mubr.msk.f32.vlgmr.msra.gmra.mxu0 %vm4159_vm12, %v15530_v39 }
 0x97d   : > { %10589 = vmatprep.mubr.msk.f32.mxu0 %vm4159_vm12, %v8253_v1 }
 0x97f   : > { %v8166_v23 = vpop.permute.xlu1 %8165 }
 0x980   : > { %v8250_v19 = vsel %vm3857_vm11, %v8246_v21, %v8166_v23 }
 0x983   : > { %v8238_v47 = vpop.permute.xlu1 %8237 }
 0x984   : > { %v8254_v15 = vsel %vm3862_vm10, %v8250_v19, %v8238_v47 }
 0x985   : > { %10590 = vmatmul.mubr.msk.f32.gmra.mxu0 %vm4159_vm12, %v8254_v15 }
 0x9f1   : > { %v10574_v41 = vpop.f32.mrf.mxu0 }
 0x9f3   : > { %v8625_v39 = vpop.f32.mrf.mxu0 }
 0xa38   : > { %v10577_v22 = vpop.f32.mrf.mxu0 }
 0xa3a   : > { %v8635_v8 = vpop.f32.mrf.mxu0 }
 0xa3c   : > { %v10588_v35 = vpop.f32.mrf.mxu0 }
 0xa3d   : > { %v8728_v2 = vadd.f32 %v10588_v35, %v10574_v41 }
 0xa3e   : > { %v8722_v51 = vpop.f32.mrf.mxu0 }
 0xa3f   : > { %v8794_v14 = vcombine.high %v8728_v2, %v8728_v2  ;;  %v8801_v56 = vrot.slane %v8728_v2, %v17275_v33  ;;  %v8723_v31 = vadd.f32 %v8722_v51, %v8625_v39 }
 0xa41   : > { %v8817_v34 = vrot.slane %v8801_v56, %v17275_v33  ;;  %v8745_v44 = vcombine.high %v8723_v31, %v8723_v31  ;;  %v8752_v20 = vrot.slane %v8723_v31, %v17275_v33  ;;  %v8808_v17 = vrot.slane %v8794_v14, %v17275_v33 }
 0xa42   : > { %v8809_v16 = vcombine.high %v8801_v56, %v8801_v56 }
 0xa43   : > { %v8976_v38 = vrot.slane %v8817_v34, %v17276_v50  ;;  %v8759_v60 = vrot.slane %v8745_v44, %v17275_v33  ;;  %v8760_v59 = vcombine.high %v8752_v20, %v8752_v20  ;;  %v8768_v42 = vrot.slane %v8752_v20, %v17275_v33 }
 0xa44   : > { %v8831_v6 = vrot.slane %v8809_v16, %v17275_v33  ;;  %v8824_v32 = vrot.slane %v8808_v17, %v17275_v33  ;;  %v8839_v12 = vcombine.high %v8817_v34, %v8817_v34  ;;  %v8810_v7 = vcombine.high %v8808_v17, %v8808_v17 }
 0xa45   : > { %v8782_v3 = vrot.slane %v8760_v59, %v17275_v33  ;;  %9085 = vrot.lane.b32.xlu1 %v8976_v38, %s11096_s20  ;;  %v8944_v30 = vrot.slane %v8768_v42, %v17276_v50  ;;  %v8775_v58 = vrot.slane %v8759_v60, %v17275_v33  ;;  %v10591_v25 = vpop.f32.mrf.mxu0  ;;  %v8761_v37 = vcombine.high %v8759_v60, %v8759_v60 }
 0xa46   : > { %v8980_v29 = vrot.slane %v8831_v6, %v17276_v50  ;;  %v8840_v40 = vcombine.high %v8824_v32, %v8824_v32  ;;  %v8984_v28 = vrot.slane %v8839_v12, %v17276_v50  ;;  %v8790_v57 = vcombine.high %v8768_v42, %v8768_v42 }
 0xa47   : > { %v8948_v0 = vrot.slane %v8782_v3, %v17276_v50  ;;  %9069 = vrot.lane.b32.xlu0 %v8944_v30, %s11096_s20  ;;  %v8960_v49 = vrot.slane %v8775_v58, %v17276_v50  ;;  %v8732_v45 = vpop.f32.mrf.mxu0  ;;  %v8792_v13 = vcombine.high %v8782_v3, %v8782_v3  ;;  %v8992_v46 = vrot.slane %v8824_v32, %v17276_v50 }
 0xa48   : > { %v8733_v61 = vadd.f32 %v8732_v45, %v8635_v8  ;;  %v9000_v62 = vrot.slane %v8840_v40, %v17276_v50  ;;  %v8789_v52 = vrot.slane %v8761_v37, %v17275_v33  ;;  %v8738_v9 = vadd.f32 %v10591_v25, %v10577_v22 }
 0xa49   : > { %9071 = vrot.lane.b32.xlu1 %v8948_v0, %s11096_s20  ;;  %v8956_v27 = vrot.slane %v8792_v13, %v17276_v50  ;;  %v8841_v1 = vcombine.high %v8831_v6, %v8831_v6  ;;  %v8952_v4 = vrot.slane %v8790_v57, %v17276_v50  ;;  %v8838_v18 = vrot.slane %v8810_v7, %v17275_v33 }
 0xa4a   : > { %v8850_v11 = vrot.slane %v8733_v61, %v17275_v33  ;;  %v8899_v5 = vrot.slane %v8738_v9, %v17275_v33  ;;  %v8964_v43 = vrot.slane %v8789_v52, %v17276_v50  ;;  %v8791_v19 = vcombine.high %v8775_v58, %v8775_v58 }
 0xa4b   : > { %9087 = vrot.lane.b32.xlu0 %v8980_v29, %s11096_s20  ;;  %v8988_v21 = vrot.slane %v8841_v1, %v17276_v50  ;;  %v8892_v41 = vcombine.high %v8738_v9, %v8738_v9  ;;  %v8996_v22 = vrot.slane %v8838_v18, %v17276_v50  ;;  %v8842_v14 = vcombine.high %v8838_v18, %v8838_v18  ;;  %v17277_v1 = vld [vmem:[#allocation64_spill] sm:$0xff] }
 0xa4c   : > { %v8866_v23 = vrot.slane %v8850_v11, %v17275_v33  ;;  %v8907_v47 = vcombine.high %v8899_v5, %v8899_v5  ;;  %v8915_v39 = vrot.slane %v8899_v5, %v17275_v33  ;;  %v8968_v35 = vrot.slane %v8791_v19, %v17276_v50 }
 0xa4d   : > { %9077 = vrot.lane.b32.xlu1 %v8960_v49, %s11096_s20  ;;  %v8906_v2 = vrot.slane %v8892_v41, %v17275_v33  ;;  %v8843_v31 = vcombine.high %v8733_v61, %v8733_v61  ;;  %v8858_v20 = vcombine.high %v8850_v11, %v8850_v11  ;;  %v9004_v17 = vrot.slane %v8842_v14, %v17276_v50 }
 0xa4e   : > { %v9008_v15 = vrot.slane %v8866_v23, %v17276_v50  ;;  %v8929_v8 = vrot.slane %v8907_v47, %v17275_v33  ;;  %v9040_v51 = vrot.slane %v8915_v39, %v17276_v50  ;;  %v8937_v56 = vcombine.high %v8915_v39, %v8915_v39 }
 0xa4f   : > { %9089 = vrot.lane.b32.xlu0 %v8984_v28, %s11096_s20  ;;  %v8922_v44 = vrot.slane %v8906_v2, %v17275_v33  ;;  %v8857_v16 = vrot.slane %v8843_v31, %v17275_v33  ;;  %v8888_v38 = vcombine.high %v8866_v23, %v8866_v23  ;;  %v8880_v59 = vrot.slane %v8858_v20, %v17275_v33  ;;  %v17278_v23 = vld [vmem:[#allocation60_spill] sm:$0xff] }
 0xa50   : > { %v9044_v34 = vrot.slane %v8929_v8, %v17276_v50  ;;  %v9048_v60 = vrot.slane %v8937_v56, %v17276_v50  ;;  %v8793_v58 = vcombine.high %v8789_v52, %v8789_v52  ;;  %v8908_v12 = vcombine.high %v8906_v2, %v8906_v2  ;;  %v17282_v2 = vld [vmem:[#allocation41_spill] sm:$0xff] }
 0xa51   : > { %9097 = vrot.lane.b32.xlu1 %v9000_v62, %s11096_s20  ;;  %v9056_v42 = vrot.slane %v8922_v44, %v17276_v50  ;;  %v8859_v3 = vcombine.high %v8857_v16, %v8857_v16  ;;  %v8873_v6 = vrot.slane %v8857_v16, %v17275_v33  ;;  %v9016_v30 = vrot.slane %v8888_v38, %v17276_v50 }
 0xa52   : > { %v9012_v32 = vrot.slane %v8880_v59, %v17276_v50  ;;  %v8939_v29 = vcombine.high %v8929_v8, %v8929_v8  ;;  %v8972_v40 = vrot.slane %v8793_v58, %v17276_v50  ;;  %v8936_v28 = vrot.slane %v8908_v12, %v17275_v33 }
 0xa53   : > { %9093 = vrot.lane.b32.xlu0 %v8992_v46, %s11096_s20  ;;  %v8887_v0 = vrot.slane %v8859_v3, %v17275_v33  ;;  %v9024_v25 = vrot.slane %v8873_v6, %v17276_v50  ;;  %v8889_v49 = vcombine.high %v8873_v6, %v8873_v6  ;;  %v8890_v62 = vcombine.high %v8880_v59, %v8880_v59 }
 0xa54   : > { %v9052_v37 = vrot.slane %v8939_v29, %v17276_v50  ;;  %v9060_v57 = vrot.slane %v8936_v28, %v17276_v50  ;;  %v8940_v52 = vcombine.high %v8936_v28, %v8936_v28  ;;  %v8938_v33 = vcombine.high %v8922_v44, %v8922_v44 }
 0xa55   : > { %9075 = vrot.lane.b32.xlu1 %v8956_v27, %s11096_s20  ;;  %v9028_v45 = vrot.slane %v8887_v0, %v17276_v50  ;;  %v9032_v13 = vrot.slane %v8889_v49, %v17276_v50  ;;  %v8891_v61 = vcombine.high %v8887_v0, %v8887_v0  ;;  %v9020_v9 = vrot.slane %v8890_v62, %v17276_v50 }
 0xa56   : > { %v9068_v11 = vrot.slane %v8940_v52, %v17276_v50  ;;  %v9064_v27 = vrot.slane %v8938_v33, %v17276_v50 }
 0xa57   : > { %9073 = vrot.lane.b32.xlu0 %v8952_v4, %s11096_s20  ;;  %v9036_v46 = vrot.slane %v8891_v61, %v17276_v50  ;;  %v17281_v50 = vld [vmem:[#allocation24_spill] sm:$0xff] }
 0xa59   : > { %9079 = vrot.lane.b32.xlu1 %v8964_v43, %s11096_s20 }
 0xa5b   : > { %9091 = vrot.lane.b32.xlu0 %v8988_v21, %s11096_s20  ;;  %v17279_v21 = vld [vmem:[#allocation45_spill] sm:$0xff] }
 0xa5d   : > { %9101 = vrot.lane.b32.xlu1 %v9008_v15, %s11096_s20  ;;  %v17280_v15 = vld [vmem:[#allocation25_spill] sm:$0xff] }
 0xa5f   : > { %9095 = vrot.lane.b32.xlu0 %v8996_v22, %s11096_s20 }
 0xa61   : > { %9081 = vrot.lane.b32.xlu1 %v8968_v35, %s11096_s20 }
 0xa63   : > { %9117 = vrot.lane.b32.xlu0 %v9040_v51, %s11096_s20 }
 0xa65   : > { %9119 = vrot.lane.b32.xlu1 %v9044_v34, %s11096_s20  ;;  %v17283_v34 = vld [vmem:[#allocation85_spill] sm:$0xff] }
 0xa67   : > { %9099 = vrot.lane.b32.xlu0 %v9004_v17, %s11096_s20 }
 0xa69   : > { %9121 = vrot.lane.b32.xlu1 %v9048_v60, %s11096_s20 }
 0xa6b   : > { %9125 = vrot.lane.b32.xlu0 %v9056_v42, %s11096_s20  ;;  %v17284_v42 = vld [vmem:[#allocation82_spill] sm:$0xff] }
 0xa6d   : > { %9105 = vrot.lane.b32.xlu1 %v9016_v30, %s11096_s20 }
 0xa6f   : > { %9103 = vrot.lane.b32.xlu0 %v9012_v32, %s11096_s20 }
 0xa71   : > { %9109 = vrot.lane.b32.xlu1 %v9024_v25, %s11096_s20 }
 0xa73   : > { %9083 = vrot.lane.b32.xlu0 %v8972_v40, %s11096_s20 }
 0xa75   : > { %9111 = vrot.lane.b32.xlu1 %v9028_v45, %s11096_s20 }
 0xa77   : > { %9123 = vrot.lane.b32.xlu0 %v9052_v37, %s11096_s20 }
 0xa79   : > { %9113 = vrot.lane.b32.xlu1 %v9032_v13, %s11096_s20 }
 0xa7b   : > { %9127 = vrot.lane.b32.xlu0 %v9060_v57, %s11096_s20 }
 0xa7d   : > { %9115 = vrot.lane.b32.xlu1 %v9036_v46, %s11096_s20 }
 0xa7f   : > { %9107 = vrot.lane.b32.xlu0 %v9020_v9, %s11096_s20 }
 0xa81   : > { %9131 = vrot.lane.b32.xlu1 %v9068_v11, %s11096_s20 }
 0xa83   : > { %9129 = vrot.lane.b32.xlu0 %v9064_v27, %s11096_s20  ;;  %s469_s20 = scalar_lea.vmem %s16265_s14, %s10223_s27 }
 0xab7   : > { %v9086_v7 = vpop.permute.xlu1 %9085 }
 0xab8   : > { %v9173_v4 = vadd.f32 %v9086_v7, %v17277_v1 }
 0xab9   : > { %v9070_v5 = vpop.permute.xlu0 %9069 }
 0xaba   : > { %11015 = vtanh.f32 %v9173_v4  ;;  %v9165_v43 = vadd.f32 %v9070_v5, %v17278_v23 }
 0xabb   : > { %v9072_v18 = vpop.permute.xlu1 %9071 }
 0xabc   : > { %v9166_v19 = vadd.f32 %v9072_v18, %v17279_v21  ;;  %11017 = vtanh.f32 %v9165_v43 }
 0xabd   : > { %v9088_v47 = vpop.permute.xlu0 %9087 }
 0xabe   : > { %11019 = vtanh.f32 %v9166_v19  ;;  %v9174_v41 = vadd.f32 %v9088_v47, %v17280_v15 }
 0xabf   : > { %v9078_v39 = vpop.permute.xlu1 %9077 }
 0xac0   : > { %11021 = vtanh.f32 %v9174_v41  ;;  %v9169_v22 = vadd.f32 %v9078_v39, %v17281_v50 }
 0xac1   : > { %v9090_v8 = vpop.permute.xlu0 %9089 }
 0xac2   : > { %v9175_v51 = vadd.f32 %v9090_v8, %v17282_v2  ;;  %11023 = vtanh.f32 %v9169_v22  ;;  %v17285_v8 = vld [vmem:[#allocation38_spill] sm:$0xff] }
 0xac3   : > { %v9098_v35 = vpop.permute.xlu1 %9097 }
 0xac4   : > { %v9179_v14 = vadd.f32 %v9098_v35, %v17238_v24  ;;  %11025 = vtanh.f32 %v9175_v51 }
 0xac5   : > { %v9094_v56 = vpop.permute.xlu0 %9093 }
 0xac6   : > { %v9177_v44 = vadd.f32 %v9094_v56, %v17283_v34  ;;  %11027 = vtanh.f32 %v9179_v14 }
 0xac7   : > { %v11016_v31 = vpop.eup %11015  ;;  %v9076_v20 = vpop.permute.xlu1 %9075 }
 0xac8   : > { %v9291_v17 = vsel %vm9234_vm13, %v11016_v31, 0.0  ;;  %v9547_v16 = vsel %vm9234_vm13, %v11016_v31, -inf  ;;  %11029 = vtanh.f32 %v9177_v44  ;;  %v9168_v3 = vadd.f32 %v9076_v20, %v17284_v42 }
 0xac9   : > { %v9292_v38 = vrot.slane %v9291_v17, 4  ;;  %v9548_v60 = vrot.slane %v9547_v16, 4  ;;  %v11018_v59 = vpop.eup %11017  ;;  %v9074_v6 = vpop.permute.xlu0 %9073 }
 0xaca   : > { %v9235_v58 = vsel %vm9234_vm13, %v11018_v59, 0.0  ;;  %v9491_v0 = vsel %vm9234_vm13, %v11018_v59, -inf  ;;  %11031 = vtanh.f32 %v9168_v3  ;;  %v15767_v35 = vadd.f32 %v9074_v6, %v17285_v8 }
 0xacb   : > { %v11020_v30 = vpop.eup %11019  ;;  %v9293_v24 = vadd.f32 %v9292_v38, %v9291_v17  ;;  %v9549_v32 = vmax.f32 %v9547_v16, %v9548_v60  ;;  %v9080_v25 = vpop.permute.xlu1 %9079  ;;  %v9236_v12 = vrot.slane %v9235_v58, 4  ;;  %v9492_v29 = vrot.slane %v9491_v0, 4  ;;  %v17286_v16 = vld [vmem:[#allocation30_spill] sm:$0xff] }
 0xacc   : > { %v9242_v40 = vsel %vm9234_vm13, %v11020_v30, 0.0  ;;  %v9498_v49 = vsel %vm9234_vm13, %v11020_v30, -inf  ;;  %v15773_v38 = vadd.f32 %v9080_v25, %v17286_v16  ;;  %11033 = vtanh.f32 %v15767_v35  ;;  %v9229_v35 = vld [vmem:[%s16260_s9] sm:$0xff] }
 0xacd   : > { %v9294_v45 = vrot.slane %v9293_v24, 2  ;;  %v9550_v28 = vrot.slane %v9549_v32, 2  ;;  %v9243_v37 = vrot.slane %v9242_v40, 4  ;;  %v9499_v13 = vrot.slane %v9498_v49, 4  ;;  %v11022_v61 = vpop.eup %11021  ;;  %v15758_v46 = vpop.permute.xlu0 %9091  ;;  %10600 = vmatprep.subr.mxu1 %v9229_v35 }
 0xace   : > { %v9237_v62 = vadd.f32 %v9236_v12, %v9235_v58  ;;  %v9493_v57 = vmax.f32 %v9491_v0, %v9492_v29  ;;  %v9298_v4 = vsel %vm9234_vm13, %v11022_v61, 0.0  ;;  %v9554_v5 = vsel %vm9234_vm13, %v11022_v61, -inf  ;;  %10601 = vmatpush3.msra.mxu1 %v9229_v35 }
 0xacf   : > { %v9295_v52 = vadd.f32 %v9294_v45, %v9293_v24  ;;  %v9551_v33 = vmax.f32 %v9549_v32, %v9550_v28  ;;  %v9244_v9 = vadd.f32 %v9243_v37, %v9242_v40  ;;  %v9500_v11 = vmax.f32 %v9498_v49, %v9499_v13  ;;  %v15760_v27 = vpop.permute.xlu1 %9101  ;;  %v11024_v21 = vpop.eup %11023 }
 0xad0   : > { %v9238_v7 = vrot.slane %v9237_v62, 2  ;;  %v9494_v1 = vrot.slane %v9493_v57, 2  ;;  %v9299_v15 = vrot.slane %v9298_v4, 4  ;;  %v9555_v41 = vrot.slane %v9554_v5, 4 }
 0xad1   : > { %v9296_v23 = vrot.slane %v9295_v52, 1  ;;  %v9245_v43 = vrot.slane %v9244_v9, 2  ;;  %v9501_v18 = vrot.slane %v9500_v11, 2  ;;  %v15764_v39 = vpop.permute.xlu0 %9095  ;;  %v9552_v51 = vrot.slane %v9551_v33, 1  ;;  %v11026_v34 = vpop.eup %11025 }
 0xad2   : > { %v9239_v19 = vadd.f32 %v9238_v7, %v9237_v62  ;;  %v9495_v47 = vmax.f32 %v9493_v57, %v9494_v1  ;;  %v9300_v56 = vadd.f32 %v9299_v15, %v9298_v4  ;;  %v9556_v31 = vmax.f32 %v9554_v5, %v9555_v41 }
 0xad3   : > { %v9246_v50 = vadd.f32 %v9245_v43, %v9244_v9  ;;  %v9502_v22 = vmax.f32 %v9500_v11, %v9501_v18  ;;  %v15769_v2 = vpop.permute.xlu1 %9081  ;;  %v9297_v44 = vadd.f32 %v9296_v23, %v9295_v52  ;;  %v9263_v17 = vsel %vm9234_vm13, %v11024_v21, 0.0  ;;  %v11028_v60 = vpop.eup %11027 }
 0xad4   : > { %v9240_v14 = vrot.slane %v9239_v19, 1  ;;  %v9496_v59 = vrot.slane %v9495_v47, 1  ;;  %v9301_v3 = vrot.slane %v9300_v56, 2  ;;  %v9557_v6 = vrot.slane %v9556_v31, 2 }
 0xad5   : > { %v9247_v20 = vrot.slane %v9246_v50, 1  ;;  %v9503_v42 = vrot.slane %v9502_v22, 1  ;;  %v15775_v30 = vpop.permute.xlu0 %9117  ;;  %v11030_v24 = vpop.eup %11029  ;;  %v9264_v0 = vrot.slane %v9263_v17, 4  ;;  %v9519_v12 = vsel %vm9234_vm13, %v11024_v21, -inf }
 0xad6   : > { %v9241_v32 = vadd.f32 %v9240_v14, %v9239_v19  ;;  %v15780_v40 = vmax.f32 %v9551_v33, %v9552_v51  ;;  %v9302_v49 = vadd.f32 %v9301_v3, %v9300_v56  ;;  %v9558_v25 = vmax.f32 %v9556_v31, %v9557_v6 }
 0xad7   : > { %v9248_v58 = vadd.f32 %v9247_v20, %v9246_v50  ;;  %v15778_v29 = vpop.permute.xlu1 %9119  ;;  %v9520_v45 = vrot.slane %v9519_v12, 4  ;;  %v15782_v28 = vmul.f32 0.125, %v9297_v44  ;;  %v15784_v37 = vadd.f32 %v9264_v0, %v9263_v17  ;;  %v11032_v7 = vpop.eup %11031 }
 0xad8   : > { %v9305_v13 = vsel %vm9234_vm13, %v11026_v34, 0.0  ;;  %v9561_v61 = vsel %vm9234_vm13, %v11026_v34, -inf  ;;  %v15788_v62 = vmax.f32 %v9495_v47, %v9496_v59  ;;  %v9303_v57 = vrot.slane %v9302_v49, 1 }
 0xad9   : > { %17287 = vst [vmem:[#allocation58_spill] sm:$0xff] %v15784_v37  ;;  %v9559_v52 = vrot.slane %v9558_v25, 1  ;;  %v9306_v9 = vrot.slane %v9305_v13, 4  ;;  %v9100_v11 = vpop.permute.xlu0 %9099  ;;  %v15790_v33 = vmul.f32 0.125, %v9241_v32  ;;  %v15792_v1 = vmul.f32 0.125, %v9248_v58  ;;  %v17291_v32 = vld [vmem:[#allocation74_spill] sm:$0xff] }
 0xada   : > { %v15794_v4 = vmax.f32 %v9502_v22, %v9503_v42  ;;  %v9562_v5 = vrot.slane %v9561_v61, 4  ;;  %v15797_v18 = vmax.f32 %v9519_v12, %v9520_v45  ;;  %v15800_v19 = vsel %vm9234_vm13, %v11028_v60, 0.0 }
 0xadb   : > { %17288 = vst [vmem:[#allocation12_spill] sm:$0xff] %v15790_v33  ;;  %17289 = vst [vmem:[#allocation120_spill] sm:$0xff] %v15792_v1  ;;  %v9122_v23 = vpop.permute.xlu1 %9121  ;;  %v9307_v21 = vadd.f32 %v9306_v9, %v9305_v13  ;;  %v9304_v47 = vadd.f32 %v9303_v57, %v9302_v49  ;;  %v9589_v41 = vsel %vm9234_vm13, %v11028_v60, -inf  ;;  %v9319_v50 = vsel %vm9234_vm13, %v11030_v24, 0.0 }
 0xadc   : > { %17290 = vst [vmem:[#allocation62_spill] sm:$0xff] %v15794_v4  ;;  %v9563_v15 = vmax.f32 %v9561_v61, %v9562_v5  ;;  %v15804_v8 = vmax.f32 %v9558_v25, %v9559_v52  ;;  %v9320_v51 = vrot.slane %v9319_v50, 4  ;;  %v9575_v14 = vsel %vm9234_vm13, %v11030_v24, -inf  ;;  %v17292_v61 = vld [vmem:[#allocation67_spill] sm:$0xff] }
 0xadd   : > { %v9308_v22 = vrot.slane %v9307_v21, 2  ;;  %v9126_v56 = vpop.permute.xlu0 %9125  ;;  %v9576_v34 = vrot.slane %v9575_v14, 4  ;;  %v9256_v44 = vsel %vm9234_vm13, %v11032_v7, 0.0  ;;  %v9512_v20 = vsel %vm9234_vm13, %v11032_v7, -inf }
 0xade   : > { %v9564_v31 = vrot.slane %v9563_v15, 2  ;;  %v9334_v60 = vrot.slane %v15800_v19, 4  ;;  %v9257_v59 = vrot.slane %v9256_v44, 4  ;;  %v9513_v42 = vrot.slane %v9512_v20, 4 }
 0xadf   : > { %v9106_v17 = vpop.permute.xlu1 %9105  ;;  %v9577_v6 = vmax.f32 %v9575_v14, %v9576_v34  ;;  %v9176_v24 = vadd.f32 %v15758_v46, %v17291_v32  ;;  %v9309_v58 = vadd.f32 %v9308_v22, %v9307_v21  ;;  %v9590_v0 = vrot.slane %v9589_v41, 4  ;;  %v17293_v46 = vld [vmem:[#allocation33_spill] sm:$0xff] }
 0xae0   : > { %v9565_v3 = vmax.f32 %v9563_v15, %v9564_v31  ;;  %v9258_v12 = vadd.f32 %v9257_v59, %v9256_v44  ;;  %v9514_v49 = vmax.f32 %v9512_v20, %v9513_v42  ;;  %v9321_v13 = vadd.f32 %v9320_v51, %v9319_v50  ;;  %v17294_v15 = vld [vmem:[#allocation65_spill] sm:$0xff] }
 0xae1   : > { %v9104_v25 = vpop.permute.xlu0 %9103  ;;  %11035 = vtanh.f32 %v15773_v38  ;;  %v9181_v57 = vadd.f32 %v15760_v27, %v17292_v61  ;;  %v9178_v5 = vadd.f32 %v15764_v39, %v17293_v46  ;;  %v9578_v21 = vrot.slane %v9577_v6, 2  ;;  %v17296_v44 = vld [vmem:[#allocation69_spill] sm:$0xff] }
 0xae2   : > { %v9566_v45 = vrot.slane %v9565_v3, 1  ;;  %v9259_v9 = vrot.slane %v9258_v12, 2  ;;  %v9515_v7 = vrot.slane %v9514_v49, 2  ;;  %11037 = vtanh.f32 %v9176_v24  ;;  %v17298_v42 = vld [vmem:[#allocation73_spill] sm:$0xff]  ;;  %v17299_v24 = vld [vmem:[#allocation50_spill] sm:$0xff] }
 0xae3   : > { %v9110_v52 = vpop.permute.xlu1 %9109  ;;  %11039 = vtanh.f32 %v9181_v57  ;;  %v9171_v38 = vadd.f32 %v15769_v2, %v17294_v15  ;;  %v9189_v27 = vadd.f32 %v15775_v30, %v17184_v53  ;;  %v9468_v50 = vmul.f32 0.125, %v9304_v47  ;;  %v17297_v30 = vld [vmem:[#allocation54_spill] sm:$0xff] }
 0xae4   : > { %v9310_v22 = vrot.slane %v9309_v58, 1  ;;  %11041 = vtanh.f32 %v9178_v5  ;;  %v9190_v51 = vadd.f32 %v15778_v29, %v17267_v54  ;;  %v9322_v31 = vrot.slane %v9321_v13, 2 }
 0xae5   : > { %v9084_v14 = vpop.permute.xlu0 %9083  ;;  %v15828_v34 = vadd.f32 %v9259_v9, %v9258_v12  ;;  %v15830_v39 = vmax.f32 %v9514_v49, %v9515_v7  ;;  %v9180_v20 = vadd.f32 %v9100_v11, %v17296_v44  ;;  %11043 = vtanh.f32 %v9171_v38  ;;  %v17300_v11 = vld [vmem:[#allocation93_spill] sm:$0xff]  ;;  %v17301_v9 = vld [vmem:[#allocation55_spill] sm:$0xff] }
 0xae6   : > { %v9191_v2 = vadd.f32 %v9122_v23, %v17205_v48  ;;  %v9193_v53 = vadd.f32 %v9126_v56, %v17212_v63  ;;  %v9183_v47 = vadd.f32 %v9106_v17, %v17297_v30  ;;  %11045 = vtanh.f32 %v9189_v27 }
 0xae7   : > { %17295 = vst [vmem:[#allocation79_spill] sm:$0xff] %v15828_v34  ;;  %v9112_v59 = vpop.permute.xlu1 %9111  ;;  %v9182_v32 = vadd.f32 %v9104_v25, %v17298_v42  ;;  %v9567_v54 = vmax.f32 %v9565_v3, %v9566_v45  ;;  %v9579_v29 = vmax.f32 %v9577_v6, %v9578_v21  ;;  %11047 = vtanh.f32 %v9190_v51  ;;  %v17302_v6 = vld [vmem:[#allocation28_spill] sm:$0xff]  ;;  %v11034_v25 = vpop.eup %11033 }
 0xae8   : > { %v9185_v12 = vadd.f32 %v9110_v52, %v17299_v24  ;;  %v9591_v61 = vmax.f32 %v9589_v41, %v9590_v0  ;;  %v9311_v57 = vadd.f32 %v9310_v22, %v9309_v58  ;;  %11049 = vtanh.f32 %v9180_v20  ;;  %v17303_v20 = vld [vmem:[#allocation94_spill] sm:$0xff] }
 0xae9   : > { %v9124_v49 = vpop.permute.xlu0 %9123  ;;  %v9172_v35 = vadd.f32 %v9084_v14, %v17300_v11  ;;  %v15840_v48 = vadd.f32 %v9112_v59, %v17301_v9  ;;  %v9580_v23 = vrot.slane %v9579_v29, 1  ;;  %11051 = vtanh.f32 %v9191_v2 }
 0xaea   : > { %v9592_v56 = vrot.slane %v9591_v61, 2  ;;  %v9754_v17 = vsel %vm3598_vm3, %v15804_v8, %v15780_v40  ;;  %v15845_v3 = vadd.f32 %v9322_v31, %v9321_v13  ;;  %11053 = vtanh.f32 %v9193_v53 }
 0xaeb   : > { %v9114_v63 = vpop.permute.xlu1 %9113  ;;  %v15848_v41 = vadd.f32 %v9124_v49, %v17200_v26  ;;  %v15854_v0 = vsel %vm3600_vm4, %v9567_v54, %v9754_v17  ;;  %11055 = vtanh.f32 %v9183_v47  ;;  %v15856_v52 = vmax.f32 %v9579_v29, %v9580_v23 }
 0xaec   : > { %v15851_v58 = vadd.f32 %v9114_v63, %v17302_v6  ;;  %v15861_v40 = vadd.f32 %v9334_v60, %v15800_v19  ;;  %v15863_v8 = vmul.f32 0.125, %v9311_v57  ;;  %v9249_v26 = vsel %vm9234_vm13, %v11034_v25, 0.0 }
 0xaed   : > { %v9128_v45 = vpop.permute.xlu0 %9127  ;;  %v9505_v13 = vsel %vm9234_vm13, %v11034_v25, -inf  ;;  %11057 = vtanh.f32 %v9182_v32  ;;  %v15867_v46 = vmax.f32 %v9591_v61, %v9592_v56  ;;  %v9250_v21 = vrot.slane %v9249_v26, 4 }
 0xaee   : > { %v11036_v5 = vpop.eup %11035  ;;  %v9506_v15 = vrot.slane %v9505_v13, 4  ;;  %v15872_v27 = vsel %vm3598_vm3, %v9468_v50, %v15782_v28  ;;  %11059 = vtanh.f32 %v9185_v12  ;;  %v15877_v51 = vadd.f32 %v9128_v45, %v17269_v55 }
 0xaef   : > { %v9116_v7 = vpop.permute.xlu1 %9115  ;;  %v11038_v19 = vpop.eup %11037  ;;  %v9270_v60 = vsel %vm9234_vm13, %v11036_v5, 0.0  ;;  %v9526_v22 = vsel %vm9234_vm13, %v11036_v5, -inf  ;;  %v9251_v31 = vadd.f32 %v9250_v21, %v9249_v26  ;;  %11061 = vtanh.f32 %v9172_v35 }
 0xaf0   : > { %v11040_v14 = vpop.eup %11039  ;;  %v9507_v44 = vmax.f32 %v9505_v13, %v9506_v15  ;;  %v15880_v59 = vadd.f32 %v9116_v7, %v17303_v20  ;;  %v9312_v28 = vsel %vm9234_vm13, %v11038_v19, 0.0  ;;  %v9568_v50 = vsel %vm9234_vm13, %v11038_v19, -inf }
 0xaf1   : > { %v11042_v2 = vpop.eup %11041  ;;  %v9347_v53 = vsel %vm9234_vm13, %v11040_v14, 0.0  ;;  %v9603_v30 = vsel %vm9234_vm13, %v11040_v14, -inf  ;;  %v9252_v47 = vrot.slane %v9251_v31, 2  ;;  %v9271_v55 = vrot.slane %v9270_v60, 4 }
 0xaf2   : > { %v9508_v42 = vrot.slane %v9507_v44, 2  ;;  %v9527_v32 = vrot.slane %v9526_v22, 4  ;;  %v11044_v54 = vpop.eup %11043  ;;  %v9313_v29 = vrot.slane %v9312_v28, 4  ;;  %v9569_v24 = vrot.slane %v9568_v50, 4 }
 0xaf3   : > { %v9348_v12 = vrot.slane %v9347_v53, 4  ;;  %v9604_v49 = vrot.slane %v9603_v30, 4  ;;  %v11046_v61 = vpop.eup %11045  ;;  %v15886_v57 = vadd.f32 %v9252_v47, %v9251_v31  ;;  %v9326_v35 = vsel %vm9234_vm13, %v11042_v2, 0.0 }
 0xaf4   : > { %v15888_v11 = vmax.f32 %v9507_v44, %v9508_v42  ;;  %v9582_v9 = vsel %vm9234_vm13, %v11042_v2, -inf  ;;  %v11048_v63 = vpop.eup %11047  ;;  %v9314_v23 = vadd.f32 %v9313_v29, %v9312_v28  ;;  %v9570_v56 = vmax.f32 %v9568_v50, %v9569_v24 }
 0xaf5   : > { %17304 = vst [vmem:[#allocation75_spill] sm:$0xff] %v15886_v57  ;;  %v9349_v17 = vadd.f32 %v9348_v12, %v9347_v53  ;;  %v9605_v6 = vmax.f32 %v9603_v30, %v9604_v49  ;;  %v15892_v25 = vpop.eup %11049  ;;  %v9327_v45 = vrot.slane %v9326_v35, 4  ;;  %v9583_v26 = vrot.slane %v9582_v9, 4 }
 0xaf6   : > { %11063 = vtanh.f32 %v15840_v48  ;;  %v11052_v7 = vpop.eup %11051  ;;  %v15896_v5 = vadd.f32 %v9271_v55, %v9270_v60  ;;  %v9315_v21 = vrot.slane %v9314_v23, 2  ;;  %v15900_v20 = vmax.f32 %v9526_v22, %v9527_v32 }
 0xaf7   : > { %v9350_v15 = vrot.slane %v9349_v17, 2  ;;  %v9606_v19 = vrot.slane %v9605_v6, 2  ;;  %v11054_v14 = vpop.eup %11053  ;;  %v9571_v2 = vrot.slane %v9570_v56, 2  ;;  %v15904_v53 = vadd.f32 %v9327_v45, %v9326_v35 }
 0xaf8   : > { %17305 = vst [vmem:[#allocation46_spill] sm:$0xff] %v15896_v5  ;;  %v15902_v28 = vpop.eup %11055  ;;  %v15906_v30 = vmax.f32 %v9582_v9, %v9583_v26  ;;  %v15911_v47 = vsel %vm9234_vm13, %v11044_v54, 0.0  ;;  %v15914_v42 = vsel %vm9234_vm13, %v11044_v54, -inf  ;;  %v9403_v22 = vsel %vm9234_vm13, %v11046_v61, 0.0 }
 0xaf9   : > { %v9351_v50 = vadd.f32 %v9350_v15, %v9349_v17  ;;  %v9607_v48 = vmax.f32 %v9605_v6, %v9606_v19  ;;  %v9659_v55 = vsel %vm9234_vm13, %v11046_v61, -inf  ;;  %v15918_v32 = vadd.f32 %v9315_v21, %v9314_v23 }
 0xafa   : > { %v15908_v60 = vpop.eup %11057  ;;  %v9404_v24 = vrot.slane %v9403_v22, 4  ;;  %v9660_v12 = vrot.slane %v9659_v55, 4  ;;  %v9410_v35 = vsel %vm9234_vm13, %v11048_v63, 0.0  ;;  %v9666_v9 = vsel %vm9234_vm13, %v11048_v63, -inf }
 0xafb   : > { %v9352_v29 = vrot.slane %v9351_v50, 1  ;;  %v11060_v49 = vpop.eup %11059  ;;  %v9417_v17 = vsel %vm9234_vm13, %v11052_v7, 0.0  ;;  %v9673_v6 = vsel %vm9234_vm13, %v11052_v7, -inf  ;;  %v15926_v45 = vmax.f32 %v9570_v56, %v9571_v2 }
 0xafc   : > { %v15924_v54 = vpop.eup %11061  ;;  %v9608_v26 = vrot.slane %v9607_v48, 1  ;;  %v9405_v61 = vadd.f32 %v9404_v24, %v9403_v22  ;;  %v9661_v23 = vmax.f32 %v9659_v55, %v9660_v12  ;;  %v9411_v21 = vrot.slane %v9410_v35, 4 }
 0xafd   : > { %v9667_v15 = vrot.slane %v9666_v9, 4  ;;  %v9418_v19 = vrot.slane %v9417_v17, 4  ;;  %v9674_v43 = vrot.slane %v9673_v6, 4  ;;  %v9353_v31 = vadd.f32 %v9352_v29, %v9351_v50 }
 0xafe   : > { %v9406_v16 = vrot.slane %v9405_v61, 2  ;;  %v9662_v44 = vrot.slane %v9661_v23, 2  ;;  %v9431_v63 = vsel %vm9234_vm13, %v11054_v14, 0.0  ;;  %v9412_v38 = vadd.f32 %v9411_v21, %v9410_v35 }
 0xaff   : > { %v9668_v13 = vmax.f32 %v9666_v9, %v9667_v15  ;;  %v9419_v1 = vadd.f32 %v9418_v19, %v9417_v17  ;;  %v9675_v7 = vmax.f32 %v9673_v6, %v9674_v43  ;;  %v9432_v56 = vrot.slane %v9431_v63, 4 }
 0xb00   : > { %v9407_v33 = vadd.f32 %v9406_v16, %v9405_v61  ;;  %v9663_v5 = vmax.f32 %v9661_v23, %v9662_v44  ;;  %v9687_v2 = vsel %vm9234_vm13, %v11054_v14, -inf  ;;  %v9413_v22 = vrot.slane %v9412_v38, 2 }
 0xb01   : > { %v9669_v55 = vrot.slane %v9668_v13, 2  ;;  %v9420_v24 = vrot.slane %v9419_v1, 2  ;;  %v9676_v12 = vrot.slane %v9675_v7, 2  ;;  %v15930_v29 = vadd.f32 %v9432_v56, %v9431_v63  ;;  %v9108_v63 = vpop.permute.xlu0 %9107 }
 0xb02   : > { %v9408_v34 = vrot.slane %v9407_v33, 1  ;;  %v9664_v50 = vrot.slane %v9663_v5, 1  ;;  %v9688_v57 = vrot.slane %v9687_v2, 4  ;;  %v9414_v4 = vadd.f32 %v9413_v22, %v9412_v38 }
 0xb03   : > { %v11064_v37 = vpop.eup %11063  ;;  %v9670_v35 = vmax.f32 %v9668_v13, %v9669_v55  ;;  %v15932_v9 = vadd.f32 %v9420_v24, %v9419_v1  ;;  %v15934_v43 = vmax.f32 %v9675_v7, %v9676_v12  ;;  %v15936_v16 = vmul.f32 0.125, %v9353_v31 }
 0xb04   : > { %v15938_v44 = vmax.f32 %v9607_v48, %v9608_v26  ;;  %v9409_v6 = vadd.f32 %v9408_v34, %v9407_v33  ;;  %v15942_v61 = vmax.f32 %v9663_v5, %v9664_v50  ;;  %v15945_v21 = vmax.f32 %v9687_v2, %v9688_v57 }
 0xb05   : > { %v9415_v38 = vrot.slane %v9414_v4, 1  ;;  %v9671_v1 = vrot.slane %v9670_v35, 1  ;;  %v9361_v13 = vsel %vm9234_vm13, %v15902_v28, 0.0  ;;  %v9617_v31 = vsel %vm9234_vm13, %v15902_v28, -inf }
 0xb06   : > { %v9362_v15 = vrot.slane %v9361_v13, 4  ;;  %v9618_v33 = vrot.slane %v9617_v31, 4  ;;  %v9354_v34 = vsel %vm9234_vm13, %v15908_v60, 0.0  ;;  %v9610_v57 = vsel %vm9234_vm13, %v15908_v60, -inf }
 0xb07   : > { %v9375_v5 = vsel %vm9234_vm13, %v11060_v49, 0.0  ;;  %v9631_v19 = vsel %vm9234_vm13, %v11060_v49, -inf  ;;  %v15959_v7 = vmul.f32 0.125, %v9409_v6  ;;  %v9355_v2 = vrot.slane %v9354_v34, 4 }
 0xb08   : > { %v9363_v28 = vadd.f32 %v9362_v15, %v9361_v13  ;;  %v9619_v56 = vmax.f32 %v9617_v31, %v9618_v33  ;;  %v9611_v22 = vrot.slane %v9610_v57, 4  ;;  %v9376_v55 = vrot.slane %v9375_v5, 4 }
 0xb09   : > { %17306 = vst [vmem:[#allocation39_spill] sm:$0xff] %v15959_v7  ;;  %v9632_v24 = vrot.slane %v9631_v19, 4  ;;  %v9382_v12 = vsel %vm9234_vm13, %v11064_v37, 0.0  ;;  %v9356_v23 = vadd.f32 %v9355_v2, %v9354_v34  ;;  %v9638_v49 = vsel %vm9234_vm13, %v11064_v37, -inf }
 0xb0a   : > { %v9364_v50 = vrot.slane %v9363_v28, 2  ;;  %v9620_v48 = vrot.slane %v9619_v56, 2  ;;  %v9383_v26 = vrot.slane %v9382_v12, 4  ;;  %v9612_v60 = vmax.f32 %v9610_v57, %v9611_v22  ;;  %v9130_v57 = vpop.permute.xlu0 %9129 }
 0xb0b   : > { %v15962_v14 = vadd.f32 %v9376_v55, %v9375_v5  ;;  %v15964_v17 = vmax.f32 %v9631_v19, %v9632_v24  ;;  %v15967_v6 = vadd.f32 %v9415_v38, %v9414_v4  ;;  %v9357_v15 = vrot.slane %v9356_v23, 2  ;;  %v17307_v38 = vld [vmem:[#allocation84_spill] sm:$0xff] }
 0xb0c   : > { %v15970_v31 = vadd.f32 %v9364_v50, %v9363_v28  ;;  %v15972_v33 = vmax.f32 %v9670_v35, %v9671_v1  ;;  %v15974_v7 = vmax.f32 %v9619_v56, %v9620_v48  ;;  %v9613_v34 = vrot.slane %v9612_v60, 2  ;;  %v9132_v1 = vpop.permute.xlu1 %9131 }
 0xb0d   : > { %v15976_v2 = vadd.f32 %v9383_v26, %v9382_v12  ;;  %v9358_v5 = vadd.f32 %v9357_v15, %v9356_v23  ;;  %v9639_v22 = vrot.slane %v9638_v49, 4  ;;  %11065 = vtanh.f32 %v15848_v41 }
 0xb0e   : > { %v9614_v37 = vmax.f32 %v9612_v60, %v9613_v34  ;;  %v9634_v4 = vrot.slane %v15964_v17, 2  ;;  %11067 = vtanh.f32 %v15851_v58  ;;  %v9184_v35 = vadd.f32 %v9108_v63, %v17307_v38 }
 0xb0f   : > { %v9359_v28 = vrot.slane %v9358_v5, 1  ;;  %11069 = vtanh.f32 %v15877_v51  ;;  %v9195_v23 = vadd.f32 %v9130_v57, %v17272_v36  ;;  %v9622_v26 = vrot.slane %v15974_v7, 1 }
 0xb10   : > { %v9615_v56 = vrot.slane %v9614_v37, 1  ;;  %v9573_v41 = vrot.slane %v15926_v45, 1  ;;  %v9585_v55 = vrot.slane %v15906_v30, 2  ;;  %v15989_v24 = vmax.f32 %v9638_v49, %v9639_v22 }
 0xb11   : > { %11071 = vtanh.f32 %v9184_v35  ;;  %v9196_v58 = vadd.f32 %v9132_v1, %v17271_v10  ;;  %v9596_v63 = vsel %vm9234_vm13, %v15892_v25, -inf  ;;  %v9360_v12 = vadd.f32 %v9359_v28, %v9358_v5 }
 0xb12   : > { %11073 = vtanh.f32 %v15880_v59  ;;  %v9574_v36 = vmax.f32 %v15926_v45, %v9573_v41  ;;  %v9586_v51 = vmax.f32 %v15906_v30, %v9585_v55  ;;  %v17308_v50 = vrot.slane %v15867_v46, 1 }
 0xb13   : > { %11075 = vtanh.f32 %v9195_v23  ;;  %v9597_v49 = vrot.slane %v9596_v63, 4  ;;  %v9317_v15 = vrot.slane %v15918_v32, 1  ;;  %v16001_v34 = vmax.f32 %v9614_v37, %v9615_v56 }
 0xb14   : > { %v9595_v60 = vmax.f32 %v15867_v46, %v17308_v50  ;;  %v9587_v10 = vrot.slane %v9586_v51, 1  ;;  %v9756_v57 = vsel %vm3602_vm5, %v9574_v36, %v15854_v0  ;;  %v9329_v59 = vrot.slane %v15904_v53, 2 }
 0xb15   : > { %v9598_v5 = vmax.f32 %v9596_v63, %v9597_v49  ;;  %v9318_v45 = vadd.f32 %v9317_v15, %v15918_v32  ;;  %v17309_v30 = vrot.slane %v15845_v3, 1  ;;  %v9336_v46 = vrot.slane %v15861_v40, 2 }
 0xb16   : > { %v9588_v38 = vmax.f32 %v9586_v51, %v9587_v10  ;;  %v9757_v37 = vsel %vm3604_vm6, %v15856_v52, %v9756_v57  ;;  %v9330_v35 = vadd.f32 %v9329_v59, %v15904_v53  ;;  %v9340_v0 = vsel %vm9234_vm13, %v15892_v25, 0.0 }
 0xb17   : > { %v9325_v22 = vadd.f32 %v17309_v30, %v15845_v3  ;;  %v9599_v1 = vrot.slane %v9598_v5, 2  ;;  %v9337_v28 = vadd.f32 %v9336_v46, %v15861_v40  ;;  %v9341_v23 = vrot.slane %v9340_v0, 4 }
 0xb18   : > { %v9470_v32 = vmul.f32 0.125, %v9318_v45  ;;  %v16017_v56 = vmul.f32 0.125, %v9360_v12  ;;  %11077 = vtanh.f32 %v9196_v58  ;;  %v9758_v3 = vsel %vm3606_vm8, %v9588_v38, %v9757_v37 }
 0xb19   : > { %v9331_v41 = vrot.slane %v9330_v35, 1  ;;  %v9600_v55 = vmax.f32 %v9598_v5, %v9599_v1  ;;  %v9471_v63 = vmul.f32 0.125, %v9325_v22  ;;  %v9916_v52 = vsel %vm3600_vm4, %v15863_v8, %v15872_v27 }
 0xb1a   : > { %v17310_v53 = vrot.slane %v15888_v11, 1  ;;  %v11066_v40 = vpop.eup %11065  ;;  %v9759_v36 = vsel %vm3608_vm7, %v9595_v60, %v9758_v3  ;;  %v9338_v51 = vrot.slane %v9337_v28, 1  ;;  %v9342_v58 = vadd.f32 %v9341_v23, %v9340_v0 }
 0xb1b   : > { %v9332_v12 = vadd.f32 %v9331_v41, %v9330_v35  ;;  %v11068_v50 = vpop.eup %11067  ;;  %v9424_v49 = vsel %vm9234_vm13, %v11066_v40, 0.0  ;;  %v9680_v15 = vsel %vm9234_vm13, %v11066_v40, -inf  ;;  %v9601_v10 = vrot.slane %v9600_v55, 1 }
 0xb1c   : > { %v16026_v25 = vmax.f32 %v15888_v11, %v17310_v53  ;;  %v9917_v57 = vsel %vm3602_vm5, %v9470_v32, %v9916_v52  ;;  %v11070_v8 = vpop.eup %11069  ;;  %v9425_v27 = vrot.slane %v9424_v49, 4  ;;  %v9681_v59 = vrot.slane %v9680_v15, 4 }
 0xb1d   : > { %v9517_v11 = vrot.slane %v15830_v39, 1  ;;  %v17311_v5 = vrot.slane %v15797_v18, 2  ;;  %v16037_v45 = vsel %vm9234_vm13, %v11068_v50, 0.0  ;;  %v16040_v30 = vsel %vm9234_vm13, %v11068_v50, -inf }
 0xb1e   : > { %v9438_v22 = vsel %vm9234_vm13, %v11070_v8, 0.0  ;;  %v9694_v46 = vsel %vm9234_vm13, %v11070_v8, -inf  ;;  %v11072_v38 = vpop.eup %11071  ;;  %v16044_v37 = vadd.f32 %v9425_v27, %v9424_v49  ;;  %v9682_v35 = vmax.f32 %v9680_v15, %v9681_v59 }
 0xb1f   : > { %v9523_v60 = vmax.f32 %v15797_v18, %v17311_v5  ;;  %v9439_v0 = vrot.slane %v9438_v22, 4  ;;  %v9695_v1 = vrot.slane %v9694_v46, 4  ;;  %v9230_v18 = vld [vmem:[%s16261_s10] sm:$0xff]  ;;  %v16049_v23 = vpop.eup %11073  ;;  %v9368_v32 = vsel %vm9234_vm13, %v11072_v38, 0.0 }
 0xb20   : > { %v9624_v3 = vsel %vm9234_vm13, %v11072_v38, -inf  ;;  %v9602_v41 = vmax.f32 %v9600_v55, %v9601_v10  ;;  %v9343_v52 = vrot.slane %v9342_v58, 2  ;;  %10592 = vmatprep.subr.mxu0 %v9230_v18  ;;  %v16053_v53 = vpop.eup %11075  ;;  %v9683_v40 = vrot.slane %v9682_v35, 2 }
 0xb21   : > { %v9646_v49 = vrot.slane %v16040_v30, 4  ;;  %v9339_v15 = vadd.f32 %v9338_v51, %v9337_v28  ;;  %10593 = vmatpush3.msra.mxu0 %v9230_v18  ;;  %v9369_v27 = vrot.slane %v9368_v32, 4  ;;  %v9625_v59 = vrot.slane %v9624_v3, 4 }
 0xb22   : > { %v16060_v5 = vsel %vm9234_vm13, %v16053_v53, -inf  ;;  %v16062_v55 = vmax.f32 %v9682_v35, %v9683_v40  ;;  %v16064_v10 = vadd.f32 %v9439_v0, %v9438_v22  ;;  %v16066_v38 = vmax.f32 %v9694_v46, %v9695_v1 }
 0xb23   : > { %v9702_v13 = vrot.slane %v16060_v5, 4  ;;  %v9370_v50 = vadd.f32 %v9369_v27, %v9368_v32  ;;  %v9626_v19 = vmax.f32 %v9624_v3, %v9625_v59  ;;  %v9760_v28 = vsel %vm3610_vm9, %v9602_v41, %v9759_v36  ;;  %v17313_v59 = vld [vmem:[#allocation62_spill] sm:$0xff] }
 0xb24   : > { %v9344_v51 = vadd.f32 %v9343_v52, %v9342_v58  ;;  %9777 = vrot.lane.b32.xlu0 %v9760_v28, %s11097_s23  ;;  %v9472_v18 = vmul.f32 0.125, %v9332_v12  ;;  %v9473_v8 = vmul.f32 0.125, %v9339_v15  ;;  %v9918_v48 = vsel %vm3604_vm6, %v9471_v63, %v9917_v57 }
 0xb25   : > { %v9518_v35 = vmax.f32 %v15830_v39, %v9517_v11  ;;  %v16073_v40 = vpop.eup %11077  ;;  %v9371_v22 = vrot.slane %v9370_v50, 2  ;;  %v9627_v46 = vrot.slane %v9626_v19, 2  ;;  %v9524_v1 = vrot.slane %v9523_v60, 1 }
 0xb26   : > { %v9345_v0 = vrot.slane %v9344_v51, 1  ;;  %v9919_v32 = vsel %vm3606_vm8, %v9472_v18, %v9918_v48  ;;  %v9529_v3 = vrot.slane %v15900_v20, 2  ;;  %v17312_v36 = vrot.slane %v15914_v42, 4 }
 0xb27   : > { %v9540_v12 = vsel %vm9234_vm13, %v15924_v54, -inf  ;;  %v16082_v63 = vadd.f32 %v9371_v22, %v9370_v50  ;;  %v9628_v39 = vmax.f32 %v9626_v19, %v9627_v46  ;;  %v9920_v11 = vsel %vm3608_vm7, %v9473_v8, %v9919_v32  ;;  %v17316_v50 = vld [vmem:[#allocation79_spill] sm:$0xff] }
 0xb28   : > { %v9535_v58 = vmax.f32 %v15914_v42, %v17312_v36  ;;  %v9346_v57 = vadd.f32 %v9345_v0, %v9344_v51  ;;  %v9525_v41 = vmax.f32 %v9523_v60, %v9524_v1  ;;  %v9530_v52 = vmax.f32 %v15900_v20, %v9529_v3  ;;  %v17314_v42 = vld [vmem:[#allocation75_spill] sm:$0xff]  ;;  %v17317_v1 = vld [vmem:[#allocation58_spill] sm:$0xff] }
 0xb29   : > { %v9541_v48 = vrot.slane %v9540_v12, 4  ;;  %v9747_v28 = vsel %vm3598_vm3, %v17313_v59, %v15788_v62  ;;  %v17315_v18 = vrot.slane %v17314_v42, 1  ;;  %v9261_v22 = vrot.slane %v17316_v50, 1 }
 0xb2a   : > { %v9536_v15 = vrot.slane %v9535_v58, 2  ;;  %v9474_v27 = vmul.f32 0.125, %v9346_v57  ;;  %v9531_v19 = vrot.slane %v9530_v52, 1  ;;  %v9748_v60 = vsel %vm3600_vm4, %v16026_v25, %v9747_v28 }
 0xb2b   : > { %v9255_v36 = vadd.f32 %v17315_v18, %v17314_v42  ;;  %v9542_v46 = vmax.f32 %v9540_v12, %v9541_v48  ;;  %v9749_v8 = vsel %vm3602_vm5, %v9518_v35, %v9748_v60  ;;  %v9262_v0 = vadd.f32 %v9261_v22, %v17316_v50 }
 0xb2c   : > { %v9537_v51 = vmax.f32 %v9535_v58, %v9536_v15  ;;  %v9921_v20 = vsel %vm3610_vm9, %v9474_v27, %v9920_v11  ;;  %v17318_v62 = vrot.slane %v17317_v1, 2  ;;  %v9532_v3 = vmax.f32 %v9530_v52, %v9531_v19  ;;  %v17319_v15 = vld [vmem:[#allocation46_spill] sm:$0xff] }
 0xb2d   : > { %9938 = vrot.lane.b32.xlu1 %v9921_v20, %s11097_s23  ;;  %v9543_v59 = vrot.slane %v9542_v46, 2  ;;  %v9750_v58 = vsel %vm3604_vm6, %v9525_v41, %v9749_v8  ;;  %v9273_v25 = vrot.slane %v17319_v15, 2  ;;  %v17320_v11 = vrot.slane %v15911_v47, 4 }
 0xb2e   : > { %v9267_v32 = vadd.f32 %v17318_v62, %v17317_v1  ;;  %v9538_v57 = vrot.slane %v9537_v51, 1  ;;  %v9284_v48 = vsel %vm9234_vm13, %v15924_v54, 0.0  ;;  %v9751_v42 = vsel %vm3606_vm8, %v9532_v3, %v9750_v58  ;;  %v17322_v54 = vld [vmem:[#allocation120_spill] sm:$0xff] }
 0xb2f   : > { %v9279_v35 = vadd.f32 %v17320_v11, %v15911_v47  ;;  %v9544_v28 = vmax.f32 %v9542_v46, %v9543_v59  ;;  %v9285_v18 = vrot.slane %v9284_v48, 4  ;;  %v9274_v50 = vadd.f32 %v9273_v25, %v17319_v15  ;;  %v17321_v11 = vld [vmem:[#allocation12_spill] sm:$0xff] }
 0xb30   : > { %v9268_v12 = vrot.slane %v9267_v32, 1  ;;  %v9539_v27 = vmax.f32 %v9537_v51, %v9538_v57  ;;  %v9461_v41 = vmul.f32 0.125, %v9255_v36  ;;  %v9462_v8 = vmul.f32 0.125, %v9262_v0 }
 0xb31   : > { %v9280_v22 = vrot.slane %v9279_v35, 2  ;;  %v9545_v19 = vrot.slane %v9544_v28, 1  ;;  %v9286_v20 = vadd.f32 %v9285_v18, %v9284_v48  ;;  %v9275_v1 = vrot.slane %v9274_v50, 1 }
 0xb32   : > { %v9269_v52 = vadd.f32 %v9268_v12, %v9267_v32  ;;  %v9752_v60 = vsel %vm3608_vm7, %v9539_v27, %v9751_v42  ;;  %v9908_v51 = vsel %vm3598_vm3, %v17322_v54, %v17321_v11  ;;  %v9623_v36 = vmax.f32 %v15974_v7, %v9622_v26 }
 0xb33   : > { %v9281_v47 = vadd.f32 %v9280_v22, %v9279_v35  ;;  %v9546_v46 = vmax.f32 %v9544_v28, %v9545_v19  ;;  %v9287_v3 = vrot.slane %v9286_v20, 2  ;;  %v9909_v32 = vsel %vm3600_vm4, %v9461_v41, %v9908_v51 }
 0xb34   : > { %v9463_v62 = vmul.f32 0.125, %v9269_v52  ;;  %v9276_v57 = vadd.f32 %v9275_v1, %v9274_v50  ;;  %v9910_v58 = vsel %vm3602_vm5, %v9462_v8, %v9909_v32  ;;  %v9629_v0 = vrot.slane %v9628_v39, 1 }
 0xb35   : > { %v9282_v59 = vrot.slane %v9281_v47, 1  ;;  %v9753_v12 = vsel %vm3610_vm9, %v9546_v46, %v9752_v60  ;;  %v9288_v15 = vadd.f32 %v9287_v3, %v9286_v20  ;;  %v9635_v35 = vmax.f32 %v15964_v17, %v9634_v4 }
 0xb36   : > { %v9911_v25 = vsel %vm3604_vm6, %v9463_v62, %v9910_v58  ;;  %9775 = vrot.lane.b32.xlu0 %v9753_v12, %s11097_s23  ;;  %v9464_v27 = vmul.f32 0.125, %v9276_v57  ;;  %v9630_v28 = vmax.f32 %v9628_v39, %v9629_v0  ;;  %v9641_v7 = vrot.slane %v15989_v24, 2 }
 0xb37   : > { %v9283_v48 = vadd.f32 %v9282_v59, %v9281_v47  ;;  %v9289_v26 = vrot.slane %v9288_v15, 1  ;;  %v9636_v42 = vrot.slane %v9635_v35, 1  ;;  %v9647_v18 = vmax.f32 %v16040_v30, %v9646_v49 }
 0xb38   : > { %v9652_v52 = vsel %vm9234_vm13, %v16049_v23, -inf  ;;  %v9912_v22 = vsel %vm3606_vm8, %v9464_v27, %v9911_v25  ;;  %v9642_v17 = vmax.f32 %v15989_v24, %v9641_v7  ;;  %v9761_v60 = vsel %vm3598_vm3, %v16001_v34, %v15938_v44 }
 0xb39   : > { %v9465_v50 = vmul.f32 0.125, %v9283_v48  ;;  %v9653_v4 = vrot.slane %v9652_v52, 4  ;;  %v9290_v41 = vadd.f32 %v9289_v26, %v9288_v15  ;;  %v9637_v19 = vmax.f32 %v9635_v35, %v9636_v42 }
 0xb3a   : > { %v9648_v39 = vrot.slane %v9647_v18, 2  ;;  %v9643_v8 = vrot.slane %v9642_v17, 1  ;;  %v9762_v49 = vsel %vm3600_vm4, %v9623_v36, %v9761_v60  ;;  %v17323_v24 = vrot.slane %v15970_v31, 1 }
 0xb3b   : > { %v9913_v20 = vsel %vm3608_vm7, %v9465_v50, %v9912_v22  ;;  %v9654_v30 = vmax.f32 %v9652_v52, %v9653_v4  ;;  %v9466_v1 = vmul.f32 0.125, %v9290_v41  ;;  %v9763_v62 = vsel %vm3602_vm5, %v9630_v28, %v9762_v49 }
 0xb3c   : > { %v9649_v47 = vmax.f32 %v9647_v18, %v9648_v39  ;;  %v9367_v11 = vadd.f32 %v17323_v24, %v15970_v31  ;;  %v9644_v54 = vmax.f32 %v9642_v17, %v9643_v8  ;;  %v9764_v46 = vsel %vm3604_vm6, %v9637_v19, %v9763_v62 }
 0xb3d   : > { %v9655_v51 = vrot.slane %v9654_v30, 2  ;;  %v9373_v44 = vrot.slane %v16082_v63, 1  ;;  %v9914_v34 = vsel %vm3610_vm9, %v9466_v1, %v9913_v20  ;;  %v17324_v32 = vrot.slane %v15962_v14, 2 }
 0xb3e   : > { %v9650_v3 = vrot.slane %v9649_v47, 1  ;;  %v9385_v57 = vrot.slane %v15976_v2, 2  ;;  %9936 = vrot.lane.b32.xlu1 %v9914_v34, %s11097_s23  ;;  %v9765_v31 = vsel %vm3606_vm8, %v9644_v54, %v9764_v46  ;;  %v17325_v0 = vrot.slane %v16037_v45, 4 }
 0xb3f   : > { %v9379_v36 = vadd.f32 %v17324_v32, %v15962_v14  ;;  %v9656_v59 = vmax.f32 %v9654_v30, %v9655_v51  ;;  %v9374_v58 = vadd.f32 %v9373_v44, %v16082_v63  ;;  %v9396_v14 = vsel %vm9234_vm13, %v16049_v23, 0.0 }
 0xb40   : > { %v9391_v12 = vadd.f32 %v17325_v0, %v16037_v45  ;;  %v9651_v15 = vmax.f32 %v9649_v47, %v9650_v3  ;;  %v9386_v35 = vadd.f32 %v9385_v57, %v15976_v2  ;;  %v9397_v28 = vrot.slane %v9396_v14, 4 }
 0xb41   : > { %v9380_v25 = vrot.slane %v9379_v36, 1  ;;  %v9657_v48 = vrot.slane %v9656_v59, 1  ;;  %v9477_v7 = vmul.f32 0.125, %v9367_v11  ;;  %v9478_v63 = vmul.f32 0.125, %v9374_v58 }
 0xb42   : > { %v9392_v27 = vrot.slane %v9391_v12, 2  ;;  %v9766_v26 = vsel %vm3608_vm7, %v9651_v15, %v9765_v31  ;;  %v9387_v18 = vrot.slane %v9386_v35, 1  ;;  %v9398_v22 = vadd.f32 %v9397_v28, %v9396_v14 }
 0xb43   : > { %v9381_v42 = vadd.f32 %v9380_v25, %v9379_v36  ;;  %v9658_v52 = vmax.f32 %v9656_v59, %v9657_v48  ;;  %v9922_v45 = vsel %vm3598_vm3, %v16017_v56, %v15936_v16  ;;  %v9445_v2 = vsel %vm9234_vm13, %v16053_v53, 0.0 }
 0xb44   : > { %v9393_v50 = vadd.f32 %v9392_v27, %v9391_v12  ;;  %v9388_v23 = vadd.f32 %v9387_v18, %v9386_v35  ;;  %v9923_v4 = vsel %vm3600_vm4, %v9477_v7, %v9922_v45  ;;  %v9399_v39 = vrot.slane %v9398_v22, 2 }
 0xb45   : > { %v9479_v17 = vmul.f32 0.125, %v9381_v42  ;;  %v9767_v41 = vsel %vm3610_vm9, %v9658_v52, %v9766_v26  ;;  %v9924_v60 = vsel %vm3602_vm5, %v9478_v63, %v9923_v4  ;;  %v9685_v16 = vrot.slane %v16062_v55, 1 }
 0xb46   : > { %v9394_v19 = vrot.slane %v9393_v50, 1  ;;  %9779 = vrot.lane.b32.xlu0 %v9767_v41, %s11097_s23  ;;  %v9480_v20 = vmul.f32 0.125, %v9388_v23  ;;  %v17326_v56 = vrot.slane %v15945_v21, 2  ;;  %v9400_v49 = vadd.f32 %v9399_v39, %v9398_v22 }
 0xb47   : > { %v9925_v8 = vsel %vm3604_vm6, %v9479_v17, %v9924_v60  ;;  %v9697_v1 = vrot.slane %v16066_v38, 2  ;;  %v9703_v47 = vmax.f32 %v16060_v5, %v9702_v13  ;;  %v17327_v62 = vrot.slane %v16044_v37, 2 }
 0xb48   : > { %v9691_v53 = vmax.f32 %v15945_v21, %v17326_v56  ;;  %v9395_v30 = vadd.f32 %v9394_v19, %v9393_v50  ;;  %v9926_v11 = vsel %vm3606_vm8, %v9480_v20, %v9925_v8  ;;  %v17328_v54 = vrot.slane %v15934_v43, 1  ;;  %v17331_v56 = vld [vmem:[#allocation39_spill] sm:$0xff] }
 0xb49   : > { %v9428_v24 = vadd.f32 %v17327_v62, %v16044_v37  ;;  %v9708_v21 = vsel %vm9234_vm13, %v16073_v40, -inf  ;;  %v9401_v46 = vrot.slane %v9400_v49, 1  ;;  %v9698_v34 = vmax.f32 %v16066_v38, %v9697_v1 }
 0xb4a   : > { %v9679_v51 = vmax.f32 %v15934_v43, %v17328_v54  ;;  %v9692_v44 = vrot.slane %v9691_v53, 1  ;;  %v9704_v3 = vrot.slane %v9703_v47, 2  ;;  %v9446_v32 = vrot.slane %v9445_v2, 4 }
 0xb4b   : > { %v9481_v13 = vmul.f32 0.125, %v9395_v30  ;;  %v9686_v5 = vmax.f32 %v16062_v55, %v9685_v16  ;;  %v9709_v36 = vrot.slane %v9708_v21, 4  ;;  %v9402_v37 = vadd.f32 %v9401_v46, %v9400_v49 }
 0xb4c   : > { %v9699_v57 = vrot.slane %v9698_v34, 1  ;;  %v9705_v59 = vmax.f32 %v9703_v47, %v9704_v3  ;;  %v9768_v43 = vsel %vm3598_vm3, %v15972_v33, %v15942_v61  ;;  %v9429_v0 = vrot.slane %v9428_v24, 1 }
 0xb4d   : > { %v9927_v31 = vsel %vm3608_vm7, %v9481_v13, %v9926_v11  ;;  %v9710_v58 = vmax.f32 %v9708_v21, %v9709_v36  ;;  %v17329_v38 = vrot.slane %v15930_v29, 2  ;;  %v9482_v15 = vmul.f32 0.125, %v9402_v37 }
 0xb4e   : > { %v9693_v25 = vmax.f32 %v9691_v53, %v9692_v44  ;;  %v9706_v35 = vrot.slane %v9705_v59, 1  ;;  %v9769_v55 = vsel %vm3600_vm4, %v9679_v51, %v9768_v43  ;;  %v9700_v14 = vmax.f32 %v9698_v34, %v9699_v57 }
 0xb4f   : > { %v9435_v12 = vadd.f32 %v17329_v38, %v15930_v29  ;;  %v9711_v48 = vrot.slane %v9710_v58, 2  ;;  %v9770_v27 = vsel %vm3602_vm5, %v9686_v5, %v9769_v55  ;;  %v17330_v61 = vrot.slane %v15932_v9, 1 }
 0xb50   : > { %v9928_v28 = vsel %vm3610_vm9, %v9482_v15, %v9927_v31  ;;  %v9707_v7 = vmax.f32 %v9705_v59, %v9706_v35  ;;  %v9430_v26 = vadd.f32 %v9429_v0, %v9428_v24  ;;  %v9441_v42 = vrot.slane %v16064_v10, 2 }
 0xb51   : > { %v9423_v33 = vadd.f32 %v17330_v61, %v15932_v9  ;;  %9940 = vrot.lane.b32.xlu1 %v9928_v28, %s11097_s23  ;;  %v9712_v29 = vmax.f32 %v9710_v58, %v9711_v48  ;;  %v9436_v18 = vrot.slane %v9435_v12, 1  ;;  %v9447_v63 = vadd.f32 %v9446_v32, %v9445_v2  ;;  %v9232_v58 = vld [vmem:[%s16263_s12] sm:$0xff] }
 0xb52   : > { %v9452_v52 = vsel %vm9234_vm13, %v16073_v40, 0.0  ;;  %v9484_v50 = vmul.f32 0.125, %v15967_v6  ;;  %v9771_v22 = vsel %vm3604_vm6, %v9693_v25, %v9770_v27  ;;  %v9442_v9 = vadd.f32 %v9441_v42, %v16064_v10  ;;  %10608 = vmatprep.subr.mxu0 %v9232_v58 }
 0xb53   : > { %v9453_v45 = vrot.slane %v9452_v52, 4  ;;  %v9713_v23 = vrot.slane %v9712_v29, 1  ;;  %v9772_v17 = vsel %vm3606_vm8, %v9700_v14, %v9771_v22  ;;  %v9448_v4 = vrot.slane %v9447_v63, 2 }
 0xb54   : > { %v9485_v41 = vmul.f32 0.125, %v9423_v33  ;;  %v9773_v19 = vsel %vm3608_vm7, %v9707_v7, %v9772_v17  ;;  %v9443_v39 = vrot.slane %v9442_v9, 1  ;;  %v9486_v2 = vmul.f32 0.125, %v9430_v26 }
 0xb55   : > { %v9454_v60 = vadd.f32 %v9453_v45, %v9452_v52  ;;  %v9714_v20 = vmax.f32 %v9712_v29, %v9713_v23  ;;  %v9437_v8 = vadd.f32 %v9436_v18, %v9435_v12  ;;  %v9449_v40 = vadd.f32 %v9448_v4, %v9447_v63  ;;  %v10315_v12 = vld [vmem:[%s16262_s11] ss:$0 sm:$0xff] }
 0xb56   : > { %v9444_v16 = vadd.f32 %v9443_v39, %v9442_v9  ;;  %v9929_v53 = vsel %vm3598_vm3, %v9484_v50, %v17331_v56  ;;  %v10316_v9 = vld [vmem:[%s16264_s13] ss:$0 sm:$0xff] }
 0xb57   : > { %v9455_v6 = vrot.slane %v9454_v60, 2  ;;  %v9774_v10 = vsel %vm3610_vm9, %v9714_v20, %v9773_v19  ;;  %v9450_v30 = vrot.slane %v9449_v40, 1  ;;  %v9930_v49 = vsel %vm3600_vm4, %v9485_v41, %v9929_v53 }
 0xb58   : > { %9781 = vrot.lane.b32.xlu0 %v9774_v10, %s11097_s23  ;;  %v9488_v47 = vmul.f32 0.125, %v9444_v16  ;;  %v9931_v62 = vsel %vm3602_vm5, %v9486_v2, %v9930_v49  ;;  %v9487_v11 = vmul.f32 0.125, %v9437_v8 }
 0xb59   : > { %v9456_v1 = vadd.f32 %v9455_v6, %v9454_v60  ;;  %v9451_v24 = vadd.f32 %v9450_v30, %v9449_v40 }
 0xb5a   : > { %v9932_v21 = vsel %vm3604_vm6, %v9487_v11, %v9931_v62 }
 0xb5b   : > { %v9457_v54 = vrot.slane %v9456_v1, 1  ;;  %v9489_v51 = vmul.f32 0.125, %v9451_v24  ;;  %v9933_v44 = vsel %vm3606_vm8, %v9488_v47, %v9932_v21 }
 0xb5d   : > { %v9458_v46 = vadd.f32 %v9457_v54, %v9456_v1  ;;  %v9934_v34 = vsel %vm3608_vm7, %v9489_v51, %v9933_v44 }
 0xb5f   : > { %v9490_v3 = vmul.f32 0.125, %v9458_v46 }
 0xb61   : > { %v9935_v32 = vsel %vm3610_vm9, %v9490_v3, %v9934_v34 }
 0xb62   : > { %9942 = vrot.lane.b32.xlu1 %v9935_v32, %s11097_s23 }
 0xb96   : > { %v9778_v13 = vpop.permute.xlu0 %9777 }
 0xb9f   : > { %v9939_v36 = vpop.permute.xlu1 %9938 }
 0xba8   : > { %v9776_v5 = vpop.permute.xlu0 %9775 }
 0xba9   : > { %10594 = vmatprep.mubr.msk.f32.mxu0 %vm1165_vm2, %v9776_v5 }
 0xbaa   : > { %10595 = vmatmul.mubr.msk.f32.vlgmr.msra.gmra.mxu0 %vm1165_vm2, %v9778_v13 }
 0xbab   : > { %10609 = vmatpush3.msra.mxu0 %v9232_v58 }
 0xbb0   : > { %v9937_v37 = vpop.permute.xlu1 %9936 }
 0xbb1   : > { %10602 = vmatprep.mubr.msk.f32.mxu1 %vm1165_vm2, %v9937_v37 }
 0xbb2   : > { %10603 = vmatmul.mubr.msk.f32.vlgmr.msra.gmra.mxu1 %vm1165_vm2, %v9939_v36 }
 0xbb8   : > { %v9780_v57 = vpop.permute.xlu0 %9779 }
 0xbb9   : > { %10597 = vmatprep.mubr.msk.f32.mxu0 %vm1165_vm2, %v9780_v57 }
 0xbc3   : > { %v9941_v59 = vpop.permute.xlu1 %9940 }
 0xbc4   : > { %10605 = vmatprep.mubr.msk.f32.mxu1 %vm1165_vm2, %v9941_v59 }
 0xbca   : > { %v9782_v43 = vpop.permute.xlu0 %9781 }
 0xbcb   : > { %10598 = vmatmul.mubr.msk.f32.gmra.mxu0 %vm1165_vm2, %v9782_v43 }
 0xbd4   : > { %v9943_v31 = vpop.permute.xlu1 %9942 }
 0xbd5   : > { %10606 = vmatmul.mubr.msk.f32.gmra.mxu1 %vm1165_vm2, %v9943_v31 }
 0xc6a   : > { %v10596_v0 = vpop.f32.mrf.mxu0 }
 0xc6c   : > { %v9857_v25 = vpop.f32.mrf.mxu0 }
 0xc72   : > { %v10604_v38 = vpop.f32.mrf.mxu1 }
 0xc73   : > { %v10024_v15 = vadd.f32 %v10604_v38, %v10596_v0 }
 0xc74   : > { %v10018_v35 = vpop.f32.mrf.mxu1 }
 0xc75   : > { %v10019_v55 = vadd.f32 %v10018_v35, %v9857_v25  ;;  %v10044_v14 = vadd.f32 %v10315_v12, %v10024_v15 }
 0xc77   : > { %v10043_v48 = vadd.f32 %v10315_v12, %v10019_v55  ;;  %v10048_v61 = vmax.f32 %v10044_v14, 0.0 }
 0xc79   : > { %v10047_v27 = vmax.f32 %v10043_v48, 0.0 }
 0xc7b   : > { %10610 = vmatprep.mubr.msk.f32.mxu0 %vm1165_vm2, %v10047_v27 }
 0xc7c   : > { %10611 = vmatmul.mubr.msk.f32.vlgmr.msra.gmra.mxu0 %vm1165_vm2, %v10048_v61 }
 0xc8b   : > { %v10599_v33 = vpop.f32.mrf.mxu0 }
 0xc8d   : > { %v9867_v26 = vpop.f32.mrf.mxu0 }
 0xc95   : > { %v10607_v28 = vpop.f32.mrf.mxu1 }
 0xc96   : > { %v10034_v7 = vadd.f32 %v10607_v28, %v10599_v33 }
 0xc97   : > { %v10028_v42 = vpop.f32.mrf.mxu1 }
 0xc98   : > { %v10029_v29 = vadd.f32 %v10028_v42, %v9867_v26  ;;  %v10046_v18 = vadd.f32 %v10315_v12, %v10034_v7 }
 0xc9a   : > { %v10045_v63 = vadd.f32 %v10315_v12, %v10029_v29  ;;  %v10050_v50 = vmax.f32 %v10046_v18, 0.0 }
 0xc9c   : > { %v10049_v52 = vmax.f32 %v10045_v63, 0.0 }
 0xc9e   : > { %10613 = vmatprep.mubr.msk.f32.mxu0 %vm1165_vm2, %v10049_v52 }
 0xc9f   : > { %10614 = vmatmul.mubr.msk.f32.gmra.mxu0 %vm1165_vm2, %v10050_v50 }
 0xd3c   : > { %v10612_v22 = vpop.f32.mrf.mxu0 }
 0xd3d   : > { %v10141_v17 = vadd.f32 %v10612_v22, %v10316_v9 }
 0xd3e   : > { %v10135_v45 = vpop.f32.mrf.mxu0 }
 0xd3f   : > { %v10136_v23 = vadd.f32 %v10316_v9, %v10135_v45  ;;  %10156 = vst.msk [vmem:[%s469_s20 + $0x8] sm:$0xff] %vm10154_vm14, %v10141_v17 }
 0xd41   : > { %10155 = vst.msk [vmem:[%s469_s20] sm:$0xff] %vm10154_vm14, %v10136_v23 }
 0xd5f   : > { %v10615_v4 = vpop.f32.mrf.mxu0 }
 0xd60   : > { %v10151_v39 = vadd.f32 %v10615_v4, %v10316_v9 }
 0xd61   : > { %v10145_v41 = vpop.f32.mrf.mxu0 }
 0xd62   : > { %v10146_v19 = vadd.f32 %v10316_v9, %v10145_v41  ;;  %10158 = vst.msk [vmem:[%s469_s20 + $0x18] sm:$0xff] %vm10154_vm14, %v10151_v39 }
 0xd64   : > { %10157 = vst.msk [vmem:[%s469_s20 + $0x10] sm:$0xff] %vm10154_vm14, %v10146_v19 }
 0xd65 PF: > { %s24_s29 = sadd.s32 1, %s11086_s29  }
 0xd66   : > { %p21_p5 = scmp.ge.s32.totalorder %s24_s29, 4  }
 0xd68   :  { %23 = sbr.rel (!%p21_p5) target bundleno = 1 (0x1), region = 106 }

</bundles_post_ra>
